<compile_context>
chip_gen: v7x
topology: tpu7x:2x2x1
jax: 0.10.0
libtpu: 0.0.40
codegen_flags: <defaults>
</compile_context>

<pallas_src>
import jax
import jax.numpy as jnp
from jax.experimental import pallas as pl
from jax.experimental.pallas import tpu as pltpu

E = 512          # embed_dim (fixed by the module: nn.MultiheadAttention(512, 8))
H = 8            # num_heads
D = E // H       # head_dim = 64
SCALE = 1.0 / (D ** 0.5)


# ---------------------------------------------------------------------------
# Fused multi-head attention: one pallas_call per nn.MultiheadAttention
# ---------------------------------------------------------------------------
def fused_mha_kernel(q_ref, kv_ref, wq_ref, wk_ref, wv_ref, wo_ref,
                     bq_ref, bk_ref, bv_ref, bo_ref, o_ref):
    """One batch element per grid step.

    q_ref : (Lq, E)   query activations (batch dim squeezed by BlockSpec)
    kv_ref: (Lk, E)   key == value activations
    wq/wk/wv_ref: (H, E, D)  head-major projection weights (tile-aligned slabs)
    wo_ref: (H, D, E)        head-major output-projection weight
    bq/bk/bv_ref: (H, 1, D); bo_ref: (1, E)
    o_ref : (Lq, E)   lane-dense output tile (last dim = 512)
    """
    x_q = q_ref[...]                           # (Lq, E)
    x_kv = kv_ref[...]                         # (Lk, E)

    o_acc = jnp.zeros(o_ref.shape, jnp.float32)
    # Static unroll over heads; every weight slab is a leading-dim ref index,
    # so all matmul operands are tile-aligned (no lane slicing / relayouts).
    for h in range(H):
        qh = jnp.dot(x_q, wq_ref[h], preferred_element_type=jnp.float32) + bq_ref[h]    # (Lq, D)
        kh = jnp.dot(x_kv, wk_ref[h], preferred_element_type=jnp.float32) + bk_ref[h]   # (Lk, D)
        vh = jnp.dot(x_kv, wv_ref[h], preferred_element_type=jnp.float32) + bv_ref[h]   # (Lk, D)

        # scores: contract last dims of q and k (avoids an explicit k.T)
        s = jax.lax.dot_general(qh, kh, (((1,), (1,)), ((), ())),
                                preferred_element_type=jnp.float32) * SCALE              # (Lq, Lk)
        m = jnp.max(s, axis=-1, keepdims=True)
        e = jnp.exp(s - m)
        p = e * pl.reciprocal(jnp.sum(e, axis=-1, keepdims=True), approx=True)
        oh = jnp.dot(p, vh, preferred_element_type=jnp.float32)                          # (Lq, D)

        # concat(heads) @ Wo  ==  sum_h  o_h @ Wo[h*D:(h+1)*D, :]
        o_acc = o_acc + jnp.dot(oh, wo_ref[h], preferred_element_type=jnp.float32)       # (Lq, E)

    o_ref[...] = (o_acc + bo_ref[...]).astype(o_ref.dtype)


def fused_mha(query, kv, params):
    """query: (Lq, N, E); kv (= key = value): (Lk, N, E)  ->  (Lq, N, E)."""
    wq, wk, wv, wo, bq, bk, bv, bo = params
    Lq, N, _ = query.shape
    Lk = kv.shape[0]

    # Batch-major so each grid step sees clean, lane-dense (L, 512) tiles.
    q_nle = jnp.transpose(query, (1, 0, 2))    # (N, Lq, E)
    kv_nle = jnp.transpose(kv, (1, 0, 2))      # (N, Lk, E)

    out_nle = pl.pallas_call(
        fused_mha_kernel,
        out_shape=jax.ShapeDtypeStruct((N, Lq, E), jnp.float32),
        grid=(N,),
        in_specs=[
            pl.BlockSpec((None, Lq, E), lambda n: (n, 0, 0)),
            pl.BlockSpec((None, Lk, E), lambda n: (n, 0, 0)),
            pl.BlockSpec((H, E, D), lambda n: (0, 0, 0)),   # wq
            pl.BlockSpec((H, E, D), lambda n: (0, 0, 0)),   # wk
            pl.BlockSpec((H, E, D), lambda n: (0, 0, 0)),   # wv
            pl.BlockSpec((H, D, E), lambda n: (0, 0, 0)),   # wo
            pl.BlockSpec((H, 1, D), lambda n: (0, 0, 0)),   # bq
            pl.BlockSpec((H, 1, D), lambda n: (0, 0, 0)),   # bk
            pl.BlockSpec((H, 1, D), lambda n: (0, 0, 0)),   # bv
            pl.BlockSpec((1, E), lambda n: (0, 0)),         # bo
        ],
        out_specs=pl.BlockSpec((None, Lq, E), lambda n: (n, 0, 0)),
        compiler_params=pltpu.CompilerParams(
            # v7x: the two batch elements are split across the two TensorCores.
            dimension_semantics=("parallel",),
            # ~4-7 MiB of resident f32 weights (double-buffered by BlockSpec):
            # give headroom above v5e's 16 MiB default scoped-VMEM limit.
            vmem_limit_bytes=32 * 1024 * 1024,
        ),
    )(q_nle, kv_nle, wq, wk, wv, wo, bq, bk, bv, bo)

    return jnp.transpose(out_nle, (1, 0, 2))   # back to (Lq, N, E)


# ---------------------------------------------------------------------------
# Fused torch.cat([text, img], -1) + final_fc(1024 -> 3)
# ---------------------------------------------------------------------------
def concat_fc_kernel(t_ref, i_ref, wt_ref, wi_ref, b_ref, o_ref):
    acc = jnp.dot(t_ref[...], wt_ref[...], preferred_element_type=jnp.float32)
    acc = acc + jnp.dot(i_ref[...], wi_ref[...], preferred_element_type=jnp.float32)
    o_ref[...] = (acc + b_ref[...]).astype(o_ref.dtype)


def concat_fc(text_feat, img_feat, fc_w, fc_b):
    """cat([text, img], -1) @ fc_w + fc_b without materializing the concat."""
    L, N, _ = text_feat.shape
    M = L * N
    n_out = fc_w.shape[1]
    out = pl.pallas_call(
        concat_fc_kernel,
        out_shape=jax.ShapeDtypeStruct((M, n_out), jnp.float32),
    )(text_feat.reshape(M, E), img_feat.reshape(M, E),
      fc_w[:E], fc_w[E:], fc_b.reshape(1, n_out))
    return out.reshape(L, N, n_out)


# ---------------------------------------------------------------------------
# Module forward (AttentionLayer / AttentionModel semantics)
# ---------------------------------------------------------------------------
def attention_layer_forward(text_feat, img_feat, params1, params2):
    """Mirrors AttentionLayer.forward.

    attention2's output is discarded by the module (it returns the ORIGINAL
    img_feat), so it is not emitted at all — guaranteed dead-code elimination.
    params2 is kept only for signature parity with the PyTorch module.
    """
    del params2
    text_out = fused_mha(text_feat, img_feat, params1)
    return text_out, img_feat


def attention_model_forward(text_feat, img_feat, layer_params, fc_w, fc_b):
    """AttentionModel.forward starting from the backbone feature outputs.

    # TODO(synk): text_feat_model / img_feat_model are external backbones with
    # no definition in the spec; this starts from their (L, N, 512) outputs.
    """
    t, i = text_feat, img_feat
    for (p1, p2) in layer_params:
        t, i = attention_layer_forward(t, i, p1, p2)
    return concat_fc(t, i, fc_w, fc_b)


# ---------------------------------------------------------------------------
# Pure-JAX reference (standard nn.MultiheadAttention math) for a sanity check
# ---------------------------------------------------------------------------
def ref_mha(query, kv, params):
    wq, wk, wv, wo, bq, bk, bv, bo = params
    Lq, N, _ = query.shape
    Lk = kv.shape[0]
    # Rebuild packed (E, E) matrices (heads = contiguous D-wide column chunks).
    Wq = jnp.transpose(wq, (1, 0, 2)).reshape(E, E)
    Wk = jnp.transpose(wk, (1, 0, 2)).reshape(E, E)
    Wv = jnp.transpose(wv, (1, 0, 2)).reshape(E, E)
    Wo = wo.reshape(E, E)
    Bq, Bk, Bv, Bo = bq.reshape(E), bk.reshape(E), bv.reshape(E), bo.reshape(E)
    q = (query @ Wq + Bq).reshape(Lq, N, H, D).transpose(1, 2, 0, 3)
    k = (kv @ Wk + Bk).reshape(Lk, N, H, D).transpose(1, 2, 0, 3)
    v = (kv @ Wv + Bv).reshape(Lk, N, H, D).transpose(1, 2, 0, 3)
    s = jnp.einsum("nhqd,nhkd->nhqk", q, k) * SCALE
    p = jax.nn.softmax(s, axis=-1)
    o = jnp.einsum("nhqk,nhkd->nhqd", p, v)
    o = o.transpose(2, 0, 1, 3).reshape(Lq, N, E)
    return o @ Wo + Bo


def ref_model_forward(text_feat, img_feat, layer_params, fc_w, fc_b):
    t, i = text_feat, img_feat
    for (p1, _p2) in layer_params:        # attention2 is dead in the module
        t = ref_mha(t, i, p1)
    cat = jnp.concatenate([t, i], axis=-1)
    return cat @ fc_w + fc_b


# ---------------------------------------------------------------------------
# Parameter init (head-major, kernel-friendly layout)
# ---------------------------------------------------------------------------
def init_mha_params(key):
    ks = jax.random.split(key, 8)
    wq = jax.random.normal(ks[0], (H, E, D), jnp.float32) * 0.02
    wk = jax.random.normal(ks[1], (H, E, D), jnp.float32) * 0.02
    wv = jax.random.normal(ks[2], (H, E, D), jnp.float32) * 0.02
    wo = jax.random.normal(ks[3], (H, D, E), jnp.float32) * 0.02
    bq = jax.random.normal(ks[4], (H, 1, D), jnp.float32) * 0.02
    bk = jax.random.normal(ks[5], (H, 1, D), jnp.float32) * 0.02
    bv = jax.random.normal(ks[6], (H, 1, D), jnp.float32) * 0.02
    bo = jax.random.normal(ks[7], (1, E), jnp.float32) * 0.02
    return (wq, wk, wv, wo, bq, bk, bv, bo)


if __name__ == "__main__":
    root = jax.random.PRNGKey(0)
    k_text, k_img, k_layers, k_fc = jax.random.split(root, 4)

    # (seq_len, batch, embed) — nn.MultiheadAttention default batch_first=False.
    # Equal seq lens are required by the module's final torch.cat(dim=-1).
    L, N = 16, 2
    text_feat = jax.random.normal(k_text, (L, N, E), jnp.float32)
    img_feat = jax.random.normal(k_img, (L, N, E), jnp.float32)

    lk = jax.random.split(k_layers, 6)
    layer_params = tuple(
        (init_mha_params(lk[2 * i]), init_mha_params(lk[2 * i + 1]))  # (attn1, attn2)
        for i in range(3)
    )
    kw, kb = jax.random.split(k_fc)
    fc_w = jax.random.normal(kw, (2 * E, 3), jnp.float32) * 0.02
    fc_b = jax.random.normal(kb, (3,), jnp.float32) * 0.02

    # Single AttentionLayer check
    layer_fwd = jax.jit(attention_layer_forward)
    t1, i1 = layer_fwd(text_feat, img_feat, layer_params[0][0], layer_params[0][1])
    jax.block_until_ready((t1, i1))
    assert t1.shape == (L, N, E) and i1.shape == (L, N, E)
    assert jnp.allclose(t1, ref_mha(text_feat, img_feat, layer_params[0][0]),
                        rtol=2e-3, atol=2e-3)
    assert jnp.allclose(i1, img_feat)

    # Full AttentionModel attention stack + final fc
    model_fwd = jax.jit(attention_model_forward)
    out = model_fwd(text_feat, img_feat, layer_params, fc_w, fc_b)
    jax.block_until_ready(out)

    ref = ref_model_forward(text_feat, img_feat, layer_params, fc_w, fc_b)
    assert out.shape == (L, N, 3)
    assert jnp.allclose(out, ref, rtol=2e-3, atol=2e-3), float(jnp.max(jnp.abs(out - ref)))

    print("KERNEL_OK")
</pallas_src>

<mosaic_0001>
module attributes {stable_mosaic.version = 11 : i64} {
  func.func @fused_mha_kernel(%arg0: i32, %arg1: memref<1x16x512xf32, #tpu.memory_space<vmem>>, %arg2: memref<1x16x512xf32, #tpu.memory_space<vmem>>, %arg3: memref<8x512x64xf32, #tpu.memory_space<vmem>>, %arg4: memref<8x512x64xf32, #tpu.memory_space<vmem>>, %arg5: memref<8x512x64xf32, #tpu.memory_space<vmem>>, %arg6: memref<8x64x512xf32, #tpu.memory_space<vmem>>, %arg7: memref<8x1x64xf32, #tpu.memory_space<vmem>>, %arg8: memref<8x1x64xf32, #tpu.memory_space<vmem>>, %arg9: memref<8x1x64xf32, #tpu.memory_space<vmem>>, %arg10: memref<1x512xf32, #tpu.memory_space<vmem>>, %arg11: memref<1x16x512xf32, #tpu.memory_space<vmem>>) attributes {dimension_semantics = [#tpu.dimension_semantics<parallel>], iteration_bounds = array<i64: 2>, scalar_prefetch = 0 : i64, scratch_operands = 0 : i64, tpu.core_type = #tpu.core_type<tc>, window_params = [{transform_indices = @transform_0, window_bounds = array<i64: 1, 16, 512>}, {transform_indices = @transform_1, window_bounds = array<i64: 1, 16, 512>}, {pipeline_mode = #tpu.pipeline_mode<synchronous>, transform_indices = @transform_2, window_bounds = array<i64: 8, 512, 64>}, {pipeline_mode = #tpu.pipeline_mode<synchronous>, transform_indices = @transform_3, window_bounds = array<i64: 8, 512, 64>}, {pipeline_mode = #tpu.pipeline_mode<synchronous>, transform_indices = @transform_4, window_bounds = array<i64: 8, 512, 64>}, {pipeline_mode = #tpu.pipeline_mode<synchronous>, transform_indices = @transform_5, window_bounds = array<i64: 8, 64, 512>}, {pipeline_mode = #tpu.pipeline_mode<synchronous>, transform_indices = @transform_6, window_bounds = array<i64: 8, 1, 64>}, {pipeline_mode = #tpu.pipeline_mode<synchronous>, transform_indices = @transform_7, window_bounds = array<i64: 8, 1, 64>}, {pipeline_mode = #tpu.pipeline_mode<synchronous>, transform_indices = @transform_8, window_bounds = array<i64: 8, 1, 64>}, {pipeline_mode = #tpu.pipeline_mode<synchronous>, transform_indices = @transform_9, window_bounds = array<i64: 1, 512>}, {transform_indices = @transform_10, window_bounds = array<i64: 1, 16, 512>}]} {
    %c0 = arith.constant 0 : index
    %c0_0 = arith.constant 0 : index
    %c0_1 = arith.constant 0 : index
    %0 = vector.load %arg1[%c0, %c0_0, %c0_1] : memref<1x16x512xf32, #tpu.memory_space<vmem>>, vector<1x16x512xf32>
    %1 = vector.shape_cast %0 : vector<1x16x512xf32> to vector<16x512xf32>
    %c0_2 = arith.constant 0 : index
    %c0_3 = arith.constant 0 : index
    %c0_4 = arith.constant 0 : index
    %2 = vector.load %arg2[%c0_2, %c0_3, %c0_4] : memref<1x16x512xf32, #tpu.memory_space<vmem>>, vector<1x16x512xf32>
    %3 = vector.shape_cast %2 : vector<1x16x512xf32> to vector<16x512xf32>
    %cst = arith.constant 0.000000e+00 : f32
    %4 = vector.broadcast %cst : f32 to vector<16x512xf32>
    %c0_5 = arith.constant 0 : index
    %c0_6 = arith.constant 0 : index
    %c0_7 = arith.constant 0 : index
    %5 = vector.load %arg3[%c0_5, %c0_6, %c0_7] : memref<8x512x64xf32, #tpu.memory_space<vmem>>, vector<1x512x64xf32>
    %6 = vector.shape_cast %5 : vector<1x512x64xf32> to vector<512x64xf32>
    %cst_8 = arith.constant dense<0.000000e+00> : vector<16x64xf32>
    %7 = tpu.matmul %1, %6, %cst_8 {dimension_numbers = #tpu.dot_dimension_numbers<[1], [0], [0], [1], [0, 0, 1, 1], [], []>} : vector<16x512xf32>, vector<512x64xf32>, vector<16x64xf32> -> vector<16x64xf32>
    %c0_9 = arith.constant 0 : index
    %c0_10 = arith.constant 0 : index
    %c0_11 = arith.constant 0 : index
    %8 = vector.load %arg7[%c0_9, %c0_10, %c0_11] : memref<8x1x64xf32, #tpu.memory_space<vmem>>, vector<1x1x64xf32>
    %9 = vector.shape_cast %8 : vector<1x1x64xf32> to vector<1x64xf32>
    %10 = vector.broadcast %9 : vector<1x64xf32> to vector<16x64xf32>
    %11 = arith.addf %7, %10 : vector<16x64xf32>
    %c0_12 = arith.constant 0 : index
    %c0_13 = arith.constant 0 : index
    %c0_14 = arith.constant 0 : index
    %12 = vector.load %arg4[%c0_12, %c0_13, %c0_14] : memref<8x512x64xf32, #tpu.memory_space<vmem>>, vector<1x512x64xf32>
    %13 = vector.shape_cast %12 : vector<1x512x64xf32> to vector<512x64xf32>
    %cst_15 = arith.constant dense<0.000000e+00> : vector<16x64xf32>
    %14 = tpu.matmul %3, %13, %cst_15 {dimension_numbers = #tpu.dot_dimension_numbers<[1], [0], [0], [1], [0, 0, 1, 1], [], []>} : vector<16x512xf32>, vector<512x64xf32>, vector<16x64xf32> -> vector<16x64xf32>
    %c0_16 = arith.constant 0 : index
    %c0_17 = arith.constant 0 : index
    %c0_18 = arith.constant 0 : index
    %15 = vector.load %arg8[%c0_16, %c0_17, %c0_18] : memref<8x1x64xf32, #tpu.memory_space<vmem>>, vector<1x1x64xf32>
    %16 = vector.shape_cast %15 : vector<1x1x64xf32> to vector<1x64xf32>
    %17 = vector.broadcast %16 : vector<1x64xf32> to vector<16x64xf32>
    %18 = arith.addf %14, %17 : vector<16x64xf32>
    %c0_19 = arith.constant 0 : index
    %c0_20 = arith.constant 0 : index
    %c0_21 = arith.constant 0 : index
    %19 = vector.load %arg5[%c0_19, %c0_20, %c0_21] : memref<8x512x64xf32, #tpu.memory_space<vmem>>, vector<1x512x64xf32>
    %20 = vector.shape_cast %19 : vector<1x512x64xf32> to vector<512x64xf32>
    %cst_22 = arith.constant dense<0.000000e+00> : vector<16x64xf32>
    %21 = tpu.matmul %3, %20, %cst_22 {dimension_numbers = #tpu.dot_dimension_numbers<[1], [0], [0], [1], [0, 0, 1, 1], [], []>} : vector<16x512xf32>, vector<512x64xf32>, vector<16x64xf32> -> vector<16x64xf32>
    %c0_23 = arith.constant 0 : index
    %c0_24 = arith.constant 0 : index
    %c0_25 = arith.constant 0 : index
    %22 = vector.load %arg9[%c0_23, %c0_24, %c0_25] : memref<8x1x64xf32, #tpu.memory_space<vmem>>, vector<1x1x64xf32>
    %23 = vector.shape_cast %22 : vector<1x1x64xf32> to vector<1x64xf32>
    %24 = vector.broadcast %23 : vector<1x64xf32> to vector<16x64xf32>
    %25 = arith.addf %21, %24 : vector<16x64xf32>
    %cst_26 = arith.constant dense<0.000000e+00> : vector<16x16xf32>
    %26 = tpu.matmul %11, %18, %cst_26 {dimension_numbers = #tpu.dot_dimension_numbers<[1], [1], [0], [0], [0, 0, 1, 0], [], []>} : vector<16x64xf32>, vector<16x64xf32>, vector<16x16xf32> -> vector<16x16xf32>
    %cst_27 = arith.constant 1.250000e-01 : f32
    %27 = vector.broadcast %cst_27 : f32 to vector<16x16xf32>
    %28 = arith.mulf %26, %27 : vector<16x16xf32>
    %cst_28 = arith.constant dense<0xFF800000> : vector<16xf32>
    %29 = vector.multi_reduction <maximumf>, %28, %cst_28 [1] : vector<16x16xf32> to vector<16xf32>
    %30 = vector.shape_cast %29 : vector<16xf32> to vector<16x1xf32>
    %31 = vector.broadcast %30 : vector<16x1xf32> to vector<16x16xf32>
    %32 = arith.subf %28, %31 : vector<16x16xf32>
    %33 = math.exp %32 : vector<16x16xf32>
    %cst_29 = arith.constant dense<0.000000e+00> : vector<16xf32>
    %34 = vector.multi_reduction <add>, %33, %cst_29 [1] : vector<16x16xf32> to vector<16xf32>
    %35 = vector.shape_cast %34 : vector<16xf32> to vector<16x1xf32>
    %36 = tpu.reciprocal %35 {approx = true} : vector<16x1xf32> -> vector<16x1xf32>
    %37 = vector.broadcast %36 : vector<16x1xf32> to vector<16x16xf32>
    %38 = arith.mulf %33, %37 : vector<16x16xf32>
    %cst_30 = arith.constant dense<0.000000e+00> : vector<16x64xf32>
    %39 = tpu.matmul %38, %25, %cst_30 {dimension_numbers = #tpu.dot_dimension_numbers<[1], [0], [0], [1], [0, 0, 1, 1], [], []>} : vector<16x16xf32>, vector<16x64xf32>, vector<16x64xf32> -> vector<16x64xf32>
    %c0_31 = arith.constant 0 : index
    %c0_32 = arith.constant 0 : index
    %c0_33 = arith.constant 0 : index
    %40 = vector.load %arg6[%c0_31, %c0_32, %c0_33] : memref<8x64x512xf32, #tpu.memory_space<vmem>>, vector<1x64x512xf32>
    %41 = vector.shape_cast %40 : vector<1x64x512xf32> to vector<64x512xf32>
    %cst_34 = arith.constant dense<0.000000e+00> : vector<16x512xf32>
    %42 = tpu.matmul %39, %41, %cst_34 {dimension_numbers = #tpu.dot_dimension_numbers<[1], [0], [0], [1], [0, 0, 1, 1], [], []>} : vector<16x64xf32>, vector<64x512xf32>, vector<16x512xf32> -> vector<16x512xf32>
    %43 = arith.addf %4, %42 : vector<16x512xf32>
    %c1 = arith.constant 1 : index
    %c0_35 = arith.constant 0 : index
    %c0_36 = arith.constant 0 : index
    %44 = vector.load %arg3[%c1, %c0_35, %c0_36] : memref<8x512x64xf32, #tpu.memory_space<vmem>>, vector<1x512x64xf32>
    %45 = vector.shape_cast %44 : vector<1x512x64xf32> to vector<512x64xf32>
    %cst_37 = arith.constant dense<0.000000e+00> : vector<16x64xf32>
    %46 = tpu.matmul %1, %45, %cst_37 {dimension_numbers = #tpu.dot_dimension_numbers<[1], [0], [0], [1], [0, 0, 1, 1], [], []>} : vector<16x512xf32>, vector<512x64xf32>, vector<16x64xf32> -> vector<16x64xf32>
    %c1_38 = arith.constant 1 : index
    %c0_39 = arith.constant 0 : index
    %c0_40 = arith.constant 0 : index
    %47 = vector.load %arg7[%c1_38, %c0_39, %c0_40] : memref<8x1x64xf32, #tpu.memory_space<vmem>>, vector<1x1x64xf32>
    %48 = vector.shape_cast %47 : vector<1x1x64xf32> to vector<1x64xf32>
    %49 = vector.broadcast %48 : vector<1x64xf32> to vector<16x64xf32>
    %50 = arith.addf %46, %49 : vector<16x64xf32>
    %c1_41 = arith.constant 1 : index
    %c0_42 = arith.constant 0 : index
    %c0_43 = arith.constant 0 : index
    %51 = vector.load %arg4[%c1_41, %c0_42, %c0_43] : memref<8x512x64xf32, #tpu.memory_space<vmem>>, vector<1x512x64xf32>
    %52 = vector.shape_cast %51 : vector<1x512x64xf32> to vector<512x64xf32>
    %cst_44 = arith.constant dense<0.000000e+00> : vector<16x64xf32>
    %53 = tpu.matmul %3, %52, %cst_44 {dimension_numbers = #tpu.dot_dimension_numbers<[1], [0], [0], [1], [0, 0, 1, 1], [], []>} : vector<16x512xf32>, vector<512x64xf32>, vector<16x64xf32> -> vector<16x64xf32>
    %c1_45 = arith.constant 1 : index
    %c0_46 = arith.constant 0 : index
    %c0_47 = arith.constant 0 : index
    %54 = vector.load %arg8[%c1_45, %c0_46, %c0_47] : memref<8x1x64xf32, #tpu.memory_space<vmem>>, vector<1x1x64xf32>
    %55 = vector.shape_cast %54 : vector<1x1x64xf32> to vector<1x64xf32>
    %56 = vector.broadcast %55 : vector<1x64xf32> to vector<16x64xf32>
    %57 = arith.addf %53, %56 : vector<16x64xf32>
    %c1_48 = arith.constant 1 : index
    %c0_49 = arith.constant 0 : index
    %c0_50 = arith.constant 0 : index
    %58 = vector.load %arg5[%c1_48, %c0_49, %c0_50] : memref<8x512x64xf32, #tpu.memory_space<vmem>>, vector<1x512x64xf32>
    %59 = vector.shape_cast %58 : vector<1x512x64xf32> to vector<512x64xf32>
    %cst_51 = arith.constant dense<0.000000e+00> : vector<16x64xf32>
    %60 = tpu.matmul %3, %59, %cst_51 {dimension_numbers = #tpu.dot_dimension_numbers<[1], [0], [0], [1], [0, 0, 1, 1], [], []>} : vector<16x512xf32>, vector<512x64xf32>, vector<16x64xf32> -> vector<16x64xf32>
    %c1_52 = arith.constant 1 : index
    %c0_53 = arith.constant 0 : index
    %c0_54 = arith.constant 0 : index
    %61 = vector.load %arg9[%c1_52, %c0_53, %c0_54] : memref<8x1x64xf32, #tpu.memory_space<vmem>>, vector<1x1x64xf32>
    %62 = vector.shape_cast %61 : vector<1x1x64xf32> to vector<1x64xf32>
    %63 = vector.broadcast %62 : vector<1x64xf32> to vector<16x64xf32>
    %64 = arith.addf %60, %63 : vector<16x64xf32>
    %cst_55 = arith.constant dense<0.000000e+00> : vector<16x16xf32>
    %65 = tpu.matmul %50, %57, %cst_55 {dimension_numbers = #tpu.dot_dimension_numbers<[1], [1], [0], [0], [0, 0, 1, 0], [], []>} : vector<16x64xf32>, vector<16x64xf32>, vector<16x16xf32> -> vector<16x16xf32>
    %cst_56 = arith.constant 1.250000e-01 : f32
    %66 = vector.broadcast %cst_56 : f32 to vector<16x16xf32>
    %67 = arith.mulf %65, %66 : vector<16x16xf32>
    %cst_57 = arith.constant dense<0xFF800000> : vector<16xf32>
    %68 = vector.multi_reduction <maximumf>, %67, %cst_57 [1] : vector<16x16xf32> to vector<16xf32>
    %69 = vector.shape_cast %68 : vector<16xf32> to vector<16x1xf32>
    %70 = vector.broadcast %69 : vector<16x1xf32> to vector<16x16xf32>
    %71 = arith.subf %67, %70 : vector<16x16xf32>
    %72 = math.exp %71 : vector<16x16xf32>
    %cst_58 = arith.constant dense<0.000000e+00> : vector<16xf32>
    %73 = vector.multi_reduction <add>, %72, %cst_58 [1] : vector<16x16xf32> to vector<16xf32>
    %74 = vector.shape_cast %73 : vector<16xf32> to vector<16x1xf32>
    %75 = tpu.reciprocal %74 {approx = true} : vector<16x1xf32> -> vector<16x1xf32>
    %76 = vector.broadcast %75 : vector<16x1xf32> to vector<16x16xf32>
    %77 = arith.mulf %72, %76 : vector<16x16xf32>
    %cst_59 = arith.constant dense<0.000000e+00> : vector<16x64xf32>
    %78 = tpu.matmul %77, %64, %cst_59 {dimension_numbers = #tpu.dot_dimension_numbers<[1], [0], [0], [1], [0, 0, 1, 1], [], []>} : vector<16x16xf32>, vector<16x64xf32>, vector<16x64xf32> -> vector<16x64xf32>
    %c1_60 = arith.constant 1 : index
    %c0_61 = arith.constant 0 : index
    %c0_62 = arith.constant 0 : index
    %79 = vector.load %arg6[%c1_60, %c0_61, %c0_62] : memref<8x64x512xf32, #tpu.memory_space<vmem>>, vector<1x64x512xf32>
    %80 = vector.shape_cast %79 : vector<1x64x512xf32> to vector<64x512xf32>
    %cst_63 = arith.constant dense<0.000000e+00> : vector<16x512xf32>
    %81 = tpu.matmul %78, %80, %cst_63 {dimension_numbers = #tpu.dot_dimension_numbers<[1], [0], [0], [1], [0, 0, 1, 1], [], []>} : vector<16x64xf32>, vector<64x512xf32>, vector<16x512xf32> -> vector<16x512xf32>
    %82 = arith.addf %43, %81 : vector<16x512xf32>
    %c2 = arith.constant 2 : index
    %c0_64 = arith.constant 0 : index
    %c0_65 = arith.constant 0 : index
    %83 = vector.load %arg3[%c2, %c0_64, %c0_65] : memref<8x512x64xf32, #tpu.memory_space<vmem>>, vector<1x512x64xf32>
    %84 = vector.shape_cast %83 : vector<1x512x64xf32> to vector<512x64xf32>
    %cst_66 = arith.constant dense<0.000000e+00> : vector<16x64xf32>
    %85 = tpu.matmul %1, %84, %cst_66 {dimension_numbers = #tpu.dot_dimension_numbers<[1], [0], [0], [1], [0, 0, 1, 1], [], []>} : vector<16x512xf32>, vector<512x64xf32>, vector<16x64xf32> -> vector<16x64xf32>
    %c2_67 = arith.constant 2 : index
    %c0_68 = arith.constant 0 : index
    %c0_69 = arith.constant 0 : index
    %86 = vector.load %arg7[%c2_67, %c0_68, %c0_69] : memref<8x1x64xf32, #tpu.memory_space<vmem>>, vector<1x1x64xf32>
    %87 = vector.shape_cast %86 : vector<1x1x64xf32> to vector<1x64xf32>
    %88 = vector.broadcast %87 : vector<1x64xf32> to vector<16x64xf32>
    %89 = arith.addf %85, %88 : vector<16x64xf32>
    %c2_70 = arith.constant 2 : index
    %c0_71 = arith.constant 0 : index
    %c0_72 = arith.constant 0 : index
    %90 = vector.load %arg4[%c2_70, %c0_71, %c0_72] : memref<8x512x64xf32, #tpu.memory_space<vmem>>, vector<1x512x64xf32>
    %91 = vector.shape_cast %90 : vector<1x512x64xf32> to vector<512x64xf32>
    %cst_73 = arith.constant dense<0.000000e+00> : vector<16x64xf32>
    %92 = tpu.matmul %3, %91, %cst_73 {dimension_numbers = #tpu.dot_dimension_numbers<[1], [0], [0], [1], [0, 0, 1, 1], [], []>} : vector<16x512xf32>, vector<512x64xf32>, vector<16x64xf32> -> vector<16x64xf32>
    %c2_74 = arith.constant 2 : index
    %c0_75 = arith.constant 0 : index
    %c0_76 = arith.constant 0 : index
    %93 = vector.load %arg8[%c2_74, %c0_75, %c0_76] : memref<8x1x64xf32, #tpu.memory_space<vmem>>, vector<1x1x64xf32>
    %94 = vector.shape_cast %93 : vector<1x1x64xf32> to vector<1x64xf32>
    %95 = vector.broadcast %94 : vector<1x64xf32> to vector<16x64xf32>
    %96 = arith.addf %92, %95 : vector<16x64xf32>
    %c2_77 = arith.constant 2 : index
    %c0_78 = arith.constant 0 : index
    %c0_79 = arith.constant 0 : index
    %97 = vector.load %arg5[%c2_77, %c0_78, %c0_79] : memref<8x512x64xf32, #tpu.memory_space<vmem>>, vector<1x512x64xf32>
    %98 = vector.shape_cast %97 : vector<1x512x64xf32> to vector<512x64xf32>
    %cst_80 = arith.constant dense<0.000000e+00> : vector<16x64xf32>
    %99 = tpu.matmul %3, %98, %cst_80 {dimension_numbers = #tpu.dot_dimension_numbers<[1], [0], [0], [1], [0, 0, 1, 1], [], []>} : vector<16x512xf32>, vector<512x64xf32>, vector<16x64xf32> -> vector<16x64xf32>
    %c2_81 = arith.constant 2 : index
    %c0_82 = arith.constant 0 : index
    %c0_83 = arith.constant 0 : index
    %100 = vector.load %arg9[%c2_81, %c0_82, %c0_83] : memref<8x1x64xf32, #tpu.memory_space<vmem>>, vector<1x1x64xf32>
    %101 = vector.shape_cast %100 : vector<1x1x64xf32> to vector<1x64xf32>
    %102 = vector.broadcast %101 : vector<1x64xf32> to vector<16x64xf32>
    %103 = arith.addf %99, %102 : vector<16x64xf32>
    %cst_84 = arith.constant dense<0.000000e+00> : vector<16x16xf32>
    %104 = tpu.matmul %89, %96, %cst_84 {dimension_numbers = #tpu.dot_dimension_numbers<[1], [1], [0], [0], [0, 0, 1, 0], [], []>} : vector<16x64xf32>, vector<16x64xf32>, vector<16x16xf32> -> vector<16x16xf32>
    %cst_85 = arith.constant 1.250000e-01 : f32
    %105 = vector.broadcast %cst_85 : f32 to vector<16x16xf32>
    %106 = arith.mulf %104, %105 : vector<16x16xf32>
    %cst_86 = arith.constant dense<0xFF800000> : vector<16xf32>
    %107 = vector.multi_reduction <maximumf>, %106, %cst_86 [1] : vector<16x16xf32> to vector<16xf32>
    %108 = vector.shape_cast %107 : vector<16xf32> to vector<16x1xf32>
    %109 = vector.broadcast %108 : vector<16x1xf32> to vector<16x16xf32>
    %110 = arith.subf %106, %109 : vector<16x16xf32>
    %111 = math.exp %110 : vector<16x16xf32>
    %cst_87 = arith.constant dense<0.000000e+00> : vector<16xf32>
    %112 = vector.multi_reduction <add>, %111, %cst_87 [1] : vector<16x16xf32> to vector<16xf32>
    %113 = vector.shape_cast %112 : vector<16xf32> to vector<16x1xf32>
    %114 = tpu.reciprocal %113 {approx = true} : vector<16x1xf32> -> vector<16x1xf32>
    %115 = vector.broadcast %114 : vector<16x1xf32> to vector<16x16xf32>
    %116 = arith.mulf %111, %115 : vector<16x16xf32>
    %cst_88 = arith.constant dense<0.000000e+00> : vector<16x64xf32>
    %117 = tpu.matmul %116, %103, %cst_88 {dimension_numbers = #tpu.dot_dimension_numbers<[1], [0], [0], [1], [0, 0, 1, 1], [], []>} : vector<16x16xf32>, vector<16x64xf32>, vector<16x64xf32> -> vector<16x64xf32>
    %c2_89 = arith.constant 2 : index
    %c0_90 = arith.constant 0 : index
    %c0_91 = arith.constant 0 : index
    %118 = vector.load %arg6[%c2_89, %c0_90, %c0_91] : memref<8x64x512xf32, #tpu.memory_space<vmem>>, vector<1x64x512xf32>
    %119 = vector.shape_cast %118 : vector<1x64x512xf32> to vector<64x512xf32>
    %cst_92 = arith.constant dense<0.000000e+00> : vector<16x512xf32>
    %120 = tpu.matmul %117, %119, %cst_92 {dimension_numbers = #tpu.dot_dimension_numbers<[1], [0], [0], [1], [0, 0, 1, 1], [], []>} : vector<16x64xf32>, vector<64x512xf32>, vector<16x512xf32> -> vector<16x512xf32>
    %121 = arith.addf %82, %120 : vector<16x512xf32>
    %c3 = arith.constant 3 : index
    %c0_93 = arith.constant 0 : index
    %c0_94 = arith.constant 0 : index
    %122 = vector.load %arg3[%c3, %c0_93, %c0_94] : memref<8x512x64xf32, #tpu.memory_space<vmem>>, vector<1x512x64xf32>
    %123 = vector.shape_cast %122 : vector<1x512x64xf32> to vector<512x64xf32>
    %cst_95 = arith.constant dense<0.000000e+00> : vector<16x64xf32>
    %124 = tpu.matmul %1, %123, %cst_95 {dimension_numbers = #tpu.dot_dimension_numbers<[1], [0], [0], [1], [0, 0, 1, 1], [], []>} : vector<16x512xf32>, vector<512x64xf32>, vector<16x64xf32> -> vector<16x64xf32>
    %c3_96 = arith.constant 3 : index
    %c0_97 = arith.constant 0 : index
    %c0_98 = arith.constant 0 : index
    %125 = vector.load %arg7[%c3_96, %c0_97, %c0_98] : memref<8x1x64xf32, #tpu.memory_space<vmem>>, vector<1x1x64xf32>
    %126 = vector.shape_cast %125 : vector<1x1x64xf32> to vector<1x64xf32>
    %127 = vector.broadcast %126 : vector<1x64xf32> to vector<16x64xf32>
    %128 = arith.addf %124, %127 : vector<16x64xf32>
    %c3_99 = arith.constant 3 : index
    %c0_100 = arith.constant 0 : index
    %c0_101 = arith.constant 0 : index
    %129 = vector.load %arg4[%c3_99, %c0_100, %c0_101] : memref<8x512x64xf32, #tpu.memory_space<vmem>>, vector<1x512x64xf32>
    %130 = vector.shape_cast %129 : vector<1x512x64xf32> to vector<512x64xf32>
    %cst_102 = arith.constant dense<0.000000e+00> : vector<16x64xf32>
    %131 = tpu.matmul %3, %130, %cst_102 {dimension_numbers = #tpu.dot_dimension_numbers<[1], [0], [0], [1], [0, 0, 1, 1], [], []>} : vector<16x512xf32>, vector<512x64xf32>, vector<16x64xf32> -> vector<16x64xf32>
    %c3_103 = arith.constant 3 : index
    %c0_104 = arith.constant 0 : index
    %c0_105 = arith.constant 0 : index
    %132 = vector.load %arg8[%c3_103, %c0_104, %c0_105] : memref<8x1x64xf32, #tpu.memory_space<vmem>>, vector<1x1x64xf32>
    %133 = vector.shape_cast %132 : vector<1x1x64xf32> to vector<1x64xf32>
    %134 = vector.broadcast %133 : vector<1x64xf32> to vector<16x64xf32>
    %135 = arith.addf %131, %134 : vector<16x64xf32>
    %c3_106 = arith.constant 3 : index
    %c0_107 = arith.constant 0 : index
    %c0_108 = arith.constant 0 : index
    %136 = vector.load %arg5[%c3_106, %c0_107, %c0_108] : memref<8x512x64xf32, #tpu.memory_space<vmem>>, vector<1x512x64xf32>
    %137 = vector.shape_cast %136 : vector<1x512x64xf32> to vector<512x64xf32>
    %cst_109 = arith.constant dense<0.000000e+00> : vector<16x64xf32>
    %138 = tpu.matmul %3, %137, %cst_109 {dimension_numbers = #tpu.dot_dimension_numbers<[1], [0], [0], [1], [0, 0, 1, 1], [], []>} : vector<16x512xf32>, vector<512x64xf32>, vector<16x64xf32> -> vector<16x64xf32>
    %c3_110 = arith.constant 3 : index
    %c0_111 = arith.constant 0 : index
    %c0_112 = arith.constant 0 : index
    %139 = vector.load %arg9[%c3_110, %c0_111, %c0_112] : memref<8x1x64xf32, #tpu.memory_space<vmem>>, vector<1x1x64xf32>
    %140 = vector.shape_cast %139 : vector<1x1x64xf32> to vector<1x64xf32>
    %141 = vector.broadcast %140 : vector<1x64xf32> to vector<16x64xf32>
    %142 = arith.addf %138, %141 : vector<16x64xf32>
    %cst_113 = arith.constant dense<0.000000e+00> : vector<16x16xf32>
    %143 = tpu.matmul %128, %135, %cst_113 {dimension_numbers = #tpu.dot_dimension_numbers<[1], [1], [0], [0], [0, 0, 1, 0], [], []>} : vector<16x64xf32>, vector<16x64xf32>, vector<16x16xf32> -> vector<16x16xf32>
    %cst_114 = arith.constant 1.250000e-01 : f32
    %144 = vector.broadcast %cst_114 : f32 to vector<16x16xf32>
    %145 = arith.mulf %143, %144 : vector<16x16xf32>
    %cst_115 = arith.constant dense<0xFF800000> : vector<16xf32>
    %146 = vector.multi_reduction <maximumf>, %145, %cst_115 [1] : vector<16x16xf32> to vector<16xf32>
    %147 = vector.shape_cast %146 : vector<16xf32> to vector<16x1xf32>
    %148 = vector.broadcast %147 : vector<16x1xf32> to vector<16x16xf32>
    %149 = arith.subf %145, %148 : vector<16x16xf32>
    %150 = math.exp %149 : vector<16x16xf32>
    %cst_116 = arith.constant dense<0.000000e+00> : vector<16xf32>
    %151 = vector.multi_reduction <add>, %150, %cst_116 [1] : vector<16x16xf32> to vector<16xf32>
    %152 = vector.shape_cast %151 : vector<16xf32> to vector<16x1xf32>
    %153 = tpu.reciprocal %152 {approx = true} : vector<16x1xf32> -> vector<16x1xf32>
    %154 = vector.broadcast %153 : vector<16x1xf32> to vector<16x16xf32>
    %155 = arith.mulf %150, %154 : vector<16x16xf32>
    %cst_117 = arith.constant dense<0.000000e+00> : vector<16x64xf32>
    %156 = tpu.matmul %155, %142, %cst_117 {dimension_numbers = #tpu.dot_dimension_numbers<[1], [0], [0], [1], [0, 0, 1, 1], [], []>} : vector<16x16xf32>, vector<16x64xf32>, vector<16x64xf32> -> vector<16x64xf32>
    %c3_118 = arith.constant 3 : index
    %c0_119 = arith.constant 0 : index
    %c0_120 = arith.constant 0 : index
    %157 = vector.load %arg6[%c3_118, %c0_119, %c0_120] : memref<8x64x512xf32, #tpu.memory_space<vmem>>, vector<1x64x512xf32>
    %158 = vector.shape_cast %157 : vector<1x64x512xf32> to vector<64x512xf32>
    %cst_121 = arith.constant dense<0.000000e+00> : vector<16x512xf32>
    %159 = tpu.matmul %156, %158, %cst_121 {dimension_numbers = #tpu.dot_dimension_numbers<[1], [0], [0], [1], [0, 0, 1, 1], [], []>} : vector<16x64xf32>, vector<64x512xf32>, vector<16x512xf32> -> vector<16x512xf32>
    %160 = arith.addf %121, %159 : vector<16x512xf32>
    %c4 = arith.constant 4 : index
    %c0_122 = arith.constant 0 : index
    %c0_123 = arith.constant 0 : index
    %161 = vector.load %arg3[%c4, %c0_122, %c0_123] : memref<8x512x64xf32, #tpu.memory_space<vmem>>, vector<1x512x64xf32>
    %162 = vector.shape_cast %161 : vector<1x512x64xf32> to vector<512x64xf32>
    %cst_124 = arith.constant dense<0.000000e+00> : vector<16x64xf32>
    %163 = tpu.matmul %1, %162, %cst_124 {dimension_numbers = #tpu.dot_dimension_numbers<[1], [0], [0], [1], [0, 0, 1, 1], [], []>} : vector<16x512xf32>, vector<512x64xf32>, vector<16x64xf32> -> vector<16x64xf32>
    %c4_125 = arith.constant 4 : index
    %c0_126 = arith.constant 0 : index
    %c0_127 = arith.constant 0 : index
    %164 = vector.load %arg7[%c4_125, %c0_126, %c0_127] : memref<8x1x64xf32, #tpu.memory_space<vmem>>, vector<1x1x64xf32>
    %165 = vector.shape_cast %164 : vector<1x1x64xf32> to vector<1x64xf32>
    %166 = vector.broadcast %165 : vector<1x64xf32> to vector<16x64xf32>
    %167 = arith.addf %163, %166 : vector<16x64xf32>
    %c4_128 = arith.constant 4 : index
    %c0_129 = arith.constant 0 : index
    %c0_130 = arith.constant 0 : index
    %168 = vector.load %arg4[%c4_128, %c0_129, %c0_130] : memref<8x512x64xf32, #tpu.memory_space<vmem>>, vector<1x512x64xf32>
    %169 = vector.shape_cast %168 : vector<1x512x64xf32> to vector<512x64xf32>
    %cst_131 = arith.constant dense<0.000000e+00> : vector<16x64xf32>
    %170 = tpu.matmul %3, %169, %cst_131 {dimension_numbers = #tpu.dot_dimension_numbers<[1], [0], [0], [1], [0, 0, 1, 1], [], []>} : vector<16x512xf32>, vector<512x64xf32>, vector<16x64xf32> -> vector<16x64xf32>
    %c4_132 = arith.constant 4 : index
    %c0_133 = arith.constant 0 : index
    %c0_134 = arith.constant 0 : index
    %171 = vector.load %arg8[%c4_132, %c0_133, %c0_134] : memref<8x1x64xf32, #tpu.memory_space<vmem>>, vector<1x1x64xf32>
    %172 = vector.shape_cast %171 : vector<1x1x64xf32> to vector<1x64xf32>
    %173 = vector.broadcast %172 : vector<1x64xf32> to vector<16x64xf32>
    %174 = arith.addf %170, %173 : vector<16x64xf32>
    %c4_135 = arith.constant 4 : index
    %c0_136 = arith.constant 0 : index
    %c0_137 = arith.constant 0 : index
    %175 = vector.load %arg5[%c4_135, %c0_136, %c0_137] : memref<8x512x64xf32, #tpu.memory_space<vmem>>, vector<1x512x64xf32>
    %176 = vector.shape_cast %175 : vector<1x512x64xf32> to vector<512x64xf32>
    %cst_138 = arith.constant dense<0.000000e+00> : vector<16x64xf32>
    %177 = tpu.matmul %3, %176, %cst_138 {dimension_numbers = #tpu.dot_dimension_numbers<[1], [0], [0], [1], [0, 0, 1, 1], [], []>} : vector<16x512xf32>, vector<512x64xf32>, vector<16x64xf32> -> vector<16x64xf32>
    %c4_139 = arith.constant 4 : index
    %c0_140 = arith.constant 0 : index
    %c0_141 = arith.constant 0 : index
    %178 = vector.load %arg9[%c4_139, %c0_140, %c0_141] : memref<8x1x64xf32, #tpu.memory_space<vmem>>, vector<1x1x64xf32>
    %179 = vector.shape_cast %178 : vector<1x1x64xf32> to vector<1x64xf32>
    %180 = vector.broadcast %179 : vector<1x64xf32> to vector<16x64xf32>
    %181 = arith.addf %177, %180 : vector<16x64xf32>
    %cst_142 = arith.constant dense<0.000000e+00> : vector<16x16xf32>
    %182 = tpu.matmul %167, %174, %cst_142 {dimension_numbers = #tpu.dot_dimension_numbers<[1], [1], [0], [0], [0, 0, 1, 0], [], []>} : vector<16x64xf32>, vector<16x64xf32>, vector<16x16xf32> -> vector<16x16xf32>
    %cst_143 = arith.constant 1.250000e-01 : f32
    %183 = vector.broadcast %cst_143 : f32 to vector<16x16xf32>
    %184 = arith.mulf %182, %183 : vector<16x16xf32>
    %cst_144 = arith.constant dense<0xFF800000> : vector<16xf32>
    %185 = vector.multi_reduction <maximumf>, %184, %cst_144 [1] : vector<16x16xf32> to vector<16xf32>
    %186 = vector.shape_cast %185 : vector<16xf32> to vector<16x1xf32>
    %187 = vector.broadcast %186 : vector<16x1xf32> to vector<16x16xf32>
    %188 = arith.subf %184, %187 : vector<16x16xf32>
    %189 = math.exp %188 : vector<16x16xf32>
    %cst_145 = arith.constant dense<0.000000e+00> : vector<16xf32>
    %190 = vector.multi_reduction <add>, %189, %cst_145 [1] : vector<16x16xf32> to vector<16xf32>
    %191 = vector.shape_cast %190 : vector<16xf32> to vector<16x1xf32>
    %192 = tpu.reciprocal %191 {approx = true} : vector<16x1xf32> -> vector<16x1xf32>
    %193 = vector.broadcast %192 : vector<16x1xf32> to vector<16x16xf32>
    %194 = arith.mulf %189, %193 : vector<16x16xf32>
    %cst_146 = arith.constant dense<0.000000e+00> : vector<16x64xf32>
    %195 = tpu.matmul %194, %181, %cst_146 {dimension_numbers = #tpu.dot_dimension_numbers<[1], [0], [0], [1], [0, 0, 1, 1], [], []>} : vector<16x16xf32>, vector<16x64xf32>, vector<16x64xf32> -> vector<16x64xf32>
    %c4_147 = arith.constant 4 : index
    %c0_148 = arith.constant 0 : index
    %c0_149 = arith.constant 0 : index
    %196 = vector.load %arg6[%c4_147, %c0_148, %c0_149] : memref<8x64x512xf32, #tpu.memory_space<vmem>>, vector<1x64x512xf32>
    %197 = vector.shape_cast %196 : vector<1x64x512xf32> to vector<64x512xf32>
    %cst_150 = arith.constant dense<0.000000e+00> : vector<16x512xf32>
    %198 = tpu.matmul %195, %197, %cst_150 {dimension_numbers = #tpu.dot_dimension_numbers<[1], [0], [0], [1], [0, 0, 1, 1], [], []>} : vector<16x64xf32>, vector<64x512xf32>, vector<16x512xf32> -> vector<16x512xf32>
    %199 = arith.addf %160, %198 : vector<16x512xf32>
    %c5 = arith.constant 5 : index
    %c0_151 = arith.constant 0 : index
    %c0_152 = arith.constant 0 : index
    %200 = vector.load %arg3[%c5, %c0_151, %c0_152] : memref<8x512x64xf32, #tpu.memory_space<vmem>>, vector<1x512x64xf32>
    %201 = vector.shape_cast %200 : vector<1x512x64xf32> to vector<512x64xf32>
    %cst_153 = arith.constant dense<0.000000e+00> : vector<16x64xf32>
    %202 = tpu.matmul %1, %201, %cst_153 {dimension_numbers = #tpu.dot_dimension_numbers<[1], [0], [0], [1], [0, 0, 1, 1], [], []>} : vector<16x512xf32>, vector<512x64xf32>, vector<16x64xf32> -> vector<16x64xf32>
    %c5_154 = arith.constant 5 : index
    %c0_155 = arith.constant 0 : index
    %c0_156 = arith.constant 0 : index
    %203 = vector.load %arg7[%c5_154, %c0_155, %c0_156] : memref<8x1x64xf32, #tpu.memory_space<vmem>>, vector<1x1x64xf32>
    %204 = vector.shape_cast %203 : vector<1x1x64xf32> to vector<1x64xf32>
    %205 = vector.broadcast %204 : vector<1x64xf32> to vector<16x64xf32>
    %206 = arith.addf %202, %205 : vector<16x64xf32>
    %c5_157 = arith.constant 5 : index
    %c0_158 = arith.constant 0 : index
    %c0_159 = arith.constant 0 : index
    %207 = vector.load %arg4[%c5_157, %c0_158, %c0_159] : memref<8x512x64xf32, #tpu.memory_space<vmem>>, vector<1x512x64xf32>
    %208 = vector.shape_cast %207 : vector<1x512x64xf32> to vector<512x64xf32>
    %cst_160 = arith.constant dense<0.000000e+00> : vector<16x64xf32>
    %209 = tpu.matmul %3, %208, %cst_160 {dimension_numbers = #tpu.dot_dimension_numbers<[1], [0], [0], [1], [0, 0, 1, 1], [], []>} : vector<16x512xf32>, vector<512x64xf32>, vector<16x64xf32> -> vector<16x64xf32>
    %c5_161 = arith.constant 5 : index
    %c0_162 = arith.constant 0 : index
    %c0_163 = arith.constant 0 : index
    %210 = vector.load %arg8[%c5_161, %c0_162, %c0_163] : memref<8x1x64xf32, #tpu.memory_space<vmem>>, vector<1x1x64xf32>
    %211 = vector.shape_cast %210 : vector<1x1x64xf32> to vector<1x64xf32>
    %212 = vector.broadcast %211 : vector<1x64xf32> to vector<16x64xf32>
    %213 = arith.addf %209, %212 : vector<16x64xf32>
    %c5_164 = arith.constant 5 : index
    %c0_165 = arith.constant 0 : index
    %c0_166 = arith.constant 0 : index
    %214 = vector.load %arg5[%c5_164, %c0_165, %c0_166] : memref<8x512x64xf32, #tpu.memory_space<vmem>>, vector<1x512x64xf32>
    %215 = vector.shape_cast %214 : vector<1x512x64xf32> to vector<512x64xf32>
    %cst_167 = arith.constant dense<0.000000e+00> : vector<16x64xf32>
    %216 = tpu.matmul %3, %215, %cst_167 {dimension_numbers = #tpu.dot_dimension_numbers<[1], [0], [0], [1], [0, 0, 1, 1], [], []>} : vector<16x512xf32>, vector<512x64xf32>, vector<16x64xf32> -> vector<16x64xf32>
    %c5_168 = arith.constant 5 : index
    %c0_169 = arith.constant 0 : index
    %c0_170 = arith.constant 0 : index
    %217 = vector.load %arg9[%c5_168, %c0_169, %c0_170] : memref<8x1x64xf32, #tpu.memory_space<vmem>>, vector<1x1x64xf32>
    %218 = vector.shape_cast %217 : vector<1x1x64xf32> to vector<1x64xf32>
    %219 = vector.broadcast %218 : vector<1x64xf32> to vector<16x64xf32>
    %220 = arith.addf %216, %219 : vector<16x64xf32>
    %cst_171 = arith.constant dense<0.000000e+00> : vector<16x16xf32>
    %221 = tpu.matmul %206, %213, %cst_171 {dimension_numbers = #tpu.dot_dimension_numbers<[1], [1], [0], [0], [0, 0, 1, 0], [], []>} : vector<16x64xf32>, vector<16x64xf32>, vector<16x16xf32> -> vector<16x16xf32>
    %cst_172 = arith.constant 1.250000e-01 : f32
    %222 = vector.broadcast %cst_172 : f32 to vector<16x16xf32>
    %223 = arith.mulf %221, %222 : vector<16x16xf32>
    %cst_173 = arith.constant dense<0xFF800000> : vector<16xf32>
    %224 = vector.multi_reduction <maximumf>, %223, %cst_173 [1] : vector<16x16xf32> to vector<16xf32>
    %225 = vector.shape_cast %224 : vector<16xf32> to vector<16x1xf32>
    %226 = vector.broadcast %225 : vector<16x1xf32> to vector<16x16xf32>
    %227 = arith.subf %223, %226 : vector<16x16xf32>
    %228 = math.exp %227 : vector<16x16xf32>
    %cst_174 = arith.constant dense<0.000000e+00> : vector<16xf32>
    %229 = vector.multi_reduction <add>, %228, %cst_174 [1] : vector<16x16xf32> to vector<16xf32>
    %230 = vector.shape_cast %229 : vector<16xf32> to vector<16x1xf32>
    %231 = tpu.reciprocal %230 {approx = true} : vector<16x1xf32> -> vector<16x1xf32>
    %232 = vector.broadcast %231 : vector<16x1xf32> to vector<16x16xf32>
    %233 = arith.mulf %228, %232 : vector<16x16xf32>
    %cst_175 = arith.constant dense<0.000000e+00> : vector<16x64xf32>
    %234 = tpu.matmul %233, %220, %cst_175 {dimension_numbers = #tpu.dot_dimension_numbers<[1], [0], [0], [1], [0, 0, 1, 1], [], []>} : vector<16x16xf32>, vector<16x64xf32>, vector<16x64xf32> -> vector<16x64xf32>
    %c5_176 = arith.constant 5 : index
    %c0_177 = arith.constant 0 : index
    %c0_178 = arith.constant 0 : index
    %235 = vector.load %arg6[%c5_176, %c0_177, %c0_178] : memref<8x64x512xf32, #tpu.memory_space<vmem>>, vector<1x64x512xf32>
    %236 = vector.shape_cast %235 : vector<1x64x512xf32> to vector<64x512xf32>
    %cst_179 = arith.constant dense<0.000000e+00> : vector<16x512xf32>
    %237 = tpu.matmul %234, %236, %cst_179 {dimension_numbers = #tpu.dot_dimension_numbers<[1], [0], [0], [1], [0, 0, 1, 1], [], []>} : vector<16x64xf32>, vector<64x512xf32>, vector<16x512xf32> -> vector<16x512xf32>
    %238 = arith.addf %199, %237 : vector<16x512xf32>
    %c6 = arith.constant 6 : index
    %c0_180 = arith.constant 0 : index
    %c0_181 = arith.constant 0 : index
    %239 = vector.load %arg3[%c6, %c0_180, %c0_181] : memref<8x512x64xf32, #tpu.memory_space<vmem>>, vector<1x512x64xf32>
    %240 = vector.shape_cast %239 : vector<1x512x64xf32> to vector<512x64xf32>
    %cst_182 = arith.constant dense<0.000000e+00> : vector<16x64xf32>
    %241 = tpu.matmul %1, %240, %cst_182 {dimension_numbers = #tpu.dot_dimension_numbers<[1], [0], [0], [1], [0, 0, 1, 1], [], []>} : vector<16x512xf32>, vector<512x64xf32>, vector<16x64xf32> -> vector<16x64xf32>
    %c6_183 = arith.constant 6 : index
    %c0_184 = arith.constant 0 : index
    %c0_185 = arith.constant 0 : index
    %242 = vector.load %arg7[%c6_183, %c0_184, %c0_185] : memref<8x1x64xf32, #tpu.memory_space<vmem>>, vector<1x1x64xf32>
    %243 = vector.shape_cast %242 : vector<1x1x64xf32> to vector<1x64xf32>
    %244 = vector.broadcast %243 : vector<1x64xf32> to vector<16x64xf32>
    %245 = arith.addf %241, %244 : vector<16x64xf32>
    %c6_186 = arith.constant 6 : index
    %c0_187 = arith.constant 0 : index
    %c0_188 = arith.constant 0 : index
    %246 = vector.load %arg4[%c6_186, %c0_187, %c0_188] : memref<8x512x64xf32, #tpu.memory_space<vmem>>, vector<1x512x64xf32>
    %247 = vector.shape_cast %246 : vector<1x512x64xf32> to vector<512x64xf32>
    %cst_189 = arith.constant dense<0.000000e+00> : vector<16x64xf32>
    %248 = tpu.matmul %3, %247, %cst_189 {dimension_numbers = #tpu.dot_dimension_numbers<[1], [0], [0], [1], [0, 0, 1, 1], [], []>} : vector<16x512xf32>, vector<512x64xf32>, vector<16x64xf32> -> vector<16x64xf32>
    %c6_190 = arith.constant 6 : index
    %c0_191 = arith.constant 0 : index
    %c0_192 = arith.constant 0 : index
    %249 = vector.load %arg8[%c6_190, %c0_191, %c0_192] : memref<8x1x64xf32, #tpu.memory_space<vmem>>, vector<1x1x64xf32>
    %250 = vector.shape_cast %249 : vector<1x1x64xf32> to vector<1x64xf32>
    %251 = vector.broadcast %250 : vector<1x64xf32> to vector<16x64xf32>
    %252 = arith.addf %248, %251 : vector<16x64xf32>
    %c6_193 = arith.constant 6 : index
    %c0_194 = arith.constant 0 : index
    %c0_195 = arith.constant 0 : index
    %253 = vector.load %arg5[%c6_193, %c0_194, %c0_195] : memref<8x512x64xf32, #tpu.memory_space<vmem>>, vector<1x512x64xf32>
    %254 = vector.shape_cast %253 : vector<1x512x64xf32> to vector<512x64xf32>
    %cst_196 = arith.constant dense<0.000000e+00> : vector<16x64xf32>
    %255 = tpu.matmul %3, %254, %cst_196 {dimension_numbers = #tpu.dot_dimension_numbers<[1], [0], [0], [1], [0, 0, 1, 1], [], []>} : vector<16x512xf32>, vector<512x64xf32>, vector<16x64xf32> -> vector<16x64xf32>
    %c6_197 = arith.constant 6 : index
    %c0_198 = arith.constant 0 : index
    %c0_199 = arith.constant 0 : index
    %256 = vector.load %arg9[%c6_197, %c0_198, %c0_199] : memref<8x1x64xf32, #tpu.memory_space<vmem>>, vector<1x1x64xf32>
    %257 = vector.shape_cast %256 : vector<1x1x64xf32> to vector<1x64xf32>
    %258 = vector.broadcast %257 : vector<1x64xf32> to vector<16x64xf32>
    %259 = arith.addf %255, %258 : vector<16x64xf32>
    %cst_200 = arith.constant dense<0.000000e+00> : vector<16x16xf32>
    %260 = tpu.matmul %245, %252, %cst_200 {dimension_numbers = #tpu.dot_dimension_numbers<[1], [1], [0], [0], [0, 0, 1, 0], [], []>} : vector<16x64xf32>, vector<16x64xf32>, vector<16x16xf32> -> vector<16x16xf32>
    %cst_201 = arith.constant 1.250000e-01 : f32
    %261 = vector.broadcast %cst_201 : f32 to vector<16x16xf32>
    %262 = arith.mulf %260, %261 : vector<16x16xf32>
    %cst_202 = arith.constant dense<0xFF800000> : vector<16xf32>
    %263 = vector.multi_reduction <maximumf>, %262, %cst_202 [1] : vector<16x16xf32> to vector<16xf32>
    %264 = vector.shape_cast %263 : vector<16xf32> to vector<16x1xf32>
    %265 = vector.broadcast %264 : vector<16x1xf32> to vector<16x16xf32>
    %266 = arith.subf %262, %265 : vector<16x16xf32>
    %267 = math.exp %266 : vector<16x16xf32>
    %cst_203 = arith.constant dense<0.000000e+00> : vector<16xf32>
    %268 = vector.multi_reduction <add>, %267, %cst_203 [1] : vector<16x16xf32> to vector<16xf32>
    %269 = vector.shape_cast %268 : vector<16xf32> to vector<16x1xf32>
    %270 = tpu.reciprocal %269 {approx = true} : vector<16x1xf32> -> vector<16x1xf32>
    %271 = vector.broadcast %270 : vector<16x1xf32> to vector<16x16xf32>
    %272 = arith.mulf %267, %271 : vector<16x16xf32>
    %cst_204 = arith.constant dense<0.000000e+00> : vector<16x64xf32>
    %273 = tpu.matmul %272, %259, %cst_204 {dimension_numbers = #tpu.dot_dimension_numbers<[1], [0], [0], [1], [0, 0, 1, 1], [], []>} : vector<16x16xf32>, vector<16x64xf32>, vector<16x64xf32> -> vector<16x64xf32>
    %c6_205 = arith.constant 6 : index
    %c0_206 = arith.constant 0 : index
    %c0_207 = arith.constant 0 : index
    %274 = vector.load %arg6[%c6_205, %c0_206, %c0_207] : memref<8x64x512xf32, #tpu.memory_space<vmem>>, vector<1x64x512xf32>
    %275 = vector.shape_cast %274 : vector<1x64x512xf32> to vector<64x512xf32>
    %cst_208 = arith.constant dense<0.000000e+00> : vector<16x512xf32>
    %276 = tpu.matmul %273, %275, %cst_208 {dimension_numbers = #tpu.dot_dimension_numbers<[1], [0], [0], [1], [0, 0, 1, 1], [], []>} : vector<16x64xf32>, vector<64x512xf32>, vector<16x512xf32> -> vector<16x512xf32>
    %277 = arith.addf %238, %276 : vector<16x512xf32>
    %c7 = arith.constant 7 : index
    %c0_209 = arith.constant 0 : index
    %c0_210 = arith.constant 0 : index
    %278 = vector.load %arg3[%c7, %c0_209, %c0_210] : memref<8x512x64xf32, #tpu.memory_space<vmem>>, vector<1x512x64xf32>
    %279 = vector.shape_cast %278 : vector<1x512x64xf32> to vector<512x64xf32>
    %cst_211 = arith.constant dense<0.000000e+00> : vector<16x64xf32>
    %280 = tpu.matmul %1, %279, %cst_211 {dimension_numbers = #tpu.dot_dimension_numbers<[1], [0], [0], [1], [0, 0, 1, 1], [], []>} : vector<16x512xf32>, vector<512x64xf32>, vector<16x64xf32> -> vector<16x64xf32>
    %c7_212 = arith.constant 7 : index
    %c0_213 = arith.constant 0 : index
    %c0_214 = arith.constant 0 : index
    %281 = vector.load %arg7[%c7_212, %c0_213, %c0_214] : memref<8x1x64xf32, #tpu.memory_space<vmem>>, vector<1x1x64xf32>
    %282 = vector.shape_cast %281 : vector<1x1x64xf32> to vector<1x64xf32>
    %283 = vector.broadcast %282 : vector<1x64xf32> to vector<16x64xf32>
    %284 = arith.addf %280, %283 : vector<16x64xf32>
    %c7_215 = arith.constant 7 : index
    %c0_216 = arith.constant 0 : index
    %c0_217 = arith.constant 0 : index
    %285 = vector.load %arg4[%c7_215, %c0_216, %c0_217] : memref<8x512x64xf32, #tpu.memory_space<vmem>>, vector<1x512x64xf32>
    %286 = vector.shape_cast %285 : vector<1x512x64xf32> to vector<512x64xf32>
    %cst_218 = arith.constant dense<0.000000e+00> : vector<16x64xf32>
    %287 = tpu.matmul %3, %286, %cst_218 {dimension_numbers = #tpu.dot_dimension_numbers<[1], [0], [0], [1], [0, 0, 1, 1], [], []>} : vector<16x512xf32>, vector<512x64xf32>, vector<16x64xf32> -> vector<16x64xf32>
    %c7_219 = arith.constant 7 : index
    %c0_220 = arith.constant 0 : index
    %c0_221 = arith.constant 0 : index
    %288 = vector.load %arg8[%c7_219, %c0_220, %c0_221] : memref<8x1x64xf32, #tpu.memory_space<vmem>>, vector<1x1x64xf32>
    %289 = vector.shape_cast %288 : vector<1x1x64xf32> to vector<1x64xf32>
    %290 = vector.broadcast %289 : vector<1x64xf32> to vector<16x64xf32>
    %291 = arith.addf %287, %290 : vector<16x64xf32>
    %c7_222 = arith.constant 7 : index
    %c0_223 = arith.constant 0 : index
    %c0_224 = arith.constant 0 : index
    %292 = vector.load %arg5[%c7_222, %c0_223, %c0_224] : memref<8x512x64xf32, #tpu.memory_space<vmem>>, vector<1x512x64xf32>
    %293 = vector.shape_cast %292 : vector<1x512x64xf32> to vector<512x64xf32>
    %cst_225 = arith.constant dense<0.000000e+00> : vector<16x64xf32>
    %294 = tpu.matmul %3, %293, %cst_225 {dimension_numbers = #tpu.dot_dimension_numbers<[1], [0], [0], [1], [0, 0, 1, 1], [], []>} : vector<16x512xf32>, vector<512x64xf32>, vector<16x64xf32> -> vector<16x64xf32>
    %c7_226 = arith.constant 7 : index
    %c0_227 = arith.constant 0 : index
    %c0_228 = arith.constant 0 : index
    %295 = vector.load %arg9[%c7_226, %c0_227, %c0_228] : memref<8x1x64xf32, #tpu.memory_space<vmem>>, vector<1x1x64xf32>
    %296 = vector.shape_cast %295 : vector<1x1x64xf32> to vector<1x64xf32>
    %297 = vector.broadcast %296 : vector<1x64xf32> to vector<16x64xf32>
    %298 = arith.addf %294, %297 : vector<16x64xf32>
    %cst_229 = arith.constant dense<0.000000e+00> : vector<16x16xf32>
    %299 = tpu.matmul %284, %291, %cst_229 {dimension_numbers = #tpu.dot_dimension_numbers<[1], [1], [0], [0], [0, 0, 1, 0], [], []>} : vector<16x64xf32>, vector<16x64xf32>, vector<16x16xf32> -> vector<16x16xf32>
    %cst_230 = arith.constant 1.250000e-01 : f32
    %300 = vector.broadcast %cst_230 : f32 to vector<16x16xf32>
    %301 = arith.mulf %299, %300 : vector<16x16xf32>
    %cst_231 = arith.constant dense<0xFF800000> : vector<16xf32>
    %302 = vector.multi_reduction <maximumf>, %301, %cst_231 [1] : vector<16x16xf32> to vector<16xf32>
    %303 = vector.shape_cast %302 : vector<16xf32> to vector<16x1xf32>
    %304 = vector.broadcast %303 : vector<16x1xf32> to vector<16x16xf32>
    %305 = arith.subf %301, %304 : vector<16x16xf32>
    %306 = math.exp %305 : vector<16x16xf32>
    %cst_232 = arith.constant dense<0.000000e+00> : vector<16xf32>
    %307 = vector.multi_reduction <add>, %306, %cst_232 [1] : vector<16x16xf32> to vector<16xf32>
    %308 = vector.shape_cast %307 : vector<16xf32> to vector<16x1xf32>
    %309 = tpu.reciprocal %308 {approx = true} : vector<16x1xf32> -> vector<16x1xf32>
    %310 = vector.broadcast %309 : vector<16x1xf32> to vector<16x16xf32>
    %311 = arith.mulf %306, %310 : vector<16x16xf32>
    %cst_233 = arith.constant dense<0.000000e+00> : vector<16x64xf32>
    %312 = tpu.matmul %311, %298, %cst_233 {dimension_numbers = #tpu.dot_dimension_numbers<[1], [0], [0], [1], [0, 0, 1, 1], [], []>} : vector<16x16xf32>, vector<16x64xf32>, vector<16x64xf32> -> vector<16x64xf32>
    %c7_234 = arith.constant 7 : index
    %c0_235 = arith.constant 0 : index
    %c0_236 = arith.constant 0 : index
    %313 = vector.load %arg6[%c7_234, %c0_235, %c0_236] : memref<8x64x512xf32, #tpu.memory_space<vmem>>, vector<1x64x512xf32>
    %314 = vector.shape_cast %313 : vector<1x64x512xf32> to vector<64x512xf32>
    %cst_237 = arith.constant dense<0.000000e+00> : vector<16x512xf32>
    %315 = tpu.matmul %312, %314, %cst_237 {dimension_numbers = #tpu.dot_dimension_numbers<[1], [0], [0], [1], [0, 0, 1, 1], [], []>} : vector<16x64xf32>, vector<64x512xf32>, vector<16x512xf32> -> vector<16x512xf32>
    %316 = arith.addf %277, %315 : vector<16x512xf32>
    %c0_238 = arith.constant 0 : index
    %c0_239 = arith.constant 0 : index
    %317 = vector.load %arg10[%c0_238, %c0_239] : memref<1x512xf32, #tpu.memory_space<vmem>>, vector<1x512xf32>
    %318 = vector.broadcast %317 : vector<1x512xf32> to vector<16x512xf32>
    %319 = arith.addf %316, %318 : vector<16x512xf32>
    %c0_240 = arith.constant 0 : index
    %c0_241 = arith.constant 0 : index
    %c0_242 = arith.constant 0 : index
    %320 = vector.load %arg11[%c0_240, %c0_241, %c0_242] : memref<1x16x512xf32, #tpu.memory_space<vmem>>, vector<1x16x512xf32>
    %321 = vector.shape_cast %320 : vector<1x16x512xf32> to vector<16x512xf32>
    %322 = vector.shape_cast %319 : vector<16x512xf32> to vector<1x16x512xf32>
    tpu.vector_store %arg11[%c0_240, %c0_241, %c0_242], %322 {strides = array<i32>} : memref<1x16x512xf32, #tpu.memory_space<vmem>>, vector<1x16x512xf32>,
    return
  }
  func.func @transform_0(%arg0: i32) -> (i32, i32, i32) {
    %c0_i32 = arith.constant 0 : i32
    %c0_i32_0 = arith.constant 0 : i32
    %c0_i32_1 = arith.constant 0 : i32
    return %arg0, %c0_i32, %c0_i32_0 : i32, i32, i32
  }
  func.func @transform_1(%arg0: i32) -> (i32, i32, i32) {
    %c0_i32 = arith.constant 0 : i32
    %c0_i32_0 = arith.constant 0 : i32
    %c0_i32_1 = arith.constant 0 : i32
    return %arg0, %c0_i32, %c0_i32_0 : i32, i32, i32
  }
  func.func @transform_2(%arg0: i32) -> (i32, i32, i32) {
    %c0_i32 = arith.constant 0 : i32
    %c0_i32_0 = arith.constant 0 : i32
    %c0_i32_1 = arith.constant 0 : i32
    %c0_i32_2 = arith.constant 0 : i32
    return %c0_i32, %c0_i32_0, %c0_i32_1 : i32, i32, i32
  }
  func.func @transform_3(%arg0: i32) -> (i32, i32, i32) {
    %c0_i32 = arith.constant 0 : i32
    %c0_i32_0 = arith.constant 0 : i32
    %c0_i32_1 = arith.constant 0 : i32
    %c0_i32_2 = arith.constant 0 : i32
    return %c0_i32, %c0_i32_0, %c0_i32_1 : i32, i32, i32
  }
  func.func @transform_4(%arg0: i32) -> (i32, i32, i32) {
    %c0_i32 = arith.constant 0 : i32
    %c0_i32_0 = arith.constant 0 : i32
    %c0_i32_1 = arith.constant 0 : i32
    %c0_i32_2 = arith.constant 0 : i32
    return %c0_i32, %c0_i32_0, %c0_i32_1 : i32, i32, i32
  }
  func.func @transform_5(%arg0: i32) -> (i32, i32, i32) {
    %c0_i32 = arith.constant 0 : i32
    %c0_i32_0 = arith.constant 0 : i32
    %c0_i32_1 = arith.constant 0 : i32
    %c0_i32_2 = arith.constant 0 : i32
    return %c0_i32, %c0_i32_0, %c0_i32_1 : i32, i32, i32
  }
  func.func @transform_6(%arg0: i32) -> (i32, i32, i32) {
    %c0_i32 = arith.constant 0 : i32
    %c0_i32_0 = arith.constant 0 : i32
    %c0_i32_1 = arith.constant 0 : i32
    %c0_i32_2 = arith.constant 0 : i32
    return %c0_i32, %c0_i32_0, %c0_i32_1 : i32, i32, i32
  }
  func.func @transform_7(%arg0: i32) -> (i32, i32, i32) {
    %c0_i32 = arith.constant 0 : i32
    %c0_i32_0 = arith.constant 0 : i32
    %c0_i32_1 = arith.constant 0 : i32
    %c0_i32_2 = arith.constant 0 : i32
    return %c0_i32, %c0_i32_0, %c0_i32_1 : i32, i32, i32
  }
  func.func @transform_8(%arg0: i32) -> (i32, i32, i32) {
    %c0_i32 = arith.constant 0 : i32
    %c0_i32_0 = arith.constant 0 : i32
    %c0_i32_1 = arith.constant 0 : i32
    %c0_i32_2 = arith.constant 0 : i32
    return %c0_i32, %c0_i32_0, %c0_i32_1 : i32, i32, i32
  }
  func.func @transform_9(%arg0: i32) -> (i32, i32) {
    %c0_i32 = arith.constant 0 : i32
    %c0_i32_0 = arith.constant 0 : i32
    %c0_i32_1 = arith.constant 0 : i32
    return %c0_i32, %c0_i32_0 : i32, i32
  }
  func.func @transform_10(%arg0: i32) -> (i32, i32, i32) {
    %c0_i32 = arith.constant 0 : i32
    %c0_i32_0 = arith.constant 0 : i32
    %c0_i32_1 = arith.constant 0 : i32
    return %arg0, %c0_i32, %c0_i32_0 : i32, i32, i32
  }
}

</mosaic_0001>

<bundles_post_ra>
// kernel: attention_layer_forward.1
= control target key start
LH: loop header
LB: loop body
LE: loop exit
PB: predicated region body
PF: predicated region fallthrough
CT: control target
= control target key end

     0   :  { %s14857_s13 = smov 0   ;;  %s20858_s0 = inlined_call_operand.vmem [shape: f32[2,16,512], index: 0, kind: input, shape index: {}]   ;;  %s20859_s1 = inlined_call_operand.vmem [shape: f32[2,16,512], index: 1, kind: input, shape index: {}]   ;;  %s20860_s2 = inlined_call_operand.vmem [shape: f32[8,512,64], index: 2, kind: input, shape index: {}]   ;;  %s20861_s3 = inlined_call_operand.vmem [shape: f32[8,512,64], index: 3, kind: input, shape index: {}]   ;;  %s20862_s4 = inlined_call_operand.vmem [shape: f32[8,512,64], index: 4, kind: input, shape index: {}]   ;;  %s20863_s5 = inlined_call_operand.vmem [shape: f32[8,64,512], index: 5, kind: input, shape index: {}]   ;;  %s20864_s6 = inlined_call_operand.vmem [shape: f32[8,1,64], index: 6, kind: input, shape index: {}]   ;;  %s20865_s7 = inlined_call_operand.vmem [shape: f32[8,1,64], index: 7, kind: input, shape index: {}]   ;;  %s20866_s8 = inlined_call_operand.vmem [shape: f32[8,1,64], index: 8, kind: input, shape index: {}]   ;;  %s20867_s9 = inlined_call_operand.vmem [shape: f32[1,512], index: 9, kind: input, shape index: {}]   ;;  %s20868_s10 = inlined_call_operand.vmem [shape: f32[2,16,512], index: 10, kind: output, shape index: {}]  }
   0x1 LB: > { %s8976_s14 = sadd.s32 4294967295, %s14799_s13   ;;  %p8980_p0 = scmp.ge.s32.totalorder %s14799_s13, 1  ;;  %s14799_s13 = sphi %s14857_s13, %s20_s13  }
   0x2   : > { %p322_p1 = scmp.lt.s32.totalorder %s14799_s13, 3 }
   0x4   : > { %p323_p2 = pnand %p8980_p0, %p322_p1 }
   0x5   : > { %v412_v0 = vld [vmem:[%s20860_s2 + $0x80] sm:$0xff] (!%p323_p2)  ;;  %v413_v1 = vld [vmem:[%s20860_s2 + $0x88] sm:$0xff] (!%p323_p2)  ;;  %v414_v11 = vld [vmem:[%s20860_s2 + $0x90] sm:$0xff] (!%p323_p2)  ;;  %p14939_p3 = scmp.lt.s32.totalorder (!%p323_p2), %s8976_s14, 1  ;;  %vm1059_vm0 = vcmask (!%p323_p2), 523264   ;;  %vm1149_vm2 = vcmask (!%p323_p2), 130048  }
   0x6   : > { %326 = sbr.rel (%p323_p2) target bundleno = 8352 (0x20a0), region = 60  ;;  %v396_v2 = vld [vmem:[%s20860_s2] sm:$0xff] (!%p323_p2)  ;;  %v12685_v3 = vpack.c.bf16 (!%p323_p2), %v413_v1, %v412_v0  ;;  %v397_v4 = vld [vmem:[%s20860_s2 + $0x8] sm:$0xff] (!%p323_p2)  ;;  %v415_v13 = vld [vmem:[%s20860_s2 + $0x98] sm:$0xff] (!%p323_p2) }
   0x7   : > { %v444_v5 = vld [vmem:[%s20860_s2 + $0x180] sm:$0xff] (!%p323_p2)  ;;  %v445_v6 = vld [vmem:[%s20860_s2 + $0x188] sm:$0xff] (!%p323_p2)  ;;  %v12687_v7 = vpack.c.bf16 (!%p323_p2), %v397_v4, %v396_v2  ;;  %v398_v14 = vld [vmem:[%s20860_s2 + $0x10] sm:$0xff] (!%p323_p2)  ;;  %v12689_v16 = vpack.c.bf16 (!%p323_p2), %v415_v13, %v414_v11 }
   0x8   : > { %v12717_v8 = vpack.c.bf16 (!%p323_p2), %v445_v6, %v444_v5  ;;  %v428_v9 = vld [vmem:[%s20860_s2 + $0x100] sm:$0xff] (!%p323_p2)  ;;  %v429_v10 = vld [vmem:[%s20860_s2 + $0x108] sm:$0xff] (!%p323_p2)  ;;  %12686 = vmatprep.subr.bf16.mxu0 (!%p323_p2), %v12685_v3  ;;  %v399_v15 = vld [vmem:[%s20860_s2 + $0x18] sm:$0xff] (!%p323_p2) }
   0x9   : > { %v12719_v12 = vpack.c.bf16 (!%p323_p2), %v429_v10, %v428_v9  ;;  %12688 = vmatpush3.bf16.msra.mxu0 (!%p323_p2), %v12687_v7  ;;  %v12691_v17 = vpack.c.bf16 (!%p323_p2), %v399_v15, %v398_v14  ;;  %v446_v18 = vld [vmem:[%s20860_s2 + $0x190] sm:$0xff] (!%p323_p2)  ;;  %v447_v19 = vld [vmem:[%s20860_s2 + $0x198] sm:$0xff] (!%p323_p2)  ;;  %v416_v23 = vld [vmem:[%s20860_s2 + $0xa0] sm:$0xff] (!%p323_p2) }
   0xa   : > { %12718 = vmatprep.subr.bf16.mxu1 (!%p323_p2), %v12717_v8  ;;  %v430_v20 = vld [vmem:[%s20860_s2 + $0x110] sm:$0xff] (!%p323_p2)  ;;  %v12721_v21 = vpack.c.bf16 (!%p323_p2), %v447_v19, %v446_v18  ;;  %v431_v22 = vld [vmem:[%s20860_s2 + $0x118] sm:$0xff] (!%p323_p2)  ;;  %v417_v24 = vld [vmem:[%s20860_s2 + $0xa8] sm:$0xff] (!%p323_p2)  ;;  %12690 = vmatprep.subr.bf16.mxu0 (!%p323_p2), %v12689_v16 }
   0xb   : > { %12720 = vmatpush3.bf16.msra.mxu1 (!%p323_p2), %v12719_v12  ;;  %v12723_v25 = vpack.c.bf16 (!%p323_p2), %v431_v22, %v430_v20  ;;  %v12693_v26 = vpack.c.bf16 (!%p323_p2), %v417_v24, %v416_v23  ;;  %v400_v27 = vld [vmem:[%s20860_s2 + $0x20] sm:$0xff] (!%p323_p2)  ;;  %v401_v28 = vld [vmem:[%s20860_s2 + $0x28] sm:$0xff] (!%p323_p2)  ;;  %v418_v35 = vld [vmem:[%s20860_s2 + $0xb0] sm:$0xff] (!%p323_p2) }
   0xc   : > { %v448_v29 = vld [vmem:[%s20860_s2 + $0x1a0] sm:$0xff] (!%p323_p2)  ;;  %12722 = vmatprep.subr.bf16.mxu1 (!%p323_p2), %v12721_v21  ;;  %v449_v30 = vld [vmem:[%s20860_s2 + $0x1a8] sm:$0xff] (!%p323_p2)  ;;  %v12695_v33 = vpack.c.bf16 (!%p323_p2), %v401_v28, %v400_v27  ;;  %v419_v36 = vld [vmem:[%s20860_s2 + $0xb8] sm:$0xff] (!%p323_p2) }
   0xd   : > { %v432_v31 = vld [vmem:[%s20860_s2 + $0x120] sm:$0xff]  ;;  %v433_v32 = vld [vmem:[%s20860_s2 + $0x128] sm:$0xff]  ;;  %12692 = vmatpush3.bf16.msra.mxu0 %v12691_v17  ;;  %v12725_v34 = vpack.c.bf16 %v449_v30, %v448_v29  ;;  %v402_v37 = vld [vmem:[%s20860_s2 + $0x30] sm:$0xff]  ;;  %v12697_v39 = vpack.c.bf16 %v419_v36, %v418_v35  ;;  %s20873_s14 = smov (!%p14939_p3, %s8976_s14), 1 }
   0xe   : > { %12694 = vmatprep.subr.bf16.mxu0 %v12693_v26  ;;  %v12727_v38 = vpack.c.bf16 %v433_v32, %v432_v31  ;;  %v403_v40 = vld [vmem:[%s20860_s2 + $0x38] sm:$0xff]  ;;  %v450_v41 = vld [vmem:[%s20860_s2 + $0x1b0] sm:$0xff]  ;;  %v420_v46 = vld [vmem:[%s20860_s2 + $0xc0] sm:$0xff]  ;;  %s15007_s15 = sshll.u32 %s20873_s14, 6 }
   0xf   : > { %12724 = vmatpush3.bf16.msra.mxu1 %v12723_v25  ;;  %v451_v42 = vld [vmem:[%s20860_s2 + $0x1b8] sm:$0xff]  ;;  %v434_v44 = vld [vmem:[%s20860_s2 + $0x130] sm:$0xff]  ;;  %v421_v47 = vld [vmem:[%s20860_s2 + $0xc8] sm:$0xff]  ;;  %v12699_v48 = vpack.c.bf16 %v403_v40, %v402_v37  ;;  %s15031_s29 = scalar_lea.vmem %s20858_s0, %s15007_s15  ;;  %s15167_s25 = scalar_lea.vmem %s20859_s1, %s15007_s15 }
  0x10   : > { %12726 = vmatprep.subr.bf16.mxu1 %v12725_v34  ;;  %v12729_v43 = vpack.c.bf16 %v451_v42, %v450_v41  ;;  %v435_v45 = vld [vmem:[%s20860_s2 + $0x138] sm:$0xff]  ;;  %v452_v49 = vld [vmem:[%s20860_s2 + $0x1c0] sm:$0xff]  ;;  %v453_v50 = vld [vmem:[%s20860_s2 + $0x1c8] sm:$0xff]  ;;  %v12701_v52 = vpack.c.bf16 %v421_v47, %v420_v46 }
  0x11   : > { %12696 = vmatpush3.bf16.msra.mxu0 %v12695_v33  ;;  %v12731_v51 = vpack.c.bf16 %v435_v45, %v434_v44  ;;  %v404_v53 = vld [vmem:[%s20860_s2 + $0x40] sm:$0xff]  ;;  %v405_v54 = vld [vmem:[%s20860_s2 + $0x48] sm:$0xff]  ;;  %v12733_v56 = vpack.c.bf16 %v453_v50, %v452_v49  ;;  %v422_v58 = vld [vmem:[%s20860_s2 + $0xd0] sm:$0xff] }
  0x12   : > { %12698 = vmatprep.subr.bf16.mxu0 %v12697_v39  ;;  %v436_v55 = vld [vmem:[%s20860_s2 + $0x140] sm:$0xff]  ;;  %v437_v57 = vld [vmem:[%s20860_s2 + $0x148] sm:$0xff]  ;;  %v423_v59 = vld [vmem:[%s20860_s2 + $0xd8] sm:$0xff]  ;;  %v12703_v62 = vpack.c.bf16 %v405_v54, %v404_v53 }
  0x13   : > { %12728 = vmatpush3.bf16.msra.mxu1 %v12727_v38  ;;  %v454_v60 = vld [vmem:[%s20860_s2 + $0x1d0] sm:$0xff]  ;;  %v455_v61 = vld [vmem:[%s20860_s2 + $0x1d8] sm:$0xff]  ;;  %v12735_v63 = vpack.c.bf16 %v437_v57, %v436_v55  ;;  %v12705_v0 = vpack.c.bf16 %v423_v59, %v422_v58  ;;  %v424_v6 = vld [vmem:[%s20860_s2 + $0xe0] sm:$0xff] }
  0x14   : > { %12730 = vmatprep.subr.bf16.mxu1 %v12729_v43  ;;  %v406_v1 = vld [vmem:[%s20860_s2 + $0x50] sm:$0xff]  ;;  %v407_v2 = vld [vmem:[%s20860_s2 + $0x58] sm:$0xff]  ;;  %v12737_v4 = vpack.c.bf16 %v455_v61, %v454_v60  ;;  %v425_v7 = vld [vmem:[%s20860_s2 + $0xe8] sm:$0xff] }
  0x15   : > { %12700 = vmatpush3.bf16.msra.mxu0 %v12699_v48  ;;  %v438_v3 = vld [vmem:[%s20860_s2 + $0x150] sm:$0xff]  ;;  %v439_v5 = vld [vmem:[%s20860_s2 + $0x158] sm:$0xff]  ;;  %v456_v8 = vld [vmem:[%s20860_s2 + $0x1e0] sm:$0xff]  ;;  %v12707_v10 = vpack.c.bf16 %v407_v2, %v406_v1  ;;  %v12709_v13 = vpack.c.bf16 %v425_v7, %v424_v6 }
  0x16   : > { %12702 = vmatprep.subr.bf16.mxu0 %v12701_v52  ;;  %v457_v9 = vld [vmem:[%s20860_s2 + $0x1e8] sm:$0xff]  ;;  %v408_v11 = vld [vmem:[%s20860_s2 + $0x60] sm:$0xff]  ;;  %v12739_v12 = vpack.c.bf16 %v439_v5, %v438_v3  ;;  %v426_v19 = vld [vmem:[%s20860_s2 + $0xf0] sm:$0xff] }
  0x17   : > { %12732 = vmatpush3.bf16.msra.mxu1 %v12731_v51  ;;  %v409_v14 = vld [vmem:[%s20860_s2 + $0x68] sm:$0xff]  ;;  %v440_v15 = vld [vmem:[%s20860_s2 + $0x160] sm:$0xff]  ;;  %v12741_v17 = vpack.c.bf16 %v457_v9, %v456_v8  ;;  %v427_v20 = vld [vmem:[%s20860_s2 + $0xf8] sm:$0xff] }
  0x18   : > { %12734 = vmatprep.subr.bf16.mxu1 %v12733_v56  ;;  %v15049_v16 = vld [vmem:[%s15031_s29 + $0x8] sm:$0xff]  ;;  %v458_v21 = vld [vmem:[%s20860_s2 + $0x1f0] sm:$0xff]  ;;  %v459_v22 = vld [vmem:[%s20860_s2 + $0x1f8] sm:$0xff]  ;;  %v12711_v23 = vpack.c.bf16 %v409_v14, %v408_v11  ;;  %v12713_v26 = vpack.c.bf16 %v427_v20, %v426_v19 }
  0x19   : > { %12704 = vmatpush3.bf16.msra.mxu0 %v12703_v62  ;;  %v441_v18 = vld [vmem:[%s20860_s2 + $0x168] sm:$0xff]  ;;  %531 = vmatprep.mubr.f32.mxu0 %v15049_v16  ;;  %v410_v24 = vld [vmem:[%s20860_s2 + $0x70] sm:$0xff]  ;;  %v411_v27 = vld [vmem:[%s20860_s2 + $0x78] sm:$0xff]  ;;  %v12745_v30 = vpack.c.bf16 %v459_v22, %v458_v21 }
  0x1a   : > { %12706 = vmatprep.subr.bf16.mxu0 %v12705_v0  ;;  %v12743_v25 = vpack.c.bf16 %v441_v18, %v440_v15  ;;  %v442_v28 = vld [vmem:[%s20860_s2 + $0x170] sm:$0xff]  ;;  %v383_v29 = vld [vmem:[%s15031_s29 + $0x18] sm:$0xff]  ;;  %v633_v32 = vld [vmem:[%s20861_s3 + $0x80] sm:$0xff]  ;;  %v12715_v36 = vpack.c.bf16 %v411_v27, %v410_v24 }
  0x1b   : > { %12736 = vmatpush3.bf16.msra.mxu1 %v12735_v63  ;;  %v443_v31 = vld [vmem:[%s20860_s2 + $0x178] sm:$0xff]  ;;  %v634_v33 = vld [vmem:[%s20861_s3 + $0x88] sm:$0xff]  ;;  %606 = vmatprep.mubr.f32.mxu1 %v383_v29  ;;  %v665_v34 = vld [vmem:[%s20861_s3 + $0x180] sm:$0xff] }
  0x1c   : > { %12738 = vmatprep.subr.bf16.mxu1 %v12737_v4  ;;  %v666_v35 = vld [vmem:[%s20861_s3 + $0x188] sm:$0xff]  ;;  %v12747_v37 = vpack.c.bf16 %v443_v31, %v442_v28  ;;  %v12749_v38 = vpack.c.bf16 %v634_v33, %v633_v32  ;;  %v617_v39 = vld [vmem:[%s20861_s3] sm:$0xff]  ;;  %v635_v44 = vld [vmem:[%s20861_s3 + $0x90] sm:$0xff] }
  0x1d   : > { %12708 = vmatpush3.bf16.msra.mxu0 %v12707_v10  ;;  %v618_v40 = vld [vmem:[%s20861_s3 + $0x8] sm:$0xff]  ;;  %v649_v41 = vld [vmem:[%s20861_s3 + $0x100] sm:$0xff]  ;;  %v12781_v42 = vpack.c.bf16 %v666_v35, %v665_v34  ;;  %v636_v45 = vld [vmem:[%s20861_s3 + $0x98] sm:$0xff] }
  0x1e   : > { %12710 = vmatprep.subr.bf16.mxu0 %v12709_v13  ;;  %v650_v43 = vld [vmem:[%s20861_s3 + $0x108] sm:$0xff]  ;;  %v667_v46 = vld [vmem:[%s20861_s3 + $0x190] sm:$0xff]  ;;  %v668_v47 = vld [vmem:[%s20861_s3 + $0x198] sm:$0xff]  ;;  %v12751_v49 = vpack.c.bf16 %v618_v40, %v617_v39  ;;  %v12753_v52 = vpack.c.bf16 %v636_v45, %v635_v44 }
  0x1f   : > { %12740 = vmatpush3.bf16.msra.mxu1 %v12739_v12  ;;  %v15117_v48 = vld [vmem:[%s15031_s29] sm:$0xff]  ;;  %v382_v50 = vld [vmem:[%s15031_s29 + $0x10] sm:$0xff]  ;;  %v12783_v51 = vpack.c.bf16 %v650_v43, %v649_v41  ;;  %v620_v54 = vld [vmem:[%s20861_s3 + $0x18] sm:$0xff]  ;;  %v12785_v56 = vpack.c.bf16 %v668_v47, %v667_v46 }
  0x20   : > { %12742 = vmatprep.subr.bf16.mxu1 %v12741_v17  ;;  %v619_v53 = vld [vmem:[%s20861_s3 + $0x10] sm:$0xff]  ;;  %v652_v57 = vld [vmem:[%s20861_s3 + $0x118] sm:$0xff]  ;;  %v637_v58 = vld [vmem:[%s20861_s3 + $0xa0] sm:$0xff] }
  0x21   : > { %12712 = vmatpush3.bf16.msra.mxu0 %v12711_v23  ;;  %v651_v55 = vld [vmem:[%s20861_s3 + $0x110] sm:$0xff]  ;;  %v638_v59 = vld [vmem:[%s20861_s3 + $0xa8] sm:$0xff]  ;;  %v669_v60 = vld [vmem:[%s20861_s3 + $0x1a0] sm:$0xff]  ;;  %v12755_v62 = vpack.c.bf16 %v620_v54, %v619_v53 }
  0x22   : > { %12714 = vmatprep.subr.bf16.mxu0 %v12713_v26  ;;  %v670_v61 = vld [vmem:[%s20861_s3 + $0x1a8] sm:$0xff]  ;;  %v12787_v63 = vpack.c.bf16 %v652_v57, %v651_v55  ;;  %v12757_v0 = vpack.c.bf16 %v638_v59, %v637_v58  ;;  %v621_v1 = vld [vmem:[%s20861_s3 + $0x20] sm:$0xff]  ;;  %v639_v6 = vld [vmem:[%s20861_s3 + $0xb0] sm:$0xff] }
  0x23   : > { %12744 = vmatpush3.bf16.msra.mxu1 %v12743_v25  ;;  %v622_v2 = vld [vmem:[%s20861_s3 + $0x28] sm:$0xff]  ;;  %v653_v3 = vld [vmem:[%s20861_s3 + $0x120] sm:$0xff]  ;;  %v12789_v4 = vpack.c.bf16 %v670_v61, %v669_v60  ;;  %v640_v7 = vld [vmem:[%s20861_s3 + $0xb8] sm:$0xff] }
  0x24   : > { %12746 = vmatprep.subr.bf16.mxu1 %v12745_v30  ;;  %v654_v5 = vld [vmem:[%s20861_s3 + $0x128] sm:$0xff]  ;;  %v671_v8 = vld [vmem:[%s20861_s3 + $0x1b0] sm:$0xff]  ;;  %v672_v9 = vld [vmem:[%s20861_s3 + $0x1b8] sm:$0xff]  ;;  %v12759_v10 = vpack.c.bf16 %v622_v2, %v621_v1  ;;  %v12761_v12 = vpack.c.bf16 %v640_v7, %v639_v6 }
  0x25   : > { %12716 = vmatpush3.bf16.msra.mxu0 %v12715_v36  ;;  %v12791_v11 = vpack.c.bf16 %v654_v5, %v653_v3  ;;  %v623_v13 = vld [vmem:[%s20861_s3 + $0x30] sm:$0xff]  ;;  %v624_v14 = vld [vmem:[%s20861_s3 + $0x38] sm:$0xff]  ;;  %v15185_v17 = vld [vmem:[%s15167_s25 + $0x8] sm:$0xff]  ;;  %v12793_v18 = vpack.c.bf16 %v672_v9, %v671_v8 }
  0x26   : > { %12750 = vmatprep.subr.bf16.mxu0 %v12749_v38  ;;  %v655_v15 = vld [vmem:[%s20861_s3 + $0x130] sm:$0xff]  ;;  %v656_v19 = vld [vmem:[%s20861_s3 + $0x138] sm:$0xff]  ;;  %v641_v20 = vld [vmem:[%s20861_s3 + $0xc0] sm:$0xff]  ;;  %v12763_v25 = vpack.c.bf16 %v624_v14, %v623_v13 }
  0x27   : > { %12748 = vmatpush3.bf16.msra.mxu1 %v12747_v37  ;;  %v642_v21 = vld [vmem:[%s20861_s3 + $0xc8] sm:$0xff]  ;;  %v673_v22 = vld [vmem:[%s20861_s3 + $0x1c0] sm:$0xff]  ;;  %v387_v28 = vld [vmem:[%s15031_s29 + $0x38] sm:$0xff]  ;;  %v12795_v29 = vpack.c.bf16 %v656_v19, %v655_v15 }
  0x28   : > { %12782 = vmatprep.subr.bf16.mxu1 %v12781_v42  ;;  %532 = vmatmul.mubr.f32.vlgmr.msra.gmra.mrb[0].mxu0 %v15117_v48  ;;  %v674_v23 = vld [vmem:[%s20861_s3 + $0x1c8] sm:$0xff]  ;;  %v625_v26 = vld [vmem:[%s20861_s3 + $0x40] sm:$0xff]  ;;  %v12765_v30 = vpack.c.bf16 %v642_v21, %v641_v20  ;;  %v386_v33 = vld [vmem:[%s15031_s29 + $0x30] sm:$0xff] }
  0x29   : > { %12752 = vmatpush3.bf16.msra.mxu0 %v12751_v49  ;;  %v15203_v24 = vld [vmem:[%s15031_s29 + $0x28] sm:$0xff]  ;;  %v15210_v27 = vld [vmem:[%s15031_s29 + $0x20] sm:$0xff]  ;;  %v12797_v34 = vpack.c.bf16 %v674_v23, %v673_v22  ;;  %v643_v36 = vld [vmem:[%s20861_s3 + $0xd0] sm:$0xff] }
  0x2a   : > { %607 = vmatmul.mubr.f32.vlgmr.msra.gmra.mrb[0].mxu1 %v382_v50  ;;  %12754 = vmatprep.subr.bf16.mxu0 %v12753_v52  ;;  %v626_v31 = vld [vmem:[%s20861_s3 + $0x48] sm:$0xff]  ;;  %v657_v32 = vld [vmem:[%s20861_s3 + $0x140] sm:$0xff]  ;;  %v644_v37 = vld [vmem:[%s20861_s3 + $0xd8] sm:$0xff] }
  0x2b   : > { %12784 = vmatpush3.bf16.msra.mxu1 %v12783_v51  ;;  %536 = vmatprep.mubr.f32.mxu0 %v15203_v24  ;;  %v658_v35 = vld [vmem:[%s20861_s3 + $0x148] sm:$0xff]  ;;  %v15231_v38 = vld [vmem:[%s15167_s25 + $0x18] sm:$0xff]  ;;  %v675_v39 = vld [vmem:[%s20861_s3 + $0x1d0] sm:$0xff]  ;;  %v12767_v41 = vpack.c.bf16 %v626_v31, %v625_v26  ;;  %v12769_v43 = vpack.c.bf16 %v644_v37, %v643_v36 }
  0x2c   : > { %12786 = vmatprep.subr.bf16.mxu1 %v12785_v56  ;;  %537 = vmatmul.mubr.f32.gmra.mrb[2].mxu0 %v15210_v27  ;;  %v676_v40 = vld [vmem:[%s20861_s3 + $0x1d8] sm:$0xff]  ;;  %v12799_v42 = vpack.c.bf16 %v658_v35, %v657_v32  ;;  %v627_v44 = vld [vmem:[%s20861_s3 + $0x50] sm:$0xff]  ;;  %v645_v50 = vld [vmem:[%s20861_s3 + $0xe0] sm:$0xff] }
  0x2d   : > { %12756 = vmatpush3.bf16.msra.mxu0 %v12755_v62  ;;  %611 = vmatprep.mubr.f32.mxu1 %v387_v28  ;;  %v628_v45 = vld [vmem:[%s20861_s3 + $0x58] sm:$0xff]  ;;  %v659_v46 = vld [vmem:[%s20861_s3 + $0x150] sm:$0xff]  ;;  %v12801_v47 = vpack.c.bf16 %v676_v40, %v675_v39  ;;  %v646_v51 = vld [vmem:[%s20861_s3 + $0xe8] sm:$0xff] }
  0x2e   : > { %12758 = vmatprep.subr.bf16.mxu0 %v12757_v0  ;;  %752 = vmatprep.mubr.f32.mxu0 %v15185_v17  ;;  %v660_v49 = vld [vmem:[%s20861_s3 + $0x158] sm:$0xff]  ;;  %v677_v52 = vld [vmem:[%s20861_s3 + $0x1e0] sm:$0xff]  ;;  %v678_v53 = vld [vmem:[%s20861_s3 + $0x1e8] sm:$0xff]  ;;  %v12771_v54 = vpack.c.bf16 %v628_v45, %v627_v44  ;;  %v12773_v56 = vpack.c.bf16 %v646_v51, %v645_v50 }
  0x2f   : > { %12788 = vmatpush3.bf16.msra.mxu1 %v12787_v63  ;;  %v12803_v55 = vpack.c.bf16 %v660_v49, %v659_v46  ;;  %v629_v57 = vld [vmem:[%s20861_s3 + $0x60] sm:$0xff]  ;;  %v630_v58 = vld [vmem:[%s20861_s3 + $0x68] sm:$0xff]  ;;  %v12805_v60 = vpack.c.bf16 %v678_v53, %v677_v52  ;;  %v647_v62 = vld [vmem:[%s20861_s3 + $0xf0] sm:$0xff] }
  0x30   : > { %12790 = vmatprep.subr.bf16.mxu1 %v12789_v4  ;;  %612 = vmatmul.mubr.f32.gmra.mrb[2].mxu1 %v386_v33  ;;  %v661_v59 = vld [vmem:[%s20861_s3 + $0x160] sm:$0xff]  ;;  %v662_v61 = vld [vmem:[%s20861_s3 + $0x168] sm:$0xff]  ;;  %v648_v63 = vld [vmem:[%s20861_s3 + $0xf8] sm:$0xff]  ;;  %v12775_v2 = vpack.c.bf16 %v630_v58, %v629_v57 }
  0x31   : > { %12760 = vmatpush3.bf16.msra.mxu0 %v12759_v10  ;;  %827 = vmatprep.mubr.f32.mxu1 %v15231_v38  ;;  %v679_v0 = vld [vmem:[%s20861_s3 + $0x1f0] sm:$0xff]  ;;  %v680_v1 = vld [vmem:[%s20861_s3 + $0x1f8] sm:$0xff]  ;;  %v12807_v3 = vpack.c.bf16 %v662_v61, %v661_v59  ;;  %v12777_v4 = vpack.c.bf16 %v648_v63, %v647_v62  ;;  %v854_v10 = vld [vmem:[%s20862_s4 + $0x80] sm:$0xff] }
  0x32   : > { %12762 = vmatprep.subr.bf16.mxu0 %v12761_v12  ;;  %v631_v5 = vld [vmem:[%s20861_s3 + $0x70] sm:$0xff]  ;;  %v632_v6 = vld [vmem:[%s20861_s3 + $0x78] sm:$0xff]  ;;  %v12809_v8 = vpack.c.bf16 %v680_v1, %v679_v0  ;;  %v838_v15 = vld [vmem:[%s20862_s4] sm:$0xff] }
  0x33   : > { %12792 = vmatpush3.bf16.msra.mxu1 %v12791_v11  ;;  %v663_v7 = vld [vmem:[%s20861_s3 + $0x170] sm:$0xff]  ;;  %v664_v9 = vld [vmem:[%s20861_s3 + $0x178] sm:$0xff]  ;;  %v855_v11 = vld [vmem:[%s20862_s4 + $0x88] sm:$0xff]  ;;  %v12779_v12 = vpack.c.bf16 %v632_v6, %v631_v5 }
  0x34   : > { %12794 = vmatprep.subr.bf16.mxu1 %v12793_v18  ;;  %v12811_v13 = vpack.c.bf16 %v664_v9, %v663_v7  ;;  %v12813_v14 = vpack.c.bf16 %v855_v11, %v854_v10  ;;  %v839_v18 = vld [vmem:[%s20862_s4 + $0x8] sm:$0xff]  ;;  %v856_v19 = vld [vmem:[%s20862_s4 + $0x90] sm:$0xff]  ;;  %v857_v20 = vld [vmem:[%s20862_s4 + $0x98] sm:$0xff] }
  0x35   : > { %12764 = vmatpush3.bf16.msra.mxu0 %v12763_v25  ;;  %v15320_v21 = vld [vmem:[%s15167_s25] sm:$0xff]  ;;  %v15323_v22 = vld [vmem:[%s15167_s25 + $0x10] sm:$0xff]  ;;  %v15326_v23 = vld [vmem:[%s15167_s25 + $0x28] sm:$0xff]  ;;  %v12815_v25 = vpack.c.bf16 %v839_v18, %v838_v15  ;;  %v12817_v28 = vpack.c.bf16 %v857_v20, %v856_v19 }
  0x36   : > { %12766 = vmatprep.subr.bf16.mxu0 %v12765_v30  ;;  %v15329_v26 = vld [vmem:[%s15167_s25 + $0x38] sm:$0xff]  ;;  %v858_v31 = vld [vmem:[%s20862_s4 + $0xa0] sm:$0xff]  ;;  %v859_v32 = vld [vmem:[%s20862_s4 + $0xa8] sm:$0xff] }
  0x37   : > { %12796 = vmatpush3.bf16.msra.mxu1 %v12795_v29  ;;  %v840_v29 = vld [vmem:[%s20862_s4 + $0x10] sm:$0xff]  ;;  %v841_v30 = vld [vmem:[%s20862_s4 + $0x18] sm:$0xff]  ;;  %v15345_v33 = vld [vmem:[%s15167_s25 + $0x20] sm:$0xff]  ;;  %v12821_v36 = vpack.c.bf16 %v859_v32, %v858_v31 }
  0x38   : > { %12798 = vmatprep.subr.bf16.mxu1 %v12797_v34  ;;  %v15350_v34 = vld [vmem:[%s15167_s25 + $0x30] sm:$0xff]  ;;  %v12819_v35 = vpack.c.bf16 %v841_v30, %v840_v29  ;;  %v842_v37 = vld [vmem:[%s20862_s4 + $0x20] sm:$0xff]  ;;  %v843_v39 = vld [vmem:[%s20862_s4 + $0x28] sm:$0xff] }
  0x39   : > { %12768 = vmatpush3.bf16.msra.mxu0 %v12767_v41  ;;  %v860_v40 = vld [vmem:[%s20862_s4 + $0xb0] sm:$0xff]  ;;  %v861_v41 = vld [vmem:[%s20862_s4 + $0xb8] sm:$0xff]  ;;  %v862_v46 = vld [vmem:[%s20862_s4 + $0xc0] sm:$0xff] }
  0x3a   : > { %12770 = vmatprep.subr.bf16.mxu0 %v12769_v43  ;;  %v12825_v43 = vpack.c.bf16 %v861_v41, %v860_v40  ;;  %v844_v44 = vld [vmem:[%s20862_s4 + $0x30] sm:$0xff]  ;;  %v845_v45 = vld [vmem:[%s20862_s4 + $0x38] sm:$0xff]  ;;  %v846_v50 = vld [vmem:[%s20862_s4 + $0x40] sm:$0xff] }
  0x3b   : > { %12800 = vmatpush3.bf16.msra.mxu1 %v12799_v42  ;;  %v12823_v42 = vpack.c.bf16 %v843_v39, %v842_v37  ;;  %v847_v51 = vld [vmem:[%s20862_s4 + $0x48] sm:$0xff]  ;;  %v864_v52 = vld [vmem:[%s20862_s4 + $0xd0] sm:$0xff]  ;;  %v865_v53 = vld [vmem:[%s20862_s4 + $0xd8] sm:$0xff] }
  0x3c   : > { %12802 = vmatprep.subr.bf16.mxu1 %v12801_v47  ;;  %v863_v47 = vld [vmem:[%s20862_s4 + $0xc8] sm:$0xff]  ;;  %v849_v57 = vld [vmem:[%s20862_s4 + $0x58] sm:$0xff]  ;;  %v866_v58 = vld [vmem:[%s20862_s4 + $0xe0] sm:$0xff] }
  0x3d   : > { %12772 = vmatpush3.bf16.msra.mxu0 %v12771_v54  ;;  %v12829_v49 = vpack.c.bf16 %v863_v47, %v862_v46  ;;  %v12831_v54 = vpack.c.bf16 %v847_v51, %v846_v50  ;;  %v867_v59 = vld [vmem:[%s20862_s4 + $0xe8] sm:$0xff]  ;;  %v850_v62 = vld [vmem:[%s20862_s4 + $0x60] sm:$0xff]  ;;  %v868_v0 = vld [vmem:[%s20862_s4 + $0xf0] sm:$0xff] }
  0x3e   : > { %12774 = vmatprep.subr.bf16.mxu0 %v12773_v56  ;;  %v848_v56 = vld [vmem:[%s20862_s4 + $0x50] sm:$0xff]  ;;  %v12837_v61 = vpack.c.bf16 %v867_v59, %v866_v58  ;;  %v851_v63 = vld [vmem:[%s20862_s4 + $0x68] sm:$0xff]  ;;  %v869_v1 = vld [vmem:[%s20862_s4 + $0xf8] sm:$0xff] }
  0x3f   : > { %12804 = vmatpush3.bf16.msra.mxu1 %v12803_v55  ;;  %v12833_v55 = vpack.c.bf16 %v865_v53, %v864_v52  ;;  %v853_v5 = vld [vmem:[%s20862_s4 + $0x78] sm:$0xff]  ;;  %v886_v7 = vld [vmem:[%s20862_s4 + $0x180] sm:$0xff]  ;;  %v871_v11 = vld [vmem:[%s20862_s4 + $0x108] sm:$0xff] }
  0x40   : > { %12806 = vmatprep.subr.bf16.mxu1 %v12805_v60  ;;  %v12835_v60 = vpack.c.bf16 %v849_v57, %v848_v56  ;;  %v870_v10 = vld [vmem:[%s20862_s4 + $0x100] sm:$0xff]  ;;  %v872_v15 = vld [vmem:[%s20862_s4 + $0x110] sm:$0xff]  ;;  %v873_v18 = vld [vmem:[%s20862_s4 + $0x118] sm:$0xff] }
  0x41   : > { %12776 = vmatpush3.bf16.msra.mxu0 %v12775_v2  ;;  %v12839_v2 = vpack.c.bf16 %v851_v63, %v850_v62  ;;  %v890_v20 = vld [vmem:[%s20862_s4 + $0x1a0] sm:$0xff]  ;;  %v875_v31 = vld [vmem:[%s20862_s4 + $0x128] sm:$0xff]  ;;  %v892_v32 = vld [vmem:[%s20862_s4 + $0x1b0] sm:$0xff] }
  0x42   : > { %12778 = vmatprep.subr.bf16.mxu0 %v12777_v4  ;;  %v852_v4 = vld [vmem:[%s20862_s4 + $0x70] sm:$0xff]  ;;  %v874_v30 = vld [vmem:[%s20862_s4 + $0x120] sm:$0xff]  ;;  %v877_v40 = vld [vmem:[%s20862_s4 + $0x138] sm:$0xff] }
  0x43   : > { %12808 = vmatpush3.bf16.msra.mxu1 %v12807_v3  ;;  %v12841_v3 = vpack.c.bf16 %v869_v1, %v868_v0  ;;  %v12843_v6 = vpack.c.bf16 %v853_v5, %v852_v4  ;;  %v876_v39 = vld [vmem:[%s20862_s4 + $0x130] sm:$0xff]  ;;  %v894_v41 = vld [vmem:[%s20862_s4 + $0x1c0] sm:$0xff]  ;;  %v879_v46 = vld [vmem:[%s20862_s4 + $0x148] sm:$0xff] }
  0x44   : > { %12810 = vmatprep.subr.bf16.mxu1 %v12809_v8  ;;  %v887_v8 = vld [vmem:[%s20862_s4 + $0x188] sm:$0xff]  ;;  %v896_v47 = vld [vmem:[%s20862_s4 + $0x1d0] sm:$0xff]  ;;  %v881_v52 = vld [vmem:[%s20862_s4 + $0x158] sm:$0xff] }
  0x45   : > { %12780 = vmatpush3.bf16.msra.mxu0 %v12779_v12  ;;  %v12845_v9 = vpack.c.bf16 %v887_v8, %v886_v7  ;;  %v888_v12 = vld [vmem:[%s20862_s4 + $0x190] sm:$0xff]  ;;  %v882_v57 = vld [vmem:[%s20862_s4 + $0x160] sm:$0xff]  ;;  %v883_v58 = vld [vmem:[%s20862_s4 + $0x168] sm:$0xff] }
  0x46   : > { %12814 = vmatprep.subr.bf16.mxu0 %v12813_v14  ;;  %v889_v14 = vld [vmem:[%s20862_s4 + $0x198] sm:$0xff]  ;;  %v880_v51 = vld [vmem:[%s20862_s4 + $0x150] sm:$0xff]  ;;  %v12871_v59 = vpack.c.bf16 %v883_v58, %v882_v57  ;;  %vm15534_vm1 = vmpackc.low %vm1059_vm0, %vm1059_vm0 }
  0x47   : > { %12812 = vmatpush3.bf16.msra.mxu1 %v12811_v13  ;;  %v12847_v13 = vpack.c.bf16 %v871_v11, %v870_v10  ;;  %v12849_v19 = vpack.c.bf16 %v889_v14, %v888_v12  ;;  %v12867_v53 = vpack.c.bf16 %v881_v52, %v880_v51  ;;  %v884_v63 = vld [vmem:[%s20862_s4 + $0x170] sm:$0xff]  ;;  %v885_v0 = vld [vmem:[%s20862_s4 + $0x178] sm:$0xff] }
  0x48   : > { %753 = vmatmul.mubr.f32.vlgmr.msra.gmra.mrb[4].mxu0 %v15320_v21  ;;  %12846 = vmatprep.subr.bf16.mxu1 %v12845_v9  ;;  %v12875_v1 = vpack.c.bf16 %v885_v0, %v884_v63 }
  0x49   : > { %757 = vmatprep.mubr.f32.mxu0 %v15326_v23  ;;  %12816 = vmatpush3.bf16.msra.mxu0 %v12815_v25  ;;  %v891_v25 = vld [vmem:[%s20862_s4 + $0x1a8] sm:$0xff] }
  0x4a   : > { %828 = vmatmul.mubr.f32.vlgmr.msra.gmra.mrb[4].mxu1 %v15323_v22  ;;  %12818 = vmatprep.subr.bf16.mxu0 %v12817_v28  ;;  %v12851_v28 = vpack.c.bf16 %v873_v18, %v872_v15  ;;  %v12853_v29 = vpack.c.bf16 %v891_v25, %v890_v20 }
  0x4b   : > { %832 = vmatprep.mubr.f32.mxu1 %v15329_v26  ;;  %12848 = vmatpush3.bf16.msra.mxu1 %v12847_v13 }
  0x4c   : > { %758 = vmatmul.mubr.f32.gmra.mrb[6].mxu0 %v15345_v33  ;;  %12850 = vmatprep.subr.bf16.mxu1 %v12849_v19 }
  0x4d   : > { %973 = vmatprep.mubr.f32.mxu0 %v15185_v17  ;;  %12820 = vmatpush3.bf16.msra.mxu0 %v12819_v35  ;;  %v893_v35 = vld [vmem:[%s20862_s4 + $0x1b8] sm:$0xff] }
  0x4e   : > { %833 = vmatmul.mubr.f32.gmra.mrb[6].mxu1 %v15350_v34  ;;  %12822 = vmatprep.subr.bf16.mxu0 %v12821_v36  ;;  %v12855_v36 = vpack.c.bf16 %v875_v31, %v874_v30  ;;  %v12857_v37 = vpack.c.bf16 %v893_v35, %v892_v32 }
  0x4f   : > { %1048 = vmatprep.mubr.f32.mxu1 %v15231_v38  ;;  %v12827_v38 = vpack.c.bf16 %v845_v45, %v844_v44  ;;  %12852 = vmatpush3.bf16.msra.mxu1 %v12851_v28  ;;  %v878_v45 = vld [vmem:[%s20862_s4 + $0x140] sm:$0xff] }
  0x50   : > { %12854 = vmatprep.subr.bf16.mxu1 %v12853_v29  ;;  %v8988_v28 = vld [vmem:[%s20865_s7] ss:$0 sm:$0xff] }
  0x51   : > { %12824 = vmatpush3.bf16.msra.mxu0 %v12823_v42  ;;  %v895_v42 = vld [vmem:[%s20862_s4 + $0x1c8] sm:$0xff] }
  0x52   : > { %12826 = vmatprep.subr.bf16.mxu0 %v12825_v43  ;;  %v12859_v43 = vpack.c.bf16 %v877_v40, %v876_v39  ;;  %v12861_v44 = vpack.c.bf16 %v895_v42, %v894_v41 }
  0x53   : > { %12856 = vmatpush3.bf16.msra.mxu1 %v12855_v36 }
  0x54   : > { %12858 = vmatprep.subr.bf16.mxu1 %v12857_v37 }
  0x55   : > { %12828 = vmatpush3.bf16.msra.mxu0 %v12827_v38  ;;  %v897_v38 = vld [vmem:[%s20862_s4 + $0x1d8] sm:$0xff] }
  0x56   : > { %12830 = vmatprep.subr.bf16.mxu0 %v12829_v49  ;;  %v12863_v49 = vpack.c.bf16 %v879_v46, %v878_v45  ;;  %v12865_v50 = vpack.c.bf16 %v897_v38, %v896_v47 }
  0x57   : > { %12860 = vmatpush3.bf16.msra.mxu1 %v12859_v43 }
  0x58   : > { %12862 = vmatprep.subr.bf16.mxu1 %v12861_v44 }
  0x59   : > { %12832 = vmatpush3.bf16.msra.mxu0 %v12831_v54  ;;  %v898_v54 = vld [vmem:[%s20862_s4 + $0x1e0] sm:$0xff] }
  0x5a   : > { %12834 = vmatprep.subr.bf16.mxu0 %v12833_v55  ;;  %v899_v55 = vld [vmem:[%s20862_s4 + $0x1e8] sm:$0xff] }
  0x5b   : > { %12864 = vmatpush3.bf16.msra.mxu1 %v12863_v49  ;;  %v12869_v56 = vpack.c.bf16 %v899_v55, %v898_v54  ;;  %v8989_v55 = vld [vmem:[%s20866_s8] ss:$0 sm:$0xff] }
  0x5c   : > { %12866 = vmatprep.subr.bf16.mxu1 %v12865_v50 }
  0x5d   : > { %12836 = vmatpush3.bf16.msra.mxu0 %v12835_v60  ;;  %v900_v60 = vld [vmem:[%s20862_s4 + $0x1f0] sm:$0xff] }
  0x5e   : > { %12838 = vmatprep.subr.bf16.mxu0 %v12837_v61  ;;  %v901_v61 = vld [vmem:[%s20862_s4 + $0x1f8] sm:$0xff] }
  0x5f   : > { %12868 = vmatpush3.bf16.msra.mxu1 %v12867_v53  ;;  %v12873_v62 = vpack.c.bf16 %v901_v61, %v900_v60 }
  0x60   : > { %12870 = vmatprep.subr.bf16.mxu1 %v12869_v56 }
  0x61   : > { %12840 = vmatpush3.bf16.msra.mxu0 %v12839_v2 }
  0x62   : > { %12842 = vmatprep.subr.bf16.mxu0 %v12841_v3  ;;  %v8987_v3 = vld [vmem:[%s20864_s6] ss:$0 sm:$0xff] }
  0x63   : > { %12872 = vmatpush3.bf16.msra.mxu1 %v12871_v59 }
  0x64   : > { %12874 = vmatprep.subr.bf16.mxu1 %v12873_v62 }
  0x65   : > { %12844 = vmatpush3.bf16.msra.mxu0 %v12843_v6 }
  0x67   : > { %12876 = vmatpush3.bf16.msra.mxu1 %v12875_v1 }
  0x68   : > { %974 = vmatmul.mubr.f32.vlgmr.msra.gmra.mrb[8].mxu0 %v15320_v21 }
  0x69   : > { %978 = vmatprep.mubr.f32.mxu0 %v15326_v23 }
  0x6a   : > { %1049 = vmatmul.mubr.f32.vlgmr.msra.gmra.mrb[8].mxu1 %v15323_v22 }
  0x6b   : > { %1053 = vmatprep.mubr.f32.mxu1 %v15329_v26 }
  0x6c   : > { %979 = vmatmul.mubr.f32.gmra.mrb[10].mxu0 %v15345_v33 }
  0x6e   : > { %1054 = vmatmul.mubr.f32.gmra.mrb[10].mxu1 %v15350_v34 }
  0xfb   : > { %v10717_v2 = vpop.f32.mrb[0].mxu0 }
  0xfc   : > { %v10718_v4 = vpop.f32.mrb[1].mxu0 }
  0xfd   : > { %v10755_v5 = vpop.f32.mrb[0].mxu1  ;;  %v10719_v6 = vadd.f32 %v10718_v4, %v10717_v2 }
  0xfe   : > { %v10756_v7 = vpop.f32.mrb[1].mxu1 }
  0xff   : > { %v10757_v8 = vadd.f32 %v10756_v7, %v10755_v5  ;;  %v534_v9 = vadd.f32 %v10719_v6, %v8987_v3  ;;  %v10720_v11 = vpop.f32.mrb[2].mxu0 }
 0x100   : > { %v10721_v12 = vpop.f32.mrb[3].mxu0 }
 0x101   : > { %v609_v10 = vadd.f32 %v10757_v8, %v534_v9  ;;  %v10722_v13 = vadd.f32 %v10721_v12, %v10720_v11 }
 0x103   : > { %12577 = vmatprep.mubr.msk.f32.mxu0 %vm1059_vm0, %v609_v10  ;;  %v10758_v14 = vpop.f32.mrb[2].mxu1  ;;  %v539_v18 = vadd.f32 %v10722_v13, %v8987_v3 }
 0x104   : > { %v10759_v15 = vpop.f32.mrb[3].mxu1 }
 0x105   : > { %v10760_v19 = vadd.f32 %v10759_v15, %v10758_v14 }
 0x107   : > { %v614_v20 = vadd.f32 %v10760_v19, %v539_v18 }
 0x11b   : > { %v10793_v25 = vpop.f32.mrb[4].mxu0 }
 0x11c   : > { %v10794_v29 = vpop.f32.mrb[5].mxu0 }
 0x11d   : > { %v10831_v30 = vpop.f32.mrb[4].mxu1  ;;  %v10795_v31 = vadd.f32 %v10794_v29, %v10793_v25  ;;  %v9013_v25 = vld [vmem:[%s20860_s2 + $0x288] sm:$0xff]  ;;  %v8996_v29 = vld [vmem:[%s20860_s2 + $0x200] sm:$0xff] }
 0x11e   : > { %v10832_v32 = vpop.f32.mrb[5].mxu1 }
 0x11f   : > { %v10833_v35 = vadd.f32 %v10832_v32, %v10831_v30  ;;  %v755_v36 = vadd.f32 %v10795_v31, %v8988_v28  ;;  %v10796_v37 = vpop.f32.mrb[6].mxu0  ;;  %v8997_v30 = vld [vmem:[%s20860_s2 + $0x208] sm:$0xff]  ;;  %v9044_v32 = vld [vmem:[%s20860_s2 + $0x380] sm:$0xff] }
 0x120   : > { %v10797_v39 = vpop.f32.mrb[7].mxu0  ;;  %v12889_v31 = vpack.c.bf16 %v8997_v30, %v8996_v29  ;;  %v9063_v29 = vld [vmem:[%s20861_s3 + $0x208] sm:$0xff] }
 0x121   : > { %v10834_v40 = vpop.f32.mrb[6].mxu1  ;;  %v830_v41 = vadd.f32 %v10833_v35, %v755_v36  ;;  %v10798_v42 = vadd.f32 %v10797_v39, %v10796_v37  ;;  %v9045_v35 = vld [vmem:[%s20860_s2 + $0x388] sm:$0xff]  ;;  %v9014_v37 = vld [vmem:[%s20860_s2 + $0x290] sm:$0xff]  ;;  %v9015_v39 = vld [vmem:[%s20860_s2 + $0x298] sm:$0xff] }
 0x122   : > { %v10835_v43 = vpop.f32.mrb[7].mxu1  ;;  %v12919_v36 = vpack.c.bf16 %v9045_v35, %v9044_v32  ;;  %v9080_v32 = vld [vmem:[%s20861_s3 + $0x290] sm:$0xff]  ;;  %v9081_v35 = vld [vmem:[%s20861_s3 + $0x298] sm:$0xff] }
 0x123   : > { %v10836_v44 = vadd.f32 %v10835_v43, %v10834_v40  ;;  %v760_v45 = vadd.f32 %v10798_v42, %v8988_v28  ;;  %v12891_v40 = vpack.c.bf16 %v9015_v39, %v9014_v37  ;;  %v8999_v42 = vld [vmem:[%s20860_s2 + $0x218] sm:$0xff]  ;;  %v9064_v37 = vld [vmem:[%s20861_s3 + $0x210] sm:$0xff] }
 0x125   : > { %v835_v46 = vadd.f32 %v10836_v44, %v760_v45  ;;  %v9016_v44 = vld [vmem:[%s20860_s2 + $0x2a0] sm:$0xff]  ;;  %v9017_v45 = vld [vmem:[%s20860_s2 + $0x2a8] sm:$0xff] }
 0x127   : > { %v12877_v38 = vpack.c.bf16 %v835_v46, %v830_v41  ;;  %v8998_v41 = vld [vmem:[%s20860_s2 + $0x210] sm:$0xff]  ;;  %v12895_v46 = vpack.c.bf16 %v9017_v45, %v9016_v44  ;;  %v9085_v45 = vld [vmem:[%s20861_s3 + $0x2b8] sm:$0xff] }
 0x128   : > { %v12893_v43 = vpack.c.bf16 %v8999_v42, %v8998_v41  ;;  %v9066_v42 = vld [vmem:[%s20861_s3 + $0x220] sm:$0xff]  ;;  %v9084_v44 = vld [vmem:[%s20861_s3 + $0x2b0] sm:$0xff] }
 0x129   : > { %12879 = vmatprep.subr.msk.bf16.mxu0 %vm15534_vm1, %v12877_v38 }
 0x12a   : > { %12882 = vmatpush3.bf16.xpose.msk.msra.mxu0 %vm15534_vm1, %v12877_v38  ;;  %v9000_v38 = vld [vmem:[%s20860_s2 + $0x220] sm:$0xff] }
 0x131   : > { %12578 = vmatmul.mubr.msk.f32.vlgmr.msra.gmra.mrb[12].mxu0 %vm1059_vm0, %v614_v20  ;;  %v9012_v20 = vld [vmem:[%s20860_s2 + $0x280] sm:$0xff] }
 0x132   : > { %1422 = vmatprep.mubr.f32.mxu0 %v15049_v16  ;;  %v12887_v28 = vpack.c.bf16 %v9013_v25, %v9012_v20  ;;  %v9078_v20 = vld [vmem:[%s20861_s3 + $0x280] sm:$0xff]  ;;  %v9079_v25 = vld [vmem:[%s20861_s3 + $0x288] sm:$0xff] }
 0x133   : > { %v12951_v30 = vpack.c.bf16 %v9079_v25, %v9078_v20  ;;  %v9030_v25 = vld [vmem:[%s20860_s2 + $0x310] sm:$0xff] }
 0x134   : > { %12888 = vmatprep.subr.bf16.mxu0 %v12887_v28  ;;  %v9062_v28 = vld [vmem:[%s20861_s3 + $0x200] sm:$0xff] }
 0x135   : > { %12890 = vmatpush3.bf16.msra.mxu0 %v12889_v31  ;;  %v12953_v31 = vpack.c.bf16 %v9063_v29, %v9062_v28  ;;  %v9031_v28 = vld [vmem:[%s20860_s2 + $0x318] sm:$0xff]  ;;  %v9048_v29 = vld [vmem:[%s20860_s2 + $0x3a0] sm:$0xff] }
 0x136   : > { %12892 = vmatprep.subr.bf16.mxu0 %v12891_v40  ;;  %v9082_v40 = vld [vmem:[%s20861_s3 + $0x2a0] sm:$0xff] }
 0x139   : > { %12894 = vmatpush3.bf16.msra.mxu0 %v12893_v43 }
 0x13a   : > { %12896 = vmatprep.subr.bf16.mxu0 %v12895_v46  ;;  %v12963_v46 = vpack.c.bf16 %v9085_v45, %v9084_v44  ;;  %v9036_v45 = vld [vmem:[%s20860_s2 + $0x340] sm:$0xff] }
 0x13b   : > { %v10869_v49 = vpop.f32.mrb[8].mxu0 }
 0x13c   : > { %v10870_v50 = vpop.f32.mrb[9].mxu0 }
 0x13d   : > { %v10871_v51 = vadd.f32 %v10870_v50, %v10869_v49  ;;  %v10907_v57 = vpop.f32.mrb[8].mxu1  ;;  %v9001_v49 = vld [vmem:[%s20860_s2 + $0x228] sm:$0xff] }
 0x13e   : > { %v10908_v58 = vpop.f32.mrb[9].mxu1  ;;  %v12897_v50 = vpack.c.bf16 %v9001_v49, %v9000_v38  ;;  %v9068_v38 = vld [vmem:[%s20861_s3 + $0x230] sm:$0xff]  ;;  %v9069_v49 = vld [vmem:[%s20861_s3 + $0x238] sm:$0xff] }
 0x13f   : > { %v10872_v52 = vpop.f32.mrb[10].mxu0  ;;  %v976_v56 = vadd.f32 %v10871_v51, %v8989_v55  ;;  %v10909_v59 = vadd.f32 %v10908_v58, %v10907_v57  ;;  %v9018_v51 = vld [vmem:[%s20860_s2 + $0x2b0] sm:$0xff]  ;;  %v9020_v57 = vld [vmem:[%s20860_s2 + $0x2c0] sm:$0xff]  ;;  %v9021_v58 = vld [vmem:[%s20860_s2 + $0x2c8] sm:$0xff] }
 0x140   : > { %v10873_v53 = vpop.f32.mrb[11].mxu0  ;;  %12898 = vmatpush3.bf16.msra.mxu0 %v12897_v50  ;;  %v12965_v50 = vpack.c.bf16 %v9069_v49, %v9068_v38  ;;  %v9054_v38 = vld [vmem:[%s20860_s2 + $0x3d0] sm:$0xff]  ;;  %v9055_v49 = vld [vmem:[%s20860_s2 + $0x3d8] sm:$0xff] }
 0x141   : > { %v10874_v54 = vadd.f32 %v10873_v53, %v10872_v52  ;;  %v1051_v61 = vadd.f32 %v10909_v59, %v976_v56  ;;  %v10910_v62 = vpop.f32.mrb[10].mxu1  ;;  %v9019_v52 = vld [vmem:[%s20860_s2 + $0x2b8] sm:$0xff]  ;;  %v12903_v59 = vpack.c.bf16 %v9021_v58, %v9020_v57  ;;  %v9088_v57 = vld [vmem:[%s20861_s3 + $0x2d0] sm:$0xff] }
 0x142   : > { %v10911_v63 = vpop.f32.mrb[11].mxu1  ;;  %v12899_v53 = vpack.c.bf16 %v9019_v52, %v9018_v51  ;;  %v9086_v51 = vld [vmem:[%s20861_s3 + $0x2c0] sm:$0xff]  ;;  %v9087_v52 = vld [vmem:[%s20861_s3 + $0x2c8] sm:$0xff]  ;;  %v9089_v58 = vld [vmem:[%s20861_s3 + $0x2d8] sm:$0xff] }
 0x143   : > { %v981_v60 = vadd.f32 %v10874_v54, %v8989_v55  ;;  %v10912_v0 = vadd.f32 %v10911_v63, %v10910_v62  ;;  %v9002_v54 = vld [vmem:[%s20860_s2 + $0x230] sm:$0xff]  ;;  %v9003_v55 = vld [vmem:[%s20860_s2 + $0x238] sm:$0xff] }
 0x144   : > { %v12901_v56 = vpack.c.bf16 %v9003_v55, %v9002_v54  ;;  %12900 = vmatprep.subr.bf16.mxu0 %v12899_v53  ;;  %v9022_v63 = vld [vmem:[%s20860_s2 + $0x2d0] sm:$0xff]  ;;  %v12967_v53 = vpack.c.bf16 %v9087_v52, %v9086_v51  ;;  %v9070_v54 = vld [vmem:[%s20861_s3 + $0x240] sm:$0xff]  ;;  %v9071_v55 = vld [vmem:[%s20861_s3 + $0x248] sm:$0xff]  ;;  %v12939_v51 = vpack.c.bf16 %v9055_v49, %v9054_v38 }
 0x145   : > { %v1056_v16 = vadd.f32 %v10912_v0, %v981_v60  ;;  %v9004_v60 = vld [vmem:[%s20860_s2 + $0x240] sm:$0xff]  ;;  %v9023_v0 = vld [vmem:[%s20860_s2 + $0x2d8] sm:$0xff]  ;;  %v9038_v52 = vld [vmem:[%s20860_s2 + $0x350] sm:$0xff] }
 0x146   : > { %12902 = vmatpush3.bf16.msra.mxu0 %v12901_v56  ;;  %v12969_v56 = vpack.c.bf16 %v9071_v55, %v9070_v54  ;;  %v9056_v54 = vld [vmem:[%s20860_s2 + $0x3e0] sm:$0xff]  ;;  %v9057_v55 = vld [vmem:[%s20860_s2 + $0x3e8] sm:$0xff] }
 0x147   : > { %v12883_v1 = vpack.c.bf16 %v1056_v16, %v1051_v61  ;;  %v9005_v61 = vld [vmem:[%s20860_s2 + $0x248] sm:$0xff]  ;;  %12904 = vmatprep.subr.bf16.mxu0 %v12903_v59  ;;  %v12907_v16 = vpack.c.bf16 %v9023_v0, %v9022_v63  ;;  %v12971_v59 = vpack.c.bf16 %v9089_v58, %v9088_v57  ;;  %v9090_v63 = vld [vmem:[%s20861_s3 + $0x2e0] sm:$0xff]  ;;  %v12943_v57 = vpack.c.bf16 %v9057_v55, %v9056_v54 }
 0x148   : > { %v12905_v62 = vpack.c.bf16 %v9005_v61, %v9004_v60  ;;  %v9072_v60 = vld [vmem:[%s20861_s3 + $0x250] sm:$0xff]  ;;  %v9073_v61 = vld [vmem:[%s20861_s3 + $0x258] sm:$0xff]  ;;  %v9091_v0 = vld [vmem:[%s20861_s3 + $0x2e8] sm:$0xff] }
 0x149   : > { %12884 = vmatprep.subr.bf16.mxu1 %v12883_v1  ;;  %v9040_v58 = vld [vmem:[%s20860_s2 + $0x360] sm:$0xff] }
 0x14a   : > { %12886 = vmatpush3.bf16.msra.mxu1 %v12883_v1  ;;  %12906 = vmatpush3.bf16.msra.mxu0 %v12905_v62  ;;  %v9006_v1 = vld [vmem:[%s20860_s2 + $0x250] sm:$0xff]  ;;  %v12973_v62 = vpack.c.bf16 %v9073_v61, %v9072_v60  ;;  %v9059_v61 = vld [vmem:[%s20860_s2 + $0x3f8] sm:$0xff] }
 0x14b   : > { %12920 = vmatprep.subr.bf16.mxu1 %v12919_v36  ;;  %12908 = vmatprep.subr.bf16.mxu0 %v12907_v16  ;;  %v12955_v36 = vpack.c.bf16 %v9081_v35, %v9080_v32  ;;  %v12975_v16 = vpack.c.bf16 %v9091_v0, %v9090_v63  ;;  %v9032_v35 = vld [vmem:[%s20860_s2 + $0x320] sm:$0xff]  ;;  %v9058_v60 = vld [vmem:[%s20860_s2 + $0x3f0] sm:$0xff] }
 0x14c   : > { %v12947_v63 = vpack.c.bf16 %v9059_v61, %v9058_v60  ;;  %v9042_v0 = vld [vmem:[%s20860_s2 + $0x370] sm:$0xff]  ;;  %v9145_v60 = vld [vmem:[%s20862_s4 + $0x288] sm:$0xff] }
 0x204   : > { %v12579_v2 = vpop.f32.mrb[12].mxu0 }
 0x205   : > { %v1138_v3 = vpop.f32.mrb[13].mxu0  ;;  %v1148_v5 = vmul.f32 0.125, %v12579_v2  ;;  %v9007_v2 = vld [vmem:[%s20860_s2 + $0x258] sm:$0xff] }
 0x206   : > { %v1147_v4 = vmul.f32 0.125, %v1138_v3  ;;  %v12909_v3 = vpack.c.bf16 %v9007_v2, %v9006_v1  ;;  %v9074_v1 = vld [vmem:[%s20861_s3 + $0x260] sm:$0xff]  ;;  %v9075_v2 = vld [vmem:[%s20861_s3 + $0x268] sm:$0xff] }
 0x207   : > { %v1153_v7 = vsel %vm1149_vm2, %v1148_v5, -inf }
 0x208   : > { %v1150_v6 = vsel %vm1149_vm2, %v1147_v4, -inf  ;;  %12910 = vmatpush3.bf16.msra.mxu0 %v12909_v3  ;;  %v12977_v3 = vpack.c.bf16 %v9075_v2, %v9074_v1  ;;  %v9110_v1 = vld [vmem:[%s20861_s3 + $0x380] sm:$0xff]  ;;  %v9111_v2 = vld [vmem:[%s20861_s3 + $0x388] sm:$0xff] }
 0x209   : > { %1151 = vmax.xlane.f32.xlu0 %v1150_v6 }
 0x20d   : > { %1154 = vmax.xlane.f32.xlu0 %v1153_v7  ;;  %v9008_v7 = vld [vmem:[%s20860_s2 + $0x260] sm:$0xff] }
 0x296   : > { %v1152_v8 = vpop.xlane.xlu0 %1151 }
 0x297   : > { %v1156_v9 = vsub.f32 %v1147_v4, %v1152_v8  ;;  %v9024_v4 = vld [vmem:[%s20860_s2 + $0x2e0] sm:$0xff]  ;;  %v9009_v8 = vld [vmem:[%s20860_s2 + $0x268] sm:$0xff] }
 0x299   : > { %v1158_v10 = vmul.f32 1.442695, %v1156_v9  ;;  %v12913_v9 = vpack.c.bf16 %v9009_v8, %v9008_v7  ;;  %v9076_v7 = vld [vmem:[%s20861_s3 + $0x270] sm:$0xff]  ;;  %v9077_v8 = vld [vmem:[%s20861_s3 + $0x278] sm:$0xff] }
 0x29a   : > { %v1155_v11 = vpop.xlane.xlu0 %1154 }
 0x29b   : > { %14622 = vpow2.f32 %v1158_v10  ;;  %v1157_v12 = vsub.f32 %v1148_v5, %v1155_v11  ;;  %v9025_v5 = vld [vmem:[%s20860_s2 + $0x2e8] sm:$0xff]  ;;  %v9026_v10 = vld [vmem:[%s20860_s2 + $0x2f0] sm:$0xff]  ;;  %v9027_v11 = vld [vmem:[%s20860_s2 + $0x2f8] sm:$0xff] }
 0x29c   : > { %v12911_v6 = vpack.c.bf16 %v9025_v5, %v9024_v4  ;;  %v9092_v4 = vld [vmem:[%s20861_s3 + $0x2f0] sm:$0xff]  ;;  %v9093_v5 = vld [vmem:[%s20861_s3 + $0x2f8] sm:$0xff] }
 0x29d   : > { %v1160_v13 = vmul.f32 1.442695, %v1157_v12  ;;  %v12915_v12 = vpack.c.bf16 %v9027_v11, %v9026_v10 }
 0x29e   : > { %12912 = vmatprep.subr.bf16.mxu0 %v12911_v6  ;;  %v12979_v6 = vpack.c.bf16 %v9093_v5, %v9092_v4  ;;  %v12983_v4 = vpack.c.bf16 %v9111_v2, %v9110_v1  ;;  %v9094_v5 = vld [vmem:[%s20861_s3 + $0x300] sm:$0xff]  ;;  %v9131_v1 = vld [vmem:[%s20862_s4 + $0x218] sm:$0xff] }
 0x29f   : > { %14624 = vpow2.f32 %v1160_v13  ;;  %12914 = vmatpush3.bf16.msra.mxu0 %v12913_v9  ;;  %v9010_v13 = vld [vmem:[%s20860_s2 + $0x270] sm:$0xff]  ;;  %v12981_v9 = vpack.c.bf16 %v9077_v8, %v9076_v7  ;;  %v9113_v8 = vld [vmem:[%s20861_s3 + $0x398] sm:$0xff]  ;;  %v9148_v2 = vld [vmem:[%s20862_s4 + $0x2a0] sm:$0xff] }
 0x2a0   : > { %12916 = vmatprep.subr.bf16.mxu0 %v12915_v12  ;;  %v9112_v7 = vld [vmem:[%s20861_s3 + $0x390] sm:$0xff] }
 0x2a5   : > { %v15549_v14 = vpop.eup %14622 }
 0x2a6   : > { %v1162_v15 = vsel %vm1149_vm2, %v15549_v14, 0.0 }
 0x2a7   : > { %1163 = vadd.xlane.f32.xlu1 %v1162_v15  ;;  %v9011_v15 = vld [vmem:[%s20860_s2 + $0x278] sm:$0xff] }
 0x2a9   : > { %v15553_v18 = vpop.eup %14624 }
 0x2aa   : > { %v1165_v19 = vsel %vm1149_vm2, %v15553_v18, 0.0 }
 0x2ab   : > { %1166 = vadd.xlane.f32.xlu1 %v1165_v19  ;;  %v12917_v19 = vpack.c.bf16 %v9011_v15, %v9010_v13  ;;  %v9028_v15 = vld [vmem:[%s20860_s2 + $0x300] sm:$0xff] }
 0x2ad   : > { %12918 = vmatpush3.bf16.msra.mxu0 %v12917_v19 }
 0x2ae   : > { %12952 = vmatprep.subr.bf16.mxu0 %v12951_v30  ;;  %v9049_v30 = vld [vmem:[%s20860_s2 + $0x3a8] sm:$0xff] }
 0x2af   : > { %v12927_v32 = vpack.c.bf16 %v9049_v30, %v9048_v29  ;;  %v14690_v30 = vld [vmem:[%s15167_s25 + $0x18] sm:$0xff] }
 0x2b0   : > { %1423 = vmatmul.mubr.f32.vlgmr.msra.gmra.mrb[14].mxu0 %v15117_v48  ;;  %v9065_v48 = vld [vmem:[%s20861_s3 + $0x218] sm:$0xff] }
 0x2b1   : > { %1427 = vmatprep.mubr.f32.mxu0 %v15203_v24  ;;  %12954 = vmatpush3.bf16.msra.mxu0 %v12953_v31  ;;  %v12957_v39 = vpack.c.bf16 %v9065_v48, %v9064_v37  ;;  %v9083_v24 = vld [vmem:[%s20861_s3 + $0x2a8] sm:$0xff]  ;;  %v14686_v31 = vld [vmem:[%s15031_s29 + $0x18] sm:$0xff]  ;;  %v9050_v37 = vld [vmem:[%s20860_s2 + $0x3b0] sm:$0xff] }
 0x2b2   : > { %12956 = vmatprep.subr.bf16.mxu0 %v12955_v36  ;;  %v12959_v41 = vpack.c.bf16 %v9083_v24, %v9082_v40  ;;  %v9033_v36 = vld [vmem:[%s20860_s2 + $0x328] sm:$0xff]  ;;  %v9051_v48 = vld [vmem:[%s20860_s2 + $0x3b8] sm:$0xff]  ;;  %v9034_v24 = vld [vmem:[%s20860_s2 + $0x330] sm:$0xff] }
 0x2b3   : > { %v12931_v40 = vpack.c.bf16 %v9051_v48, %v9050_v37 }
 0x2b4   : > { %1428 = vmatmul.mubr.f32.gmra.mrb[16].mxu0 %v15210_v27  ;;  %v9067_v27 = vld [vmem:[%s20861_s3 + $0x228] sm:$0xff] }
 0x2b5   : > { %1645 = vmatprep.mubr.f32.mxu0 %v15185_v17  ;;  %12958 = vmatpush3.bf16.msra.mxu0 %v12957_v39  ;;  %v12961_v43 = vpack.c.bf16 %v9067_v27, %v9066_v42  ;;  %v12929_v39 = vpack.c.bf16 %v9033_v36, %v9032_v35  ;;  %v9052_v42 = vld [vmem:[%s20860_s2 + $0x3c0] sm:$0xff]  ;;  %v9053_v27 = vld [vmem:[%s20860_s2 + $0x3c8] sm:$0xff] }
 0x2b6   : > { %12960 = vmatprep.subr.bf16.mxu0 %v12959_v41  ;;  %v9035_v41 = vld [vmem:[%s20860_s2 + $0x338] sm:$0xff]  ;;  %v12935_v44 = vpack.c.bf16 %v9053_v27, %v9052_v42  ;;  %v9118_v35 = vld [vmem:[%s20861_s3 + $0x3c0] sm:$0xff]  ;;  %v9119_v36 = vld [vmem:[%s20861_s3 + $0x3c8] sm:$0xff] }
 0x2b7   : > { %v12999_v48 = vpack.c.bf16 %v9119_v36, %v9118_v35  ;;  %v9140_v36 = vld [vmem:[%s20862_s4 + $0x260] sm:$0xff] }
 0x2b9   : > { %12962 = vmatpush3.bf16.msra.mxu0 %v12961_v43  ;;  %v12933_v43 = vpack.c.bf16 %v9035_v41, %v9034_v24  ;;  %v9120_v24 = vld [vmem:[%s20861_s3 + $0x3d0] sm:$0xff]  ;;  %v9121_v41 = vld [vmem:[%s20861_s3 + $0x3d8] sm:$0xff] }
 0x2ba   : > { %12964 = vmatprep.subr.bf16.mxu0 %v12963_v46  ;;  %v9037_v46 = vld [vmem:[%s20860_s2 + $0x348] sm:$0xff]  ;;  %v13003_v27 = vpack.c.bf16 %v9121_v41, %v9120_v24  ;;  %v9142_v41 = vld [vmem:[%s20862_s4 + $0x270] sm:$0xff] }
 0x2bd   : > { %12966 = vmatpush3.bf16.msra.mxu0 %v12965_v50  ;;  %v12937_v50 = vpack.c.bf16 %v9037_v46, %v9036_v45  ;;  %v9122_v45 = vld [vmem:[%s20861_s3 + $0x3e0] sm:$0xff]  ;;  %v9123_v46 = vld [vmem:[%s20861_s3 + $0x3e8] sm:$0xff] }
 0x2be   : > { %12968 = vmatprep.subr.bf16.mxu0 %v12967_v53  ;;  %v9039_v53 = vld [vmem:[%s20860_s2 + $0x358] sm:$0xff]  ;;  %v13007_v49 = vpack.c.bf16 %v9123_v46, %v9122_v45  ;;  %v14691_v46 = vld [vmem:[%s15167_s25] sm:$0xff] }
 0x2c1   : > { %12970 = vmatpush3.bf16.msra.mxu0 %v12969_v56  ;;  %v12941_v56 = vpack.c.bf16 %v9039_v53, %v9038_v52  ;;  %v9124_v52 = vld [vmem:[%s20861_s3 + $0x3f0] sm:$0xff]  ;;  %v9125_v53 = vld [vmem:[%s20861_s3 + $0x3f8] sm:$0xff] }
 0x2c2   : > { %12972 = vmatprep.subr.bf16.mxu0 %v12971_v59  ;;  %v9041_v59 = vld [vmem:[%s20860_s2 + $0x368] sm:$0xff]  ;;  %v13011_v55 = vpack.c.bf16 %v9125_v53, %v9124_v52  ;;  %v9160_v53 = vld [vmem:[%s20862_s4 + $0x300] sm:$0xff] }
 0x2c5   : > { %12974 = vmatpush3.bf16.msra.mxu0 %v12973_v62  ;;  %v12945_v62 = vpack.c.bf16 %v9041_v59, %v9040_v58  ;;  %v9144_v59 = vld [vmem:[%s20862_s4 + $0x280] sm:$0xff] }
 0x2c6   : > { %12976 = vmatprep.subr.bf16.mxu0 %v12975_v16  ;;  %v9043_v16 = vld [vmem:[%s20860_s2 + $0x378] sm:$0xff]  ;;  %v13015_v61 = vpack.c.bf16 %v9145_v60, %v9144_v59  ;;  %v9162_v59 = vld [vmem:[%s20862_s4 + $0x310] sm:$0xff] }
 0x2c7   : > { %v9163_v60 = vld [vmem:[%s20862_s4 + $0x318] sm:$0xff] }
 0x2c9   : > { %12978 = vmatpush3.bf16.msra.mxu0 %v12977_v3  ;;  %v12949_v3 = vpack.c.bf16 %v9043_v16, %v9042_v0  ;;  %v9130_v0 = vld [vmem:[%s20862_s4 + $0x210] sm:$0xff] }
 0x2ca   : > { %12980 = vmatprep.subr.bf16.mxu0 %v12979_v6  ;;  %v9095_v6 = vld [vmem:[%s20861_s3 + $0x308] sm:$0xff] }
 0x2cd   : > { %12982 = vmatpush3.bf16.msra.mxu0 %v12981_v9  ;;  %v12985_v9 = vpack.c.bf16 %v9095_v6, %v9094_v5  ;;  %v9132_v6 = vld [vmem:[%s20862_s4 + $0x220] sm:$0xff] }
 0x2ce   : > { %13016 = vmatprep.subr.bf16.mxu0 %v13015_v61 }
 0x2d0   : > { %1646 = vmatmul.mubr.f32.vlgmr.msra.gmra.mrb[18].mxu0 %v15320_v21  ;;  %v9029_v21 = vld [vmem:[%s20860_s2 + $0x308] sm:$0xff] }
 0x2d1   : > { %1650 = vmatprep.mubr.f32.mxu0 %v15326_v23  ;;  %v9047_v23 = vld [vmem:[%s20860_s2 + $0x398] sm:$0xff] }
 0x2d4   : > { %1651 = vmatmul.mubr.f32.gmra.mrb[20].mxu0 %v15345_v33 }
 0x2d5   : > { %1868 = vmatprep.mubr.f32.mxu0 %v15185_v17  ;;  %v9046_v17 = vld [vmem:[%s20860_s2 + $0x390] sm:$0xff] }
 0x2d6   : > { %v12923_v20 = vpack.c.bf16 %v9047_v23, %v9046_v17  ;;  %v14688_v23 = vld [vmem:[%s15031_s29 + $0x38] sm:$0xff] }
 0x334   : > { %v1164_v10 = vpop.xlane.xlu1 %1163 }
 0x335   : > { %14626 = vrcp.f32 %v1164_v10  ;;  %v12987_v10 = vpack.c.bf16 %v9113_v8, %v9112_v7  ;;  %v9133_v7 = vld [vmem:[%s20862_s4 + $0x228] sm:$0xff]  ;;  %v9150_v8 = vld [vmem:[%s20862_s4 + $0x2b0] sm:$0xff] }
 0x338   : > { %v1167_v11 = vpop.xlane.xlu1 %1166 }
 0x339   : > { %14628 = vrcp.f32 %v1167_v11  ;;  %v9096_v11 = vld [vmem:[%s20861_s3 + $0x310] sm:$0xff] }
 0x33f   : > { %v14627_v12 = vpop.eup %14626 }
 0x340   : > { %v1170_v13 = vmul.f32 %v14627_v12, %v15549_v14  ;;  %v12921_v14 = vpack.c.bf16 %v9029_v21, %v9028_v15  ;;  %v9097_v12 = vld [vmem:[%s20861_s3 + $0x318] sm:$0xff]  ;;  %v9115_v15 = vld [vmem:[%s20861_s3 + $0x3a8] sm:$0xff]  ;;  %v14687_v21 = vld [vmem:[%s15031_s29 + $0x10] sm:$0xff] }
 0x341   : > { %v12989_v17 = vpack.c.bf16 %v9097_v12, %v9096_v11  ;;  %v9134_v12 = vld [vmem:[%s20862_s4 + $0x230] sm:$0xff] }
 0x342   : > { %12584 = vmatprep.mubr.msk.f32.mxu1 %vm1149_vm2, %v1170_v13  ;;  %v9114_v13 = vld [vmem:[%s20861_s3 + $0x3a0] sm:$0xff] }
 0x343   : > { %v14629_v33 = vpop.eup %14628 }
 0x344   : > { %v1171_v19 = vmul.f32 %v14629_v33, %v15553_v18  ;;  %v12925_v18 = vpack.c.bf16 %v9031_v28, %v9030_v25  ;;  %v12991_v33 = vpack.c.bf16 %v9115_v15, %v9114_v13  ;;  %v9117_v25 = vld [vmem:[%s20861_s3 + $0x3b8] sm:$0xff]  ;;  %v14689_v28 = vld [vmem:[%s15031_s29 + $0x30] sm:$0xff]  ;;  %v9152_v15 = vld [vmem:[%s20862_s4 + $0x2c0] sm:$0xff] }
 0x345   : > { %v9135_v13 = vld [vmem:[%s20862_s4 + $0x238] sm:$0xff] }
 0x346   : > { %12585 = vmatmul.mubr.msk.f32.vlgmr.msra.gmra.mrb[12].mxu1 %vm1149_vm2, %v1171_v19  ;;  %v9099_v19 = vld [vmem:[%s20861_s3 + $0x328] sm:$0xff] }
 0x347   : > { %12922 = vmatpush3.bf16.msra.mxu1 %v12921_v14  ;;  %1497 = vmatprep.mubr.f32.mxu1 %v14686_v31  ;;  %v9098_v14 = vld [vmem:[%s20861_s3 + $0x320] sm:$0xff]  ;;  %v9100_v31 = vld [vmem:[%s20861_s3 + $0x330] sm:$0xff] }
 0x348   : > { %12924 = vmatprep.subr.bf16.mxu1 %v12923_v20  ;;  %v9116_v20 = vld [vmem:[%s20861_s3 + $0x3b0] sm:$0xff]  ;;  %v12993_v29 = vpack.c.bf16 %v9099_v19, %v9098_v14  ;;  %v9137_v14 = vld [vmem:[%s20862_s4 + $0x248] sm:$0xff] }
 0x349   : > { %v9154_v19 = vld [vmem:[%s20862_s4 + $0x2d0] sm:$0xff] }
 0x34b   : > { %12926 = vmatpush3.bf16.msra.mxu1 %v12925_v18  ;;  %v12995_v18 = vpack.c.bf16 %v9117_v25, %v9116_v20  ;;  %v9155_v20 = vld [vmem:[%s20862_s4 + $0x2d8] sm:$0xff] }
 0x34c   : > { %12928 = vmatprep.subr.bf16.mxu1 %v12927_v32  ;;  %v9101_v32 = vld [vmem:[%s20861_s3 + $0x338] sm:$0xff] }
 0x34d   : > { %v12997_v37 = vpack.c.bf16 %v9101_v32, %v9100_v31  ;;  %v9157_v31 = vld [vmem:[%s20862_s4 + $0x2e8] sm:$0xff] }
 0x34f   : > { %12930 = vmatpush3.bf16.msra.mxu1 %v12929_v39  ;;  %v9102_v39 = vld [vmem:[%s20861_s3 + $0x340] sm:$0xff] }
 0x350   : > { %12932 = vmatprep.subr.bf16.mxu1 %v12931_v40  ;;  %v9103_v40 = vld [vmem:[%s20861_s3 + $0x348] sm:$0xff] }
 0x351   : > { %v13001_v42 = vpack.c.bf16 %v9103_v40, %v9102_v39  ;;  %v9159_v39 = vld [vmem:[%s20862_s4 + $0x2f8] sm:$0xff] }
 0x353   : > { %12934 = vmatpush3.bf16.msra.mxu1 %v12933_v43  ;;  %v9104_v43 = vld [vmem:[%s20861_s3 + $0x350] sm:$0xff] }
 0x354   : > { %12936 = vmatprep.subr.bf16.mxu1 %v12935_v44  ;;  %v9105_v44 = vld [vmem:[%s20861_s3 + $0x358] sm:$0xff] }
 0x355   : > { %v13005_v38 = vpack.c.bf16 %v9105_v44, %v9104_v43 }
 0x357   : > { %12938 = vmatpush3.bf16.msra.mxu1 %v12937_v50  ;;  %v9106_v50 = vld [vmem:[%s20861_s3 + $0x360] sm:$0xff] }
 0x358   : > { %12940 = vmatprep.subr.bf16.mxu1 %v12939_v51  ;;  %v9107_v51 = vld [vmem:[%s20861_s3 + $0x368] sm:$0xff] }
 0x359   : > { %v13009_v54 = vpack.c.bf16 %v9107_v51, %v9106_v50  ;;  %v9176_v50 = vld [vmem:[%s20862_s4 + $0x380] sm:$0xff]  ;;  %v9177_v51 = vld [vmem:[%s20862_s4 + $0x388] sm:$0xff] }
 0x35a   : > { %v13047_v52 = vpack.c.bf16 %v9177_v51, %v9176_v50  ;;  %v9061_v50 = vld [vmem:[%s20864_s6 + $0x1] ss:$0 sm:$0xff] }
 0x35b   : > { %12942 = vmatpush3.bf16.msra.mxu1 %v12941_v56  ;;  %v9108_v56 = vld [vmem:[%s20861_s3 + $0x370] sm:$0xff] }
 0x35c   : > { %12944 = vmatprep.subr.bf16.mxu1 %v12943_v57  ;;  %v9109_v57 = vld [vmem:[%s20861_s3 + $0x378] sm:$0xff] }
 0x35d   : > { %v13013_v58 = vpack.c.bf16 %v9109_v57, %v9108_v56 }
 0x35f   : > { %12946 = vmatpush3.bf16.msra.mxu1 %v12945_v62  ;;  %v9128_v62 = vld [vmem:[%s20862_s4 + $0x200] sm:$0xff] }
 0x360   : > { %12948 = vmatprep.subr.bf16.mxu1 %v12947_v63  ;;  %v9147_v63 = vld [vmem:[%s20862_s4 + $0x298] sm:$0xff] }
 0x363   : > { %12950 = vmatpush3.bf16.msra.mxu1 %v12949_v3  ;;  %v9149_v3 = vld [vmem:[%s20862_s4 + $0x2a8] sm:$0xff] }
 0x364   : > { %12984 = vmatprep.subr.bf16.mxu1 %v12983_v4  ;;  %v13021_v4 = vpack.c.bf16 %v9131_v1, %v9130_v0  ;;  %v13023_v5 = vpack.c.bf16 %v9149_v3, %v9148_v2  ;;  %v9165_v1 = vld [vmem:[%s20862_s4 + $0x328] sm:$0xff]  ;;  %v9182_v2 = vld [vmem:[%s20862_s4 + $0x3b0] sm:$0xff]  ;;  %v9183_v3 = vld [vmem:[%s20862_s4 + $0x3b8] sm:$0xff] }
 0x366   : > { %1498 = vmatmul.mubr.f32.vlgmr.msra.gmra.mrb[14].mxu1 %v14687_v21  ;;  %v9153_v21 = vld [vmem:[%s20862_s4 + $0x2c8] sm:$0xff] }
 0x367   : > { %12986 = vmatpush3.bf16.msra.mxu1 %v12985_v9  ;;  %1502 = vmatprep.mubr.f32.mxu1 %v14688_v23  ;;  %v9151_v9 = vld [vmem:[%s20862_s4 + $0x2b8] sm:$0xff]  ;;  %v13031_v23 = vpack.c.bf16 %v9153_v21, %v9152_v15  ;;  %v9186_v15 = vld [vmem:[%s20862_s4 + $0x3d0] sm:$0xff] }
 0x368   : > { %12988 = vmatprep.subr.bf16.mxu1 %v12987_v10  ;;  %v13025_v10 = vpack.c.bf16 %v9133_v7, %v9132_v6  ;;  %v13027_v11 = vpack.c.bf16 %v9151_v9, %v9150_v8  ;;  %v9166_v6 = vld [vmem:[%s20862_s4 + $0x330] sm:$0xff]  ;;  %v9167_v7 = vld [vmem:[%s20862_s4 + $0x338] sm:$0xff]  ;;  %v9184_v8 = vld [vmem:[%s20862_s4 + $0x3c0] sm:$0xff] }
 0x369   : > { %v9185_v9 = vld [vmem:[%s20862_s4 + $0x3c8] sm:$0xff]  ;;  %v9187_v21 = vld [vmem:[%s20862_s4 + $0x3d8] sm:$0xff] }
 0x36a   : > { %1503 = vmatmul.mubr.f32.gmra.mrb[16].mxu1 %v14689_v28  ;;  %v13035_v28 = vpack.c.bf16 %v9155_v20, %v9154_v19  ;;  %v9188_v20 = vld [vmem:[%s20862_s4 + $0x3e0] sm:$0xff] }
 0x36b   : > { %12990 = vmatpush3.bf16.msra.mxu1 %v12989_v17  ;;  %1720 = vmatprep.mubr.f32.mxu1 %v14690_v30  ;;  %v13029_v17 = vpack.c.bf16 %v9135_v13, %v9134_v12  ;;  %v9168_v12 = vld [vmem:[%s20862_s4 + $0x340] sm:$0xff]  ;;  %v9169_v13 = vld [vmem:[%s20862_s4 + $0x348] sm:$0xff] }
 0x36c   : > { %12992 = vmatprep.subr.bf16.mxu1 %v12991_v33  ;;  %v9136_v33 = vld [vmem:[%s20862_s4 + $0x240] sm:$0xff] }
 0x36d   : > { %v13033_v25 = vpack.c.bf16 %v9137_v14, %v9136_v33  ;;  %v9170_v33 = vld [vmem:[%s20862_s4 + $0x350] sm:$0xff]  ;;  %v9171_v14 = vld [vmem:[%s20862_s4 + $0x358] sm:$0xff] }
 0x36e   : > { %v13069_v19 = vpack.c.bf16 %v9171_v14, %v9170_v33 }
 0x36f   : > { %12994 = vmatpush3.bf16.msra.mxu1 %v12993_v29  ;;  %v9138_v29 = vld [vmem:[%s20862_s4 + $0x250] sm:$0xff] }
 0x370   : > { %12996 = vmatprep.subr.bf16.mxu1 %v12995_v18  ;;  %v9156_v18 = vld [vmem:[%s20862_s4 + $0x2e0] sm:$0xff] }
 0x371   : > { %v13039_v35 = vpack.c.bf16 %v9157_v31, %v9156_v18  ;;  %v9173_v18 = vld [vmem:[%s20862_s4 + $0x368] sm:$0xff] }
 0x373   : > { %12998 = vmatpush3.bf16.msra.mxu1 %v12997_v37  ;;  %v9141_v37 = vld [vmem:[%s20862_s4 + $0x268] sm:$0xff] }
 0x374   : > { %13000 = vmatprep.subr.bf16.mxu1 %v12999_v48  ;;  %v9158_v48 = vld [vmem:[%s20862_s4 + $0x2f0] sm:$0xff]  ;;  %v13041_v40 = vpack.c.bf16 %v9141_v37, %v9140_v36  ;;  %v9191_v37 = vld [vmem:[%s20862_s4 + $0x3f8] sm:$0xff] }
 0x375   : > { %v13043_v24 = vpack.c.bf16 %v9159_v39, %v9158_v48  ;;  %v9190_v36 = vld [vmem:[%s20862_s4 + $0x3f0] sm:$0xff] }
 0x376   : > { %v13075_v39 = vpack.c.bf16 %v9191_v37, %v9190_v36 }
 0x377   : > { %13002 = vmatpush3.bf16.msra.mxu1 %v13001_v42  ;;  %v9143_v42 = vld [vmem:[%s20862_s4 + $0x278] sm:$0xff] }
 0x378   : > { %13004 = vmatprep.subr.bf16.mxu1 %v13003_v27  ;;  %v13045_v27 = vpack.c.bf16 %v9143_v42, %v9142_v41 }
 0x37b   : > { %13006 = vmatpush3.bf16.msra.mxu1 %v13005_v38  ;;  %v14692_v38 = vld [vmem:[%s15167_s25 + $0x28] sm:$0xff] }
 0x37c   : > { %13008 = vmatprep.subr.bf16.mxu1 %v13007_v49  ;;  %v14693_v49 = vld [vmem:[%s15167_s25 + $0x20] sm:$0xff] }
 0x37f   : > { %13010 = vmatpush3.bf16.msra.mxu1 %v13009_v54  ;;  %v9161_v54 = vld [vmem:[%s20862_s4 + $0x308] sm:$0xff] }
 0x380   : > { %13012 = vmatprep.subr.bf16.mxu1 %v13011_v55  ;;  %v9178_v55 = vld [vmem:[%s20862_s4 + $0x390] sm:$0xff]  ;;  %v13049_v57 = vpack.c.bf16 %v9161_v54, %v9160_v53 }
 0x383   : > { %13014 = vmatpush3.bf16.msra.mxu1 %v13013_v58  ;;  %v10953_v43 = vpop.f32.mrb[14].mxu0  ;;  %v9179_v58 = vld [vmem:[%s20862_s4 + $0x398] sm:$0xff] }
 0x384   : > { %v10954_v44 = vpop.f32.mrb[15].mxu0  ;;  %13048 = vmatprep.subr.bf16.mxu1 %v13047_v52 }
 0x385   : > { %v16057_v45 = vadd.f32 %v10954_v44, %v10953_v43  ;;  %v16161_v43 = vld [vmem:[%s15167_s25 + $0x10] sm:$0xff]  ;;  %v14695_v44 = vld [vmem:[%s15167_s25 + $0x38] sm:$0xff] }
 0x386   : > { %1721 = vmatmul.mubr.f32.vlgmr.msra.gmra.mrb[18].mxu1 %v15323_v22  ;;  %v9129_v22 = vld [vmem:[%s20862_s4 + $0x208] sm:$0xff] }
 0x387   : > { %1725 = vmatprep.mubr.f32.mxu1 %v15329_v26  ;;  %v13017_v26 = vpack.c.bf16 %v9129_v22, %v9128_v62  ;;  %v10956_v56 = vpop.f32.mrb[16].mxu0  ;;  %v13051_v62 = vpack.c.bf16 %v9179_v58, %v9178_v55  ;;  %v9180_v22 = vld [vmem:[%s20862_s4 + $0x3a0] sm:$0xff]  ;;  %13050 = vmatpush3.bf16.msra.mxu1 %v13049_v57  ;;  %v1425_v51 = vadd.f32 %v16057_v45, %v9061_v50 }
 0x388   : > { %v10957_v61 = vpop.f32.mrb[17].mxu0 }
 0x389   : > { %13018 = vmatpush3.bf16.msra.mxu0 %v13017_v26  ;;  %v9181_v26 = vld [vmem:[%s20862_s4 + $0x3a8] sm:$0xff]  ;;  %13052 = vmatprep.subr.bf16.mxu1 %v13051_v62 }
 0x38a   : > { %1726 = vmatmul.mubr.f32.gmra.mrb[20].mxu1 %v15350_v34  ;;  %v9146_v34 = vld [vmem:[%s20862_s4 + $0x290] sm:$0xff]  ;;  %v13055_v0 = vpack.c.bf16 %v9181_v26, %v9180_v22 }
 0x38b   : > { %1943 = vmatprep.mubr.f32.mxu1 %v14690_v30  ;;  %v13019_v16 = vpack.c.bf16 %v9147_v63, %v9146_v34  ;;  %v9139_v30 = vld [vmem:[%s20862_s4 + $0x258] sm:$0xff]  ;;  %v16092_v34 = vadd.f32 %v10957_v61, %v10956_v56  ;;  %v13053_v63 = vpack.c.bf16 %v9163_v60, %v9162_v59  ;;  %v9127_v61 = vld [vmem:[%s20865_s7 + $0x1] ss:$0 sm:$0xff] }
 0x38c   : > { %v13037_v32 = vpack.c.bf16 %v9139_v30, %v9138_v29  ;;  %v9172_v30 = vld [vmem:[%s20862_s4 + $0x360] sm:$0xff] }
 0x38d   : > { %13020 = vmatprep.subr.bf16.mxu0 %v13019_v16  ;;  %v9164_v16 = vld [vmem:[%s20862_s4 + $0x320] sm:$0xff]  ;;  %13054 = vmatpush3.bf16.msra.mxu1 %v13053_v63  ;;  %v1430_v56 = vadd.f32 %v16092_v34, %v9061_v50 }
 0x38e   : > { %13022 = vmatpush3.bf16.msra.mxu0 %v13021_v4  ;;  %v13057_v4 = vpack.c.bf16 %v9165_v1, %v9164_v16  ;;  %13056 = vmatprep.subr.bf16.mxu1 %v13055_v0 }
 0x38f   : > { %13024 = vmatprep.subr.bf16.mxu0 %v13023_v5  ;;  %v13059_v5 = vpack.c.bf16 %v9183_v3, %v9182_v2 }
 0x391   : > { %13058 = vmatpush3.bf16.msra.mxu1 %v13057_v4 }
 0x392   : > { %13026 = vmatpush3.bf16.msra.mxu0 %v13025_v10  ;;  %v13061_v10 = vpack.c.bf16 %v9167_v7, %v9166_v6  ;;  %13060 = vmatprep.subr.bf16.mxu1 %v13059_v5 }
 0x393   : > { %13028 = vmatprep.subr.bf16.mxu0 %v13027_v11  ;;  %v13063_v11 = vpack.c.bf16 %v9185_v9, %v9184_v8 }
 0x395   : > { %13062 = vmatpush3.bf16.msra.mxu1 %v13061_v10  ;;  %v9193_v10 = vld [vmem:[%s20866_s8 + $0x1] ss:$0 sm:$0xff] }
 0x396   : > { %13030 = vmatpush3.bf16.msra.mxu0 %v13029_v17  ;;  %v13065_v17 = vpack.c.bf16 %v9169_v13, %v9168_v12  ;;  %13064 = vmatprep.subr.bf16.mxu1 %v13063_v11 }
 0x397   : > { %13032 = vmatprep.subr.bf16.mxu0 %v13031_v23  ;;  %v13067_v23 = vpack.c.bf16 %v9187_v21, %v9186_v15 }
 0x399   : > { %13066 = vmatpush3.bf16.msra.mxu1 %v13065_v17 }
 0x39a   : > { %13034 = vmatpush3.bf16.msra.mxu0 %v13033_v25  ;;  %13068 = vmatprep.subr.bf16.mxu1 %v13067_v23  ;;  %v9189_v25 = vld [vmem:[%s20862_s4 + $0x3e8] sm:$0xff] }
 0x39b   : > { %13036 = vmatprep.subr.bf16.mxu0 %v13035_v28  ;;  %v13071_v29 = vpack.c.bf16 %v9189_v25, %v9188_v20 }
 0x39d   : > { %13070 = vmatpush3.bf16.msra.mxu1 %v13069_v19 }
 0x39e   : > { %13038 = vmatpush3.bf16.msra.mxu0 %v13037_v32  ;;  %v13073_v32 = vpack.c.bf16 %v9173_v18, %v9172_v30  ;;  %13072 = vmatprep.subr.bf16.mxu1 %v13071_v29 }
 0x39f   : > { %13040 = vmatprep.subr.bf16.mxu0 %v13039_v35 }
 0x3a1   : > { %13074 = vmatpush3.bf16.msra.mxu1 %v13073_v32 }
 0x3a2   : > { %13042 = vmatpush3.bf16.msra.mxu0 %v13041_v40  ;;  %v9174_v40 = vld [vmem:[%s20862_s4 + $0x370] sm:$0xff]  ;;  %13076 = vmatprep.subr.bf16.mxu1 %v13075_v39 }
 0x3a3   : > { %13044 = vmatprep.subr.bf16.mxu0 %v13043_v24  ;;  %v11029_v28 = vpop.f32.mrb[18].mxu0  ;;  %v9175_v24 = vld [vmem:[%s20862_s4 + $0x378] sm:$0xff] }
 0x3a4   : > { %v11030_v31 = vpop.f32.mrb[19].mxu0  ;;  %v13077_v42 = vpack.c.bf16 %v9175_v24, %v9174_v40 }
 0x3a5   : > { %v11031_v35 = vadd.f32 %v11030_v31, %v11029_v28 }
 0x3a6   : > { %13046 = vmatpush3.bf16.msra.mxu0 %v13045_v27  ;;  %13078 = vmatpush3.bf16.msra.mxu1 %v13077_v42 }
 0x3a7   : > { %v11032_v48 = vpop.f32.mrb[20].mxu0  ;;  %v1648_v62 = vadd.f32 %v11031_v35, %v9127_v61 }
 0x3a8   : > { %v11033_v41 = vpop.f32.mrb[21].mxu0 }
 0x3a9   : > { %1869 = vmatmul.mubr.f32.vlgmr.msra.gmra.mrb[22].mxu0 %v14691_v46  ;;  %v11034_v27 = vadd.f32 %v11033_v41, %v11032_v48  ;;  %1944 = vmatmul.mubr.f32.vlgmr.msra.gmra.mrb[22].mxu1 %v16161_v43  ;;  %v14696_v46 = vld [vmem:[%s15167_s25 + $0x30] sm:$0xff] }
 0x3aa   : > { %1873 = vmatprep.mubr.f32.mxu0 %v14692_v38  ;;  %1948 = vmatprep.mubr.f32.mxu1 %v14695_v44  ;;  %v9205_v44 = vld [vmem:[%s20863_s5 + $0x128] sm:$0xff] }
 0x3ab   : > { %v1653_v0 = vadd.f32 %v11034_v27, %v9127_v61  ;;  %v9201_v27 = vld [vmem:[%s20863_s5 + $0x108] sm:$0xff] }
 0x3ac   : > { %v13089_v50 = vpack.c.bf16 %v9205_v44, %v9201_v27  ;;  %v14801_v27 = vmov 0.0   ;;  %v1253_v44 = vld [vmem:[%s20863_s5] sm:$0xff] }
 0x3ad   : > { %1874 = vmatmul.mubr.f32.gmra.mrb[24].mxu0 %v14693_v49  ;;  %1949 = vmatmul.mubr.f32.gmra.mrb[24].mxu1 %v14696_v46  ;;  %v9203_v46 = vld [vmem:[%s20863_s5 + $0x118] sm:$0xff] }
 0x419   : > { %v16166_v38 = vpop.f32.mrb[12].mxu1 }
 0x41a   : > { %v16168_v49 = vpop.f32.mrb[13].mxu1 }
 0x439   : > { %v10991_v52 = vpop.f32.mrb[14].mxu1 }
 0x43a   : > { %v10992_v53 = vpop.f32.mrb[15].mxu1 }
 0x43b   : > { %v10993_v54 = vadd.f32 %v10992_v53, %v10991_v52  ;;  %v9200_v52 = vld [vmem:[%s20863_s5 + $0x100] sm:$0xff] }
 0x43c   : > { %v9204_v53 = vld [vmem:[%s20863_s5 + $0x120] sm:$0xff] }
 0x43d   : > { %v1500_v55 = vadd.f32 %v10993_v54, %v1425_v51  ;;  %v10994_v57 = vpop.f32.mrb[16].mxu1  ;;  %v9207_v51 = vld [vmem:[%s20863_s5 + $0x138] sm:$0xff] }
 0x43e   : > { %v10995_v58 = vpop.f32.mrb[17].mxu1  ;;  %v13105_v54 = vpack.c.bf16 %v9207_v51, %v9203_v46  ;;  %v1257_v46 = vld [vmem:[%s20863_s5 + $0x20] sm:$0xff]  ;;  %v1259_v51 = vld [vmem:[%s20863_s5 + $0x30] sm:$0xff] }
 0x43f   : > { %12591 = vmatprep.mubr.msk.f32.mxu0 %vm1059_vm0, %v1500_v55  ;;  %v10996_v59 = vadd.f32 %v10995_v58, %v10994_v57  ;;  %v13091_v55 = vpack.c.bf16 %v9204_v53, %v9200_v52  ;;  %v9213_v57 = vld [vmem:[%s20863_s5 + $0x168] sm:$0xff] }
 0x440   : > { %v1262_v52 = vld [vmem:[%s20863_s5 + $0x48] sm:$0xff] }
 0x441   : > { %v1505_v60 = vadd.f32 %v10996_v59, %v1430_v56  ;;  %v9209_v56 = vld [vmem:[%s20863_s5 + $0x148] sm:$0xff]  ;;  %v9208_v59 = vld [vmem:[%s20863_s5 + $0x140] sm:$0xff] }
 0x442   : > { %v13093_v58 = vpack.c.bf16 %v9213_v57, %v9209_v56  ;;  %v1266_v53 = vld [vmem:[%s20863_s5 + $0x68] sm:$0xff]  ;;  %v13123_v56 = vpack.c.bf16 %v1257_v46, %v1253_v44  ;;  %v9242_v46 = vld [vmem:[%s20860_s2 + $0x410] sm:$0xff] }
 0x459   : > { %v11067_v22 = vpop.f32.mrb[18].mxu1 }
 0x45a   : > { %v11068_v26 = vpop.f32.mrb[19].mxu1 }
 0x45b   : > { %v11069_v45 = vadd.f32 %v11068_v26, %v11067_v22  ;;  %v9221_v22 = vld [vmem:[%s20863_s5 + $0x1a8] sm:$0xff] }
 0x45d   : > { %v1723_v63 = vadd.f32 %v11069_v45, %v1648_v62  ;;  %v11070_v16 = vpop.f32.mrb[20].mxu1  ;;  %v9217_v62 = vld [vmem:[%s20863_s5 + $0x188] sm:$0xff]  ;;  %v9216_v45 = vld [vmem:[%s20863_s5 + $0x180] sm:$0xff] }
 0x45e   : > { %v11071_v1 = vpop.f32.mrb[21].mxu1  ;;  %v13097_v26 = vpack.c.bf16 %v9221_v22, %v9217_v62  ;;  %v1267_v62 = vld [vmem:[%s20863_s5 + $0x70] sm:$0xff]  ;;  %v1270_v22 = vld [vmem:[%s20863_s5 + $0x88] sm:$0xff] }
 0x45f   : > { %v11072_v2 = vadd.f32 %v11071_v1, %v11070_v16  ;;  %v9225_v16 = vld [vmem:[%s20863_s5 + $0x1c8] sm:$0xff] }
 0x460   : > { %v9229_v1 = vld [vmem:[%s20863_s5 + $0x1e8] sm:$0xff] }
 0x461   : > { %v1728_v34 = vadd.f32 %v11072_v2, %v1653_v0  ;;  %v13101_v2 = vpack.c.bf16 %v9229_v1, %v9225_v16  ;;  %v1272_v16 = vld [vmem:[%s20863_s5 + $0x98] sm:$0xff] }
 0x462   : > { %v1276_v1 = vld [vmem:[%s20863_s5 + $0xb8] sm:$0xff] }
 0x463   : > { %v13079_v3 = vpack.c.bf16 %v1728_v34, %v1723_v63  ;;  %v9220_v63 = vld [vmem:[%s20863_s5 + $0x1a0] sm:$0xff] }
 0x464   : > { %v13099_v0 = vpack.c.bf16 %v9220_v63, %v9216_v45  ;;  %v9224_v34 = vld [vmem:[%s20863_s5 + $0x1c0] sm:$0xff]  ;;  %v13125_v45 = vpack.c.bf16 %v1266_v53, %v1262_v52  ;;  %v9275_v52 = vld [vmem:[%s20860_s2 + $0x518] sm:$0xff] }
 0x465   : > { %13081 = vmatprep.subr.msk.bf16.mxu0 %vm15534_vm1, %v13079_v3  ;;  %v9260_v53 = vld [vmem:[%s20860_s2 + $0x4a0] sm:$0xff] }
 0x466   : > { %13084 = vmatpush3.bf16.xpose.msk.msra.mxu0 %vm15534_vm1, %v13079_v3  ;;  %v9228_v3 = vld [vmem:[%s20863_s5 + $0x1e0] sm:$0xff] }
 0x467   : > { %13090 = vmatprep.subr.bf16.mxu0 %v13089_v50  ;;  %v1255_v50 = vld [vmem:[%s20863_s5 + $0x10] sm:$0xff] }
 0x468   : > { %v13139_v57 = vpack.c.bf16 %v1259_v51, %v1255_v50  ;;  %v9243_v50 = vld [vmem:[%s20860_s2 + $0x418] sm:$0xff]  ;;  %v9274_v51 = vld [vmem:[%s20860_s2 + $0x510] sm:$0xff] }
 0x46d   : > { %12592 = vmatmul.mubr.msk.f32.vlgmr.msra.gmra.mrb[26].mxu0 %vm1059_vm0, %v1505_v60  ;;  %v9212_v60 = vld [vmem:[%s20863_s5 + $0x160] sm:$0xff] }
 0x46e   : > { %13092 = vmatpush1.bf16.msra.mxu0 %v13091_v55  ;;  %v13095_v61 = vpack.c.bf16 %v9212_v60, %v9208_v59  ;;  %2249 = vmatprep.mubr.f32.mxu0 %v14801_v27  ;;  %v1268_v55 = vld [vmem:[%s20863_s5 + $0x78] sm:$0xff]  ;;  %v1265_v59 = vld [vmem:[%s20863_s5 + $0x60] sm:$0xff] }
 0x46f   : > { %13094 = vmatprep.subr.bf16.mxu0 %v13093_v58  ;;  %v1261_v58 = vld [vmem:[%s20863_s5 + $0x40] sm:$0xff] }
 0x472   : > { %13096 = vmatpush1.bf16.msra.mxu0 %v13095_v61  ;;  %v1263_v61 = vld [vmem:[%s20863_s5 + $0x50] sm:$0xff] }
 0x473   : > { %13098 = vmatprep.subr.bf16.mxu0 %v13097_v26 }
 0x476   : > { %13100 = vmatpush1.bf16.msra.mxu0 %v13099_v0  ;;  %v1274_v0 = vld [vmem:[%s20863_s5 + $0xa8] sm:$0xff] }
 0x477   : > { %13102 = vmatprep.subr.bf16.mxu0 %v13101_v2  ;;  %v13127_v2 = vpack.c.bf16 %v1265_v59, %v1261_v58  ;;  %v9293_v58 = vld [vmem:[%s20860_s2 + $0x5a8] sm:$0xff]  ;;  %v13159_v59 = vpack.c.bf16 %v9243_v50, %v9242_v46  ;;  %v9252_v50 = vld [vmem:[%s20860_s2 + $0x460] sm:$0xff] }
 0x47c   : > { %v11105_v4 = vpop.f32.mrb[22].mxu0  ;;  %v11143_v12 = vpop.f32.mrb[22].mxu1 }
 0x47d   : > { %v11106_v5 = vpop.f32.mrb[23].mxu0  ;;  %v11144_v13 = vpop.f32.mrb[23].mxu1 }
 0x47e   : > { %v11107_v6 = vadd.f32 %v11106_v5, %v11105_v4  ;;  %v11145_v15 = vadd.f32 %v11144_v13, %v11143_v12  ;;  %v13103_v4 = vpack.c.bf16 %v9228_v3, %v9224_v34  ;;  %v13143_v34 = vpack.c.bf16 %v1267_v62, %v1263_v61  ;;  %v1269_v3 = vld [vmem:[%s20863_s5 + $0x80] sm:$0xff]  ;;  %v9245_v62 = vld [vmem:[%s20860_s2 + $0x428] sm:$0xff] }
 0x47f   : > { %v9244_v61 = vld [vmem:[%s20860_s2 + $0x420] sm:$0xff] }
 0x480   : > { %v11108_v7 = vpop.f32.mrb[24].mxu0  ;;  %v1871_v11 = vadd.f32 %v11107_v6, %v9193_v10  ;;  %v11146_v23 = vpop.f32.mrb[24].mxu1  ;;  %13104 = vmatpush1.bf16.msra.mxu0 %v13103_v4  ;;  %v1273_v4 = vld [vmem:[%s20863_s5 + $0xa0] sm:$0xff] }
 0x481   : > { %v11109_v8 = vpop.f32.mrb[25].mxu0  ;;  %v11147_v33 = vpop.f32.mrb[25].mxu1 }
 0x482   : > { %v11110_v9 = vadd.f32 %v11109_v8, %v11108_v7  ;;  %v1946_v17 = vadd.f32 %v11145_v15, %v1871_v11  ;;  %v11148_v14 = vadd.f32 %v11147_v33, %v11146_v23  ;;  %v9202_v7 = vld [vmem:[%s20863_s5 + $0x110] sm:$0xff]  ;;  %v9215_v11 = vld [vmem:[%s20863_s5 + $0x178] sm:$0xff] }
 0x483   : > { %v9206_v8 = vld [vmem:[%s20863_s5 + $0x130] sm:$0xff] }
 0x484   : > { %v1876_v21 = vadd.f32 %v11110_v9, %v9193_v10  ;;  %v9211_v10 = vld [vmem:[%s20863_s5 + $0x158] sm:$0xff]  ;;  %v13107_v15 = vpack.c.bf16 %v9206_v8, %v9202_v7  ;;  %v9210_v23 = vld [vmem:[%s20863_s5 + $0x150] sm:$0xff] }
 0x485   : > { %v9214_v33 = vld [vmem:[%s20863_s5 + $0x170] sm:$0xff] }
 0x486   : > { %v1951_v19 = vadd.f32 %v11148_v14, %v1876_v21  ;;  %v9219_v14 = vld [vmem:[%s20863_s5 + $0x198] sm:$0xff]  ;;  %v1271_v7 = vld [vmem:[%s20863_s5 + $0x90] sm:$0xff] }
 0x487   : > { %v1275_v8 = vld [vmem:[%s20863_s5 + $0xb0] sm:$0xff] }
 0x488   : > { %v13085_v20 = vpack.c.bf16 %v1951_v19, %v1946_v17  ;;  %v13109_v17 = vpack.c.bf16 %v9215_v11, %v9211_v10  ;;  %v9223_v19 = vld [vmem:[%s20863_s5 + $0x1b8] sm:$0xff]  ;;  %v1282_v10 = vld [vmem:[%s20863_s5 + $0xe8] sm:$0xff] }
 0x489   : > { %v1280_v11 = vld [vmem:[%s20863_s5 + $0xd8] sm:$0xff] }
 0x48a   : > { %13086 = vmatprep.subr.bf16.mxu1 %v13085_v20 }
 0x48b   : > { %13088 = vmatpush3.bf16.msra.mxu1 %v13085_v20  ;;  %v13111_v20 = vpack.c.bf16 %v9214_v33, %v9210_v23 }
 0x48c   : > { %13106 = vmatprep.subr.bf16.mxu1 %v13105_v54  ;;  %v1264_v54 = vld [vmem:[%s20863_s5 + $0x58] sm:$0xff] }
 0x48d   : > { %v13141_v63 = vpack.c.bf16 %v1268_v55, %v1264_v54 }
 0x540   : > { %v12593_v25 = vpop.f32.mrb[26].mxu0 }
 0x541   : > { %v2042_v28 = vmul.f32 0.125, %v12593_v25  ;;  %v2032_v29 = vpop.f32.mrb[27].mxu0  ;;  %v13113_v25 = vpack.c.bf16 %v9223_v19, %v9219_v14  ;;  %v1279_v14 = vld [vmem:[%s20863_s5 + $0xd0] sm:$0xff] }
 0x542   : > { %v2041_v30 = vmul.f32 0.125, %v2032_v29  ;;  %v9222_v29 = vld [vmem:[%s20863_s5 + $0x1b0] sm:$0xff] }
 0x543   : > { %v2046_v18 = vsel %vm1149_vm2, %v2042_v28, -inf  ;;  %v1283_v19 = vld [vmem:[%s20863_s5 + $0xf0] sm:$0xff] }
 0x544   : > { %2047 = vmax.xlane.f32.xlu1 %v2046_v18  ;;  %v2043_v31 = vsel %vm1149_vm2, %v2041_v30, -inf  ;;  %v9231_v18 = vld [vmem:[%s20863_s5 + $0x1f8] sm:$0xff] }
 0x545   : > { %2044 = vmax.xlane.f32.xlu0 %v2043_v31 }
 0x5d1   : > { %v2048_v32 = vpop.xlane.xlu1 %2047 }
 0x5d2   : > { %v2050_v35 = vsub.f32 %v2042_v28, %v2048_v32  ;;  %v2045_v36 = vpop.xlane.xlu0 %2044  ;;  %v9218_v28 = vld [vmem:[%s20863_s5 + $0x190] sm:$0xff] }
 0x5d3   : > { %v2049_v37 = vsub.f32 %v2041_v30, %v2045_v36  ;;  %v9227_v30 = vld [vmem:[%s20863_s5 + $0x1d8] sm:$0xff]  ;;  %v13115_v31 = vpack.c.bf16 %v9222_v29, %v9218_v28  ;;  %v9230_v36 = vld [vmem:[%s20863_s5 + $0x1f0] sm:$0xff]  ;;  %v9288_v28 = vld [vmem:[%s20860_s2 + $0x580] sm:$0xff] }
 0x5d4   : > { %v2053_v48 = vmul.f32 1.442695, %v2050_v35  ;;  %v13117_v32 = vpack.c.bf16 %v9231_v18, %v9227_v30  ;;  %v9226_v35 = vld [vmem:[%s20863_s5 + $0x1d0] sm:$0xff]  ;;  %v9289_v29 = vld [vmem:[%s20860_s2 + $0x588] sm:$0xff]  ;;  %v13151_v18 = vpack.c.bf16 %v1283_v19, %v1279_v14  ;;  %v9280_v19 = vld [vmem:[%s20860_s2 + $0x540] sm:$0xff] }
 0x5d5   : > { %v2051_v39 = vmul.f32 1.442695, %v2049_v37  ;;  %v13119_v37 = vpack.c.bf16 %v9230_v36, %v9226_v35  ;;  %v9241_v35 = vld [vmem:[%s20860_s2 + $0x408] sm:$0xff]  ;;  %v13185_v36 = vpack.c.bf16 %v9289_v29, %v9288_v28  ;;  %v9267_v28 = vld [vmem:[%s20860_s2 + $0x4d8] sm:$0xff]  ;;  %v9298_v29 = vld [vmem:[%s20860_s2 + $0x5d0] sm:$0xff] }
 0x5d6   : > { %14630 = vpow2.f32 %v2053_v48  ;;  %v1254_v48 = vld [vmem:[%s20863_s5 + $0x8] sm:$0xff] }
 0x5d7   : > { %14632 = vpow2.f32 %v2051_v39  ;;  %v1258_v39 = vld [vmem:[%s20863_s5 + $0x28] sm:$0xff] }
 0x5e0   : > { %v14631_v40 = vpop.eup %14630 }
 0x5e1   : > { %v14633_v24 = vpop.eup %14632  ;;  %v2058_v41 = vsel %vm1149_vm2, %v14631_v40, 0.0 }
 0x5e2   : > { %2059 = vadd.xlane.f32.xlu1 %v2058_v41  ;;  %v2055_v42 = vsel %vm1149_vm2, %v14633_v24, 0.0  ;;  %v1260_v41 = vld [vmem:[%s20863_s5 + $0x38] sm:$0xff] }
 0x5e3   : > { %2056 = vadd.xlane.f32.xlu0 %v2055_v42 }
 0x66f   : > { %v2060_v5 = vpop.xlane.xlu1 %2059 }
 0x670   : > { %14634 = vrcp.f32 %v2060_v5  ;;  %v2057_v6 = vpop.xlane.xlu0 %2056  ;;  %v13129_v5 = vpack.c.bf16 %v1274_v0, %v1270_v22  ;;  %v9263_v0 = vld [vmem:[%s20860_s2 + $0x4b8] sm:$0xff] }
 0x671   : > { %14636 = vrcp.f32 %v2057_v6  ;;  %v13145_v6 = vpack.c.bf16 %v1276_v1, %v1272_v16  ;;  %v9294_v16 = vld [vmem:[%s20860_s2 + $0x5b0] sm:$0xff]  ;;  %v9295_v1 = vld [vmem:[%s20860_s2 + $0x5b8] sm:$0xff] }
 0x67a   : > { %v14635_v9 = vpop.eup %14634 }
 0x67b   : > { %v14637_v12 = vpop.eup %14636  ;;  %v2064_v21 = vmul.f32 %v14635_v9, %v14631_v40  ;;  %v1256_v40 = vld [vmem:[%s20863_s5 + $0x18] sm:$0xff]  ;;  %v1278_v9 = vld [vmem:[%s20863_s5 + $0xc8] sm:$0xff] }
 0x67c   : > { %v2063_v13 = vmul.f32 %v14637_v12, %v14633_v24  ;;  %v13121_v24 = vpack.c.bf16 %v1258_v39, %v1254_v48  ;;  %v13137_v42 = vpack.c.bf16 %v1260_v41, %v1256_v40  ;;  %v1284_v12 = vld [vmem:[%s20863_s5 + $0xf8] sm:$0xff]  ;;  %v13133_v23 = vpack.c.bf16 %v1282_v10, %v1278_v9  ;;  %v9273_v48 = vld [vmem:[%s20860_s2 + $0x508] sm:$0xff]  ;;  %v9258_v39 = vld [vmem:[%s20860_s2 + $0x490] sm:$0xff] }
 0x67d   : > { %v13149_v33 = vpack.c.bf16 %v1284_v12, %v1280_v11  ;;  %v9259_v40 = vld [vmem:[%s20860_s2 + $0x498] sm:$0xff]  ;;  %v9265_v9 = vld [vmem:[%s20860_s2 + $0x4c8] sm:$0xff]  ;;  %v9296_v10 = vld [vmem:[%s20860_s2 + $0x5c0] sm:$0xff] }
 0x67e   : > { %12598 = vmatprep.mubr.msk.f32.mxu1 %vm1149_vm2, %v2063_v13  ;;  %13122 = vmatprep.subr.bf16.mxu0 %v13121_v24  ;;  %v13131_v13 = vpack.c.bf16 %v1273_v4, %v1269_v3  ;;  %v9290_v24 = vld [vmem:[%s20860_s2 + $0x590] sm:$0xff]  ;;  %v9291_v41 = vld [vmem:[%s20860_s2 + $0x598] sm:$0xff]  ;;  %v13157_v54 = vpack.c.bf16 %v9259_v40, %v9258_v39  ;;  %v9297_v11 = vld [vmem:[%s20860_s2 + $0x5c8] sm:$0xff] }
 0x67f   : > { %12599 = vmatmul.mubr.msk.f32.vlgmr.msra.gmra.mrb[26].mxu1 %vm1149_vm2, %v2064_v21  ;;  %v1277_v21 = vld [vmem:[%s20863_s5 + $0xc0] sm:$0xff]  ;;  %v13189_v55 = vpack.c.bf16 %v9291_v41, %v9290_v24  ;;  %v9246_v3 = vld [vmem:[%s20860_s2 + $0x430] sm:$0xff]  ;;  %v9247_v4 = vld [vmem:[%s20860_s2 + $0x438] sm:$0xff]  ;;  %v13201_v14 = vpack.c.bf16 %v9297_v11, %v9296_v10 }
 0x680   : > { %13108 = vmatpush1.bf16.msra.mxu1 %v13107_v15  ;;  %2326 = vmatprep.mubr.f32.mxu1 %v14801_v27  ;;  %v13147_v15 = vpack.c.bf16 %v1275_v8, %v1271_v7  ;;  %v9279_v7 = vld [vmem:[%s20860_s2 + $0x538] sm:$0xff]  ;;  %v9264_v8 = vld [vmem:[%s20860_s2 + $0x4c0] sm:$0xff]  ;;  %v14697_v12 = vld [vmem:[%s15031_s29 + $0x8] sm:$0xff] }
 0x681   : > { %13110 = vmatprep.subr.bf16.mxu1 %v13109_v17  ;;  %v1281_v17 = vld [vmem:[%s20863_s5 + $0xe0] sm:$0xff]  ;;  %v9283_v39 = vld [vmem:[%s20860_s2 + $0x558] sm:$0xff]  ;;  %v9269_v24 = vld [vmem:[%s20860_s2 + $0x4e8] sm:$0xff] }
 0x682   : > { %v13135_v30 = vpack.c.bf16 %v1281_v17, %v1277_v21  ;;  %v9248_v17 = vld [vmem:[%s20860_s2 + $0x440] sm:$0xff]  ;;  %v9325_v10 = vld [vmem:[%s20861_s3 + $0x498] sm:$0xff]  ;;  %v9356_v11 = vld [vmem:[%s20861_s3 + $0x590] sm:$0xff] }
 0x683   : > { %v9268_v40 = vld [vmem:[%s20860_s2 + $0x4e0] sm:$0xff] }
 0x684   : > { %13112 = vmatpush1.bf16.msra.mxu1 %v13111_v20  ;;  %v9256_v20 = vld [vmem:[%s20860_s2 + $0x480] sm:$0xff] }
 0x685   : > { %13114 = vmatprep.subr.bf16.mxu1 %v13113_v25  ;;  %v9257_v25 = vld [vmem:[%s20860_s2 + $0x488] sm:$0xff]  ;;  %v9300_v41 = vld [vmem:[%s20860_s2 + $0x5e0] sm:$0xff] }
 0x688   : > { %13116 = vmatpush1.bf16.msra.mxu1 %v13115_v31  ;;  %v9240_v31 = vld [vmem:[%s20860_s2 + $0x400] sm:$0xff] }
 0x689   : > { %13118 = vmatprep.subr.bf16.mxu1 %v13117_v32  ;;  %v13153_v32 = vpack.c.bf16 %v9257_v25, %v9256_v20  ;;  %v9281_v20 = vld [vmem:[%s20860_s2 + $0x548] sm:$0xff]  ;;  %v9266_v25 = vld [vmem:[%s20860_s2 + $0x4d0] sm:$0xff] }
 0x68c   : > { %13120 = vmatpush1.bf16.msra.mxu1 %v13119_v37  ;;  %v9272_v37 = vld [vmem:[%s20860_s2 + $0x500] sm:$0xff] }
 0x68d   : > { %13138 = vmatprep.subr.bf16.mxu1 %v13137_v42  ;;  %v13155_v42 = vpack.c.bf16 %v9241_v35, %v9240_v31  ;;  %v13187_v44 = vpack.c.bf16 %v9273_v48, %v9272_v37  ;;  %v13203_v31 = vpack.c.bf16 %v9281_v20, %v9280_v19  ;;  %v9251_v35 = vld [vmem:[%s20860_s2 + $0x458] sm:$0xff]  ;;  %v9282_v48 = vld [vmem:[%s20860_s2 + $0x550] sm:$0xff]  ;;  %v9326_v20 = vld [vmem:[%s20861_s3 + $0x4a0] sm:$0xff] }
 0x68e   : > { %v13207_v46 = vpack.c.bf16 %v9283_v39, %v9282_v48  ;;  %v9341_v19 = vld [vmem:[%s20861_s3 + $0x518] sm:$0xff]  ;;  %v9342_v39 = vld [vmem:[%s20861_s3 + $0x520] sm:$0xff] }
 0x752   : > { %v12600_v60 = vpop.f32.mrb[26].mxu1 }
 0x753   : > { %v2137_v26 = vpop.f32.mrb[27].mxu1 }
 0x754   : > { %9232 = vmatmul.mubr.msk.f32.vlgmr.msra.gmra.mrb[28].mxu0 %vm1059_vm0, %v2137_v26  ;;  %9234 = vmatmul.mubr.msk.f32.vlgmr.msra.gmra.mrb[28].mxu1 %vm1059_vm0, %v2137_v26 }
 0x755   : > { %13124 = vmatpush1.bf16.msra.mxu0 %v13123_v56  ;;  %13140 = vmatpush1.bf16.msra.mxu1 %v13139_v57  ;;  %v9261_v56 = vld [vmem:[%s20860_s2 + $0x4a8] sm:$0xff]  ;;  %v9292_v57 = vld [vmem:[%s20860_s2 + $0x5a0] sm:$0xff] }
 0x756   : > { %2255 = vmatprep.mubr.f32.mxu0 %v14801_v27  ;;  %2332 = vmatprep.mubr.f32.mxu1 %v14801_v27  ;;  %v13161_v22 = vpack.c.bf16 %v9261_v56, %v9260_v53  ;;  %v13193_v26 = vpack.c.bf16 %v9293_v58, %v9292_v57  ;;  %v9270_v56 = vld [vmem:[%s20860_s2 + $0x4f0] sm:$0xff]  ;;  %v9271_v57 = vld [vmem:[%s20860_s2 + $0x4f8] sm:$0xff] }
 0x757   : > { %13126 = vmatprep.subr.bf16.mxu0 %v13125_v45  ;;  %13142 = vmatprep.subr.bf16.mxu1 %v13141_v63  ;;  %v9277_v45 = vld [vmem:[%s20860_s2 + $0x528] sm:$0xff]  ;;  %v9262_v63 = vld [vmem:[%s20860_s2 + $0x4b0] sm:$0xff] }
 0x758   : > { %9233 = vmatmul.mubr.msk.f32.gmra.mrb[30].mxu0 %vm1059_vm0, %v12600_v60  ;;  %9235 = vmatmul.mubr.msk.f32.gmra.mrb[30].mxu1 %vm1059_vm0, %v12600_v60  ;;  %v13191_v60 = vpack.c.bf16 %v9275_v52, %v9274_v51  ;;  %v9253_v51 = vld [vmem:[%s20860_s2 + $0x468] sm:$0xff]  ;;  %v13177_v52 = vpack.c.bf16 %v9269_v24, %v9268_v40  ;;  %v9302_v58 = vld [vmem:[%s20860_s2 + $0x5f0] sm:$0xff] }
 0x759   : > { %13128 = vmatpush1.bf16.msra.mxu0 %v13127_v2  ;;  %13144 = vmatpush1.bf16.msra.mxu1 %v13143_v34  ;;  %v13163_v2 = vpack.c.bf16 %v9245_v62, %v9244_v61  ;;  %v9254_v62 = vld [vmem:[%s20860_s2 + $0x470] sm:$0xff]  ;;  %v9343_v40 = vld [vmem:[%s20861_s3 + $0x528] sm:$0xff] }
 0x75a   : > { %13130 = vmatprep.subr.bf16.mxu0 %v13129_v5  ;;  %13146 = vmatprep.subr.bf16.mxu1 %v13145_v6  ;;  %v13165_v5 = vpack.c.bf16 %v9263_v0, %v9262_v63  ;;  %v13197_v6 = vpack.c.bf16 %v9295_v1, %v9294_v16  ;;  %v9287_v63 = vld [vmem:[%s20860_s2 + $0x578] sm:$0xff]  ;;  %v9322_v0 = vld [vmem:[%s20861_s3 + $0x480] sm:$0xff]  ;;  %v9323_v16 = vld [vmem:[%s20861_s3 + $0x488] sm:$0xff] }
 0x75b   : > { %2409 = vmatprep.mubr.f32.mxu0 %v14801_v27  ;;  %2486 = vmatprep.mubr.f32.mxu1 %v14801_v27  ;;  %v9354_v1 = vld [vmem:[%s20861_s3 + $0x580] sm:$0xff]  ;;  %v9328_v24 = vld [vmem:[%s20861_s3 + $0x4b0] sm:$0xff] }
 0x75d   : > { %13132 = vmatpush1.bf16.msra.mxu0 %v13131_v13  ;;  %13148 = vmatpush1.bf16.msra.mxu1 %v13147_v15  ;;  %v14698_v13 = vld [vmem:[%s15031_s29 + $0x18] sm:$0xff]  ;;  %v13167_v15 = vpack.c.bf16 %v9247_v4, %v9246_v3  ;;  %v9306_v4 = vld [vmem:[%s20861_s3 + $0x400] sm:$0xff] }
 0x75e   : > { %13134 = vmatprep.subr.bf16.mxu0 %v13133_v23  ;;  %13150 = vmatprep.subr.bf16.mxu1 %v13149_v33  ;;  %v9249_v23 = vld [vmem:[%s20860_s2 + $0x448] sm:$0xff]  ;;  %v13169_v33 = vpack.c.bf16 %v9265_v9, %v9264_v8  ;;  %v9324_v9 = vld [vmem:[%s20861_s3 + $0x490] sm:$0xff] }
 0x75f   : > { %v9339_v8 = vld [vmem:[%s20861_s3 + $0x508] sm:$0xff] }
 0x761   : > { %13136 = vmatpush1.bf16.msra.mxu0 %v13135_v30  ;;  %13152 = vmatpush1.bf16.msra.mxu1 %v13151_v18  ;;  %v9299_v30 = vld [vmem:[%s20860_s2 + $0x5d8] sm:$0xff]  ;;  %v13171_v18 = vpack.c.bf16 %v9249_v23, %v9248_v17  ;;  %v13221_v23 = vpack.c.bf16 %v9325_v10, %v9324_v9  ;;  %v9316_v10 = vld [vmem:[%s20861_s3 + $0x450] sm:$0xff] }
 0x762   : > { %13154 = vmatprep.subr.bf16.mxu0 %v13153_v32  ;;  %13186 = vmatprep.subr.bf16.mxu1 %v13185_v36  ;;  %v9250_v32 = vld [vmem:[%s20860_s2 + $0x450] sm:$0xff]  ;;  %v13173_v36 = vpack.c.bf16 %v9267_v28, %v9266_v25  ;;  %v13205_v37 = vpack.c.bf16 %v9299_v30, %v9298_v29  ;;  %v9309_v17 = vld [vmem:[%s20861_s3 + $0x418] sm:$0xff]  ;;  %v9327_v25 = vld [vmem:[%s20861_s3 + $0x4a8] sm:$0xff] }
 0x763   : > { %v9358_v28 = vld [vmem:[%s20861_s3 + $0x5a0] sm:$0xff]  ;;  %v9359_v29 = vld [vmem:[%s20861_s3 + $0x5a8] sm:$0xff] }
 0x764   : > { %9236 = vmatmul.mubr.msk.f32.vlgmr.msra.gmra.mrb[28].mxu0 %vm1059_vm0, %v16168_v49  ;;  %9238 = vmatmul.mubr.msk.f32.vlgmr.msra.gmra.mrb[28].mxu1 %vm1059_vm0, %v16168_v49  ;;  %v9276_v49 = vld [vmem:[%s20860_s2 + $0x520] sm:$0xff]  ;;  %v13257_v48 = vpack.c.bf16 %v9359_v29, %v9358_v28  ;;  %v9319_v28 = vld [vmem:[%s20861_s3 + $0x468] sm:$0xff] }
 0x765   : > { %13156 = vmatpush3.bf16.msra.mxu0 %v13155_v42  ;;  %13188 = vmatpush3.bf16.msra.mxu1 %v13187_v44  ;;  %v13195_v34 = vpack.c.bf16 %v9277_v45, %v9276_v49  ;;  %v9301_v42 = vld [vmem:[%s20860_s2 + $0x5e8] sm:$0xff]  ;;  %v13175_v44 = vpack.c.bf16 %v9251_v35, %v9250_v32  ;;  %v9286_v45 = vld [vmem:[%s20860_s2 + $0x570] sm:$0xff]  ;;  %v14699_v30 = vld [vmem:[%s15031_s29] sm:$0xff] }
 0x766   : > { %2415 = vmatprep.mubr.f32.mxu0 %v14801_v27  ;;  %2492 = vmatprep.mubr.f32.mxu1 %v14801_v27  ;;  %v13209_v53 = vpack.c.bf16 %v9301_v42, %v9300_v41  ;;  %v13215_v3 = vpack.c.bf16 %v9287_v63, %v9286_v45  ;;  %v9310_v35 = vld [vmem:[%s20861_s3 + $0x420] sm:$0xff]  ;;  %v9329_v41 = vld [vmem:[%s20861_s3 + $0x4b8] sm:$0xff]  ;;  %v9360_v42 = vld [vmem:[%s20861_s3 + $0x5b0] sm:$0xff] }
 0x767   : > { %13158 = vmatprep.subr.bf16.mxu0 %v13157_v54  ;;  %13190 = vmatprep.subr.bf16.mxu1 %v13189_v55  ;;  %v9284_v54 = vld [vmem:[%s20860_s2 + $0x560] sm:$0xff]  ;;  %v9285_v55 = vld [vmem:[%s20860_s2 + $0x568] sm:$0xff]  ;;  %v16718_v45 = vld [vmem:[%s15167_s25 + $0x18] sm:$0xff] }
 0x768   : > { %9237 = vmatmul.mubr.msk.f32.gmra.mrb[30].mxu0 %vm1059_vm0, %v16166_v38  ;;  %9239 = vmatmul.mubr.msk.f32.gmra.mrb[30].mxu1 %vm1059_vm0, %v16166_v38  ;;  %v9278_v38 = vld [vmem:[%s20860_s2 + $0x530] sm:$0xff]  ;;  %v13211_v61 = vpack.c.bf16 %v9285_v55, %v9284_v54  ;;  %v13259_v54 = vpack.c.bf16 %v9343_v40, %v9342_v39 }
 0x769   : > { %13160 = vmatpush3.bf16.msra.mxu0 %v13159_v59  ;;  %13192 = vmatpush3.bf16.msra.mxu1 %v13191_v60  ;;  %v13199_v21 = vpack.c.bf16 %v9279_v7, %v9278_v38  ;;  %v9303_v59 = vld [vmem:[%s20860_s2 + $0x5f8] sm:$0xff]  ;;  %v13179_v60 = vpack.c.bf16 %v9253_v51, %v9252_v50  ;;  %v9338_v7 = vld [vmem:[%s20861_s3 + $0x500] sm:$0xff]  ;;  %v9312_v55 = vld [vmem:[%s20861_s3 + $0x430] sm:$0xff] }
 0x76a   : > { %13162 = vmatprep.subr.bf16.mxu0 %v13161_v22  ;;  %13194 = vmatprep.subr.bf16.mxu1 %v13193_v26  ;;  %v9255_v22 = vld [vmem:[%s20860_s2 + $0x478] sm:$0xff]  ;;  %v13181_v26 = vpack.c.bf16 %v9271_v57, %v9270_v56  ;;  %v13213_v49 = vpack.c.bf16 %v9303_v59, %v9302_v58  ;;  %v14703_v51 = vld [vmem:[%s15031_s29 + $0x20] sm:$0xff]  ;;  %v13229_v57 = vpack.c.bf16 %v9329_v41, %v9328_v24  ;;  %v9344_v59 = vld [vmem:[%s20861_s3 + $0x530] sm:$0xff] }
 0x76b   : > { %2636 = vmatprep.mubr.f32.mxu0 %v14697_v12  ;;  %2711 = vmatprep.mubr.f32.mxu1 %v14698_v13  ;;  %v9357_v12 = vld [vmem:[%s20861_s3 + $0x598] sm:$0xff]  ;;  %v9320_v40 = vld [vmem:[%s20861_s3 + $0x470] sm:$0xff] }
 0x76c   : > { %v14702_v50 = vld [vmem:[%s15031_s29 + $0x38] sm:$0xff] }
 0x76d   : > { %13164 = vmatpush3.bf16.msra.mxu0 %v13163_v2  ;;  %13196 = vmatpush3.bf16.msra.mxu1 %v13195_v34  ;;  %v9355_v2 = vld [vmem:[%s20861_s3 + $0x588] sm:$0xff]  ;;  %v13183_v34 = vpack.c.bf16 %v9255_v22, %v9254_v62  ;;  %v9313_v56 = vld [vmem:[%s20861_s3 + $0x438] sm:$0xff]  ;;  %v9362_v22 = vld [vmem:[%s20861_s3 + $0x5c0] sm:$0xff] }
 0x76e   : > { %13166 = vmatprep.subr.bf16.mxu0 %v13165_v5  ;;  %13198 = vmatprep.subr.bf16.mxu1 %v13197_v6  ;;  %v9307_v5 = vld [vmem:[%s20861_s3 + $0x408] sm:$0xff]  ;;  %v13217_v6 = vpack.c.bf16 %v9323_v16, %v9322_v0  ;;  %v13249_v38 = vpack.c.bf16 %v9355_v2, %v9354_v1  ;;  %v13231_v63 = vpack.c.bf16 %v9313_v56, %v9312_v55  ;;  %v9314_v16 = vld [vmem:[%s20861_s3 + $0x440] sm:$0xff]  ;;  %v9321_v41 = vld [vmem:[%s20861_s3 + $0x478] sm:$0xff] }
 0x76f   : > { %v13219_v13 = vpack.c.bf16 %v9307_v5, %v9306_v4  ;;  %v9331_v62 = vld [vmem:[%s20861_s3 + $0x4c8] sm:$0xff]  ;;  %v9332_v5 = vld [vmem:[%s20861_s3 + $0x4d0] sm:$0xff]  ;;  %v9372_v55 = vld [vmem:[%s20862_s4 + $0x400] sm:$0xff] }
 0x770   : > { %v9315_v1 = vld [vmem:[%s20861_s3 + $0x448] sm:$0xff] }
 0x771   : > { %13168 = vmatpush3.bf16.msra.mxu0 %v13167_v15  ;;  %13200 = vmatpush3.bf16.msra.mxu1 %v13199_v21  ;;  %v13251_v15 = vpack.c.bf16 %v9339_v8, %v9338_v7  ;;  %v9308_v21 = vld [vmem:[%s20861_s3 + $0x410] sm:$0xff]  ;;  %v9347_v4 = vld [vmem:[%s20861_s3 + $0x548] sm:$0xff]  ;;  %v9365_v7 = vld [vmem:[%s20861_s3 + $0x5d8] sm:$0xff]  ;;  %v13235_v8 = vpack.c.bf16 %v9315_v1, %v9314_v16 }
 0x772   : > { %13170 = vmatprep.subr.bf16.mxu0 %v13169_v33  ;;  %13202 = vmatprep.subr.bf16.mxu1 %v13201_v14  ;;  %v13253_v33 = vpack.c.bf16 %v9357_v12, %v9356_v11  ;;  %v9340_v14 = vld [vmem:[%s20861_s3 + $0x510] sm:$0xff]  ;;  %v9317_v11 = vld [vmem:[%s20861_s3 + $0x458] sm:$0xff]  ;;  %v9373_v56 = vld [vmem:[%s20862_s4 + $0x408] sm:$0xff] }
 0x773   : > { %v13255_v32 = vpack.c.bf16 %v9341_v19, %v9340_v14  ;;  %v9367_v14 = vld [vmem:[%s20861_s3 + $0x5e8] sm:$0xff]  ;;  %v13239_v19 = vpack.c.bf16 %v9317_v11, %v9316_v10  ;;  %v16842_v16 = vld [vmem:[%s15167_s25 + $0x38] sm:$0xff]  ;;  %v9396_v10 = vld [vmem:[%s20862_s4 + $0x4c0] sm:$0xff] }
 0x775   : > { %13172 = vmatpush3.bf16.msra.mxu0 %v13171_v18  ;;  %13204 = vmatpush3.bf16.msra.mxu1 %v13203_v31  ;;  %v14700_v18 = vld [vmem:[%s15031_s29 + $0x10] sm:$0xff]  ;;  %v13223_v31 = vpack.c.bf16 %v9309_v17, %v9308_v21  ;;  %v9349_v21 = vld [vmem:[%s20861_s3 + $0x558] sm:$0xff]  ;;  %v9334_v17 = vld [vmem:[%s20861_s3 + $0x4e0] sm:$0xff] }
 0x776   : > { %13174 = vmatprep.subr.bf16.mxu0 %v13173_v36  ;;  %13206 = vmatprep.subr.bf16.mxu1 %v13205_v37  ;;  %v9311_v36 = vld [vmem:[%s20861_s3 + $0x428] sm:$0xff]  ;;  %v13225_v37 = vpack.c.bf16 %v9327_v25, %v9326_v20  ;;  %v9318_v25 = vld [vmem:[%s20861_s3 + $0x460] sm:$0xff] }
 0x779   : > { %13176 = vmatpush3.bf16.msra.mxu0 %v13175_v44  ;;  %13208 = vmatpush3.bf16.msra.mxu1 %v13207_v46  ;;  %v9361_v44 = vld [vmem:[%s20861_s3 + $0x5b8] sm:$0xff]  ;;  %v14701_v46 = vld [vmem:[%s15031_s29 + $0x28] sm:$0xff] }
 0x77a   : > { %13178 = vmatprep.subr.bf16.mxu0 %v13177_v52  ;;  %13210 = vmatprep.subr.bf16.mxu1 %v13209_v53  ;;  %v14704_v52 = vld [vmem:[%s15031_s29 + $0x30] sm:$0xff]  ;;  %v13227_v53 = vpack.c.bf16 %v9311_v36, %v9310_v35  ;;  %v13261_v58 = vpack.c.bf16 %v9361_v44, %v9360_v42  ;;  %v9337_v35 = vld [vmem:[%s20861_s3 + $0x4f8] sm:$0xff] }
 0x77b   : > { %v9368_v36 = vld [vmem:[%s20861_s3 + $0x5f0] sm:$0xff] }
 0x77c   : > { %v9352_v44 = vld [vmem:[%s20861_s3 + $0x570] sm:$0xff] }
 0x77d   : > { %13180 = vmatpush3.bf16.msra.mxu0 %v13179_v60  ;;  %13212 = vmatpush3.bf16.msra.mxu1 %v13211_v61  ;;  %v9345_v60 = vld [vmem:[%s20861_s3 + $0x538] sm:$0xff]  ;;  %v9330_v61 = vld [vmem:[%s20861_s3 + $0x4c0] sm:$0xff] }
 0x77e   : > { %13182 = vmatprep.subr.bf16.mxu0 %v13181_v26  ;;  %13214 = vmatprep.subr.bf16.mxu1 %v13213_v49  ;;  %v9363_v26 = vld [vmem:[%s20861_s3 + $0x5c8] sm:$0xff]  ;;  %v13263_v0 = vpack.c.bf16 %v9345_v60, %v9344_v59  ;;  %v13233_v2 = vpack.c.bf16 %v9331_v62, %v9330_v61  ;;  %v13283_v59 = vpack.c.bf16 %v9373_v56, %v9372_v55  ;;  %v9374_v61 = vld [vmem:[%s20862_s4 + $0x410] sm:$0xff]  ;;  %v9375_v62 = vld [vmem:[%s20862_s4 + $0x418] sm:$0xff] }
 0x77f   : > { %v16714_v49 = vld [vmem:[%s15167_s25 + $0x8] sm:$0xff]  ;;  %v13287_v1 = vpack.c.bf16 %v9375_v62, %v9374_v61  ;;  %v9427_v61 = vld [vmem:[%s20862_s4 + $0x5b8] sm:$0xff] }
 0x780   : > { %v9425_v55 = vld [vmem:[%s20862_s4 + $0x5a8] sm:$0xff] }
 0x781   : > { %13184 = vmatpush3.bf16.msra.mxu0 %v13183_v34  ;;  %13216 = vmatpush3.bf16.msra.mxu1 %v13215_v3  ;;  %v13265_v34 = vpack.c.bf16 %v9363_v26, %v9362_v22  ;;  %v9346_v3 = vld [vmem:[%s20861_s3 + $0x540] sm:$0xff] }
 0x782   : > { %13218 = vmatprep.subr.bf16.mxu0 %v13217_v6  ;;  %13250 = vmatprep.subr.bf16.mxu1 %v13249_v38  ;;  %v9333_v6 = vld [vmem:[%s20861_s3 + $0x4d8] sm:$0xff]  ;;  %v9364_v38 = vld [vmem:[%s20861_s3 + $0x5d0] sm:$0xff]  ;;  %v13267_v9 = vpack.c.bf16 %v9347_v4, %v9346_v3  ;;  %v16830_v22 = vld [vmem:[%s15167_s25] sm:$0xff] }
 0x783   : > { %v13237_v12 = vpack.c.bf16 %v9333_v6, %v9332_v5  ;;  %v9392_v26 = vld [vmem:[%s20862_s4 + $0x4a0] sm:$0xff]  ;;  %v16853_v4 = vld [vmem:[%s15167_s25 + $0x30] sm:$0xff]  ;;  %v9395_v6 = vld [vmem:[%s20862_s4 + $0x4b8] sm:$0xff] }
 0x784   : > { %2637 = vmatmul.mubr.f32.vlgmr.msra.gmra.mrb[32].mxu0 %v14699_v30  ;;  %2712 = vmatmul.mubr.f32.vlgmr.msra.gmra.mrb[32].mxu1 %v14700_v18  ;;  %v9350_v18 = vld [vmem:[%s20861_s3 + $0x560] sm:$0xff]  ;;  %v9394_v5 = vld [vmem:[%s20862_s4 + $0x4b0] sm:$0xff] }
 0x785   : > { %13220 = vmatpush3.bf16.msra.mxu0 %v13219_v13  ;;  %13252 = vmatpush3.bf16.msra.mxu1 %v13251_v15  ;;  %v13269_v13 = vpack.c.bf16 %v9365_v7, %v9364_v38  ;;  %v9348_v15 = vld [vmem:[%s20861_s3 + $0x550] sm:$0xff]  ;;  %v14710_v3 = vld [vmem:[%s15167_s25 + $0x20] sm:$0xff]  ;;  %v13293_v7 = vpack.c.bf16 %v9395_v6, %v9394_v5  ;;  %v9431_v6 = vld [vmem:[%s20862_s4 + $0x5d8] sm:$0xff] }
 0x786   : > { %13222 = vmatprep.subr.bf16.mxu0 %v13221_v23  ;;  %13254 = vmatprep.subr.bf16.mxu1 %v13253_v33  ;;  %v9335_v23 = vld [vmem:[%s20861_s3 + $0x4e8] sm:$0xff]  ;;  %v9366_v33 = vld [vmem:[%s20861_s3 + $0x5e0] sm:$0xff]  ;;  %v13271_v20 = vpack.c.bf16 %v9349_v21, %v9348_v15  ;;  %v9398_v15 = vld [vmem:[%s20862_s4 + $0x4d0] sm:$0xff] }
 0x787   : > { %2641 = vmatprep.mubr.f32.mxu0 %v14701_v46  ;;  %2716 = vmatprep.mubr.f32.mxu1 %v14702_v50  ;;  %v13241_v29 = vpack.c.bf16 %v9335_v23, %v9334_v17  ;;  %v13273_v30 = vpack.c.bf16 %v9367_v14, %v9366_v33  ;;  %v9353_v46 = vld [vmem:[%s20861_s3 + $0x578] sm:$0xff]  ;;  %v9388_v50 = vld [vmem:[%s20862_s4 + $0x480] sm:$0xff]  ;;  %v9382_v33 = vld [vmem:[%s20862_s4 + $0x450] sm:$0xff] }
 0x788   : > { %2642 = vmatmul.mubr.f32.gmra.mrb[34].mxu0 %v14703_v51  ;;  %2717 = vmatmul.mubr.f32.gmra.mrb[34].mxu1 %v14704_v52  ;;  %v9389_v51 = vld [vmem:[%s20862_s4 + $0x488] sm:$0xff]  ;;  %v13247_v52 = vpack.c.bf16 %v9321_v41, %v9320_v40  ;;  %v9399_v21 = vld [vmem:[%s20862_s4 + $0x4d8] sm:$0xff]  ;;  %v9404_v41 = vld [vmem:[%s20862_s4 + $0x500] sm:$0xff] }
 0x789   : > { %13224 = vmatpush3.bf16.msra.mxu0 %v13223_v31  ;;  %13256 = vmatpush3.bf16.msra.mxu1 %v13255_v32  ;;  %v9351_v31 = vld [vmem:[%s20861_s3 + $0x568] sm:$0xff]  ;;  %v9336_v32 = vld [vmem:[%s20861_s3 + $0x4f0] sm:$0xff]  ;;  %v13301_v23 = vpack.c.bf16 %v9399_v21, %v9398_v15  ;;  %v9383_v14 = vld [vmem:[%s20862_s4 + $0x458] sm:$0xff] }
 0x78a   : > { %13226 = vmatprep.subr.bf16.mxu0 %v13225_v37  ;;  %13258 = vmatprep.subr.bf16.mxu1 %v13257_v48  ;;  %v9369_v37 = vld [vmem:[%s20861_s3 + $0x5f8] sm:$0xff]  ;;  %v13243_v48 = vpack.c.bf16 %v9319_v28, %v9318_v25  ;;  %v13275_v39 = vpack.c.bf16 %v9351_v31, %v9350_v18  ;;  %v13245_v24 = vpack.c.bf16 %v9337_v35, %v9336_v32  ;;  %v9402_v18 = vld [vmem:[%s20862_s4 + $0x4f0] sm:$0xff]  ;;  %v9421_v40 = vld [vmem:[%s20862_s4 + $0x588] sm:$0xff] }
 0x78b   : > { %2859 = vmatprep.mubr.f32.mxu0 %v16714_v49  ;;  %2934 = vmatprep.mubr.f32.mxu1 %v16718_v45  ;;  %v13277_v42 = vpack.c.bf16 %v9369_v37, %v9368_v36  ;;  %v13303_v25 = vpack.c.bf16 %v9383_v14, %v9382_v33  ;;  %v9403_v31 = vld [vmem:[%s20862_s4 + $0x4f8] sm:$0xff]  ;;  %v9386_v36 = vld [vmem:[%s20862_s4 + $0x470] sm:$0xff] }
 0x78c   : > { %v13309_v35 = vpack.c.bf16 %v9403_v31, %v9402_v18  ;;  %v9387_v37 = vld [vmem:[%s20862_s4 + $0x478] sm:$0xff]  ;;  %v9430_v5 = vld [vmem:[%s20862_s4 + $0x5d0] sm:$0xff] }
 0x78d   : > { %13228 = vmatpush3.bf16.msra.mxu0 %v13227_v53  ;;  %13260 = vmatpush3.bf16.msra.mxu1 %v13259_v54  ;;  %v13279_v53 = vpack.c.bf16 %v9353_v46, %v9352_v44  ;;  %v13281_v54 = vpack.c.bf16 %v9389_v51, %v9388_v50  ;;  %v9422_v44 = vld [vmem:[%s20862_s4 + $0x590] sm:$0xff]  ;;  %v9423_v50 = vld [vmem:[%s20862_s4 + $0x598] sm:$0xff] }
 0x78e   : > { %13230 = vmatprep.subr.bf16.mxu0 %v13229_v57  ;;  %13262 = vmatprep.subr.bf16.mxu1 %v13261_v58  ;;  %v9390_v57 = vld [vmem:[%s20862_s4 + $0x490] sm:$0xff]  ;;  %v9391_v58 = vld [vmem:[%s20862_s4 + $0x498] sm:$0xff] }
 0x78f   : > { %v13285_v60 = vpack.c.bf16 %v9391_v58, %v9390_v57  ;;  %v9406_v51 = vld [vmem:[%s20862_s4 + $0x510] sm:$0xff]  ;;  %v9408_v58 = vld [vmem:[%s20862_s4 + $0x520] sm:$0xff]  ;;  %v9419_v14 = vld [vmem:[%s20862_s4 + $0x578] sm:$0xff] }
 0x790   : > { %v9434_v21 = vld [vmem:[%s20862_s4 + $0x5f0] sm:$0xff] }
 0x791   : > { %13232 = vmatpush3.bf16.msra.mxu0 %v13231_v63  ;;  %13264 = vmatpush3.bf16.msra.mxu1 %v13263_v0  ;;  %v9393_v63 = vld [vmem:[%s20862_s4 + $0x4a8] sm:$0xff]  ;;  %v9418_v33 = vld [vmem:[%s20862_s4 + $0x570] sm:$0xff] }
 0x792   : > { %13234 = vmatprep.subr.bf16.mxu0 %v13233_v2  ;;  %13266 = vmatprep.subr.bf16.mxu1 %v13265_v34  ;;  %v14708_v0 = vld [vmem:[%s15167_s25 + $0x28] sm:$0xff]  ;;  %v13289_v2 = vpack.c.bf16 %v9393_v63, %v9392_v26  ;;  %v9410_v26 = vld [vmem:[%s20862_s4 + $0x530] sm:$0xff]  ;;  %v9411_v63 = vld [vmem:[%s20862_s4 + $0x538] sm:$0xff] }
 0x793   : > { %v9377_v34 = vld [vmem:[%s20862_s4 + $0x428] sm:$0xff] }
 0x795   : > { %13236 = vmatpush3.bf16.msra.mxu0 %v13235_v8  ;;  %13268 = vmatpush3.bf16.msra.mxu1 %v13267_v9  ;;  %v9378_v8 = vld [vmem:[%s20862_s4 + $0x430] sm:$0xff]  ;;  %v9379_v9 = vld [vmem:[%s20862_s4 + $0x438] sm:$0xff] }
 0x796   : > { %13238 = vmatprep.subr.bf16.mxu0 %v13237_v12  ;;  %13270 = vmatprep.subr.bf16.mxu1 %v13269_v13  ;;  %v9380_v12 = vld [vmem:[%s20862_s4 + $0x440] sm:$0xff]  ;;  %v9381_v13 = vld [vmem:[%s20862_s4 + $0x448] sm:$0xff] }
 0x797   : > { %v13299_v17 = vpack.c.bf16 %v9381_v13, %v9380_v12  ;;  %v9416_v12 = vld [vmem:[%s20862_s4 + $0x560] sm:$0xff]  ;;  %v9417_v13 = vld [vmem:[%s20862_s4 + $0x568] sm:$0xff] }
 0x798   : > { %v13339_v15 = vpack.c.bf16 %v9417_v13, %v9416_v12 }
 0x799   : > { %13240 = vmatpush3.bf16.msra.mxu0 %v13239_v19  ;;  %13272 = vmatpush3.bf16.msra.mxu1 %v13271_v20  ;;  %v9400_v19 = vld [vmem:[%s20862_s4 + $0x4e0] sm:$0xff]  ;;  %v9401_v20 = vld [vmem:[%s20862_s4 + $0x4e8] sm:$0xff] }
 0x79a   : > { %13242 = vmatprep.subr.bf16.mxu0 %v13241_v29  ;;  %13274 = vmatprep.subr.bf16.mxu1 %v13273_v30  ;;  %v13305_v28 = vpack.c.bf16 %v9401_v20, %v9400_v19  ;;  %v9384_v29 = vld [vmem:[%s20862_s4 + $0x460] sm:$0xff]  ;;  %v9385_v30 = vld [vmem:[%s20862_s4 + $0x468] sm:$0xff]  ;;  %v13343_v19 = vpack.c.bf16 %v9419_v14, %v9418_v33  ;;  %v17016_v20 = vld [vmem:[%s15167_s25 + $0x10] sm:$0xff] }
 0x79b   : > { %v13307_v32 = vpack.c.bf16 %v9385_v30, %v9384_v29  ;;  %v9305_v29 = vld [vmem:[%s20864_s6 + $0x2] ss:$0 sm:$0xff] }
 0x79d   : > { %13244 = vmatpush3.bf16.msra.mxu0 %v13243_v48  ;;  %13276 = vmatpush3.bf16.msra.mxu1 %v13275_v39  ;;  %v13311_v48 = vpack.c.bf16 %v9387_v37, %v9386_v36  ;;  %v9420_v39 = vld [vmem:[%s20862_s4 + $0x580] sm:$0xff] }
 0x79e   : > { %13246 = vmatprep.subr.bf16.mxu0 %v13245_v24  ;;  %13278 = vmatprep.subr.bf16.mxu1 %v13277_v42  ;;  %v13313_v24 = vpack.c.bf16 %v9421_v40, %v9420_v39  ;;  %v9405_v42 = vld [vmem:[%s20862_s4 + $0x508] sm:$0xff] }
 0x79f   : > { %v13315_v46 = vpack.c.bf16 %v9405_v42, %v9404_v41 }
 0x7a1   : > { %13248 = vmatpush3.bf16.msra.mxu0 %v13247_v52  ;;  %13280 = vmatpush3.bf16.msra.mxu1 %v13279_v53  ;;  %v9407_v52 = vld [vmem:[%s20862_s4 + $0x518] sm:$0xff]  ;;  %v13317_v53 = vpack.c.bf16 %v9423_v50, %v9422_v44 }
 0x7a2   : > { %13282 = vmatprep.subr.bf16.mxu0 %v13281_v54  ;;  %13314 = vmatprep.subr.bf16.mxu1 %v13313_v24  ;;  %v9424_v54 = vld [vmem:[%s20862_s4 + $0x5a0] sm:$0xff]  ;;  %v13319_v56 = vpack.c.bf16 %v9407_v52, %v9406_v51 }
 0x7a3   : > { %v13321_v57 = vpack.c.bf16 %v9425_v55, %v9424_v54 }
 0x7a4   : > { %2860 = vmatmul.mubr.f32.vlgmr.msra.gmra.mrb[36].mxu0 %v16830_v22  ;;  %2935 = vmatmul.mubr.f32.vlgmr.msra.gmra.mrb[36].mxu1 %v16161_v43  ;;  %v9376_v43 = vld [vmem:[%s20862_s4 + $0x420] sm:$0xff] }
 0x7a5   : > { %2864 = vmatprep.mubr.f32.mxu0 %v14708_v0  ;;  %2939 = vmatprep.mubr.f32.mxu1 %v16842_v16  ;;  %v13291_v38 = vpack.c.bf16 %v9377_v34, %v9376_v43  ;;  %v9412_v34 = vld [vmem:[%s20862_s4 + $0x540] sm:$0xff] }
 0x7a6   : > { %13284 = vmatpush3.bf16.msra.mxu0 %v13283_v59  ;;  %13316 = vmatpush3.bf16.msra.mxu1 %v13315_v46  ;;  %v9409_v59 = vld [vmem:[%s20862_s4 + $0x528] sm:$0xff]  ;;  %v9371_v46 = vld [vmem:[%s20865_s7 + $0x2] ss:$0 sm:$0xff] }
 0x7a7   : > { %13286 = vmatprep.subr.bf16.mxu0 %v13285_v60  ;;  %13318 = vmatprep.subr.bf16.mxu1 %v13317_v53  ;;  %v9426_v60 = vld [vmem:[%s20862_s4 + $0x5b0] sm:$0xff]  ;;  %v13323_v62 = vpack.c.bf16 %v9409_v59, %v9408_v58 }
 0x7a8   : > { %2865 = vmatmul.mubr.f32.gmra.mrb[38].mxu0 %v14710_v3  ;;  %2940 = vmatmul.mubr.f32.gmra.mrb[38].mxu1 %v16853_v4 }
 0x7a9   : > { %3082 = vmatprep.mubr.f32.mxu0 %v16714_v49  ;;  %3157 = vmatprep.mubr.f32.mxu1 %v16718_v45  ;;  %v9397_v49 = vld [vmem:[%s20862_s4 + $0x4c8] sm:$0xff]  ;;  %v13295_v45 = vpack.c.bf16 %v9379_v9, %v9378_v8  ;;  %v9414_v8 = vld [vmem:[%s20862_s4 + $0x550] sm:$0xff]  ;;  %v9415_v9 = vld [vmem:[%s20862_s4 + $0x558] sm:$0xff] }
 0x7aa   : > { %13288 = vmatpush3.bf16.msra.mxu0 %v13287_v1  ;;  %v13297_v11 = vpack.c.bf16 %v9397_v49, %v9396_v10  ;;  %13320 = vmatpush3.bf16.msra.mxu1 %v13319_v56  ;;  %v9429_v1 = vld [vmem:[%s20862_s4 + $0x5c8] sm:$0xff]  ;;  %v13335_v10 = vpack.c.bf16 %v9415_v9, %v9414_v8  ;;  %v9432_v49 = vld [vmem:[%s20862_s4 + $0x5e0] sm:$0xff] }
 0x7ab   : > { %13290 = vmatprep.subr.bf16.mxu0 %v13289_v2  ;;  %13322 = vmatprep.subr.bf16.mxu1 %v13321_v57  ;;  %v13327_v2 = vpack.c.bf16 %v9411_v63, %v9410_v26 }
 0x7ae   : > { %13292 = vmatpush3.bf16.msra.mxu0 %v13291_v38  ;;  %13324 = vmatpush3.bf16.msra.mxu1 %v13323_v62 }
 0x7af   : > { %13294 = vmatprep.subr.bf16.mxu0 %v13293_v7  ;;  %v13333_v7 = vpack.c.bf16 %v9431_v6, %v9430_v5 }
 0x7b2   : > { %13296 = vmatpush3.bf16.msra.mxu0 %v13295_v45  ;;  %v9433_v45 = vld [vmem:[%s20862_s4 + $0x5e8] sm:$0xff] }
 0x7b3   : > { %13298 = vmatprep.subr.bf16.mxu0 %v13297_v11  ;;  %v13337_v11 = vpack.c.bf16 %v9433_v45, %v9432_v49 }
 0x7b6   : > { %13300 = vmatpush3.bf16.msra.mxu0 %v13299_v17  ;;  %v9435_v17 = vld [vmem:[%s20862_s4 + $0x5f8] sm:$0xff] }
 0x7b7   : > { %13302 = vmatprep.subr.bf16.mxu0 %v13301_v23  ;;  %v13341_v23 = vpack.c.bf16 %v9435_v17, %v9434_v21 }
 0x7ba   : > { %13304 = vmatpush3.bf16.msra.mxu0 %v13303_v25 }
 0x7bb   : > { %13306 = vmatprep.subr.bf16.mxu0 %v13305_v28 }
 0x7be   : > { %13308 = vmatpush3.bf16.msra.mxu0 %v13307_v32 }
 0x7bf   : > { %13310 = vmatprep.subr.bf16.mxu0 %v13309_v35 }
 0x7c2   : > { %13312 = vmatpush3.bf16.msra.mxu0 %v13311_v48 }
 0x7c5   : > { %3083 = vmatmul.mubr.f32.vlgmr.msra.gmra.mrb[40].mxu0 %v16830_v22  ;;  %v13325_v22 = vpack.c.bf16 %v9427_v61, %v9426_v60 }
 0x7c6   : > { %3087 = vmatprep.mubr.f32.mxu0 %v14708_v0  ;;  %v9428_v0 = vld [vmem:[%s20862_s4 + $0x5c0] sm:$0xff] }
 0x7c7   : > { %13326 = vmatprep.subr.bf16.mxu1 %v13325_v22  ;;  %v13329_v43 = vpack.c.bf16 %v9429_v1, %v9428_v0 }
 0x7c8   : > { %13328 = vmatpush3.bf16.msra.mxu1 %v13327_v2 }
 0x7c9   : > { %3088 = vmatmul.mubr.f32.gmra.mrb[42].mxu0 %v14710_v3  ;;  %v9413_v3 = vld [vmem:[%s20862_s4 + $0x548] sm:$0xff]  ;;  %13330 = vmatprep.subr.bf16.mxu1 %v13329_v43 }
 0x7ca   : > { %v13331_v38 = vpack.c.bf16 %v9413_v3, %v9412_v34  ;;  %v9437_v3 = vld [vmem:[%s20866_s8 + $0x2] ss:$0 sm:$0xff] }
 0x7cc   : > { %13332 = vmatpush3.bf16.msra.mxu1 %v13331_v38 }
 0x7cd   : > { %13334 = vmatprep.subr.bf16.mxu1 %v13333_v7 }
 0x7d0   : > { %13336 = vmatpush3.bf16.msra.mxu1 %v13335_v10 }
 0x7d1   : > { %13338 = vmatprep.subr.bf16.mxu1 %v13337_v11 }
 0x7d4   : > { %13340 = vmatpush3.bf16.msra.mxu1 %v13339_v15 }
 0x7d5   : > { %13342 = vmatprep.subr.bf16.mxu1 %v13341_v23 }
 0x7d8   : > { %13344 = vmatpush3.bf16.msra.mxu1 %v13343_v19 }
 0x7db   : > { %3158 = vmatmul.mubr.f32.vlgmr.msra.gmra.mrb[40].mxu1 %v17016_v20 }
 0x7dc   : > { %3162 = vmatprep.mubr.f32.mxu1 %v16842_v16 }
 0x7df   : > { %3163 = vmatmul.mubr.f32.gmra.mrb[42].mxu1 %v16853_v4 }
 0x857   : > { %v11189_v25 = vpop.f32.mrb[32].mxu0  ;;  %v11227_v28 = vpop.f32.mrb[32].mxu1 }
 0x858   : > { %v11190_v30 = vpop.f32.mrb[33].mxu0  ;;  %v11228_v18 = vpop.f32.mrb[33].mxu1 }
 0x859   : > { %v11191_v31 = vadd.f32 %v11190_v30, %v11189_v25  ;;  %v11229_v32 = vadd.f32 %v11228_v18, %v11227_v28 }
 0x85b   : > { %v2639_v35 = vadd.f32 %v11191_v31, %v9305_v29  ;;  %v11192_v36 = vpop.f32.mrb[34].mxu0  ;;  %v11230_v37 = vpop.f32.mrb[34].mxu1 }
 0x85c   : > { %v11193_v48 = vpop.f32.mrb[35].mxu0  ;;  %v11231_v39 = vpop.f32.mrb[35].mxu1 }
 0x85d   : > { %v2714_v40 = vadd.f32 %v11229_v32, %v2639_v35  ;;  %v11194_v24 = vadd.f32 %v11193_v48, %v11192_v36  ;;  %v11232_v16 = vadd.f32 %v11231_v39, %v11230_v37  ;;  %v9445_v36 = vld [vmem:[%s20863_s5 + $0x208] sm:$0xff]  ;;  %v9444_v48 = vld [vmem:[%s20863_s5 + $0x200] sm:$0xff] }
 0x85e   : > { %v9449_v37 = vld [vmem:[%s20863_s5 + $0x228] sm:$0xff] }
 0x85f   : > { %12605 = vmatprep.mubr.msk.f32.mxu0 %vm1059_vm0, %v2714_v40  ;;  %v2644_v4 = vadd.f32 %v11194_v24, %v9305_v29  ;;  %v13355_v39 = vpack.c.bf16 %v9449_v37, %v9445_v36  ;;  %v9448_v40 = vld [vmem:[%s20863_s5 + $0x220] sm:$0xff]  ;;  %v9447_v24 = vld [vmem:[%s20863_s5 + $0x218] sm:$0xff]  ;;  %v9481_v36 = vld [vmem:[%s20860_s2 + $0x608] sm:$0xff] }
 0x860   : > { %v9512_v37 = vld [vmem:[%s20860_s2 + $0x700] sm:$0xff] }
 0x861   : > { %v2719_v41 = vadd.f32 %v11232_v16, %v2644_v4  ;;  %v9451_v16 = vld [vmem:[%s20863_s5 + $0x238] sm:$0xff]  ;;  %v13357_v4 = vpack.c.bf16 %v9448_v40, %v9444_v48  ;;  %v9513_v48 = vld [vmem:[%s20860_s2 + $0x708] sm:$0xff] }
 0x862   : > { %v9499_v40 = vld [vmem:[%s20860_s2 + $0x698] sm:$0xff] }
 0x877   : > { %v11265_v42 = vpop.f32.mrb[36].mxu0  ;;  %v11303_v44 = vpop.f32.mrb[36].mxu1 }
 0x878   : > { %v11266_v50 = vpop.f32.mrb[37].mxu0  ;;  %v11304_v51 = vpop.f32.mrb[37].mxu1 }
 0x879   : > { %v11267_v52 = vadd.f32 %v11266_v50, %v11265_v42  ;;  %v11305_v53 = vadd.f32 %v11304_v51, %v11303_v44  ;;  %v9453_v42 = vld [vmem:[%s20863_s5 + $0x248] sm:$0xff]  ;;  %v9456_v50 = vld [vmem:[%s20863_s5 + $0x260] sm:$0xff] }
 0x87a   : > { %v9457_v44 = vld [vmem:[%s20863_s5 + $0x268] sm:$0xff] }
 0x87b   : > { %v2862_v54 = vadd.f32 %v11267_v52, %v9371_v46  ;;  %v11268_v55 = vpop.f32.mrb[38].mxu0  ;;  %v11306_v56 = vpop.f32.mrb[38].mxu1  ;;  %v13359_v51 = vpack.c.bf16 %v9457_v44, %v9453_v42  ;;  %v9482_v42 = vld [vmem:[%s20860_s2 + $0x610] sm:$0xff]  ;;  %v9483_v44 = vld [vmem:[%s20860_s2 + $0x618] sm:$0xff] }
 0x87c   : > { %v11269_v57 = vpop.f32.mrb[39].mxu0  ;;  %v11307_v58 = vpop.f32.mrb[39].mxu1 }
 0x87d   : > { %v2937_v59 = vadd.f32 %v11305_v53, %v2862_v54  ;;  %v11270_v60 = vadd.f32 %v11269_v57, %v11268_v55  ;;  %v11308_v61 = vadd.f32 %v11307_v58, %v11306_v56  ;;  %v9461_v53 = vld [vmem:[%s20863_s5 + $0x288] sm:$0xff]  ;;  %v9460_v56 = vld [vmem:[%s20863_s5 + $0x280] sm:$0xff] }
 0x87e   : > { %v9465_v54 = vld [vmem:[%s20863_s5 + $0x2a8] sm:$0xff]  ;;  %v9464_v57 = vld [vmem:[%s20863_s5 + $0x2a0] sm:$0xff] }
 0x87f   : > { %v2867_v62 = vadd.f32 %v11270_v60, %v9371_v46  ;;  %v9452_v46 = vld [vmem:[%s20863_s5 + $0x240] sm:$0xff]  ;;  %v13363_v55 = vpack.c.bf16 %v9465_v54, %v9461_v53  ;;  %v13365_v58 = vpack.c.bf16 %v9464_v57, %v9460_v56  ;;  %v9473_v60 = vld [vmem:[%s20863_s5 + $0x2e8] sm:$0xff] }
 0x880   : > { %v13361_v52 = vpack.c.bf16 %v9456_v50, %v9452_v46  ;;  %v9514_v50 = vld [vmem:[%s20860_s2 + $0x710] sm:$0xff]  ;;  %v9501_v56 = vld [vmem:[%s20860_s2 + $0x6a8] sm:$0xff]  ;;  %v9532_v57 = vld [vmem:[%s20860_s2 + $0x7a0] sm:$0xff] }
 0x881   : > { %v2942_v22 = vadd.f32 %v11308_v61, %v2867_v62  ;;  %v9468_v61 = vld [vmem:[%s20863_s5 + $0x2c0] sm:$0xff] }
 0x883   : > { %v13345_v26 = vpack.c.bf16 %v2942_v22, %v2937_v59  ;;  %v9469_v59 = vld [vmem:[%s20863_s5 + $0x2c8] sm:$0xff]  ;;  %v9472_v22 = vld [vmem:[%s20863_s5 + $0x2e0] sm:$0xff] }
 0x884   : > { %v13367_v62 = vpack.c.bf16 %v9473_v60, %v9469_v59  ;;  %v13393_v59 = vpack.c.bf16 %v9483_v44, %v9482_v42  ;;  %v9541_v42 = vld [vmem:[%s20860_s2 + $0x7e8] sm:$0xff] }
 0x885   : > { %13347 = vmatprep.subr.msk.bf16.mxu0 %vm15534_vm1, %v13345_v26 }
 0x886   : > { %13350 = vmatpush3.bf16.xpose.msk.msra.mxu0 %vm15534_vm1, %v13345_v26  ;;  %v13369_v26 = vpack.c.bf16 %v9472_v22, %v9468_v61  ;;  %v9484_v61 = vld [vmem:[%s20860_s2 + $0x620] sm:$0xff] }
 0x887   : > { %13356 = vmatprep.subr.bf16.mxu0 %v13355_v39  ;;  %v9498_v39 = vld [vmem:[%s20860_s2 + $0x690] sm:$0xff] }
 0x888   : > { %v13391_v54 = vpack.c.bf16 %v9499_v40, %v9498_v39  ;;  %v9522_v40 = vld [vmem:[%s20860_s2 + $0x750] sm:$0xff] }
 0x88d   : > { %12606 = vmatmul.mubr.msk.f32.vlgmr.msra.gmra.mrb[44].mxu0 %vm1059_vm0, %v2719_v41  ;;  %v13371_v41 = vpack.c.bf16 %v9451_v16, %v9447_v24  ;;  %v9530_v24 = vld [vmem:[%s20860_s2 + $0x790] sm:$0xff]  ;;  %v9531_v16 = vld [vmem:[%s20860_s2 + $0x798] sm:$0xff] }
 0x88e   : > { %3463 = vmatprep.mubr.f32.mxu0 %v14801_v27  ;;  %13358 = vmatpush1.bf16.msra.mxu0 %v13357_v4 }
 0x88f   : > { %13360 = vmatprep.subr.bf16.mxu0 %v13359_v51  ;;  %v9515_v51 = vld [vmem:[%s20860_s2 + $0x718] sm:$0xff] }
 0x890   : > { %v13425_v60 = vpack.c.bf16 %v9515_v51, %v9514_v50  ;;  %v9492_v50 = vld [vmem:[%s20860_s2 + $0x660] sm:$0xff]  ;;  %v9493_v51 = vld [vmem:[%s20860_s2 + $0x668] sm:$0xff] }
 0x892   : > { %13362 = vmatpush1.bf16.msra.mxu0 %v13361_v52  ;;  %v9500_v52 = vld [vmem:[%s20860_s2 + $0x6a0] sm:$0xff] }
 0x893   : > { %13364 = vmatprep.subr.bf16.mxu0 %v13363_v55  ;;  %v13423_v55 = vpack.c.bf16 %v9531_v16, %v9530_v24  ;;  %v13395_v22 = vpack.c.bf16 %v9501_v56, %v9500_v52  ;;  %v9523_v24 = vld [vmem:[%s20860_s2 + $0x758] sm:$0xff]  ;;  %v9508_v16 = vld [vmem:[%s20860_s2 + $0x6e0] sm:$0xff]  ;;  %v9510_v56 = vld [vmem:[%s20860_s2 + $0x6f0] sm:$0xff] }
 0x896   : > { %13366 = vmatpush1.bf16.msra.mxu0 %v13365_v58  ;;  %v9533_v58 = vld [vmem:[%s20860_s2 + $0x7a8] sm:$0xff] }
 0x897   : > { %13368 = vmatprep.subr.bf16.mxu0 %v13367_v62  ;;  %v9485_v62 = vld [vmem:[%s20860_s2 + $0x628] sm:$0xff] }
 0x898   : > { %v11341_v63 = vpop.f32.mrb[40].mxu0 }
 0x899   : > { %v11342_v0 = vpop.f32.mrb[41].mxu0 }
 0x89a   : > { %v11343_v1 = vadd.f32 %v11342_v0, %v11341_v63  ;;  %13370 = vmatpush1.bf16.msra.mxu0 %v13369_v26  ;;  %v13427_v26 = vpack.c.bf16 %v9533_v58, %v9532_v57  ;;  %v9511_v57 = vld [vmem:[%s20860_s2 + $0x6f8] sm:$0xff]  ;;  %v9542_v58 = vld [vmem:[%s20860_s2 + $0x7f0] sm:$0xff] }
 0x89c   : > { %v11344_v2 = vpop.f32.mrb[42].mxu0  ;;  %v3085_v5 = vadd.f32 %v11343_v1, %v9437_v3  ;;  %v9446_v1 = vld [vmem:[%s20863_s5 + $0x210] sm:$0xff] }
 0x89d   : > { %v11345_v43 = vpop.f32.mrb[43].mxu0 }
 0x89e   : > { %v11346_v34 = vadd.f32 %v11345_v43, %v11344_v2  ;;  %v9450_v2 = vld [vmem:[%s20863_s5 + $0x230] sm:$0xff] }
 0x8a0   : > { %v3090_v8 = vadd.f32 %v11346_v34, %v9437_v3  ;;  %v9455_v34 = vld [vmem:[%s20863_s5 + $0x258] sm:$0xff] }
 0x8a1   : > { %v9459_v3 = vld [vmem:[%s20863_s5 + $0x278] sm:$0xff] }
 0x8ae   : > { %v11379_v6 = vpop.f32.mrb[40].mxu1 }
 0x8af   : > { %v11380_v38 = vpop.f32.mrb[41].mxu1 }
 0x8b0   : > { %v11381_v7 = vadd.f32 %v11380_v38, %v11379_v6  ;;  %v13373_v38 = vpack.c.bf16 %v9450_v2, %v9446_v1  ;;  %v9502_v1 = vld [vmem:[%s20860_s2 + $0x6b0] sm:$0xff]  ;;  %v9503_v2 = vld [vmem:[%s20860_s2 + $0x6b8] sm:$0xff] }
 0x8b2   : > { %v3160_v9 = vadd.f32 %v11381_v7, %v3085_v5  ;;  %v11382_v10 = vpop.f32.mrb[42].mxu1 }
 0x8b3   : > { %v11383_v49 = vpop.f32.mrb[43].mxu1 }
 0x8b4   : > { %v11384_v45 = vadd.f32 %v11383_v49, %v11382_v10  ;;  %v9458_v10 = vld [vmem:[%s20863_s5 + $0x270] sm:$0xff]  ;;  %v9463_v49 = vld [vmem:[%s20863_s5 + $0x298] sm:$0xff] }
 0x8b6   : > { %v3165_v11 = vadd.f32 %v11384_v45, %v3090_v8  ;;  %v13375_v8 = vpack.c.bf16 %v9459_v3, %v9455_v34  ;;  %v9467_v45 = vld [vmem:[%s20863_s5 + $0x2b8] sm:$0xff]  ;;  %v13397_v3 = vpack.c.bf16 %v9485_v62, %v9484_v61  ;;  %v9494_v62 = vld [vmem:[%s20860_s2 + $0x670] sm:$0xff] }
 0x8b7   : > { %v9535_v34 = vld [vmem:[%s20860_s2 + $0x7b8] sm:$0xff] }
 0x8b8   : > { %v13351_v12 = vpack.c.bf16 %v3165_v11, %v3160_v9  ;;  %v9454_v9 = vld [vmem:[%s20863_s5 + $0x250] sm:$0xff] }
 0x8b9   : > { %v13377_v11 = vpack.c.bf16 %v9458_v10, %v9454_v9  ;;  %v9518_v9 = vld [vmem:[%s20860_s2 + $0x730] sm:$0xff]  ;;  %v9519_v10 = vld [vmem:[%s20860_s2 + $0x738] sm:$0xff] }
 0x8ba   : > { %13352 = vmatprep.subr.bf16.mxu1 %v13351_v12 }
 0x8bb   : > { %13354 = vmatpush3.bf16.msra.mxu1 %v13351_v12  ;;  %v13379_v12 = vpack.c.bf16 %v9467_v45, %v9463_v49  ;;  %v9504_v49 = vld [vmem:[%s20860_s2 + $0x6c0] sm:$0xff]  ;;  %v9505_v45 = vld [vmem:[%s20860_s2 + $0x6c8] sm:$0xff] }
 0x8bc   : > { %13372 = vmatprep.subr.bf16.mxu1 %v13371_v41  ;;  %v13421_v41 = vpack.c.bf16 %v9513_v48, %v9512_v37  ;;  %v9491_v37 = vld [vmem:[%s20860_s2 + $0x658] sm:$0xff] }
 0x960   : > { %v12607_v13 = vpop.f32.mrb[44].mxu0 }
 0x961   : > { %v3256_v15 = vmul.f32 0.125, %v12607_v13  ;;  %v3246_v21 = vpop.f32.mrb[45].mxu0  ;;  %v9462_v13 = vld [vmem:[%s20863_s5 + $0x290] sm:$0xff] }
 0x962   : > { %v3255_v17 = vmul.f32 0.125, %v3246_v21  ;;  %v9471_v21 = vld [vmem:[%s20863_s5 + $0x2d8] sm:$0xff] }
 0x963   : > { %v3260_v23 = vsel %vm1149_vm2, %v3256_v15, -inf }
 0x964   : > { %3261 = vmax.xlane.f32.xlu1 %v3260_v23  ;;  %v3257_v33 = vsel %vm1149_vm2, %v3255_v17, -inf }
 0x965   : > { %3258 = vmax.xlane.f32.xlu0 %v3257_v33 }
 0x9f1   : > { %v3262_v14 = vpop.xlane.xlu1 %3261 }
 0x9f2   : > { %v3264_v19 = vsub.f32 %v3256_v15, %v3262_v14  ;;  %v3259_v25 = vpop.xlane.xlu0 %3258  ;;  %v9466_v15 = vld [vmem:[%s20863_s5 + $0x2b0] sm:$0xff] }
 0x9f3   : > { %v3263_v28 = vsub.f32 %v3255_v17, %v3259_v25  ;;  %v9475_v17 = vld [vmem:[%s20863_s5 + $0x2f8] sm:$0xff]  ;;  %v13381_v23 = vpack.c.bf16 %v9466_v15, %v9462_v13  ;;  %v9470_v14 = vld [vmem:[%s20863_s5 + $0x2d0] sm:$0xff]  ;;  %v14713_v13 = vld [vmem:[%s15031_s29 + $0x8] sm:$0xff] }
 0x9f4   : > { %v3267_v29 = vmul.f32 1.442695, %v3264_v19  ;;  %v13383_v33 = vpack.c.bf16 %v9475_v17, %v9471_v21  ;;  %v9474_v19 = vld [vmem:[%s20863_s5 + $0x2f0] sm:$0xff]  ;;  %v14714_v15 = vld [vmem:[%s15031_s29 + $0x18] sm:$0xff]  ;;  %v13433_v17 = vpack.c.bf16 %v9519_v10, %v9518_v9  ;;  %v9578_v10 = vld [vmem:[%s20861_s3 + $0x700] sm:$0xff] }
 0x9f5   : > { %v3265_v30 = vmul.f32 1.442695, %v3263_v28  ;;  %v13385_v25 = vpack.c.bf16 %v9474_v19, %v9470_v14  ;;  %v9496_v28 = vld [vmem:[%s20860_s2 + $0x680] sm:$0xff]  ;;  %v13403_v14 = vpack.c.bf16 %v9505_v45, %v9504_v49  ;;  %v9579_v49 = vld [vmem:[%s20861_s3 + $0x708] sm:$0xff]  ;;  %v9564_v45 = vld [vmem:[%s20861_s3 + $0x690] sm:$0xff] }
 0x9f6   : > { %14638 = vpow2.f32 %v3267_v29  ;;  %v9497_v29 = vld [vmem:[%s20860_s2 + $0x688] sm:$0xff] }
 0x9f7   : > { %14640 = vpow2.f32 %v3265_v30  ;;  %v13387_v30 = vpack.c.bf16 %v9497_v29, %v9496_v28  ;;  %v9521_v28 = vld [vmem:[%s20860_s2 + $0x748] sm:$0xff]  ;;  %v9506_v29 = vld [vmem:[%s20860_s2 + $0x6d0] sm:$0xff] }
 0x9f9   : > { %13388 = vmatprep.subr.bf16.mxu0 %v13387_v30  ;;  %v9507_v30 = vld [vmem:[%s20860_s2 + $0x6d8] sm:$0xff] }
 0x9fa   : > { %v13407_v48 = vpack.c.bf16 %v9507_v30, %v9506_v29  ;;  %v9567_v29 = vld [vmem:[%s20861_s3 + $0x6a8] sm:$0xff]  ;;  %v9598_v30 = vld [vmem:[%s20861_s3 + $0x7a0] sm:$0xff] }
 0xa00   : > { %v14639_v18 = vpop.eup %14638 }
 0xa01   : > { %v14641_v31 = vpop.eup %14640  ;;  %v3272_v32 = vsel %vm1149_vm2, %v14639_v18, 0.0 }
 0xa02   : > { %3273 = vadd.xlane.f32.xlu1 %v3272_v32  ;;  %v3269_v35 = vsel %vm1149_vm2, %v14641_v31, 0.0 }
 0xa03   : > { %3270 = vadd.xlane.f32.xlu0 %v3269_v35  ;;  %v9480_v35 = vld [vmem:[%s20860_s2 + $0x600] sm:$0xff] }
 0xa04   : > { %v13389_v4 = vpack.c.bf16 %v9481_v36, %v9480_v35  ;;  %v9490_v36 = vld [vmem:[%s20860_s2 + $0x650] sm:$0xff] }
 0xa05   : > { %v13409_v44 = vpack.c.bf16 %v9491_v37, %v9490_v36  ;;  %v9550_v37 = vld [vmem:[%s20861_s3 + $0x620] sm:$0xff] }
 0xa8f   : > { %v3274_v63 = vpop.xlane.xlu1 %3273 }
 0xa90   : > { %14642 = vrcp.f32 %v3274_v63  ;;  %v3271_v0 = vpop.xlane.xlu0 %3270  ;;  %v9516_v63 = vld [vmem:[%s20860_s2 + $0x720] sm:$0xff] }
 0xa91   : > { %14644 = vrcp.f32 %v3271_v0  ;;  %v9517_v0 = vld [vmem:[%s20860_s2 + $0x728] sm:$0xff] }
 0xa9a   : > { %v14643_v43 = vpop.eup %14642 }
 0xa9b   : > { %v14645_v5 = vpop.eup %14644  ;;  %v3278_v7 = vmul.f32 %v14643_v43, %v14639_v18  ;;  %v9528_v18 = vld [vmem:[%s20860_s2 + $0x780] sm:$0xff]  ;;  %v9534_v43 = vld [vmem:[%s20860_s2 + $0x7b0] sm:$0xff] }
 0xa9c   : > { %v3277_v6 = vmul.f32 %v14645_v5, %v14641_v31  ;;  %v9529_v31 = vld [vmem:[%s20860_s2 + $0x788] sm:$0xff]  ;;  %v13429_v5 = vpack.c.bf16 %v9517_v0, %v9516_v63  ;;  %v9526_v0 = vld [vmem:[%s20860_s2 + $0x770] sm:$0xff] }
 0xa9d   : > { %v13419_v32 = vpack.c.bf16 %v9529_v31, %v9528_v18  ;;  %v9538_v18 = vld [vmem:[%s20860_s2 + $0x7d0] sm:$0xff]  ;;  %v9539_v31 = vld [vmem:[%s20860_s2 + $0x7d8] sm:$0xff] }
 0xa9e   : > { %12612 = vmatprep.mubr.msk.f32.mxu1 %vm1149_vm2, %v3277_v6  ;;  %v9486_v6 = vld [vmem:[%s20860_s2 + $0x630] sm:$0xff]  ;;  %v13439_v39 = vpack.c.bf16 %v9539_v31, %v9538_v18  ;;  %v9599_v18 = vld [vmem:[%s20861_s3 + $0x7a8] sm:$0xff]  ;;  %v14715_v31 = vld [vmem:[%s15031_s29] sm:$0xff] }
 0xa9f   : > { %12613 = vmatmul.mubr.msk.f32.vlgmr.msra.gmra.mrb[44].mxu1 %vm1149_vm2, %v3278_v7  ;;  %v13399_v7 = vpack.c.bf16 %v9503_v2, %v9502_v1  ;;  %v9527_v1 = vld [vmem:[%s20860_s2 + $0x778] sm:$0xff]  ;;  %v9562_v2 = vld [vmem:[%s20861_s3 + $0x680] sm:$0xff] }
 0xaa0   : > { %13374 = vmatpush1.bf16.msra.mxu1 %v13373_v38  ;;  %3540 = vmatprep.mubr.f32.mxu1 %v14801_v27  ;;  %v9487_v38 = vld [vmem:[%s20860_s2 + $0x638] sm:$0xff] }
 0xaa1   : > { %13376 = vmatprep.subr.bf16.mxu1 %v13375_v8  ;;  %v13431_v8 = vpack.c.bf16 %v9535_v34, %v9534_v43  ;;  %v13401_v21 = vpack.c.bf16 %v9487_v38, %v9486_v6  ;;  %v9563_v43 = vld [vmem:[%s20861_s3 + $0x688] sm:$0xff]  ;;  %v9594_v34 = vld [vmem:[%s20861_s3 + $0x780] sm:$0xff]  ;;  %v13449_v6 = vpack.c.bf16 %v9527_v1, %v9526_v0  ;;  %v17459_v0 = vld [vmem:[%s15167_s25 + $0x18] sm:$0xff] }
 0xaa2   : > { %v9546_v38 = vld [vmem:[%s20861_s3 + $0x600] sm:$0xff] }
 0xaa4   : > { %13378 = vmatpush1.bf16.msra.mxu1 %v13377_v11  ;;  %v9536_v11 = vld [vmem:[%s20860_s2 + $0x7c0] sm:$0xff] }
 0xaa5   : > { %13380 = vmatprep.subr.bf16.mxu1 %v13379_v12  ;;  %v9537_v12 = vld [vmem:[%s20860_s2 + $0x7c8] sm:$0xff] }
 0xaa6   : > { %v13435_v19 = vpack.c.bf16 %v9537_v12, %v9536_v11  ;;  %v9565_v11 = vld [vmem:[%s20861_s3 + $0x698] sm:$0xff]  ;;  %v9596_v12 = vld [vmem:[%s20861_s3 + $0x790] sm:$0xff] }
 0xaa8   : > { %13382 = vmatpush1.bf16.msra.mxu1 %v13381_v23  ;;  %v9488_v23 = vld [vmem:[%s20860_s2 + $0x640] sm:$0xff] }
 0xaa9   : > { %13384 = vmatprep.subr.bf16.mxu1 %v13383_v33  ;;  %v9489_v33 = vld [vmem:[%s20860_s2 + $0x648] sm:$0xff] }
 0xaac   : > { %13386 = vmatpush1.bf16.msra.mxu1 %v13385_v25  ;;  %v9520_v25 = vld [vmem:[%s20860_s2 + $0x740] sm:$0xff] }
 0xaad   : > { %13420 = vmatprep.subr.bf16.mxu1 %v13419_v32  ;;  %v13405_v32 = vpack.c.bf16 %v9489_v33, %v9488_v23  ;;  %v13437_v35 = vpack.c.bf16 %v9521_v28, %v9520_v25  ;;  %v9549_v23 = vld [vmem:[%s20861_s3 + $0x618] sm:$0xff]  ;;  %v13455_v33 = vpack.c.bf16 %v9565_v11, %v9564_v45  ;;  %v9566_v28 = vld [vmem:[%s20861_s3 + $0x6a0] sm:$0xff]  ;;  %v9556_v11 = vld [vmem:[%s20861_s3 + $0x650] sm:$0xff] }
 0xaae   : > { %v9581_v25 = vld [vmem:[%s20861_s3 + $0x718] sm:$0xff] }
 0xb72   : > { %v12614_v46 = vpop.f32.mrb[44].mxu1 }
 0xb73   : > { %v3351_v53 = vpop.f32.mrb[45].mxu1 }
 0xb74   : > { %9476 = vmatmul.mubr.msk.f32.vlgmr.msra.gmra.mrb[28].mxu0 %vm1059_vm0, %v3351_v53  ;;  %9478 = vmatmul.mubr.msk.f32.vlgmr.msra.gmra.mrb[28].mxu1 %vm1059_vm0, %v3351_v53 }
 0xb75   : > { %13390 = vmatpush3.bf16.msra.mxu0 %v13389_v4  ;;  %13422 = vmatpush3.bf16.msra.mxu1 %v13421_v41  ;;  %v9509_v4 = vld [vmem:[%s20860_s2 + $0x6e8] sm:$0xff]  ;;  %v9540_v41 = vld [vmem:[%s20860_s2 + $0x7e0] sm:$0xff] }
 0xb76   : > { %3469 = vmatprep.mubr.f32.mxu0 %v14801_v27  ;;  %3546 = vmatprep.mubr.f32.mxu1 %v14801_v27  ;;  %v13411_v52 = vpack.c.bf16 %v9509_v4, %v9508_v16  ;;  %v13443_v53 = vpack.c.bf16 %v9541_v42, %v9540_v41  ;;  %v9583_v16 = vld [vmem:[%s20861_s3 + $0x728] sm:$0xff]  ;;  %v9568_v4 = vld [vmem:[%s20861_s3 + $0x6b0] sm:$0xff]  ;;  %v9569_v41 = vld [vmem:[%s20861_s3 + $0x6b8] sm:$0xff] }
 0xb77   : > { %13392 = vmatprep.subr.bf16.mxu0 %v13391_v54  ;;  %13424 = vmatprep.subr.bf16.mxu1 %v13423_v55  ;;  %v9524_v54 = vld [vmem:[%s20860_s2 + $0x760] sm:$0xff]  ;;  %v9525_v55 = vld [vmem:[%s20860_s2 + $0x768] sm:$0xff]  ;;  %v9600_v42 = vld [vmem:[%s20861_s3 + $0x7b0] sm:$0xff] }
 0xb78   : > { %9477 = vmatmul.mubr.msk.f32.gmra.mrb[30].mxu0 %vm1059_vm0, %v12614_v46  ;;  %9479 = vmatmul.mubr.msk.f32.gmra.mrb[30].mxu1 %vm1059_vm0, %v12614_v46  ;;  %v13441_v46 = vpack.c.bf16 %v9523_v24, %v9522_v40  ;;  %v13445_v61 = vpack.c.bf16 %v9525_v55, %v9524_v54  ;;  %v13491_v40 = vpack.c.bf16 %v9599_v18, %v9598_v30  ;;  %v9582_v24 = vld [vmem:[%s20861_s3 + $0x720] sm:$0xff]  ;;  %v9552_v55 = vld [vmem:[%s20861_s3 + $0x630] sm:$0xff]  ;;  %v9559_v30 = vld [vmem:[%s20861_s3 + $0x668] sm:$0xff] }
 0xb79   : > { %13394 = vmatpush3.bf16.msra.mxu0 %v13393_v59  ;;  %13426 = vmatpush3.bf16.msra.mxu1 %v13425_v60  ;;  %v9543_v59 = vld [vmem:[%s20860_s2 + $0x7f8] sm:$0xff]  ;;  %v13413_v60 = vpack.c.bf16 %v9493_v51, %v9492_v50  ;;  %v14719_v51 = vld [vmem:[%s15031_s29 + $0x20] sm:$0xff]  ;;  %v13493_v54 = vpack.c.bf16 %v9583_v16, %v9582_v24  ;;  %v9560_v16 = vld [vmem:[%s20861_s3 + $0x670] sm:$0xff] }
 0xb7a   : > { %13396 = vmatprep.subr.bf16.mxu0 %v13395_v22  ;;  %13428 = vmatprep.subr.bf16.mxu1 %v13427_v26  ;;  %v9495_v22 = vld [vmem:[%s20860_s2 + $0x678] sm:$0xff]  ;;  %v13415_v26 = vpack.c.bf16 %v9511_v57, %v9510_v56  ;;  %v13447_v63 = vpack.c.bf16 %v9543_v59, %v9542_v58  ;;  %v13463_v57 = vpack.c.bf16 %v9569_v41, %v9568_v4  ;;  %v9584_v59 = vld [vmem:[%s20861_s3 + $0x730] sm:$0xff] }
 0xb7b   : > { %3698 = vmatprep.mubr.f32.mxu0 %v14713_v13  ;;  %3773 = vmatprep.mubr.f32.mxu1 %v14714_v15  ;;  %v9597_v13 = vld [vmem:[%s20861_s3 + $0x798] sm:$0xff] }
 0xb7c   : > { %v14718_v50 = vld [vmem:[%s15031_s29 + $0x38] sm:$0xff] }
 0xb7d   : > { %13398 = vmatpush3.bf16.msra.mxu0 %v13397_v3  ;;  %13430 = vmatpush3.bf16.msra.mxu1 %v13429_v5  ;;  %v9595_v3 = vld [vmem:[%s20861_s3 + $0x788] sm:$0xff]  ;;  %v13417_v5 = vpack.c.bf16 %v9495_v22, %v9494_v62  ;;  %v9553_v56 = vld [vmem:[%s20861_s3 + $0x638] sm:$0xff]  ;;  %v9602_v22 = vld [vmem:[%s20861_s3 + $0x7c0] sm:$0xff] }
 0xb7e   : > { %13400 = vmatprep.subr.bf16.mxu0 %v13399_v7  ;;  %13432 = vmatprep.subr.bf16.mxu1 %v13431_v8  ;;  %v9547_v7 = vld [vmem:[%s20861_s3 + $0x608] sm:$0xff]  ;;  %v13451_v8 = vpack.c.bf16 %v9563_v43, %v9562_v2  ;;  %v13483_v9 = vpack.c.bf16 %v9595_v3, %v9594_v34  ;;  %v13465_v1 = vpack.c.bf16 %v9553_v56, %v9552_v55  ;;  %v9554_v43 = vld [vmem:[%s20861_s3 + $0x640] sm:$0xff]  ;;  %v9561_v41 = vld [vmem:[%s20861_s3 + $0x678] sm:$0xff] }
 0xb7f   : > { %v13453_v15 = vpack.c.bf16 %v9547_v7, %v9546_v38  ;;  %v9571_v62 = vld [vmem:[%s20861_s3 + $0x6c8] sm:$0xff]  ;;  %v9572_v7 = vld [vmem:[%s20861_s3 + $0x6d0] sm:$0xff]  ;;  %v9612_v55 = vld [vmem:[%s20862_s4 + $0x600] sm:$0xff] }
 0xb80   : > { %v9555_v34 = vld [vmem:[%s20861_s3 + $0x648] sm:$0xff] }
 0xb81   : > { %13402 = vmatpush3.bf16.msra.mxu0 %v13401_v21  ;;  %13434 = vmatpush3.bf16.msra.mxu1 %v13433_v17  ;;  %v13485_v21 = vpack.c.bf16 %v9579_v49, %v9578_v10  ;;  %v9548_v17 = vld [vmem:[%s20861_s3 + $0x610] sm:$0xff]  ;;  %v9587_v38 = vld [vmem:[%s20861_s3 + $0x748] sm:$0xff]  ;;  %v9605_v10 = vld [vmem:[%s20861_s3 + $0x7d8] sm:$0xff]  ;;  %v13469_v49 = vpack.c.bf16 %v9555_v34, %v9554_v43 }
 0xb82   : > { %13404 = vmatprep.subr.bf16.mxu0 %v13403_v14  ;;  %13436 = vmatprep.subr.bf16.mxu1 %v13435_v19  ;;  %v13487_v14 = vpack.c.bf16 %v9597_v13, %v9596_v12  ;;  %v9580_v19 = vld [vmem:[%s20861_s3 + $0x710] sm:$0xff]  ;;  %v9557_v12 = vld [vmem:[%s20861_s3 + $0x658] sm:$0xff]  ;;  %v9613_v56 = vld [vmem:[%s20862_s4 + $0x608] sm:$0xff] }
 0xb83   : > { %v13489_v36 = vpack.c.bf16 %v9581_v25, %v9580_v19  ;;  %v9607_v19 = vld [vmem:[%s20861_s3 + $0x7e8] sm:$0xff]  ;;  %v13473_v25 = vpack.c.bf16 %v9557_v12, %v9556_v11  ;;  %v17583_v43 = vld [vmem:[%s15167_s25 + $0x38] sm:$0xff]  ;;  %v9636_v11 = vld [vmem:[%s20862_s4 + $0x6c0] sm:$0xff] }
 0xb85   : > { %13406 = vmatpush3.bf16.msra.mxu0 %v13405_v32  ;;  %13438 = vmatpush3.bf16.msra.mxu1 %v13437_v35  ;;  %v14716_v32 = vld [vmem:[%s15031_s29 + $0x10] sm:$0xff]  ;;  %v13457_v35 = vpack.c.bf16 %v9549_v23, %v9548_v17  ;;  %v9589_v17 = vld [vmem:[%s20861_s3 + $0x758] sm:$0xff]  ;;  %v9574_v23 = vld [vmem:[%s20861_s3 + $0x6e0] sm:$0xff] }
 0xb86   : > { %13408 = vmatprep.subr.bf16.mxu0 %v13407_v48  ;;  %13440 = vmatprep.subr.bf16.mxu1 %v13439_v39  ;;  %v9551_v48 = vld [vmem:[%s20861_s3 + $0x628] sm:$0xff]  ;;  %v13459_v39 = vpack.c.bf16 %v9567_v29, %v9566_v28  ;;  %v9558_v29 = vld [vmem:[%s20861_s3 + $0x660] sm:$0xff] }
 0xb89   : > { %13410 = vmatpush3.bf16.msra.mxu0 %v13409_v44  ;;  %13442 = vmatpush3.bf16.msra.mxu1 %v13441_v46  ;;  %v9601_v44 = vld [vmem:[%s20861_s3 + $0x7b8] sm:$0xff]  ;;  %v14717_v46 = vld [vmem:[%s15031_s29 + $0x28] sm:$0xff] }
 0xb8a   : > { %13412 = vmatprep.subr.bf16.mxu0 %v13411_v52  ;;  %13444 = vmatprep.subr.bf16.mxu1 %v13443_v53  ;;  %v14720_v52 = vld [vmem:[%s15031_s29 + $0x30] sm:$0xff]  ;;  %v13461_v53 = vpack.c.bf16 %v9551_v48, %v9550_v37  ;;  %v13495_v58 = vpack.c.bf16 %v9601_v44, %v9600_v42  ;;  %v9577_v37 = vld [vmem:[%s20861_s3 + $0x6f8] sm:$0xff] }
 0xb8b   : > { %v9608_v48 = vld [vmem:[%s20861_s3 + $0x7f0] sm:$0xff] }
 0xb8c   : > { %v9592_v44 = vld [vmem:[%s20861_s3 + $0x770] sm:$0xff] }
 0xb8d   : > { %13414 = vmatpush3.bf16.msra.mxu0 %v13413_v60  ;;  %13446 = vmatpush3.bf16.msra.mxu1 %v13445_v61  ;;  %v9585_v60 = vld [vmem:[%s20861_s3 + $0x738] sm:$0xff]  ;;  %v9570_v61 = vld [vmem:[%s20861_s3 + $0x6c0] sm:$0xff] }
 0xb8e   : > { %13416 = vmatprep.subr.bf16.mxu0 %v13415_v26  ;;  %13448 = vmatprep.subr.bf16.mxu1 %v13447_v63  ;;  %v9603_v26 = vld [vmem:[%s20861_s3 + $0x7c8] sm:$0xff]  ;;  %v13497_v2 = vpack.c.bf16 %v9585_v60, %v9584_v59  ;;  %v13467_v3 = vpack.c.bf16 %v9571_v62, %v9570_v61  ;;  %v13517_v59 = vpack.c.bf16 %v9613_v56, %v9612_v55  ;;  %v9614_v61 = vld [vmem:[%s20862_s4 + $0x610] sm:$0xff]  ;;  %v9615_v62 = vld [vmem:[%s20862_s4 + $0x618] sm:$0xff] }
 0xb8f   : > { %v17455_v63 = vld [vmem:[%s15167_s25 + $0x8] sm:$0xff]  ;;  %v13521_v34 = vpack.c.bf16 %v9615_v62, %v9614_v61  ;;  %v9667_v61 = vld [vmem:[%s20862_s4 + $0x7b8] sm:$0xff] }
 0xb90   : > { %v9665_v55 = vld [vmem:[%s20862_s4 + $0x7a8] sm:$0xff] }
 0xb91   : > { %13418 = vmatpush3.bf16.msra.mxu0 %v13417_v5  ;;  %13450 = vmatpush3.bf16.msra.mxu1 %v13449_v6  ;;  %v13499_v5 = vpack.c.bf16 %v9603_v26, %v9602_v22  ;;  %v9586_v6 = vld [vmem:[%s20861_s3 + $0x740] sm:$0xff] }
 0xb92   : > { %13452 = vmatprep.subr.bf16.mxu0 %v13451_v8  ;;  %13484 = vmatprep.subr.bf16.mxu1 %v13483_v9  ;;  %v9573_v8 = vld [vmem:[%s20861_s3 + $0x6d8] sm:$0xff]  ;;  %v9604_v9 = vld [vmem:[%s20861_s3 + $0x7d0] sm:$0xff]  ;;  %v13501_v45 = vpack.c.bf16 %v9587_v38, %v9586_v6  ;;  %v17571_v22 = vld [vmem:[%s15167_s25] sm:$0xff] }
 0xb93   : > { %v13471_v13 = vpack.c.bf16 %v9573_v8, %v9572_v7  ;;  %v9632_v26 = vld [vmem:[%s20862_s4 + $0x6a0] sm:$0xff]  ;;  %v17594_v38 = vld [vmem:[%s15167_s25 + $0x30] sm:$0xff]  ;;  %v9635_v8 = vld [vmem:[%s20862_s4 + $0x6b8] sm:$0xff] }
 0xb94   : > { %3699 = vmatmul.mubr.f32.vlgmr.msra.gmra.mrb[46].mxu0 %v14715_v31  ;;  %3774 = vmatmul.mubr.f32.vlgmr.msra.gmra.mrb[46].mxu1 %v14716_v32  ;;  %v9590_v32 = vld [vmem:[%s20861_s3 + $0x760] sm:$0xff]  ;;  %v9634_v7 = vld [vmem:[%s20862_s4 + $0x6b0] sm:$0xff] }
 0xb95   : > { %13454 = vmatpush3.bf16.msra.mxu0 %v13453_v15  ;;  %13486 = vmatpush3.bf16.msra.mxu1 %v13485_v21  ;;  %v13503_v15 = vpack.c.bf16 %v9605_v10, %v9604_v9  ;;  %v9588_v21 = vld [vmem:[%s20861_s3 + $0x750] sm:$0xff]  ;;  %v14726_v6 = vld [vmem:[%s15167_s25 + $0x20] sm:$0xff]  ;;  %v13527_v10 = vpack.c.bf16 %v9635_v8, %v9634_v7  ;;  %v9671_v8 = vld [vmem:[%s20862_s4 + $0x7d8] sm:$0xff] }
 0xb96   : > { %13456 = vmatprep.subr.bf16.mxu0 %v13455_v33  ;;  %13488 = vmatprep.subr.bf16.mxu1 %v13487_v14  ;;  %v9575_v33 = vld [vmem:[%s20861_s3 + $0x6e8] sm:$0xff]  ;;  %v9606_v14 = vld [vmem:[%s20861_s3 + $0x7e0] sm:$0xff]  ;;  %v13505_v28 = vpack.c.bf16 %v9589_v17, %v9588_v21  ;;  %v9638_v21 = vld [vmem:[%s20862_s4 + $0x6d0] sm:$0xff] }
 0xb97   : > { %3703 = vmatprep.mubr.f32.mxu0 %v14717_v46  ;;  %3778 = vmatprep.mubr.f32.mxu1 %v14718_v50  ;;  %v13475_v18 = vpack.c.bf16 %v9575_v33, %v9574_v23  ;;  %v13507_v31 = vpack.c.bf16 %v9607_v19, %v9606_v14  ;;  %v9593_v46 = vld [vmem:[%s20861_s3 + $0x778] sm:$0xff]  ;;  %v9628_v50 = vld [vmem:[%s20862_s4 + $0x680] sm:$0xff]  ;;  %v9622_v14 = vld [vmem:[%s20862_s4 + $0x650] sm:$0xff] }
 0xb98   : > { %3704 = vmatmul.mubr.f32.gmra.mrb[48].mxu0 %v14719_v51  ;;  %3779 = vmatmul.mubr.f32.gmra.mrb[48].mxu1 %v14720_v52  ;;  %v9629_v51 = vld [vmem:[%s20862_s4 + $0x688] sm:$0xff]  ;;  %v13481_v52 = vpack.c.bf16 %v9561_v41, %v9560_v16  ;;  %v9639_v17 = vld [vmem:[%s20862_s4 + $0x6d8] sm:$0xff]  ;;  %v9644_v41 = vld [vmem:[%s20862_s4 + $0x700] sm:$0xff] }
 0xb99   : > { %13458 = vmatpush3.bf16.msra.mxu0 %v13457_v35  ;;  %13490 = vmatpush3.bf16.msra.mxu1 %v13489_v36  ;;  %v9591_v35 = vld [vmem:[%s20861_s3 + $0x768] sm:$0xff]  ;;  %v9576_v36 = vld [vmem:[%s20861_s3 + $0x6f0] sm:$0xff]  ;;  %v13535_v33 = vpack.c.bf16 %v9639_v17, %v9638_v21  ;;  %v9623_v19 = vld [vmem:[%s20862_s4 + $0x658] sm:$0xff] }
 0xb9a   : > { %13460 = vmatprep.subr.bf16.mxu0 %v13459_v39  ;;  %13492 = vmatprep.subr.bf16.mxu1 %v13491_v40  ;;  %v9609_v39 = vld [vmem:[%s20861_s3 + $0x7f8] sm:$0xff]  ;;  %v13477_v40 = vpack.c.bf16 %v9559_v30, %v9558_v29  ;;  %v13509_v24 = vpack.c.bf16 %v9591_v35, %v9590_v32  ;;  %v13479_v4 = vpack.c.bf16 %v9577_v37, %v9576_v36  ;;  %v9642_v32 = vld [vmem:[%s20862_s4 + $0x6f0] sm:$0xff]  ;;  %v9661_v16 = vld [vmem:[%s20862_s4 + $0x788] sm:$0xff] }
 0xb9b   : > { %3921 = vmatprep.mubr.f32.mxu0 %v17455_v63  ;;  %3996 = vmatprep.mubr.f32.mxu1 %v17459_v0  ;;  %v13511_v42 = vpack.c.bf16 %v9609_v39, %v9608_v48  ;;  %v13537_v29 = vpack.c.bf16 %v9623_v19, %v9622_v14  ;;  %v9643_v35 = vld [vmem:[%s20862_s4 + $0x6f8] sm:$0xff]  ;;  %v9626_v48 = vld [vmem:[%s20862_s4 + $0x670] sm:$0xff] }
 0xb9c   : > { %v13543_v37 = vpack.c.bf16 %v9643_v35, %v9642_v32  ;;  %v9627_v39 = vld [vmem:[%s20862_s4 + $0x678] sm:$0xff]  ;;  %v9670_v7 = vld [vmem:[%s20862_s4 + $0x7d0] sm:$0xff] }
 0xb9d   : > { %13462 = vmatpush3.bf16.msra.mxu0 %v13461_v53  ;;  %13494 = vmatpush3.bf16.msra.mxu1 %v13493_v54  ;;  %v13513_v53 = vpack.c.bf16 %v9593_v46, %v9592_v44  ;;  %v13515_v54 = vpack.c.bf16 %v9629_v51, %v9628_v50  ;;  %v9662_v44 = vld [vmem:[%s20862_s4 + $0x790] sm:$0xff]  ;;  %v9663_v50 = vld [vmem:[%s20862_s4 + $0x798] sm:$0xff] }
 0xb9e   : > { %13464 = vmatprep.subr.bf16.mxu0 %v13463_v57  ;;  %13496 = vmatprep.subr.bf16.mxu1 %v13495_v58  ;;  %v9630_v57 = vld [vmem:[%s20862_s4 + $0x690] sm:$0xff]  ;;  %v9631_v58 = vld [vmem:[%s20862_s4 + $0x698] sm:$0xff] }
 0xb9f   : > { %v13519_v60 = vpack.c.bf16 %v9631_v58, %v9630_v57  ;;  %v9646_v51 = vld [vmem:[%s20862_s4 + $0x710] sm:$0xff]  ;;  %v9648_v58 = vld [vmem:[%s20862_s4 + $0x720] sm:$0xff]  ;;  %v9659_v19 = vld [vmem:[%s20862_s4 + $0x778] sm:$0xff] }
 0xba0   : > { %v9674_v17 = vld [vmem:[%s20862_s4 + $0x7f0] sm:$0xff] }
 0xba1   : > { %13466 = vmatpush3.bf16.msra.mxu0 %v13465_v1  ;;  %13498 = vmatpush3.bf16.msra.mxu1 %v13497_v2  ;;  %v9633_v1 = vld [vmem:[%s20862_s4 + $0x6a8] sm:$0xff]  ;;  %v9658_v14 = vld [vmem:[%s20862_s4 + $0x770] sm:$0xff] }
 0xba2   : > { %13468 = vmatprep.subr.bf16.mxu0 %v13467_v3  ;;  %13500 = vmatprep.subr.bf16.mxu1 %v13499_v5  ;;  %v14724_v2 = vld [vmem:[%s15167_s25 + $0x28] sm:$0xff]  ;;  %v13523_v3 = vpack.c.bf16 %v9633_v1, %v9632_v26  ;;  %v9650_v26 = vld [vmem:[%s20862_s4 + $0x730] sm:$0xff]  ;;  %v9651_v1 = vld [vmem:[%s20862_s4 + $0x738] sm:$0xff] }
 0xba3   : > { %v9617_v5 = vld [vmem:[%s20862_s4 + $0x628] sm:$0xff] }
 0xba5   : > { %13470 = vmatpush3.bf16.msra.mxu0 %v13469_v49  ;;  %13502 = vmatpush3.bf16.msra.mxu1 %v13501_v45  ;;  %v9618_v49 = vld [vmem:[%s20862_s4 + $0x630] sm:$0xff]  ;;  %v9619_v45 = vld [vmem:[%s20862_s4 + $0x638] sm:$0xff] }
 0xba6   : > { %13472 = vmatprep.subr.bf16.mxu0 %v13471_v13  ;;  %13504 = vmatprep.subr.bf16.mxu1 %v13503_v15  ;;  %v9620_v13 = vld [vmem:[%s20862_s4 + $0x640] sm:$0xff]  ;;  %v9621_v15 = vld [vmem:[%s20862_s4 + $0x648] sm:$0xff] }
 0xba7   : > { %v13533_v23 = vpack.c.bf16 %v9621_v15, %v9620_v13  ;;  %v9656_v13 = vld [vmem:[%s20862_s4 + $0x760] sm:$0xff]  ;;  %v9657_v15 = vld [vmem:[%s20862_s4 + $0x768] sm:$0xff] }
 0xba8   : > { %v13573_v21 = vpack.c.bf16 %v9657_v15, %v9656_v13 }
 0xba9   : > { %13474 = vmatpush3.bf16.msra.mxu0 %v13473_v25  ;;  %13506 = vmatpush3.bf16.msra.mxu1 %v13505_v28  ;;  %v9640_v25 = vld [vmem:[%s20862_s4 + $0x6e0] sm:$0xff]  ;;  %v9641_v28 = vld [vmem:[%s20862_s4 + $0x6e8] sm:$0xff] }
 0xbaa   : > { %13476 = vmatprep.subr.bf16.mxu0 %v13475_v18  ;;  %13508 = vmatprep.subr.bf16.mxu1 %v13507_v31  ;;  %v13539_v30 = vpack.c.bf16 %v9641_v28, %v9640_v25  ;;  %v9624_v18 = vld [vmem:[%s20862_s4 + $0x660] sm:$0xff]  ;;  %v9625_v31 = vld [vmem:[%s20862_s4 + $0x668] sm:$0xff]  ;;  %v13577_v25 = vpack.c.bf16 %v9659_v19, %v9658_v14  ;;  %v17757_v28 = vld [vmem:[%s15167_s25 + $0x10] sm:$0xff] }
 0xbab   : > { %v13541_v36 = vpack.c.bf16 %v9625_v31, %v9624_v18  ;;  %v9545_v18 = vld [vmem:[%s20864_s6 + $0x3] ss:$0 sm:$0xff] }
 0xbad   : > { %13478 = vmatpush3.bf16.msra.mxu0 %v13477_v40  ;;  %13510 = vmatpush3.bf16.msra.mxu1 %v13509_v24  ;;  %v13545_v40 = vpack.c.bf16 %v9627_v39, %v9626_v48  ;;  %v9660_v24 = vld [vmem:[%s20862_s4 + $0x780] sm:$0xff] }
 0xbae   : > { %13480 = vmatprep.subr.bf16.mxu0 %v13479_v4  ;;  %13512 = vmatprep.subr.bf16.mxu1 %v13511_v42  ;;  %v13547_v4 = vpack.c.bf16 %v9661_v16, %v9660_v24  ;;  %v9645_v42 = vld [vmem:[%s20862_s4 + $0x708] sm:$0xff] }
 0xbaf   : > { %v13549_v46 = vpack.c.bf16 %v9645_v42, %v9644_v41 }
 0xbb1   : > { %13482 = vmatpush3.bf16.msra.mxu0 %v13481_v52  ;;  %13514 = vmatpush3.bf16.msra.mxu1 %v13513_v53  ;;  %v9647_v52 = vld [vmem:[%s20862_s4 + $0x718] sm:$0xff]  ;;  %v13551_v53 = vpack.c.bf16 %v9663_v50, %v9662_v44 }
 0xbb2   : > { %13516 = vmatprep.subr.bf16.mxu0 %v13515_v54  ;;  %13548 = vmatprep.subr.bf16.mxu1 %v13547_v4  ;;  %v9664_v54 = vld [vmem:[%s20862_s4 + $0x7a0] sm:$0xff]  ;;  %v13553_v56 = vpack.c.bf16 %v9647_v52, %v9646_v51 }
 0xbb3   : > { %v13555_v57 = vpack.c.bf16 %v9665_v55, %v9664_v54 }
 0xbb4   : > { %3922 = vmatmul.mubr.f32.vlgmr.msra.gmra.mrb[50].mxu0 %v17571_v22  ;;  %3997 = vmatmul.mubr.f32.vlgmr.msra.gmra.mrb[50].mxu1 %v17016_v20  ;;  %v9616_v20 = vld [vmem:[%s20862_s4 + $0x620] sm:$0xff] }
 0xbb5   : > { %3926 = vmatprep.mubr.f32.mxu0 %v14724_v2  ;;  %4001 = vmatprep.mubr.f32.mxu1 %v17583_v43  ;;  %v13525_v9 = vpack.c.bf16 %v9617_v5, %v9616_v20  ;;  %v9652_v5 = vld [vmem:[%s20862_s4 + $0x740] sm:$0xff] }
 0xbb6   : > { %13518 = vmatpush3.bf16.msra.mxu0 %v13517_v59  ;;  %13550 = vmatpush3.bf16.msra.mxu1 %v13549_v46  ;;  %v9649_v59 = vld [vmem:[%s20862_s4 + $0x728] sm:$0xff]  ;;  %v9611_v46 = vld [vmem:[%s20865_s7 + $0x3] ss:$0 sm:$0xff] }
 0xbb7   : > { %13520 = vmatprep.subr.bf16.mxu0 %v13519_v60  ;;  %13552 = vmatprep.subr.bf16.mxu1 %v13551_v53  ;;  %v9666_v60 = vld [vmem:[%s20862_s4 + $0x7b0] sm:$0xff]  ;;  %v13557_v62 = vpack.c.bf16 %v9649_v59, %v9648_v58 }
 0xbb8   : > { %3927 = vmatmul.mubr.f32.gmra.mrb[52].mxu0 %v14726_v6  ;;  %4002 = vmatmul.mubr.f32.gmra.mrb[52].mxu1 %v17594_v38 }
 0xbb9   : > { %4144 = vmatprep.mubr.f32.mxu0 %v17455_v63  ;;  %4219 = vmatprep.mubr.f32.mxu1 %v17459_v0  ;;  %v9637_v63 = vld [vmem:[%s20862_s4 + $0x6c8] sm:$0xff]  ;;  %v13529_v0 = vpack.c.bf16 %v9619_v45, %v9618_v49  ;;  %v9654_v49 = vld [vmem:[%s20862_s4 + $0x750] sm:$0xff]  ;;  %v9655_v45 = vld [vmem:[%s20862_s4 + $0x758] sm:$0xff] }
 0xbba   : > { %13522 = vmatpush3.bf16.msra.mxu0 %v13521_v34  ;;  %v13531_v12 = vpack.c.bf16 %v9637_v63, %v9636_v11  ;;  %13554 = vmatpush3.bf16.msra.mxu1 %v13553_v56  ;;  %v9669_v34 = vld [vmem:[%s20862_s4 + $0x7c8] sm:$0xff]  ;;  %v13569_v11 = vpack.c.bf16 %v9655_v45, %v9654_v49  ;;  %v9672_v63 = vld [vmem:[%s20862_s4 + $0x7e0] sm:$0xff] }
 0xbbb   : > { %13524 = vmatprep.subr.bf16.mxu0 %v13523_v3  ;;  %13556 = vmatprep.subr.bf16.mxu1 %v13555_v57  ;;  %v13561_v3 = vpack.c.bf16 %v9651_v1, %v9650_v26 }
 0xbbe   : > { %13526 = vmatpush3.bf16.msra.mxu0 %v13525_v9  ;;  %13558 = vmatpush3.bf16.msra.mxu1 %v13557_v62 }
 0xbbf   : > { %13528 = vmatprep.subr.bf16.mxu0 %v13527_v10  ;;  %v13567_v10 = vpack.c.bf16 %v9671_v8, %v9670_v7 }
 0xbc2   : > { %13530 = vmatpush3.bf16.msra.mxu0 %v13529_v0  ;;  %v9673_v0 = vld [vmem:[%s20862_s4 + $0x7e8] sm:$0xff] }
 0xbc3   : > { %13532 = vmatprep.subr.bf16.mxu0 %v13531_v12  ;;  %v13571_v12 = vpack.c.bf16 %v9673_v0, %v9672_v63 }
 0xbc6   : > { %13534 = vmatpush3.bf16.msra.mxu0 %v13533_v23  ;;  %v9675_v23 = vld [vmem:[%s20862_s4 + $0x7f8] sm:$0xff] }
 0xbc7   : > { %13536 = vmatprep.subr.bf16.mxu0 %v13535_v33  ;;  %v13575_v33 = vpack.c.bf16 %v9675_v23, %v9674_v17 }
 0xbca   : > { %13538 = vmatpush3.bf16.msra.mxu0 %v13537_v29 }
 0xbcb   : > { %13540 = vmatprep.subr.bf16.mxu0 %v13539_v30 }
 0xbce   : > { %13542 = vmatpush3.bf16.msra.mxu0 %v13541_v36 }
 0xbcf   : > { %13544 = vmatprep.subr.bf16.mxu0 %v13543_v37 }
 0xbd2   : > { %13546 = vmatpush3.bf16.msra.mxu0 %v13545_v40 }
 0xbd5   : > { %4145 = vmatmul.mubr.f32.vlgmr.msra.gmra.mrb[54].mxu0 %v17571_v22  ;;  %v13559_v22 = vpack.c.bf16 %v9667_v61, %v9666_v60 }
 0xbd6   : > { %4149 = vmatprep.mubr.f32.mxu0 %v14724_v2  ;;  %v9668_v2 = vld [vmem:[%s20862_s4 + $0x7c0] sm:$0xff] }
 0xbd7   : > { %13560 = vmatprep.subr.bf16.mxu1 %v13559_v22  ;;  %v13563_v20 = vpack.c.bf16 %v9669_v34, %v9668_v2 }
 0xbd8   : > { %13562 = vmatpush3.bf16.msra.mxu1 %v13561_v3 }
 0xbd9   : > { %4150 = vmatmul.mubr.f32.gmra.mrb[56].mxu0 %v14726_v6  ;;  %v9653_v6 = vld [vmem:[%s20862_s4 + $0x748] sm:$0xff]  ;;  %13564 = vmatprep.subr.bf16.mxu1 %v13563_v20 }
 0xbda   : > { %v13565_v9 = vpack.c.bf16 %v9653_v6, %v9652_v5  ;;  %v9677_v6 = vld [vmem:[%s20866_s8 + $0x3] ss:$0 sm:$0xff] }
 0xbdc   : > { %13566 = vmatpush3.bf16.msra.mxu1 %v13565_v9 }
 0xbdd   : > { %13568 = vmatprep.subr.bf16.mxu1 %v13567_v10 }
 0xbe0   : > { %13570 = vmatpush3.bf16.msra.mxu1 %v13569_v11 }
 0xbe1   : > { %13572 = vmatprep.subr.bf16.mxu1 %v13571_v12 }
 0xbe4   : > { %13574 = vmatpush3.bf16.msra.mxu1 %v13573_v21 }
 0xbe5   : > { %13576 = vmatprep.subr.bf16.mxu1 %v13575_v33 }
 0xbe8   : > { %13578 = vmatpush3.bf16.msra.mxu1 %v13577_v25 }
 0xbeb   : > { %4220 = vmatmul.mubr.f32.vlgmr.msra.gmra.mrb[54].mxu1 %v17757_v28 }
 0xbec   : > { %4224 = vmatprep.mubr.f32.mxu1 %v17583_v43 }
 0xbef   : > { %4225 = vmatmul.mubr.f32.gmra.mrb[56].mxu1 %v17594_v38 }
 0xc67   : > { %v11425_v29 = vpop.f32.mrb[46].mxu0  ;;  %v11463_v30 = vpop.f32.mrb[46].mxu1 }
 0xc68   : > { %v11426_v31 = vpop.f32.mrb[47].mxu0  ;;  %v11464_v32 = vpop.f32.mrb[47].mxu1 }
 0xc69   : > { %v11427_v35 = vadd.f32 %v11426_v31, %v11425_v29  ;;  %v11465_v36 = vadd.f32 %v11464_v32, %v11463_v30 }
 0xc6b   : > { %v3701_v37 = vadd.f32 %v11427_v35, %v9545_v18  ;;  %v11428_v48 = vpop.f32.mrb[48].mxu0  ;;  %v11466_v39 = vpop.f32.mrb[48].mxu1 }
 0xc6c   : > { %v11429_v40 = vpop.f32.mrb[49].mxu0  ;;  %v11467_v24 = vpop.f32.mrb[49].mxu1 }
 0xc6d   : > { %v3776_v16 = vadd.f32 %v11465_v36, %v3701_v37  ;;  %v11430_v4 = vadd.f32 %v11429_v40, %v11428_v48  ;;  %v11468_v43 = vadd.f32 %v11467_v24, %v11466_v39  ;;  %v9685_v48 = vld [vmem:[%s20863_s5 + $0x308] sm:$0xff]  ;;  %v9684_v40 = vld [vmem:[%s20863_s5 + $0x300] sm:$0xff] }
 0xc6e   : > { %v9689_v39 = vld [vmem:[%s20863_s5 + $0x328] sm:$0xff] }
 0xc6f   : > { %12619 = vmatprep.mubr.msk.f32.mxu0 %vm1059_vm0, %v3776_v16  ;;  %v3706_v38 = vadd.f32 %v11430_v4, %v9545_v18  ;;  %v13589_v24 = vpack.c.bf16 %v9689_v39, %v9685_v48  ;;  %v9688_v16 = vld [vmem:[%s20863_s5 + $0x320] sm:$0xff]  ;;  %v9687_v4 = vld [vmem:[%s20863_s5 + $0x318] sm:$0xff]  ;;  %v9721_v48 = vld [vmem:[%s20860_s2 + $0x808] sm:$0xff] }
 0xc70   : > { %v9752_v39 = vld [vmem:[%s20860_s2 + $0x900] sm:$0xff] }
 0xc71   : > { %v3781_v41 = vadd.f32 %v11468_v43, %v3706_v38  ;;  %v9691_v43 = vld [vmem:[%s20863_s5 + $0x338] sm:$0xff]  ;;  %v13591_v38 = vpack.c.bf16 %v9688_v16, %v9684_v40  ;;  %v9753_v40 = vld [vmem:[%s20860_s2 + $0x908] sm:$0xff] }
 0xc72   : > { %v9739_v16 = vld [vmem:[%s20860_s2 + $0x898] sm:$0xff] }
 0xc87   : > { %v11501_v42 = vpop.f32.mrb[50].mxu0  ;;  %v11539_v44 = vpop.f32.mrb[50].mxu1 }
 0xc88   : > { %v11502_v50 = vpop.f32.mrb[51].mxu0  ;;  %v11540_v51 = vpop.f32.mrb[51].mxu1 }
 0xc89   : > { %v11503_v52 = vadd.f32 %v11502_v50, %v11501_v42  ;;  %v11541_v53 = vadd.f32 %v11540_v51, %v11539_v44  ;;  %v9693_v42 = vld [vmem:[%s20863_s5 + $0x348] sm:$0xff]  ;;  %v9696_v50 = vld [vmem:[%s20863_s5 + $0x360] sm:$0xff] }
 0xc8a   : > { %v9697_v44 = vld [vmem:[%s20863_s5 + $0x368] sm:$0xff] }
 0xc8b   : > { %v3924_v54 = vadd.f32 %v11503_v52, %v9611_v46  ;;  %v11504_v55 = vpop.f32.mrb[52].mxu0  ;;  %v11542_v56 = vpop.f32.mrb[52].mxu1  ;;  %v13593_v51 = vpack.c.bf16 %v9697_v44, %v9693_v42  ;;  %v9722_v42 = vld [vmem:[%s20860_s2 + $0x810] sm:$0xff]  ;;  %v9723_v44 = vld [vmem:[%s20860_s2 + $0x818] sm:$0xff] }
 0xc8c   : > { %v11505_v57 = vpop.f32.mrb[53].mxu0  ;;  %v11543_v58 = vpop.f32.mrb[53].mxu1 }
 0xc8d   : > { %v3999_v59 = vadd.f32 %v11541_v53, %v3924_v54  ;;  %v11506_v60 = vadd.f32 %v11505_v57, %v11504_v55  ;;  %v11544_v61 = vadd.f32 %v11543_v58, %v11542_v56  ;;  %v9701_v53 = vld [vmem:[%s20863_s5 + $0x388] sm:$0xff]  ;;  %v9700_v56 = vld [vmem:[%s20863_s5 + $0x380] sm:$0xff] }
 0xc8e   : > { %v9705_v54 = vld [vmem:[%s20863_s5 + $0x3a8] sm:$0xff]  ;;  %v9704_v57 = vld [vmem:[%s20863_s5 + $0x3a0] sm:$0xff] }
 0xc8f   : > { %v3929_v62 = vadd.f32 %v11506_v60, %v9611_v46  ;;  %v9692_v46 = vld [vmem:[%s20863_s5 + $0x340] sm:$0xff]  ;;  %v13597_v55 = vpack.c.bf16 %v9705_v54, %v9701_v53  ;;  %v13599_v58 = vpack.c.bf16 %v9704_v57, %v9700_v56  ;;  %v9713_v60 = vld [vmem:[%s20863_s5 + $0x3e8] sm:$0xff] }
 0xc90   : > { %v13595_v52 = vpack.c.bf16 %v9696_v50, %v9692_v46  ;;  %v9754_v50 = vld [vmem:[%s20860_s2 + $0x910] sm:$0xff]  ;;  %v9741_v56 = vld [vmem:[%s20860_s2 + $0x8a8] sm:$0xff]  ;;  %v9772_v57 = vld [vmem:[%s20860_s2 + $0x9a0] sm:$0xff] }
 0xc91   : > { %v4004_v22 = vadd.f32 %v11544_v61, %v3929_v62  ;;  %v9708_v61 = vld [vmem:[%s20863_s5 + $0x3c0] sm:$0xff] }
 0xc93   : > { %v13579_v26 = vpack.c.bf16 %v4004_v22, %v3999_v59  ;;  %v9709_v59 = vld [vmem:[%s20863_s5 + $0x3c8] sm:$0xff]  ;;  %v9712_v22 = vld [vmem:[%s20863_s5 + $0x3e0] sm:$0xff] }
 0xc94   : > { %v13601_v62 = vpack.c.bf16 %v9713_v60, %v9709_v59  ;;  %v13627_v59 = vpack.c.bf16 %v9723_v44, %v9722_v42  ;;  %v9781_v42 = vld [vmem:[%s20860_s2 + $0x9e8] sm:$0xff] }
 0xc95   : > { %13581 = vmatprep.subr.msk.bf16.mxu0 %vm15534_vm1, %v13579_v26 }
 0xc96   : > { %13584 = vmatpush3.bf16.xpose.msk.msra.mxu0 %vm15534_vm1, %v13579_v26  ;;  %v13603_v26 = vpack.c.bf16 %v9712_v22, %v9708_v61  ;;  %v9724_v61 = vld [vmem:[%s20860_s2 + $0x820] sm:$0xff] }
 0xc97   : > { %13590 = vmatprep.subr.bf16.mxu0 %v13589_v24  ;;  %v9738_v24 = vld [vmem:[%s20860_s2 + $0x890] sm:$0xff] }
 0xc98   : > { %v13625_v54 = vpack.c.bf16 %v9739_v16, %v9738_v24  ;;  %v9762_v16 = vld [vmem:[%s20860_s2 + $0x950] sm:$0xff] }
 0xc9d   : > { %12620 = vmatmul.mubr.msk.f32.vlgmr.msra.gmra.mrb[58].mxu0 %vm1059_vm0, %v3781_v41  ;;  %v13605_v41 = vpack.c.bf16 %v9691_v43, %v9687_v4  ;;  %v9770_v4 = vld [vmem:[%s20860_s2 + $0x990] sm:$0xff]  ;;  %v9771_v43 = vld [vmem:[%s20860_s2 + $0x998] sm:$0xff] }
 0xc9e   : > { %4525 = vmatprep.mubr.f32.mxu0 %v14801_v27  ;;  %13592 = vmatpush1.bf16.msra.mxu0 %v13591_v38 }
 0xc9f   : > { %13594 = vmatprep.subr.bf16.mxu0 %v13593_v51  ;;  %v9755_v51 = vld [vmem:[%s20860_s2 + $0x918] sm:$0xff] }
 0xca0   : > { %v13659_v60 = vpack.c.bf16 %v9755_v51, %v9754_v50  ;;  %v9732_v50 = vld [vmem:[%s20860_s2 + $0x860] sm:$0xff]  ;;  %v9733_v51 = vld [vmem:[%s20860_s2 + $0x868] sm:$0xff] }
 0xca2   : > { %13596 = vmatpush1.bf16.msra.mxu0 %v13595_v52  ;;  %v9740_v52 = vld [vmem:[%s20860_s2 + $0x8a0] sm:$0xff] }
 0xca3   : > { %13598 = vmatprep.subr.bf16.mxu0 %v13597_v55  ;;  %v13657_v55 = vpack.c.bf16 %v9771_v43, %v9770_v4  ;;  %v13629_v22 = vpack.c.bf16 %v9741_v56, %v9740_v52  ;;  %v9763_v4 = vld [vmem:[%s20860_s2 + $0x958] sm:$0xff]  ;;  %v9748_v43 = vld [vmem:[%s20860_s2 + $0x8e0] sm:$0xff]  ;;  %v9750_v56 = vld [vmem:[%s20860_s2 + $0x8f0] sm:$0xff] }
 0xca6   : > { %13600 = vmatpush1.bf16.msra.mxu0 %v13599_v58  ;;  %v9773_v58 = vld [vmem:[%s20860_s2 + $0x9a8] sm:$0xff] }
 0xca7   : > { %13602 = vmatprep.subr.bf16.mxu0 %v13601_v62  ;;  %v9725_v62 = vld [vmem:[%s20860_s2 + $0x828] sm:$0xff] }
 0xca8   : > { %v11577_v1 = vpop.f32.mrb[54].mxu0 }
 0xca9   : > { %v11578_v2 = vpop.f32.mrb[55].mxu0 }
 0xcaa   : > { %v11579_v34 = vadd.f32 %v11578_v2, %v11577_v1  ;;  %13604 = vmatpush1.bf16.msra.mxu0 %v13603_v26  ;;  %v13661_v26 = vpack.c.bf16 %v9773_v58, %v9772_v57  ;;  %v9751_v57 = vld [vmem:[%s20860_s2 + $0x8f8] sm:$0xff]  ;;  %v9782_v58 = vld [vmem:[%s20860_s2 + $0x9f0] sm:$0xff] }
 0xcac   : > { %v11580_v3 = vpop.f32.mrb[56].mxu0  ;;  %v4147_v7 = vadd.f32 %v11579_v34, %v9677_v6  ;;  %v9686_v34 = vld [vmem:[%s20863_s5 + $0x310] sm:$0xff] }
 0xcad   : > { %v11581_v20 = vpop.f32.mrb[57].mxu0 }
 0xcae   : > { %v11582_v5 = vadd.f32 %v11581_v20, %v11580_v3  ;;  %v9690_v3 = vld [vmem:[%s20863_s5 + $0x330] sm:$0xff] }
 0xcb0   : > { %v4152_v49 = vadd.f32 %v11582_v5, %v9677_v6  ;;  %v9695_v5 = vld [vmem:[%s20863_s5 + $0x358] sm:$0xff] }
 0xcb1   : > { %v9699_v6 = vld [vmem:[%s20863_s5 + $0x378] sm:$0xff] }
 0xcbe   : > { %v11615_v8 = vpop.f32.mrb[54].mxu1 }
 0xcbf   : > { %v11616_v9 = vpop.f32.mrb[55].mxu1 }
 0xcc0   : > { %v11617_v10 = vadd.f32 %v11616_v9, %v11615_v8  ;;  %v13607_v9 = vpack.c.bf16 %v9690_v3, %v9686_v34  ;;  %v9742_v34 = vld [vmem:[%s20860_s2 + $0x8b0] sm:$0xff]  ;;  %v9743_v3 = vld [vmem:[%s20860_s2 + $0x8b8] sm:$0xff] }
 0xcc2   : > { %v4222_v45 = vadd.f32 %v11617_v10, %v4147_v7  ;;  %v11618_v11 = vpop.f32.mrb[56].mxu1 }
 0xcc3   : > { %v11619_v63 = vpop.f32.mrb[57].mxu1 }
 0xcc4   : > { %v11620_v0 = vadd.f32 %v11619_v63, %v11618_v11  ;;  %v9698_v11 = vld [vmem:[%s20863_s5 + $0x370] sm:$0xff]  ;;  %v9703_v63 = vld [vmem:[%s20863_s5 + $0x398] sm:$0xff] }
 0xcc6   : > { %v4227_v12 = vadd.f32 %v11620_v0, %v4152_v49  ;;  %v13609_v49 = vpack.c.bf16 %v9699_v6, %v9695_v5  ;;  %v9707_v0 = vld [vmem:[%s20863_s5 + $0x3b8] sm:$0xff]  ;;  %v13631_v6 = vpack.c.bf16 %v9725_v62, %v9724_v61  ;;  %v9734_v62 = vld [vmem:[%s20860_s2 + $0x870] sm:$0xff] }
 0xcc7   : > { %v9775_v5 = vld [vmem:[%s20860_s2 + $0x9b8] sm:$0xff] }
 0xcc8   : > { %v13585_v13 = vpack.c.bf16 %v4227_v12, %v4222_v45  ;;  %v9694_v45 = vld [vmem:[%s20863_s5 + $0x350] sm:$0xff] }
 0xcc9   : > { %v13611_v12 = vpack.c.bf16 %v9698_v11, %v9694_v45  ;;  %v9758_v45 = vld [vmem:[%s20860_s2 + $0x930] sm:$0xff]  ;;  %v9759_v11 = vld [vmem:[%s20860_s2 + $0x938] sm:$0xff] }
 0xcca   : > { %13586 = vmatprep.subr.bf16.mxu1 %v13585_v13 }
 0xccb   : > { %13588 = vmatpush3.bf16.msra.mxu1 %v13585_v13  ;;  %v13613_v13 = vpack.c.bf16 %v9707_v0, %v9703_v63  ;;  %v9744_v63 = vld [vmem:[%s20860_s2 + $0x8c0] sm:$0xff]  ;;  %v9745_v0 = vld [vmem:[%s20860_s2 + $0x8c8] sm:$0xff] }
 0xccc   : > { %13606 = vmatprep.subr.bf16.mxu1 %v13605_v41  ;;  %v13655_v41 = vpack.c.bf16 %v9753_v40, %v9752_v39  ;;  %v9731_v39 = vld [vmem:[%s20860_s2 + $0x858] sm:$0xff] }
 0xd70   : > { %v12621_v15 = vpop.f32.mrb[58].mxu0 }
 0xd71   : > { %v4318_v21 = vmul.f32 0.125, %v12621_v15  ;;  %v4308_v17 = vpop.f32.mrb[59].mxu0  ;;  %v9702_v15 = vld [vmem:[%s20863_s5 + $0x390] sm:$0xff] }
 0xd72   : > { %v4317_v23 = vmul.f32 0.125, %v4308_v17  ;;  %v9711_v17 = vld [vmem:[%s20863_s5 + $0x3d8] sm:$0xff] }
 0xd73   : > { %v4322_v33 = vsel %vm1149_vm2, %v4318_v21, -inf }
 0xd74   : > { %4323 = vmax.xlane.f32.xlu1 %v4322_v33  ;;  %v4319_v14 = vsel %vm1149_vm2, %v4317_v23, -inf }
 0xd75   : > { %4320 = vmax.xlane.f32.xlu0 %v4319_v14 }
 0xe01   : > { %v4324_v19 = vpop.xlane.xlu1 %4323 }
 0xe02   : > { %v4326_v25 = vsub.f32 %v4318_v21, %v4324_v19  ;;  %v4321_v29 = vpop.xlane.xlu0 %4320  ;;  %v9706_v21 = vld [vmem:[%s20863_s5 + $0x3b0] sm:$0xff] }
 0xe03   : > { %v4325_v30 = vsub.f32 %v4317_v23, %v4321_v29  ;;  %v9715_v23 = vld [vmem:[%s20863_s5 + $0x3f8] sm:$0xff]  ;;  %v13615_v33 = vpack.c.bf16 %v9706_v21, %v9702_v15  ;;  %v9710_v19 = vld [vmem:[%s20863_s5 + $0x3d0] sm:$0xff]  ;;  %v14729_v15 = vld [vmem:[%s15031_s29 + $0x8] sm:$0xff] }
 0xe04   : > { %v4329_v18 = vmul.f32 1.442695, %v4326_v25  ;;  %v13617_v14 = vpack.c.bf16 %v9715_v23, %v9711_v17  ;;  %v9714_v25 = vld [vmem:[%s20863_s5 + $0x3f0] sm:$0xff]  ;;  %v14730_v21 = vld [vmem:[%s15031_s29 + $0x18] sm:$0xff]  ;;  %v13667_v23 = vpack.c.bf16 %v9759_v11, %v9758_v45  ;;  %v9818_v11 = vld [vmem:[%s20861_s3 + $0x900] sm:$0xff] }
 0xe05   : > { %v4327_v31 = vmul.f32 1.442695, %v4325_v30  ;;  %v13619_v29 = vpack.c.bf16 %v9714_v25, %v9710_v19  ;;  %v9736_v30 = vld [vmem:[%s20860_s2 + $0x880] sm:$0xff]  ;;  %v13637_v19 = vpack.c.bf16 %v9745_v0, %v9744_v63  ;;  %v9819_v63 = vld [vmem:[%s20861_s3 + $0x908] sm:$0xff]  ;;  %v9804_v0 = vld [vmem:[%s20861_s3 + $0x890] sm:$0xff] }
 0xe06   : > { %14646 = vpow2.f32 %v4329_v18  ;;  %v9737_v18 = vld [vmem:[%s20860_s2 + $0x888] sm:$0xff] }
 0xe07   : > { %14648 = vpow2.f32 %v4327_v31  ;;  %v13621_v31 = vpack.c.bf16 %v9737_v18, %v9736_v30  ;;  %v9761_v30 = vld [vmem:[%s20860_s2 + $0x948] sm:$0xff]  ;;  %v9746_v18 = vld [vmem:[%s20860_s2 + $0x8d0] sm:$0xff] }
 0xe09   : > { %13622 = vmatprep.subr.bf16.mxu0 %v13621_v31  ;;  %v9747_v31 = vld [vmem:[%s20860_s2 + $0x8d8] sm:$0xff] }
 0xe0a   : > { %v13641_v40 = vpack.c.bf16 %v9747_v31, %v9746_v18  ;;  %v9807_v18 = vld [vmem:[%s20861_s3 + $0x8a8] sm:$0xff]  ;;  %v9838_v31 = vld [vmem:[%s20861_s3 + $0x9a0] sm:$0xff] }
 0xe10   : > { %v14647_v32 = vpop.eup %14646 }
 0xe11   : > { %v14649_v35 = vpop.eup %14648  ;;  %v4334_v36 = vsel %vm1149_vm2, %v14647_v32, 0.0 }
 0xe12   : > { %4335 = vadd.xlane.f32.xlu1 %v4334_v36  ;;  %v4331_v37 = vsel %vm1149_vm2, %v14649_v35, 0.0 }
 0xe13   : > { %4332 = vadd.xlane.f32.xlu0 %v4331_v37  ;;  %v9720_v37 = vld [vmem:[%s20860_s2 + $0x800] sm:$0xff] }
 0xe14   : > { %v13623_v38 = vpack.c.bf16 %v9721_v48, %v9720_v37  ;;  %v9730_v48 = vld [vmem:[%s20860_s2 + $0x850] sm:$0xff] }
 0xe15   : > { %v13643_v44 = vpack.c.bf16 %v9731_v39, %v9730_v48  ;;  %v9790_v39 = vld [vmem:[%s20861_s3 + $0x820] sm:$0xff] }
 0xe9f   : > { %v4336_v1 = vpop.xlane.xlu1 %4335 }
 0xea0   : > { %14650 = vrcp.f32 %v4336_v1  ;;  %v4333_v2 = vpop.xlane.xlu0 %4332  ;;  %v9756_v1 = vld [vmem:[%s20860_s2 + $0x920] sm:$0xff] }
 0xea1   : > { %14652 = vrcp.f32 %v4333_v2  ;;  %v9757_v2 = vld [vmem:[%s20860_s2 + $0x928] sm:$0xff] }
 0xeaa   : > { %v14651_v20 = vpop.eup %14650 }
 0xeab   : > { %v14653_v7 = vpop.eup %14652  ;;  %v4340_v10 = vmul.f32 %v14651_v20, %v14647_v32  ;;  %v9768_v32 = vld [vmem:[%s20860_s2 + $0x980] sm:$0xff]  ;;  %v9774_v20 = vld [vmem:[%s20860_s2 + $0x9b0] sm:$0xff] }
 0xeac   : > { %v4339_v8 = vmul.f32 %v14653_v7, %v14649_v35  ;;  %v9769_v35 = vld [vmem:[%s20860_s2 + $0x988] sm:$0xff]  ;;  %v13663_v7 = vpack.c.bf16 %v9757_v2, %v9756_v1  ;;  %v9766_v2 = vld [vmem:[%s20860_s2 + $0x970] sm:$0xff] }
 0xead   : > { %v13653_v36 = vpack.c.bf16 %v9769_v35, %v9768_v32  ;;  %v9778_v32 = vld [vmem:[%s20860_s2 + $0x9d0] sm:$0xff]  ;;  %v9779_v35 = vld [vmem:[%s20860_s2 + $0x9d8] sm:$0xff] }
 0xeae   : > { %12626 = vmatprep.mubr.msk.f32.mxu1 %vm1149_vm2, %v4339_v8  ;;  %v9726_v8 = vld [vmem:[%s20860_s2 + $0x830] sm:$0xff]  ;;  %v13673_v24 = vpack.c.bf16 %v9779_v35, %v9778_v32  ;;  %v9839_v32 = vld [vmem:[%s20861_s3 + $0x9a8] sm:$0xff]  ;;  %v14731_v35 = vld [vmem:[%s15031_s29] sm:$0xff] }
 0xeaf   : > { %12627 = vmatmul.mubr.msk.f32.vlgmr.msra.gmra.mrb[58].mxu1 %vm1149_vm2, %v4340_v10  ;;  %v13633_v10 = vpack.c.bf16 %v9743_v3, %v9742_v34  ;;  %v9767_v34 = vld [vmem:[%s20860_s2 + $0x978] sm:$0xff]  ;;  %v9802_v3 = vld [vmem:[%s20861_s3 + $0x880] sm:$0xff] }
 0xeb0   : > { %13608 = vmatpush1.bf16.msra.mxu1 %v13607_v9  ;;  %4602 = vmatprep.mubr.f32.mxu1 %v14801_v27  ;;  %v9727_v9 = vld [vmem:[%s20860_s2 + $0x838] sm:$0xff] }
 0xeb1   : > { %13610 = vmatprep.subr.bf16.mxu1 %v13609_v49  ;;  %v13665_v49 = vpack.c.bf16 %v9775_v5, %v9774_v20  ;;  %v13635_v17 = vpack.c.bf16 %v9727_v9, %v9726_v8  ;;  %v9803_v20 = vld [vmem:[%s20861_s3 + $0x888] sm:$0xff]  ;;  %v9834_v5 = vld [vmem:[%s20861_s3 + $0x980] sm:$0xff]  ;;  %v13683_v8 = vpack.c.bf16 %v9767_v34, %v9766_v2  ;;  %v18200_v2 = vld [vmem:[%s15167_s25 + $0x18] sm:$0xff] }
 0xeb2   : > { %v9786_v9 = vld [vmem:[%s20861_s3 + $0x800] sm:$0xff] }
 0xeb4   : > { %13612 = vmatpush1.bf16.msra.mxu1 %v13611_v12  ;;  %v9776_v12 = vld [vmem:[%s20860_s2 + $0x9c0] sm:$0xff] }
 0xeb5   : > { %13614 = vmatprep.subr.bf16.mxu1 %v13613_v13  ;;  %v9777_v13 = vld [vmem:[%s20860_s2 + $0x9c8] sm:$0xff] }
 0xeb6   : > { %v13669_v25 = vpack.c.bf16 %v9777_v13, %v9776_v12  ;;  %v9805_v12 = vld [vmem:[%s20861_s3 + $0x898] sm:$0xff]  ;;  %v9836_v13 = vld [vmem:[%s20861_s3 + $0x990] sm:$0xff] }
 0xeb8   : > { %13616 = vmatpush1.bf16.msra.mxu1 %v13615_v33  ;;  %v9728_v33 = vld [vmem:[%s20860_s2 + $0x840] sm:$0xff] }
 0xeb9   : > { %13618 = vmatprep.subr.bf16.mxu1 %v13617_v14  ;;  %v9729_v14 = vld [vmem:[%s20860_s2 + $0x848] sm:$0xff] }
 0xebc   : > { %13620 = vmatpush1.bf16.msra.mxu1 %v13619_v29  ;;  %v9760_v29 = vld [vmem:[%s20860_s2 + $0x940] sm:$0xff] }
 0xebd   : > { %13654 = vmatprep.subr.bf16.mxu1 %v13653_v36  ;;  %v13639_v36 = vpack.c.bf16 %v9729_v14, %v9728_v33  ;;  %v13671_v37 = vpack.c.bf16 %v9761_v30, %v9760_v29  ;;  %v9789_v33 = vld [vmem:[%s20861_s3 + $0x818] sm:$0xff]  ;;  %v13689_v14 = vpack.c.bf16 %v9805_v12, %v9804_v0  ;;  %v9806_v30 = vld [vmem:[%s20861_s3 + $0x8a0] sm:$0xff]  ;;  %v9796_v12 = vld [vmem:[%s20861_s3 + $0x850] sm:$0xff] }
 0xebe   : > { %v9821_v29 = vld [vmem:[%s20861_s3 + $0x918] sm:$0xff] }
 0xf82   : > { %v12628_v46 = vpop.f32.mrb[58].mxu1 }
 0xf83   : > { %v4413_v53 = vpop.f32.mrb[59].mxu1 }
 0xf84   : > { %9716 = vmatmul.mubr.msk.f32.vlgmr.msra.gmra.mrb[28].mxu0 %vm1059_vm0, %v4413_v53  ;;  %9718 = vmatmul.mubr.msk.f32.vlgmr.msra.gmra.mrb[28].mxu1 %vm1059_vm0, %v4413_v53 }
 0xf85   : > { %13624 = vmatpush3.bf16.msra.mxu0 %v13623_v38  ;;  %13656 = vmatpush3.bf16.msra.mxu1 %v13655_v41  ;;  %v9749_v38 = vld [vmem:[%s20860_s2 + $0x8e8] sm:$0xff]  ;;  %v9780_v41 = vld [vmem:[%s20860_s2 + $0x9e0] sm:$0xff] }
 0xf86   : > { %4531 = vmatprep.mubr.f32.mxu0 %v14801_v27  ;;  %4608 = vmatprep.mubr.f32.mxu1 %v14801_v27  ;;  %v13645_v52 = vpack.c.bf16 %v9749_v38, %v9748_v43  ;;  %v13677_v53 = vpack.c.bf16 %v9781_v42, %v9780_v41  ;;  %v9823_v43 = vld [vmem:[%s20861_s3 + $0x928] sm:$0xff]  ;;  %v9808_v38 = vld [vmem:[%s20861_s3 + $0x8b0] sm:$0xff]  ;;  %v9809_v41 = vld [vmem:[%s20861_s3 + $0x8b8] sm:$0xff] }
 0xf87   : > { %13626 = vmatprep.subr.bf16.mxu0 %v13625_v54  ;;  %13658 = vmatprep.subr.bf16.mxu1 %v13657_v55  ;;  %v9764_v54 = vld [vmem:[%s20860_s2 + $0x960] sm:$0xff]  ;;  %v9765_v55 = vld [vmem:[%s20860_s2 + $0x968] sm:$0xff]  ;;  %v9840_v42 = vld [vmem:[%s20861_s3 + $0x9b0] sm:$0xff] }
 0xf88   : > { %9717 = vmatmul.mubr.msk.f32.gmra.mrb[30].mxu0 %vm1059_vm0, %v12628_v46  ;;  %9719 = vmatmul.mubr.msk.f32.gmra.mrb[30].mxu1 %vm1059_vm0, %v12628_v46  ;;  %v13675_v46 = vpack.c.bf16 %v9763_v4, %v9762_v16  ;;  %v13679_v61 = vpack.c.bf16 %v9765_v55, %v9764_v54  ;;  %v13725_v16 = vpack.c.bf16 %v9839_v32, %v9838_v31  ;;  %v9822_v4 = vld [vmem:[%s20861_s3 + $0x920] sm:$0xff]  ;;  %v9792_v55 = vld [vmem:[%s20861_s3 + $0x830] sm:$0xff]  ;;  %v9799_v31 = vld [vmem:[%s20861_s3 + $0x868] sm:$0xff] }
 0xf89   : > { %13628 = vmatpush3.bf16.msra.mxu0 %v13627_v59  ;;  %13660 = vmatpush3.bf16.msra.mxu1 %v13659_v60  ;;  %v9783_v59 = vld [vmem:[%s20860_s2 + $0x9f8] sm:$0xff]  ;;  %v13647_v60 = vpack.c.bf16 %v9733_v51, %v9732_v50  ;;  %v14735_v51 = vld [vmem:[%s15031_s29 + $0x20] sm:$0xff]  ;;  %v13727_v54 = vpack.c.bf16 %v9823_v43, %v9822_v4  ;;  %v9800_v43 = vld [vmem:[%s20861_s3 + $0x870] sm:$0xff] }
 0xf8a   : > { %13630 = vmatprep.subr.bf16.mxu0 %v13629_v22  ;;  %13662 = vmatprep.subr.bf16.mxu1 %v13661_v26  ;;  %v9735_v22 = vld [vmem:[%s20860_s2 + $0x878] sm:$0xff]  ;;  %v13649_v26 = vpack.c.bf16 %v9751_v57, %v9750_v56  ;;  %v13681_v1 = vpack.c.bf16 %v9783_v59, %v9782_v58  ;;  %v13697_v57 = vpack.c.bf16 %v9809_v41, %v9808_v38  ;;  %v9824_v59 = vld [vmem:[%s20861_s3 + $0x930] sm:$0xff] }
 0xf8b   : > { %4760 = vmatprep.mubr.f32.mxu0 %v14729_v15  ;;  %4835 = vmatprep.mubr.f32.mxu1 %v14730_v21  ;;  %v9837_v15 = vld [vmem:[%s20861_s3 + $0x998] sm:$0xff] }
 0xf8c   : > { %v14734_v50 = vld [vmem:[%s15031_s29 + $0x38] sm:$0xff] }
 0xf8d   : > { %13632 = vmatpush3.bf16.msra.mxu0 %v13631_v6  ;;  %13664 = vmatpush3.bf16.msra.mxu1 %v13663_v7  ;;  %v9835_v6 = vld [vmem:[%s20861_s3 + $0x988] sm:$0xff]  ;;  %v13651_v7 = vpack.c.bf16 %v9735_v22, %v9734_v62  ;;  %v9793_v56 = vld [vmem:[%s20861_s3 + $0x838] sm:$0xff]  ;;  %v9842_v22 = vld [vmem:[%s20861_s3 + $0x9c0] sm:$0xff] }
 0xf8e   : > { %13634 = vmatprep.subr.bf16.mxu0 %v13633_v10  ;;  %13666 = vmatprep.subr.bf16.mxu1 %v13665_v49  ;;  %v9787_v10 = vld [vmem:[%s20861_s3 + $0x808] sm:$0xff]  ;;  %v13685_v49 = vpack.c.bf16 %v9803_v20, %v9802_v3  ;;  %v13717_v45 = vpack.c.bf16 %v9835_v6, %v9834_v5  ;;  %v13699_v34 = vpack.c.bf16 %v9793_v56, %v9792_v55  ;;  %v9794_v20 = vld [vmem:[%s20861_s3 + $0x840] sm:$0xff]  ;;  %v9801_v41 = vld [vmem:[%s20861_s3 + $0x878] sm:$0xff] }
 0xf8f   : > { %v13687_v21 = vpack.c.bf16 %v9787_v10, %v9786_v9  ;;  %v9811_v62 = vld [vmem:[%s20861_s3 + $0x8c8] sm:$0xff]  ;;  %v9812_v10 = vld [vmem:[%s20861_s3 + $0x8d0] sm:$0xff]  ;;  %v9852_v55 = vld [vmem:[%s20862_s4 + $0x800] sm:$0xff] }
 0xf90   : > { %v9795_v5 = vld [vmem:[%s20861_s3 + $0x848] sm:$0xff] }
 0xf91   : > { %13636 = vmatpush3.bf16.msra.mxu0 %v13635_v17  ;;  %13668 = vmatpush3.bf16.msra.mxu1 %v13667_v23  ;;  %v13719_v17 = vpack.c.bf16 %v9819_v63, %v9818_v11  ;;  %v9788_v23 = vld [vmem:[%s20861_s3 + $0x810] sm:$0xff]  ;;  %v9827_v9 = vld [vmem:[%s20861_s3 + $0x948] sm:$0xff]  ;;  %v9845_v11 = vld [vmem:[%s20861_s3 + $0x9d8] sm:$0xff]  ;;  %v13703_v63 = vpack.c.bf16 %v9795_v5, %v9794_v20 }
 0xf92   : > { %13638 = vmatprep.subr.bf16.mxu0 %v13637_v19  ;;  %13670 = vmatprep.subr.bf16.mxu1 %v13669_v25  ;;  %v13721_v19 = vpack.c.bf16 %v9837_v15, %v9836_v13  ;;  %v9820_v25 = vld [vmem:[%s20861_s3 + $0x910] sm:$0xff]  ;;  %v9797_v13 = vld [vmem:[%s20861_s3 + $0x858] sm:$0xff]  ;;  %v9853_v56 = vld [vmem:[%s20862_s4 + $0x808] sm:$0xff] }
 0xf93   : > { %v13723_v48 = vpack.c.bf16 %v9821_v29, %v9820_v25  ;;  %v9847_v25 = vld [vmem:[%s20861_s3 + $0x9e8] sm:$0xff]  ;;  %v13707_v29 = vpack.c.bf16 %v9797_v13, %v9796_v12  ;;  %v18324_v20 = vld [vmem:[%s15167_s25 + $0x38] sm:$0xff]  ;;  %v9876_v12 = vld [vmem:[%s20862_s4 + $0x8c0] sm:$0xff] }
 0xf95   : > { %13640 = vmatpush3.bf16.msra.mxu0 %v13639_v36  ;;  %13672 = vmatpush3.bf16.msra.mxu1 %v13671_v37  ;;  %v14732_v36 = vld [vmem:[%s15031_s29 + $0x10] sm:$0xff]  ;;  %v13691_v37 = vpack.c.bf16 %v9789_v33, %v9788_v23  ;;  %v9829_v23 = vld [vmem:[%s20861_s3 + $0x958] sm:$0xff]  ;;  %v9814_v33 = vld [vmem:[%s20861_s3 + $0x8e0] sm:$0xff] }
 0xf96   : > { %13642 = vmatprep.subr.bf16.mxu0 %v13641_v40  ;;  %13674 = vmatprep.subr.bf16.mxu1 %v13673_v24  ;;  %v9791_v40 = vld [vmem:[%s20861_s3 + $0x828] sm:$0xff]  ;;  %v13693_v24 = vpack.c.bf16 %v9807_v18, %v9806_v30  ;;  %v9798_v18 = vld [vmem:[%s20861_s3 + $0x860] sm:$0xff] }
 0xf99   : > { %13644 = vmatpush3.bf16.msra.mxu0 %v13643_v44  ;;  %13676 = vmatpush3.bf16.msra.mxu1 %v13675_v46  ;;  %v9841_v44 = vld [vmem:[%s20861_s3 + $0x9b8] sm:$0xff]  ;;  %v14733_v46 = vld [vmem:[%s15031_s29 + $0x28] sm:$0xff] }
 0xf9a   : > { %13646 = vmatprep.subr.bf16.mxu0 %v13645_v52  ;;  %13678 = vmatprep.subr.bf16.mxu1 %v13677_v53  ;;  %v14736_v52 = vld [vmem:[%s15031_s29 + $0x30] sm:$0xff]  ;;  %v13695_v53 = vpack.c.bf16 %v9791_v40, %v9790_v39  ;;  %v13729_v58 = vpack.c.bf16 %v9841_v44, %v9840_v42  ;;  %v9817_v39 = vld [vmem:[%s20861_s3 + $0x8f8] sm:$0xff] }
 0xf9b   : > { %v9848_v40 = vld [vmem:[%s20861_s3 + $0x9f0] sm:$0xff] }
 0xf9c   : > { %v9832_v44 = vld [vmem:[%s20861_s3 + $0x970] sm:$0xff] }
 0xf9d   : > { %13648 = vmatpush3.bf16.msra.mxu0 %v13647_v60  ;;  %13680 = vmatpush3.bf16.msra.mxu1 %v13679_v61  ;;  %v9825_v60 = vld [vmem:[%s20861_s3 + $0x938] sm:$0xff]  ;;  %v9810_v61 = vld [vmem:[%s20861_s3 + $0x8c0] sm:$0xff] }
 0xf9e   : > { %13650 = vmatprep.subr.bf16.mxu0 %v13649_v26  ;;  %13682 = vmatprep.subr.bf16.mxu1 %v13681_v1  ;;  %v9843_v26 = vld [vmem:[%s20861_s3 + $0x9c8] sm:$0xff]  ;;  %v13731_v3 = vpack.c.bf16 %v9825_v60, %v9824_v59  ;;  %v13701_v6 = vpack.c.bf16 %v9811_v62, %v9810_v61  ;;  %v13751_v59 = vpack.c.bf16 %v9853_v56, %v9852_v55  ;;  %v9854_v61 = vld [vmem:[%s20862_s4 + $0x810] sm:$0xff]  ;;  %v9855_v62 = vld [vmem:[%s20862_s4 + $0x818] sm:$0xff] }
 0xf9f   : > { %v18196_v1 = vld [vmem:[%s15167_s25 + $0x8] sm:$0xff]  ;;  %v13755_v5 = vpack.c.bf16 %v9855_v62, %v9854_v61  ;;  %v9907_v61 = vld [vmem:[%s20862_s4 + $0x9b8] sm:$0xff] }
 0xfa0   : > { %v9905_v55 = vld [vmem:[%s20862_s4 + $0x9a8] sm:$0xff] }
 0xfa1   : > { %13652 = vmatpush3.bf16.msra.mxu0 %v13651_v7  ;;  %13684 = vmatpush3.bf16.msra.mxu1 %v13683_v8  ;;  %v13733_v7 = vpack.c.bf16 %v9843_v26, %v9842_v22  ;;  %v9826_v8 = vld [vmem:[%s20861_s3 + $0x940] sm:$0xff] }
 0xfa2   : > { %13686 = vmatprep.subr.bf16.mxu0 %v13685_v49  ;;  %13718 = vmatprep.subr.bf16.mxu1 %v13717_v45  ;;  %v9813_v49 = vld [vmem:[%s20861_s3 + $0x8d8] sm:$0xff]  ;;  %v9844_v45 = vld [vmem:[%s20861_s3 + $0x9d0] sm:$0xff]  ;;  %v13735_v0 = vpack.c.bf16 %v9827_v9, %v9826_v8  ;;  %v18312_v22 = vld [vmem:[%s15167_s25] sm:$0xff] }
 0xfa3   : > { %v13705_v15 = vpack.c.bf16 %v9813_v49, %v9812_v10  ;;  %v9872_v26 = vld [vmem:[%s20862_s4 + $0x8a0] sm:$0xff]  ;;  %v18335_v9 = vld [vmem:[%s15167_s25 + $0x30] sm:$0xff]  ;;  %v9875_v49 = vld [vmem:[%s20862_s4 + $0x8b8] sm:$0xff] }
 0xfa4   : > { %4761 = vmatmul.mubr.f32.vlgmr.msra.gmra.mrb[60].mxu0 %v14731_v35  ;;  %4836 = vmatmul.mubr.f32.vlgmr.msra.gmra.mrb[60].mxu1 %v14732_v36  ;;  %v9830_v36 = vld [vmem:[%s20861_s3 + $0x960] sm:$0xff]  ;;  %v9874_v10 = vld [vmem:[%s20862_s4 + $0x8b0] sm:$0xff] }
 0xfa5   : > { %13688 = vmatpush3.bf16.msra.mxu0 %v13687_v21  ;;  %13720 = vmatpush3.bf16.msra.mxu1 %v13719_v17  ;;  %v13737_v21 = vpack.c.bf16 %v9845_v11, %v9844_v45  ;;  %v9828_v17 = vld [vmem:[%s20861_s3 + $0x950] sm:$0xff]  ;;  %v14742_v8 = vld [vmem:[%s15167_s25 + $0x20] sm:$0xff]  ;;  %v13761_v11 = vpack.c.bf16 %v9875_v49, %v9874_v10  ;;  %v9911_v49 = vld [vmem:[%s20862_s4 + $0x9d8] sm:$0xff] }
 0xfa6   : > { %13690 = vmatprep.subr.bf16.mxu0 %v13689_v14  ;;  %13722 = vmatprep.subr.bf16.mxu1 %v13721_v19  ;;  %v9815_v14 = vld [vmem:[%s20861_s3 + $0x8e8] sm:$0xff]  ;;  %v9846_v19 = vld [vmem:[%s20861_s3 + $0x9e0] sm:$0xff]  ;;  %v13739_v30 = vpack.c.bf16 %v9829_v23, %v9828_v17  ;;  %v9878_v17 = vld [vmem:[%s20862_s4 + $0x8d0] sm:$0xff] }
 0xfa7   : > { %4765 = vmatprep.mubr.f32.mxu0 %v14733_v46  ;;  %4840 = vmatprep.mubr.f32.mxu1 %v14734_v50  ;;  %v13709_v32 = vpack.c.bf16 %v9815_v14, %v9814_v33  ;;  %v13741_v35 = vpack.c.bf16 %v9847_v25, %v9846_v19  ;;  %v9833_v46 = vld [vmem:[%s20861_s3 + $0x978] sm:$0xff]  ;;  %v9868_v50 = vld [vmem:[%s20862_s4 + $0x880] sm:$0xff]  ;;  %v9862_v19 = vld [vmem:[%s20862_s4 + $0x850] sm:$0xff] }
 0xfa8   : > { %4766 = vmatmul.mubr.f32.gmra.mrb[62].mxu0 %v14735_v51  ;;  %4841 = vmatmul.mubr.f32.gmra.mrb[62].mxu1 %v14736_v52  ;;  %v9869_v51 = vld [vmem:[%s20862_s4 + $0x888] sm:$0xff]  ;;  %v13715_v52 = vpack.c.bf16 %v9801_v41, %v9800_v43  ;;  %v9879_v23 = vld [vmem:[%s20862_s4 + $0x8d8] sm:$0xff]  ;;  %v9884_v41 = vld [vmem:[%s20862_s4 + $0x900] sm:$0xff] }
 0xfa9   : > { %13692 = vmatpush3.bf16.msra.mxu0 %v13691_v37  ;;  %13724 = vmatpush3.bf16.msra.mxu1 %v13723_v48  ;;  %v9831_v37 = vld [vmem:[%s20861_s3 + $0x968] sm:$0xff]  ;;  %v9816_v48 = vld [vmem:[%s20861_s3 + $0x8f0] sm:$0xff]  ;;  %v13769_v14 = vpack.c.bf16 %v9879_v23, %v9878_v17  ;;  %v9863_v25 = vld [vmem:[%s20862_s4 + $0x858] sm:$0xff] }
 0xfaa   : > { %13694 = vmatprep.subr.bf16.mxu0 %v13693_v24  ;;  %13726 = vmatprep.subr.bf16.mxu1 %v13725_v16  ;;  %v9849_v24 = vld [vmem:[%s20861_s3 + $0x9f8] sm:$0xff]  ;;  %v13711_v16 = vpack.c.bf16 %v9799_v31, %v9798_v18  ;;  %v13743_v4 = vpack.c.bf16 %v9831_v37, %v9830_v36  ;;  %v13713_v38 = vpack.c.bf16 %v9817_v39, %v9816_v48  ;;  %v9882_v36 = vld [vmem:[%s20862_s4 + $0x8f0] sm:$0xff]  ;;  %v9901_v43 = vld [vmem:[%s20862_s4 + $0x988] sm:$0xff] }
 0xfab   : > { %4983 = vmatprep.mubr.f32.mxu0 %v18196_v1  ;;  %5058 = vmatprep.mubr.f32.mxu1 %v18200_v2  ;;  %v13745_v42 = vpack.c.bf16 %v9849_v24, %v9848_v40  ;;  %v13771_v18 = vpack.c.bf16 %v9863_v25, %v9862_v19  ;;  %v9883_v37 = vld [vmem:[%s20862_s4 + $0x8f8] sm:$0xff]  ;;  %v9866_v40 = vld [vmem:[%s20862_s4 + $0x870] sm:$0xff] }
 0xfac   : > { %v13777_v39 = vpack.c.bf16 %v9883_v37, %v9882_v36  ;;  %v9867_v24 = vld [vmem:[%s20862_s4 + $0x878] sm:$0xff]  ;;  %v9910_v10 = vld [vmem:[%s20862_s4 + $0x9d0] sm:$0xff] }
 0xfad   : > { %13696 = vmatpush3.bf16.msra.mxu0 %v13695_v53  ;;  %13728 = vmatpush3.bf16.msra.mxu1 %v13727_v54  ;;  %v13747_v53 = vpack.c.bf16 %v9833_v46, %v9832_v44  ;;  %v13749_v54 = vpack.c.bf16 %v9869_v51, %v9868_v50  ;;  %v9902_v44 = vld [vmem:[%s20862_s4 + $0x990] sm:$0xff]  ;;  %v9903_v50 = vld [vmem:[%s20862_s4 + $0x998] sm:$0xff] }
 0xfae   : > { %13698 = vmatprep.subr.bf16.mxu0 %v13697_v57  ;;  %13730 = vmatprep.subr.bf16.mxu1 %v13729_v58  ;;  %v9870_v57 = vld [vmem:[%s20862_s4 + $0x890] sm:$0xff]  ;;  %v9871_v58 = vld [vmem:[%s20862_s4 + $0x898] sm:$0xff] }
 0xfaf   : > { %v13753_v60 = vpack.c.bf16 %v9871_v58, %v9870_v57  ;;  %v9886_v51 = vld [vmem:[%s20862_s4 + $0x910] sm:$0xff]  ;;  %v9888_v58 = vld [vmem:[%s20862_s4 + $0x920] sm:$0xff]  ;;  %v9899_v25 = vld [vmem:[%s20862_s4 + $0x978] sm:$0xff] }
 0xfb0   : > { %v9914_v23 = vld [vmem:[%s20862_s4 + $0x9f0] sm:$0xff] }
 0xfb1   : > { %13700 = vmatpush3.bf16.msra.mxu0 %v13699_v34  ;;  %13732 = vmatpush3.bf16.msra.mxu1 %v13731_v3  ;;  %v9873_v34 = vld [vmem:[%s20862_s4 + $0x8a8] sm:$0xff]  ;;  %v9898_v19 = vld [vmem:[%s20862_s4 + $0x970] sm:$0xff] }
 0xfb2   : > { %13702 = vmatprep.subr.bf16.mxu0 %v13701_v6  ;;  %13734 = vmatprep.subr.bf16.mxu1 %v13733_v7  ;;  %v14740_v3 = vld [vmem:[%s15167_s25 + $0x28] sm:$0xff]  ;;  %v13757_v6 = vpack.c.bf16 %v9873_v34, %v9872_v26  ;;  %v9890_v26 = vld [vmem:[%s20862_s4 + $0x930] sm:$0xff]  ;;  %v9891_v34 = vld [vmem:[%s20862_s4 + $0x938] sm:$0xff] }
 0xfb3   : > { %v9857_v7 = vld [vmem:[%s20862_s4 + $0x828] sm:$0xff] }
 0xfb5   : > { %13704 = vmatpush3.bf16.msra.mxu0 %v13703_v63  ;;  %13736 = vmatpush3.bf16.msra.mxu1 %v13735_v0  ;;  %v9858_v63 = vld [vmem:[%s20862_s4 + $0x830] sm:$0xff]  ;;  %v9859_v0 = vld [vmem:[%s20862_s4 + $0x838] sm:$0xff] }
 0xfb6   : > { %13706 = vmatprep.subr.bf16.mxu0 %v13705_v15  ;;  %13738 = vmatprep.subr.bf16.mxu1 %v13737_v21  ;;  %v9860_v15 = vld [vmem:[%s20862_s4 + $0x840] sm:$0xff]  ;;  %v9861_v21 = vld [vmem:[%s20862_s4 + $0x848] sm:$0xff] }
 0xfb7   : > { %v13767_v33 = vpack.c.bf16 %v9861_v21, %v9860_v15  ;;  %v9896_v15 = vld [vmem:[%s20862_s4 + $0x960] sm:$0xff]  ;;  %v9897_v21 = vld [vmem:[%s20862_s4 + $0x968] sm:$0xff] }
 0xfb8   : > { %v13807_v17 = vpack.c.bf16 %v9897_v21, %v9896_v15 }
 0xfb9   : > { %13708 = vmatpush3.bf16.msra.mxu0 %v13707_v29  ;;  %13740 = vmatpush3.bf16.msra.mxu1 %v13739_v30  ;;  %v9880_v29 = vld [vmem:[%s20862_s4 + $0x8e0] sm:$0xff]  ;;  %v9881_v30 = vld [vmem:[%s20862_s4 + $0x8e8] sm:$0xff] }
 0xfba   : > { %13710 = vmatprep.subr.bf16.mxu0 %v13709_v32  ;;  %13742 = vmatprep.subr.bf16.mxu1 %v13741_v35  ;;  %v13773_v31 = vpack.c.bf16 %v9881_v30, %v9880_v29  ;;  %v9864_v32 = vld [vmem:[%s20862_s4 + $0x860] sm:$0xff]  ;;  %v9865_v35 = vld [vmem:[%s20862_s4 + $0x868] sm:$0xff]  ;;  %v13811_v29 = vpack.c.bf16 %v9899_v25, %v9898_v19  ;;  %v18498_v30 = vld [vmem:[%s15167_s25 + $0x10] sm:$0xff] }
 0xfbb   : > { %v13775_v48 = vpack.c.bf16 %v9865_v35, %v9864_v32  ;;  %v9785_v32 = vld [vmem:[%s20864_s6 + $0x4] ss:$0 sm:$0xff] }
 0xfbd   : > { %13712 = vmatpush3.bf16.msra.mxu0 %v13711_v16  ;;  %13744 = vmatpush3.bf16.msra.mxu1 %v13743_v4  ;;  %v13779_v16 = vpack.c.bf16 %v9867_v24, %v9866_v40  ;;  %v9900_v4 = vld [vmem:[%s20862_s4 + $0x980] sm:$0xff] }
 0xfbe   : > { %13714 = vmatprep.subr.bf16.mxu0 %v13713_v38  ;;  %13746 = vmatprep.subr.bf16.mxu1 %v13745_v42  ;;  %v13781_v38 = vpack.c.bf16 %v9901_v43, %v9900_v4  ;;  %v9885_v42 = vld [vmem:[%s20862_s4 + $0x908] sm:$0xff] }
 0xfbf   : > { %v13783_v46 = vpack.c.bf16 %v9885_v42, %v9884_v41 }
 0xfc1   : > { %13716 = vmatpush3.bf16.msra.mxu0 %v13715_v52  ;;  %13748 = vmatpush3.bf16.msra.mxu1 %v13747_v53  ;;  %v9887_v52 = vld [vmem:[%s20862_s4 + $0x918] sm:$0xff]  ;;  %v13785_v53 = vpack.c.bf16 %v9903_v50, %v9902_v44 }
 0xfc2   : > { %13750 = vmatprep.subr.bf16.mxu0 %v13749_v54  ;;  %13782 = vmatprep.subr.bf16.mxu1 %v13781_v38  ;;  %v9904_v54 = vld [vmem:[%s20862_s4 + $0x9a0] sm:$0xff]  ;;  %v13787_v56 = vpack.c.bf16 %v9887_v52, %v9886_v51 }
 0xfc3   : > { %v13789_v57 = vpack.c.bf16 %v9905_v55, %v9904_v54 }
 0xfc4   : > { %4984 = vmatmul.mubr.f32.vlgmr.msra.gmra.mrb[64].mxu0 %v18312_v22  ;;  %5059 = vmatmul.mubr.f32.vlgmr.msra.gmra.mrb[64].mxu1 %v17757_v28  ;;  %v9856_v28 = vld [vmem:[%s20862_s4 + $0x820] sm:$0xff] }
 0xfc5   : > { %4988 = vmatprep.mubr.f32.mxu0 %v14740_v3  ;;  %5063 = vmatprep.mubr.f32.mxu1 %v18324_v20  ;;  %v13759_v45 = vpack.c.bf16 %v9857_v7, %v9856_v28  ;;  %v9892_v7 = vld [vmem:[%s20862_s4 + $0x940] sm:$0xff] }
 0xfc6   : > { %13752 = vmatpush3.bf16.msra.mxu0 %v13751_v59  ;;  %13784 = vmatpush3.bf16.msra.mxu1 %v13783_v46  ;;  %v9889_v59 = vld [vmem:[%s20862_s4 + $0x928] sm:$0xff]  ;;  %v9851_v46 = vld [vmem:[%s20865_s7 + $0x4] ss:$0 sm:$0xff] }
 0xfc7   : > { %13754 = vmatprep.subr.bf16.mxu0 %v13753_v60  ;;  %13786 = vmatprep.subr.bf16.mxu1 %v13785_v53  ;;  %v9906_v60 = vld [vmem:[%s20862_s4 + $0x9b0] sm:$0xff]  ;;  %v13791_v62 = vpack.c.bf16 %v9889_v59, %v9888_v58 }
 0xfc8   : > { %4989 = vmatmul.mubr.f32.gmra.mrb[66].mxu0 %v14742_v8  ;;  %5064 = vmatmul.mubr.f32.gmra.mrb[66].mxu1 %v18335_v9 }
 0xfc9   : > { %5206 = vmatprep.mubr.f32.mxu0 %v18196_v1  ;;  %5281 = vmatprep.mubr.f32.mxu1 %v18200_v2  ;;  %v9877_v1 = vld [vmem:[%s20862_s4 + $0x8c8] sm:$0xff]  ;;  %v13763_v2 = vpack.c.bf16 %v9859_v0, %v9858_v63  ;;  %v9894_v63 = vld [vmem:[%s20862_s4 + $0x950] sm:$0xff]  ;;  %v9895_v0 = vld [vmem:[%s20862_s4 + $0x958] sm:$0xff] }
 0xfca   : > { %13756 = vmatpush3.bf16.msra.mxu0 %v13755_v5  ;;  %v13765_v13 = vpack.c.bf16 %v9877_v1, %v9876_v12  ;;  %13788 = vmatpush3.bf16.msra.mxu1 %v13787_v56  ;;  %v9909_v5 = vld [vmem:[%s20862_s4 + $0x9c8] sm:$0xff]  ;;  %v13803_v12 = vpack.c.bf16 %v9895_v0, %v9894_v63  ;;  %v9912_v1 = vld [vmem:[%s20862_s4 + $0x9e0] sm:$0xff] }
 0xfcb   : > { %13758 = vmatprep.subr.bf16.mxu0 %v13757_v6  ;;  %13790 = vmatprep.subr.bf16.mxu1 %v13789_v57  ;;  %v13795_v6 = vpack.c.bf16 %v9891_v34, %v9890_v26 }
 0xfce   : > { %13760 = vmatpush3.bf16.msra.mxu0 %v13759_v45  ;;  %13792 = vmatpush3.bf16.msra.mxu1 %v13791_v62 }
 0xfcf   : > { %13762 = vmatprep.subr.bf16.mxu0 %v13761_v11  ;;  %v13801_v11 = vpack.c.bf16 %v9911_v49, %v9910_v10 }
 0xfd2   : > { %13764 = vmatpush3.bf16.msra.mxu0 %v13763_v2  ;;  %v9913_v2 = vld [vmem:[%s20862_s4 + $0x9e8] sm:$0xff] }
 0xfd3   : > { %13766 = vmatprep.subr.bf16.mxu0 %v13765_v13  ;;  %v13805_v13 = vpack.c.bf16 %v9913_v2, %v9912_v1 }
 0xfd6   : > { %13768 = vmatpush3.bf16.msra.mxu0 %v13767_v33  ;;  %v9915_v33 = vld [vmem:[%s20862_s4 + $0x9f8] sm:$0xff] }
 0xfd7   : > { %13770 = vmatprep.subr.bf16.mxu0 %v13769_v14  ;;  %v13809_v14 = vpack.c.bf16 %v9915_v33, %v9914_v23 }
 0xfda   : > { %13772 = vmatpush3.bf16.msra.mxu0 %v13771_v18 }
 0xfdb   : > { %13774 = vmatprep.subr.bf16.mxu0 %v13773_v31 }
 0xfde   : > { %13776 = vmatpush3.bf16.msra.mxu0 %v13775_v48 }
 0xfdf   : > { %13778 = vmatprep.subr.bf16.mxu0 %v13777_v39 }
 0xfe2   : > { %13780 = vmatpush3.bf16.msra.mxu0 %v13779_v16 }
 0xfe5   : > { %5207 = vmatmul.mubr.f32.vlgmr.msra.gmra.mrb[68].mxu0 %v18312_v22  ;;  %v13793_v22 = vpack.c.bf16 %v9907_v61, %v9906_v60 }
 0xfe6   : > { %5211 = vmatprep.mubr.f32.mxu0 %v14740_v3  ;;  %v9908_v3 = vld [vmem:[%s20862_s4 + $0x9c0] sm:$0xff] }
 0xfe7   : > { %13794 = vmatprep.subr.bf16.mxu1 %v13793_v22  ;;  %v13797_v28 = vpack.c.bf16 %v9909_v5, %v9908_v3 }
 0xfe8   : > { %13796 = vmatpush3.bf16.msra.mxu1 %v13795_v6 }
 0xfe9   : > { %5212 = vmatmul.mubr.f32.gmra.mrb[70].mxu0 %v14742_v8  ;;  %v9893_v8 = vld [vmem:[%s20862_s4 + $0x948] sm:$0xff]  ;;  %13798 = vmatprep.subr.bf16.mxu1 %v13797_v28 }
 0xfea   : > { %v13799_v45 = vpack.c.bf16 %v9893_v8, %v9892_v7  ;;  %v9917_v8 = vld [vmem:[%s20866_s8 + $0x4] ss:$0 sm:$0xff] }
 0xfec   : > { %13800 = vmatpush3.bf16.msra.mxu1 %v13799_v45 }
 0xfed   : > { %13802 = vmatprep.subr.bf16.mxu1 %v13801_v11 }
 0xff0   : > { %13804 = vmatpush3.bf16.msra.mxu1 %v13803_v12 }
 0xff1   : > { %13806 = vmatprep.subr.bf16.mxu1 %v13805_v13 }
 0xff4   : > { %13808 = vmatpush3.bf16.msra.mxu1 %v13807_v17 }
 0xff5   : > { %13810 = vmatprep.subr.bf16.mxu1 %v13809_v14 }
 0xff8   : > { %13812 = vmatpush3.bf16.msra.mxu1 %v13811_v29 }
 0xffb   : > { %5282 = vmatmul.mubr.f32.vlgmr.msra.gmra.mrb[68].mxu1 %v18498_v30 }
 0xffc   : > { %5286 = vmatprep.mubr.f32.mxu1 %v18324_v20 }
 0xfff   : > { %5287 = vmatmul.mubr.f32.gmra.mrb[70].mxu1 %v18335_v9 }
0x1077   : > { %v11661_v18 = vpop.f32.mrb[60].mxu0  ;;  %v11699_v31 = vpop.f32.mrb[60].mxu1 }
0x1078   : > { %v11662_v35 = vpop.f32.mrb[61].mxu0  ;;  %v11700_v36 = vpop.f32.mrb[61].mxu1 }
0x1079   : > { %v11663_v37 = vadd.f32 %v11662_v35, %v11661_v18  ;;  %v11701_v48 = vadd.f32 %v11700_v36, %v11699_v31 }
0x107b   : > { %v4763_v39 = vadd.f32 %v11663_v37, %v9785_v32  ;;  %v11664_v40 = vpop.f32.mrb[62].mxu0  ;;  %v11702_v24 = vpop.f32.mrb[62].mxu1 }
0x107c   : > { %v11665_v16 = vpop.f32.mrb[63].mxu0  ;;  %v11703_v4 = vpop.f32.mrb[63].mxu1 }
0x107d   : > { %v4838_v43 = vadd.f32 %v11701_v48, %v4763_v39  ;;  %v11666_v38 = vadd.f32 %v11665_v16, %v11664_v40  ;;  %v11704_v20 = vadd.f32 %v11703_v4, %v11702_v24  ;;  %v9925_v40 = vld [vmem:[%s20863_s5 + $0x408] sm:$0xff]  ;;  %v9924_v16 = vld [vmem:[%s20863_s5 + $0x400] sm:$0xff] }
0x107e   : > { %v9929_v24 = vld [vmem:[%s20863_s5 + $0x428] sm:$0xff] }
0x107f   : > { %12633 = vmatprep.mubr.msk.f32.mxu0 %vm1059_vm0, %v4838_v43  ;;  %v4768_v9 = vadd.f32 %v11666_v38, %v9785_v32  ;;  %v13823_v4 = vpack.c.bf16 %v9929_v24, %v9925_v40  ;;  %v9928_v43 = vld [vmem:[%s20863_s5 + $0x420] sm:$0xff]  ;;  %v9927_v38 = vld [vmem:[%s20863_s5 + $0x418] sm:$0xff]  ;;  %v9961_v40 = vld [vmem:[%s20860_s2 + $0xa08] sm:$0xff] }
0x1080   : > { %v9992_v24 = vld [vmem:[%s20860_s2 + $0xb00] sm:$0xff] }
0x1081   : > { %v4843_v41 = vadd.f32 %v11704_v20, %v4768_v9  ;;  %v9931_v20 = vld [vmem:[%s20863_s5 + $0x438] sm:$0xff]  ;;  %v13825_v9 = vpack.c.bf16 %v9928_v43, %v9924_v16  ;;  %v9993_v16 = vld [vmem:[%s20860_s2 + $0xb08] sm:$0xff] }
0x1082   : > { %v9979_v43 = vld [vmem:[%s20860_s2 + $0xa98] sm:$0xff] }
0x1097   : > { %v11737_v42 = vpop.f32.mrb[64].mxu0  ;;  %v11775_v44 = vpop.f32.mrb[64].mxu1 }
0x1098   : > { %v11738_v50 = vpop.f32.mrb[65].mxu0  ;;  %v11776_v51 = vpop.f32.mrb[65].mxu1 }
0x1099   : > { %v11739_v52 = vadd.f32 %v11738_v50, %v11737_v42  ;;  %v11777_v53 = vadd.f32 %v11776_v51, %v11775_v44  ;;  %v9933_v42 = vld [vmem:[%s20863_s5 + $0x448] sm:$0xff]  ;;  %v9936_v50 = vld [vmem:[%s20863_s5 + $0x460] sm:$0xff] }
0x109a   : > { %v9937_v44 = vld [vmem:[%s20863_s5 + $0x468] sm:$0xff] }
0x109b   : > { %v4986_v54 = vadd.f32 %v11739_v52, %v9851_v46  ;;  %v11740_v55 = vpop.f32.mrb[66].mxu0  ;;  %v11778_v56 = vpop.f32.mrb[66].mxu1  ;;  %v13827_v51 = vpack.c.bf16 %v9937_v44, %v9933_v42  ;;  %v9962_v42 = vld [vmem:[%s20860_s2 + $0xa10] sm:$0xff]  ;;  %v9963_v44 = vld [vmem:[%s20860_s2 + $0xa18] sm:$0xff] }
0x109c   : > { %v11741_v57 = vpop.f32.mrb[67].mxu0  ;;  %v11779_v58 = vpop.f32.mrb[67].mxu1 }
0x109d   : > { %v5061_v59 = vadd.f32 %v11777_v53, %v4986_v54  ;;  %v11742_v60 = vadd.f32 %v11741_v57, %v11740_v55  ;;  %v11780_v61 = vadd.f32 %v11779_v58, %v11778_v56  ;;  %v9941_v53 = vld [vmem:[%s20863_s5 + $0x488] sm:$0xff]  ;;  %v9940_v56 = vld [vmem:[%s20863_s5 + $0x480] sm:$0xff] }
0x109e   : > { %v9945_v54 = vld [vmem:[%s20863_s5 + $0x4a8] sm:$0xff]  ;;  %v9944_v57 = vld [vmem:[%s20863_s5 + $0x4a0] sm:$0xff] }
0x109f   : > { %v4991_v62 = vadd.f32 %v11742_v60, %v9851_v46  ;;  %v9932_v46 = vld [vmem:[%s20863_s5 + $0x440] sm:$0xff]  ;;  %v13831_v55 = vpack.c.bf16 %v9945_v54, %v9941_v53  ;;  %v13833_v58 = vpack.c.bf16 %v9944_v57, %v9940_v56  ;;  %v9953_v60 = vld [vmem:[%s20863_s5 + $0x4e8] sm:$0xff] }
0x10a0   : > { %v13829_v52 = vpack.c.bf16 %v9936_v50, %v9932_v46  ;;  %v9994_v50 = vld [vmem:[%s20860_s2 + $0xb10] sm:$0xff]  ;;  %v9981_v56 = vld [vmem:[%s20860_s2 + $0xaa8] sm:$0xff]  ;;  %v10012_v57 = vld [vmem:[%s20860_s2 + $0xba0] sm:$0xff] }
0x10a1   : > { %v5066_v22 = vadd.f32 %v11780_v61, %v4991_v62  ;;  %v9948_v61 = vld [vmem:[%s20863_s5 + $0x4c0] sm:$0xff] }
0x10a3   : > { %v13813_v26 = vpack.c.bf16 %v5066_v22, %v5061_v59  ;;  %v9949_v59 = vld [vmem:[%s20863_s5 + $0x4c8] sm:$0xff]  ;;  %v9952_v22 = vld [vmem:[%s20863_s5 + $0x4e0] sm:$0xff] }
0x10a4   : > { %v13835_v62 = vpack.c.bf16 %v9953_v60, %v9949_v59  ;;  %v13861_v59 = vpack.c.bf16 %v9963_v44, %v9962_v42  ;;  %v10021_v42 = vld [vmem:[%s20860_s2 + $0xbe8] sm:$0xff] }
0x10a5   : > { %13815 = vmatprep.subr.msk.bf16.mxu0 %vm15534_vm1, %v13813_v26 }
0x10a6   : > { %13818 = vmatpush3.bf16.xpose.msk.msra.mxu0 %vm15534_vm1, %v13813_v26  ;;  %v13837_v26 = vpack.c.bf16 %v9952_v22, %v9948_v61  ;;  %v9964_v61 = vld [vmem:[%s20860_s2 + $0xa20] sm:$0xff] }
0x10a7   : > { %13824 = vmatprep.subr.bf16.mxu0 %v13823_v4  ;;  %v9978_v4 = vld [vmem:[%s20860_s2 + $0xa90] sm:$0xff] }
0x10a8   : > { %v13859_v54 = vpack.c.bf16 %v9979_v43, %v9978_v4  ;;  %v10002_v43 = vld [vmem:[%s20860_s2 + $0xb50] sm:$0xff] }
0x10ad   : > { %12634 = vmatmul.mubr.msk.f32.vlgmr.msra.gmra.mrb[72].mxu0 %vm1059_vm0, %v4843_v41  ;;  %v13839_v41 = vpack.c.bf16 %v9931_v20, %v9927_v38  ;;  %v10010_v38 = vld [vmem:[%s20860_s2 + $0xb90] sm:$0xff]  ;;  %v10011_v20 = vld [vmem:[%s20860_s2 + $0xb98] sm:$0xff] }
0x10ae   : > { %5587 = vmatprep.mubr.f32.mxu0 %v14801_v27  ;;  %13826 = vmatpush1.bf16.msra.mxu0 %v13825_v9 }
0x10af   : > { %13828 = vmatprep.subr.bf16.mxu0 %v13827_v51  ;;  %v9995_v51 = vld [vmem:[%s20860_s2 + $0xb18] sm:$0xff] }
0x10b0   : > { %v13893_v60 = vpack.c.bf16 %v9995_v51, %v9994_v50  ;;  %v9972_v50 = vld [vmem:[%s20860_s2 + $0xa60] sm:$0xff]  ;;  %v9973_v51 = vld [vmem:[%s20860_s2 + $0xa68] sm:$0xff] }
0x10b2   : > { %13830 = vmatpush1.bf16.msra.mxu0 %v13829_v52  ;;  %v9980_v52 = vld [vmem:[%s20860_s2 + $0xaa0] sm:$0xff] }
0x10b3   : > { %13832 = vmatprep.subr.bf16.mxu0 %v13831_v55  ;;  %v13891_v55 = vpack.c.bf16 %v10011_v20, %v10010_v38  ;;  %v13863_v22 = vpack.c.bf16 %v9981_v56, %v9980_v52  ;;  %v10003_v38 = vld [vmem:[%s20860_s2 + $0xb58] sm:$0xff]  ;;  %v9988_v20 = vld [vmem:[%s20860_s2 + $0xae0] sm:$0xff]  ;;  %v9990_v56 = vld [vmem:[%s20860_s2 + $0xaf0] sm:$0xff] }
0x10b6   : > { %13834 = vmatpush1.bf16.msra.mxu0 %v13833_v58  ;;  %v10013_v58 = vld [vmem:[%s20860_s2 + $0xba8] sm:$0xff] }
0x10b7   : > { %13836 = vmatprep.subr.bf16.mxu0 %v13835_v62  ;;  %v9965_v62 = vld [vmem:[%s20860_s2 + $0xa28] sm:$0xff] }
0x10b8   : > { %v11813_v34 = vpop.f32.mrb[68].mxu0 }
0x10b9   : > { %v11814_v3 = vpop.f32.mrb[69].mxu0 }
0x10ba   : > { %v11815_v5 = vadd.f32 %v11814_v3, %v11813_v34  ;;  %13838 = vmatpush1.bf16.msra.mxu0 %v13837_v26  ;;  %v13895_v26 = vpack.c.bf16 %v10013_v58, %v10012_v57  ;;  %v9991_v57 = vld [vmem:[%s20860_s2 + $0xaf8] sm:$0xff]  ;;  %v10022_v58 = vld [vmem:[%s20860_s2 + $0xbf0] sm:$0xff] }
0x10bc   : > { %v11816_v6 = vpop.f32.mrb[70].mxu0  ;;  %v5209_v10 = vadd.f32 %v11815_v5, %v9917_v8  ;;  %v9926_v5 = vld [vmem:[%s20863_s5 + $0x410] sm:$0xff] }
0x10bd   : > { %v11817_v28 = vpop.f32.mrb[71].mxu0 }
0x10be   : > { %v11818_v7 = vadd.f32 %v11817_v28, %v11816_v6  ;;  %v9930_v6 = vld [vmem:[%s20863_s5 + $0x430] sm:$0xff] }
0x10c0   : > { %v5214_v63 = vadd.f32 %v11818_v7, %v9917_v8  ;;  %v9935_v7 = vld [vmem:[%s20863_s5 + $0x458] sm:$0xff] }
0x10c1   : > { %v9939_v8 = vld [vmem:[%s20863_s5 + $0x478] sm:$0xff] }
0x10ce   : > { %v11851_v49 = vpop.f32.mrb[68].mxu1 }
0x10cf   : > { %v11852_v45 = vpop.f32.mrb[69].mxu1 }
0x10d0   : > { %v11853_v11 = vadd.f32 %v11852_v45, %v11851_v49  ;;  %v13841_v45 = vpack.c.bf16 %v9930_v6, %v9926_v5  ;;  %v9982_v5 = vld [vmem:[%s20860_s2 + $0xab0] sm:$0xff]  ;;  %v9983_v6 = vld [vmem:[%s20860_s2 + $0xab8] sm:$0xff] }
0x10d2   : > { %v5284_v0 = vadd.f32 %v11853_v11, %v5209_v10  ;;  %v11854_v12 = vpop.f32.mrb[70].mxu1 }
0x10d3   : > { %v11855_v1 = vpop.f32.mrb[71].mxu1 }
0x10d4   : > { %v11856_v2 = vadd.f32 %v11855_v1, %v11854_v12  ;;  %v9938_v12 = vld [vmem:[%s20863_s5 + $0x470] sm:$0xff]  ;;  %v9943_v1 = vld [vmem:[%s20863_s5 + $0x498] sm:$0xff] }
0x10d6   : > { %v5289_v13 = vadd.f32 %v11856_v2, %v5214_v63  ;;  %v13843_v63 = vpack.c.bf16 %v9939_v8, %v9935_v7  ;;  %v9947_v2 = vld [vmem:[%s20863_s5 + $0x4b8] sm:$0xff]  ;;  %v13865_v8 = vpack.c.bf16 %v9965_v62, %v9964_v61  ;;  %v9974_v62 = vld [vmem:[%s20860_s2 + $0xa70] sm:$0xff] }
0x10d7   : > { %v10015_v7 = vld [vmem:[%s20860_s2 + $0xbb8] sm:$0xff] }
0x10d8   : > { %v13819_v15 = vpack.c.bf16 %v5289_v13, %v5284_v0  ;;  %v9934_v0 = vld [vmem:[%s20863_s5 + $0x450] sm:$0xff] }
0x10d9   : > { %v13845_v13 = vpack.c.bf16 %v9938_v12, %v9934_v0  ;;  %v9998_v0 = vld [vmem:[%s20860_s2 + $0xb30] sm:$0xff]  ;;  %v9999_v12 = vld [vmem:[%s20860_s2 + $0xb38] sm:$0xff] }
0x10da   : > { %13820 = vmatprep.subr.bf16.mxu1 %v13819_v15 }
0x10db   : > { %13822 = vmatpush3.bf16.msra.mxu1 %v13819_v15  ;;  %v13847_v15 = vpack.c.bf16 %v9947_v2, %v9943_v1  ;;  %v9984_v1 = vld [vmem:[%s20860_s2 + $0xac0] sm:$0xff]  ;;  %v9985_v2 = vld [vmem:[%s20860_s2 + $0xac8] sm:$0xff] }
0x10dc   : > { %13840 = vmatprep.subr.bf16.mxu1 %v13839_v41  ;;  %v13889_v41 = vpack.c.bf16 %v9993_v16, %v9992_v24  ;;  %v9971_v24 = vld [vmem:[%s20860_s2 + $0xa58] sm:$0xff] }
0x1180   : > { %v12635_v21 = vpop.f32.mrb[72].mxu0 }
0x1181   : > { %v5380_v17 = vmul.f32 0.125, %v12635_v21  ;;  %v5370_v23 = vpop.f32.mrb[73].mxu0  ;;  %v9942_v21 = vld [vmem:[%s20863_s5 + $0x490] sm:$0xff] }
0x1182   : > { %v5379_v33 = vmul.f32 0.125, %v5370_v23  ;;  %v9951_v23 = vld [vmem:[%s20863_s5 + $0x4d8] sm:$0xff] }
0x1183   : > { %v5384_v14 = vsel %vm1149_vm2, %v5380_v17, -inf }
0x1184   : > { %5385 = vmax.xlane.f32.xlu1 %v5384_v14  ;;  %v5381_v19 = vsel %vm1149_vm2, %v5379_v33, -inf }
0x1185   : > { %5382 = vmax.xlane.f32.xlu0 %v5381_v19 }
0x1211   : > { %v5386_v25 = vpop.xlane.xlu1 %5385 }
0x1212   : > { %v5388_v29 = vsub.f32 %v5380_v17, %v5386_v25  ;;  %v5383_v18 = vpop.xlane.xlu0 %5382  ;;  %v9946_v17 = vld [vmem:[%s20863_s5 + $0x4b0] sm:$0xff] }
0x1213   : > { %v5387_v31 = vsub.f32 %v5379_v33, %v5383_v18  ;;  %v9955_v33 = vld [vmem:[%s20863_s5 + $0x4f8] sm:$0xff]  ;;  %v13849_v14 = vpack.c.bf16 %v9946_v17, %v9942_v21  ;;  %v9950_v25 = vld [vmem:[%s20863_s5 + $0x4d0] sm:$0xff]  ;;  %v14745_v21 = vld [vmem:[%s15031_s29 + $0x8] sm:$0xff] }
0x1214   : > { %v5391_v32 = vmul.f32 1.442695, %v5388_v29  ;;  %v13851_v19 = vpack.c.bf16 %v9955_v33, %v9951_v23  ;;  %v9954_v29 = vld [vmem:[%s20863_s5 + $0x4f0] sm:$0xff]  ;;  %v14746_v17 = vld [vmem:[%s15031_s29 + $0x18] sm:$0xff]  ;;  %v13901_v33 = vpack.c.bf16 %v9999_v12, %v9998_v0  ;;  %v10058_v12 = vld [vmem:[%s20861_s3 + $0xb00] sm:$0xff] }
0x1215   : > { %v5389_v35 = vmul.f32 1.442695, %v5387_v31  ;;  %v13853_v18 = vpack.c.bf16 %v9954_v29, %v9950_v25  ;;  %v9976_v31 = vld [vmem:[%s20860_s2 + $0xa80] sm:$0xff]  ;;  %v13871_v25 = vpack.c.bf16 %v9985_v2, %v9984_v1  ;;  %v10059_v1 = vld [vmem:[%s20861_s3 + $0xb08] sm:$0xff]  ;;  %v10044_v2 = vld [vmem:[%s20861_s3 + $0xa90] sm:$0xff] }
0x1216   : > { %14654 = vpow2.f32 %v5391_v32  ;;  %v9977_v32 = vld [vmem:[%s20860_s2 + $0xa88] sm:$0xff] }
0x1217   : > { %14656 = vpow2.f32 %v5389_v35  ;;  %v13855_v35 = vpack.c.bf16 %v9977_v32, %v9976_v31  ;;  %v10001_v31 = vld [vmem:[%s20860_s2 + $0xb48] sm:$0xff]  ;;  %v9986_v32 = vld [vmem:[%s20860_s2 + $0xad0] sm:$0xff] }
0x1219   : > { %13856 = vmatprep.subr.bf16.mxu0 %v13855_v35  ;;  %v9987_v35 = vld [vmem:[%s20860_s2 + $0xad8] sm:$0xff] }
0x121a   : > { %v13875_v16 = vpack.c.bf16 %v9987_v35, %v9986_v32  ;;  %v10047_v32 = vld [vmem:[%s20861_s3 + $0xaa8] sm:$0xff]  ;;  %v10078_v35 = vld [vmem:[%s20861_s3 + $0xba0] sm:$0xff] }
0x1220   : > { %v14655_v36 = vpop.eup %14654 }
0x1221   : > { %v14657_v37 = vpop.eup %14656  ;;  %v5396_v48 = vsel %vm1149_vm2, %v14655_v36, 0.0 }
0x1222   : > { %5397 = vadd.xlane.f32.xlu1 %v5396_v48  ;;  %v5393_v39 = vsel %vm1149_vm2, %v14657_v37, 0.0 }
0x1223   : > { %5394 = vadd.xlane.f32.xlu0 %v5393_v39  ;;  %v9960_v39 = vld [vmem:[%s20860_s2 + $0xa00] sm:$0xff] }
0x1224   : > { %v13857_v9 = vpack.c.bf16 %v9961_v40, %v9960_v39  ;;  %v9970_v40 = vld [vmem:[%s20860_s2 + $0xa50] sm:$0xff] }
0x1225   : > { %v13877_v44 = vpack.c.bf16 %v9971_v24, %v9970_v40  ;;  %v10030_v24 = vld [vmem:[%s20861_s3 + $0xa20] sm:$0xff] }
0x12af   : > { %v5398_v34 = vpop.xlane.xlu1 %5397 }
0x12b0   : > { %14658 = vrcp.f32 %v5398_v34  ;;  %v5395_v3 = vpop.xlane.xlu0 %5394  ;;  %v9996_v34 = vld [vmem:[%s20860_s2 + $0xb20] sm:$0xff] }
0x12b1   : > { %14660 = vrcp.f32 %v5395_v3  ;;  %v9997_v3 = vld [vmem:[%s20860_s2 + $0xb28] sm:$0xff] }
0x12ba   : > { %v14659_v28 = vpop.eup %14658 }
0x12bb   : > { %v14661_v10 = vpop.eup %14660  ;;  %v5402_v11 = vmul.f32 %v14659_v28, %v14655_v36  ;;  %v10008_v36 = vld [vmem:[%s20860_s2 + $0xb80] sm:$0xff]  ;;  %v10014_v28 = vld [vmem:[%s20860_s2 + $0xbb0] sm:$0xff] }
0x12bc   : > { %v5401_v49 = vmul.f32 %v14661_v10, %v14657_v37  ;;  %v10009_v37 = vld [vmem:[%s20860_s2 + $0xb88] sm:$0xff]  ;;  %v13897_v10 = vpack.c.bf16 %v9997_v3, %v9996_v34  ;;  %v10006_v3 = vld [vmem:[%s20860_s2 + $0xb70] sm:$0xff] }
0x12bd   : > { %v13887_v48 = vpack.c.bf16 %v10009_v37, %v10008_v36  ;;  %v10018_v36 = vld [vmem:[%s20860_s2 + $0xbd0] sm:$0xff]  ;;  %v10019_v37 = vld [vmem:[%s20860_s2 + $0xbd8] sm:$0xff] }
0x12be   : > { %12640 = vmatprep.mubr.msk.f32.mxu1 %vm1149_vm2, %v5401_v49  ;;  %v9966_v49 = vld [vmem:[%s20860_s2 + $0xa30] sm:$0xff]  ;;  %v13907_v4 = vpack.c.bf16 %v10019_v37, %v10018_v36  ;;  %v10079_v36 = vld [vmem:[%s20861_s3 + $0xba8] sm:$0xff]  ;;  %v14747_v37 = vld [vmem:[%s15031_s29] sm:$0xff] }
0x12bf   : > { %12641 = vmatmul.mubr.msk.f32.vlgmr.msra.gmra.mrb[72].mxu1 %vm1149_vm2, %v5402_v11  ;;  %v13867_v11 = vpack.c.bf16 %v9983_v6, %v9982_v5  ;;  %v10007_v5 = vld [vmem:[%s20860_s2 + $0xb78] sm:$0xff]  ;;  %v10042_v6 = vld [vmem:[%s20861_s3 + $0xa80] sm:$0xff] }
0x12c0   : > { %13842 = vmatpush1.bf16.msra.mxu1 %v13841_v45  ;;  %5664 = vmatprep.mubr.f32.mxu1 %v14801_v27  ;;  %v9967_v45 = vld [vmem:[%s20860_s2 + $0xa38] sm:$0xff] }
0x12c1   : > { %13844 = vmatprep.subr.bf16.mxu1 %v13843_v63  ;;  %v13899_v63 = vpack.c.bf16 %v10015_v7, %v10014_v28  ;;  %v13869_v23 = vpack.c.bf16 %v9967_v45, %v9966_v49  ;;  %v10043_v28 = vld [vmem:[%s20861_s3 + $0xa88] sm:$0xff]  ;;  %v10074_v7 = vld [vmem:[%s20861_s3 + $0xb80] sm:$0xff]  ;;  %v13917_v49 = vpack.c.bf16 %v10007_v5, %v10006_v3  ;;  %v18941_v3 = vld [vmem:[%s15167_s25 + $0x18] sm:$0xff] }
0x12c2   : > { %v10026_v45 = vld [vmem:[%s20861_s3 + $0xa00] sm:$0xff] }
0x12c4   : > { %13846 = vmatpush1.bf16.msra.mxu1 %v13845_v13  ;;  %v10016_v13 = vld [vmem:[%s20860_s2 + $0xbc0] sm:$0xff] }
0x12c5   : > { %13848 = vmatprep.subr.bf16.mxu1 %v13847_v15  ;;  %v10017_v15 = vld [vmem:[%s20860_s2 + $0xbc8] sm:$0xff] }
0x12c6   : > { %v13903_v29 = vpack.c.bf16 %v10017_v15, %v10016_v13  ;;  %v10045_v13 = vld [vmem:[%s20861_s3 + $0xa98] sm:$0xff]  ;;  %v10076_v15 = vld [vmem:[%s20861_s3 + $0xb90] sm:$0xff] }
0x12c8   : > { %13850 = vmatpush1.bf16.msra.mxu1 %v13849_v14  ;;  %v9968_v14 = vld [vmem:[%s20860_s2 + $0xa40] sm:$0xff] }
0x12c9   : > { %13852 = vmatprep.subr.bf16.mxu1 %v13851_v19  ;;  %v9969_v19 = vld [vmem:[%s20860_s2 + $0xa48] sm:$0xff] }
0x12cc   : > { %13854 = vmatpush1.bf16.msra.mxu1 %v13853_v18  ;;  %v10000_v18 = vld [vmem:[%s20860_s2 + $0xb40] sm:$0xff] }
0x12cd   : > { %13888 = vmatprep.subr.bf16.mxu1 %v13887_v48  ;;  %v13873_v48 = vpack.c.bf16 %v9969_v19, %v9968_v14  ;;  %v13905_v39 = vpack.c.bf16 %v10001_v31, %v10000_v18  ;;  %v10029_v14 = vld [vmem:[%s20861_s3 + $0xa18] sm:$0xff]  ;;  %v13923_v19 = vpack.c.bf16 %v10045_v13, %v10044_v2  ;;  %v10046_v31 = vld [vmem:[%s20861_s3 + $0xaa0] sm:$0xff]  ;;  %v10036_v13 = vld [vmem:[%s20861_s3 + $0xa50] sm:$0xff] }
0x12ce   : > { %v10061_v18 = vld [vmem:[%s20861_s3 + $0xb18] sm:$0xff] }
0x1392   : > { %v12642_v46 = vpop.f32.mrb[72].mxu1 }
0x1393   : > { %v5475_v53 = vpop.f32.mrb[73].mxu1 }
0x1394   : > { %9956 = vmatmul.mubr.msk.f32.vlgmr.msra.gmra.mrb[28].mxu0 %vm1059_vm0, %v5475_v53  ;;  %9958 = vmatmul.mubr.msk.f32.vlgmr.msra.gmra.mrb[28].mxu1 %vm1059_vm0, %v5475_v53 }
0x1395   : > { %13858 = vmatpush3.bf16.msra.mxu0 %v13857_v9  ;;  %13890 = vmatpush3.bf16.msra.mxu1 %v13889_v41  ;;  %v9989_v9 = vld [vmem:[%s20860_s2 + $0xae8] sm:$0xff]  ;;  %v10020_v41 = vld [vmem:[%s20860_s2 + $0xbe0] sm:$0xff] }
0x1396   : > { %5593 = vmatprep.mubr.f32.mxu0 %v14801_v27  ;;  %5670 = vmatprep.mubr.f32.mxu1 %v14801_v27  ;;  %v13879_v52 = vpack.c.bf16 %v9989_v9, %v9988_v20  ;;  %v13911_v53 = vpack.c.bf16 %v10021_v42, %v10020_v41  ;;  %v10063_v20 = vld [vmem:[%s20861_s3 + $0xb28] sm:$0xff]  ;;  %v10048_v9 = vld [vmem:[%s20861_s3 + $0xab0] sm:$0xff]  ;;  %v10049_v41 = vld [vmem:[%s20861_s3 + $0xab8] sm:$0xff] }
0x1397   : > { %13860 = vmatprep.subr.bf16.mxu0 %v13859_v54  ;;  %13892 = vmatprep.subr.bf16.mxu1 %v13891_v55  ;;  %v10004_v54 = vld [vmem:[%s20860_s2 + $0xb60] sm:$0xff]  ;;  %v10005_v55 = vld [vmem:[%s20860_s2 + $0xb68] sm:$0xff]  ;;  %v10080_v42 = vld [vmem:[%s20861_s3 + $0xbb0] sm:$0xff] }
0x1398   : > { %9957 = vmatmul.mubr.msk.f32.gmra.mrb[30].mxu0 %vm1059_vm0, %v12642_v46  ;;  %9959 = vmatmul.mubr.msk.f32.gmra.mrb[30].mxu1 %vm1059_vm0, %v12642_v46  ;;  %v13909_v46 = vpack.c.bf16 %v10003_v38, %v10002_v43  ;;  %v13913_v61 = vpack.c.bf16 %v10005_v55, %v10004_v54  ;;  %v13959_v43 = vpack.c.bf16 %v10079_v36, %v10078_v35  ;;  %v10062_v38 = vld [vmem:[%s20861_s3 + $0xb20] sm:$0xff]  ;;  %v10032_v55 = vld [vmem:[%s20861_s3 + $0xa30] sm:$0xff]  ;;  %v10039_v35 = vld [vmem:[%s20861_s3 + $0xa68] sm:$0xff] }
0x1399   : > { %13862 = vmatpush3.bf16.msra.mxu0 %v13861_v59  ;;  %13894 = vmatpush3.bf16.msra.mxu1 %v13893_v60  ;;  %v10023_v59 = vld [vmem:[%s20860_s2 + $0xbf8] sm:$0xff]  ;;  %v13881_v60 = vpack.c.bf16 %v9973_v51, %v9972_v50  ;;  %v14751_v51 = vld [vmem:[%s15031_s29 + $0x20] sm:$0xff]  ;;  %v13961_v54 = vpack.c.bf16 %v10063_v20, %v10062_v38  ;;  %v10040_v20 = vld [vmem:[%s20861_s3 + $0xa70] sm:$0xff] }
0x139a   : > { %13864 = vmatprep.subr.bf16.mxu0 %v13863_v22  ;;  %13896 = vmatprep.subr.bf16.mxu1 %v13895_v26  ;;  %v9975_v22 = vld [vmem:[%s20860_s2 + $0xa78] sm:$0xff]  ;;  %v13883_v26 = vpack.c.bf16 %v9991_v57, %v9990_v56  ;;  %v13915_v34 = vpack.c.bf16 %v10023_v59, %v10022_v58  ;;  %v13931_v57 = vpack.c.bf16 %v10049_v41, %v10048_v9  ;;  %v10064_v59 = vld [vmem:[%s20861_s3 + $0xb30] sm:$0xff] }
0x139b   : > { %5822 = vmatprep.mubr.f32.mxu0 %v14745_v21  ;;  %5897 = vmatprep.mubr.f32.mxu1 %v14746_v17  ;;  %v10077_v21 = vld [vmem:[%s20861_s3 + $0xb98] sm:$0xff] }
0x139c   : > { %v14750_v50 = vld [vmem:[%s15031_s29 + $0x38] sm:$0xff] }
0x139d   : > { %13866 = vmatpush3.bf16.msra.mxu0 %v13865_v8  ;;  %13898 = vmatpush3.bf16.msra.mxu1 %v13897_v10  ;;  %v10075_v8 = vld [vmem:[%s20861_s3 + $0xb88] sm:$0xff]  ;;  %v13885_v10 = vpack.c.bf16 %v9975_v22, %v9974_v62  ;;  %v10033_v56 = vld [vmem:[%s20861_s3 + $0xa38] sm:$0xff]  ;;  %v10082_v22 = vld [vmem:[%s20861_s3 + $0xbc0] sm:$0xff] }
0x139e   : > { %13868 = vmatprep.subr.bf16.mxu0 %v13867_v11  ;;  %13900 = vmatprep.subr.bf16.mxu1 %v13899_v63  ;;  %v10027_v11 = vld [vmem:[%s20861_s3 + $0xa08] sm:$0xff]  ;;  %v13919_v63 = vpack.c.bf16 %v10043_v28, %v10042_v6  ;;  %v13951_v0 = vpack.c.bf16 %v10075_v8, %v10074_v7  ;;  %v13933_v5 = vpack.c.bf16 %v10033_v56, %v10032_v55  ;;  %v10034_v28 = vld [vmem:[%s20861_s3 + $0xa40] sm:$0xff]  ;;  %v10041_v41 = vld [vmem:[%s20861_s3 + $0xa78] sm:$0xff] }
0x139f   : > { %v13921_v17 = vpack.c.bf16 %v10027_v11, %v10026_v45  ;;  %v10051_v62 = vld [vmem:[%s20861_s3 + $0xac8] sm:$0xff]  ;;  %v10052_v11 = vld [vmem:[%s20861_s3 + $0xad0] sm:$0xff]  ;;  %v10092_v55 = vld [vmem:[%s20862_s4 + $0xa00] sm:$0xff] }
0x13a0   : > { %v10035_v7 = vld [vmem:[%s20861_s3 + $0xa48] sm:$0xff] }
0x13a1   : > { %13870 = vmatpush3.bf16.msra.mxu0 %v13869_v23  ;;  %13902 = vmatpush3.bf16.msra.mxu1 %v13901_v33  ;;  %v13953_v23 = vpack.c.bf16 %v10059_v1, %v10058_v12  ;;  %v10028_v33 = vld [vmem:[%s20861_s3 + $0xa10] sm:$0xff]  ;;  %v10067_v45 = vld [vmem:[%s20861_s3 + $0xb48] sm:$0xff]  ;;  %v10085_v12 = vld [vmem:[%s20861_s3 + $0xbd8] sm:$0xff]  ;;  %v13937_v1 = vpack.c.bf16 %v10035_v7, %v10034_v28 }
0x13a2   : > { %13872 = vmatprep.subr.bf16.mxu0 %v13871_v25  ;;  %13904 = vmatprep.subr.bf16.mxu1 %v13903_v29  ;;  %v13955_v25 = vpack.c.bf16 %v10077_v21, %v10076_v15  ;;  %v10060_v29 = vld [vmem:[%s20861_s3 + $0xb10] sm:$0xff]  ;;  %v10037_v15 = vld [vmem:[%s20861_s3 + $0xa58] sm:$0xff]  ;;  %v10093_v56 = vld [vmem:[%s20862_s4 + $0xa08] sm:$0xff] }
0x13a3   : > { %v13957_v40 = vpack.c.bf16 %v10061_v18, %v10060_v29  ;;  %v10087_v29 = vld [vmem:[%s20861_s3 + $0xbe8] sm:$0xff]  ;;  %v13941_v18 = vpack.c.bf16 %v10037_v15, %v10036_v13  ;;  %v19065_v28 = vld [vmem:[%s15167_s25 + $0x38] sm:$0xff]  ;;  %v10116_v13 = vld [vmem:[%s20862_s4 + $0xac0] sm:$0xff] }
0x13a5   : > { %13874 = vmatpush3.bf16.msra.mxu0 %v13873_v48  ;;  %13906 = vmatpush3.bf16.msra.mxu1 %v13905_v39  ;;  %v14748_v48 = vld [vmem:[%s15031_s29 + $0x10] sm:$0xff]  ;;  %v13925_v39 = vpack.c.bf16 %v10029_v14, %v10028_v33  ;;  %v10069_v33 = vld [vmem:[%s20861_s3 + $0xb58] sm:$0xff]  ;;  %v10054_v14 = vld [vmem:[%s20861_s3 + $0xae0] sm:$0xff] }
0x13a6   : > { %13876 = vmatprep.subr.bf16.mxu0 %v13875_v16  ;;  %13908 = vmatprep.subr.bf16.mxu1 %v13907_v4  ;;  %v10031_v16 = vld [vmem:[%s20861_s3 + $0xa28] sm:$0xff]  ;;  %v13927_v4 = vpack.c.bf16 %v10047_v32, %v10046_v31  ;;  %v10038_v32 = vld [vmem:[%s20861_s3 + $0xa60] sm:$0xff] }
0x13a9   : > { %13878 = vmatpush3.bf16.msra.mxu0 %v13877_v44  ;;  %13910 = vmatpush3.bf16.msra.mxu1 %v13909_v46  ;;  %v10081_v44 = vld [vmem:[%s20861_s3 + $0xbb8] sm:$0xff]  ;;  %v14749_v46 = vld [vmem:[%s15031_s29 + $0x28] sm:$0xff] }
0x13aa   : > { %13880 = vmatprep.subr.bf16.mxu0 %v13879_v52  ;;  %13912 = vmatprep.subr.bf16.mxu1 %v13911_v53  ;;  %v14752_v52 = vld [vmem:[%s15031_s29 + $0x30] sm:$0xff]  ;;  %v13929_v53 = vpack.c.bf16 %v10031_v16, %v10030_v24  ;;  %v13963_v58 = vpack.c.bf16 %v10081_v44, %v10080_v42  ;;  %v10057_v24 = vld [vmem:[%s20861_s3 + $0xaf8] sm:$0xff] }
0x13ab   : > { %v10088_v16 = vld [vmem:[%s20861_s3 + $0xbf0] sm:$0xff] }
0x13ac   : > { %v10072_v44 = vld [vmem:[%s20861_s3 + $0xb70] sm:$0xff] }
0x13ad   : > { %13882 = vmatpush3.bf16.msra.mxu0 %v13881_v60  ;;  %13914 = vmatpush3.bf16.msra.mxu1 %v13913_v61  ;;  %v10065_v60 = vld [vmem:[%s20861_s3 + $0xb38] sm:$0xff]  ;;  %v10050_v61 = vld [vmem:[%s20861_s3 + $0xac0] sm:$0xff] }
0x13ae   : > { %13884 = vmatprep.subr.bf16.mxu0 %v13883_v26  ;;  %13916 = vmatprep.subr.bf16.mxu1 %v13915_v34  ;;  %v10083_v26 = vld [vmem:[%s20861_s3 + $0xbc8] sm:$0xff]  ;;  %v13965_v6 = vpack.c.bf16 %v10065_v60, %v10064_v59  ;;  %v13935_v8 = vpack.c.bf16 %v10051_v62, %v10050_v61  ;;  %v13985_v59 = vpack.c.bf16 %v10093_v56, %v10092_v55  ;;  %v10094_v61 = vld [vmem:[%s20862_s4 + $0xa10] sm:$0xff]  ;;  %v10095_v62 = vld [vmem:[%s20862_s4 + $0xa18] sm:$0xff] }
0x13af   : > { %v18937_v34 = vld [vmem:[%s15167_s25 + $0x8] sm:$0xff]  ;;  %v13989_v7 = vpack.c.bf16 %v10095_v62, %v10094_v61  ;;  %v10147_v61 = vld [vmem:[%s20862_s4 + $0xbb8] sm:$0xff] }
0x13b0   : > { %v10145_v55 = vld [vmem:[%s20862_s4 + $0xba8] sm:$0xff] }
0x13b1   : > { %13886 = vmatpush3.bf16.msra.mxu0 %v13885_v10  ;;  %13918 = vmatpush3.bf16.msra.mxu1 %v13917_v49  ;;  %v13967_v10 = vpack.c.bf16 %v10083_v26, %v10082_v22  ;;  %v10066_v49 = vld [vmem:[%s20861_s3 + $0xb40] sm:$0xff] }
0x13b2   : > { %13920 = vmatprep.subr.bf16.mxu0 %v13919_v63  ;;  %13952 = vmatprep.subr.bf16.mxu1 %v13951_v0  ;;  %v10053_v63 = vld [vmem:[%s20861_s3 + $0xad8] sm:$0xff]  ;;  %v10084_v0 = vld [vmem:[%s20861_s3 + $0xbd0] sm:$0xff]  ;;  %v13969_v2 = vpack.c.bf16 %v10067_v45, %v10066_v49  ;;  %v19053_v22 = vld [vmem:[%s15167_s25] sm:$0xff] }
0x13b3   : > { %v13939_v21 = vpack.c.bf16 %v10053_v63, %v10052_v11  ;;  %v10112_v26 = vld [vmem:[%s20862_s4 + $0xaa0] sm:$0xff]  ;;  %v19076_v45 = vld [vmem:[%s15167_s25 + $0x30] sm:$0xff]  ;;  %v10115_v63 = vld [vmem:[%s20862_s4 + $0xab8] sm:$0xff] }
0x13b4   : > { %5823 = vmatmul.mubr.f32.vlgmr.msra.gmra.mrb[74].mxu0 %v14747_v37  ;;  %5898 = vmatmul.mubr.f32.vlgmr.msra.gmra.mrb[74].mxu1 %v14748_v48  ;;  %v10070_v48 = vld [vmem:[%s20861_s3 + $0xb60] sm:$0xff]  ;;  %v10114_v11 = vld [vmem:[%s20862_s4 + $0xab0] sm:$0xff] }
0x13b5   : > { %13922 = vmatpush3.bf16.msra.mxu0 %v13921_v17  ;;  %13954 = vmatpush3.bf16.msra.mxu1 %v13953_v23  ;;  %v13971_v17 = vpack.c.bf16 %v10085_v12, %v10084_v0  ;;  %v10068_v23 = vld [vmem:[%s20861_s3 + $0xb50] sm:$0xff]  ;;  %v14758_v49 = vld [vmem:[%s15167_s25 + $0x20] sm:$0xff]  ;;  %v13995_v12 = vpack.c.bf16 %v10115_v63, %v10114_v11  ;;  %v10151_v63 = vld [vmem:[%s20862_s4 + $0xbd8] sm:$0xff] }
0x13b6   : > { %13924 = vmatprep.subr.bf16.mxu0 %v13923_v19  ;;  %13956 = vmatprep.subr.bf16.mxu1 %v13955_v25  ;;  %v10055_v19 = vld [vmem:[%s20861_s3 + $0xae8] sm:$0xff]  ;;  %v10086_v25 = vld [vmem:[%s20861_s3 + $0xbe0] sm:$0xff]  ;;  %v13973_v31 = vpack.c.bf16 %v10069_v33, %v10068_v23  ;;  %v10118_v23 = vld [vmem:[%s20862_s4 + $0xad0] sm:$0xff] }
0x13b7   : > { %5827 = vmatprep.mubr.f32.mxu0 %v14749_v46  ;;  %5902 = vmatprep.mubr.f32.mxu1 %v14750_v50  ;;  %v13943_v36 = vpack.c.bf16 %v10055_v19, %v10054_v14  ;;  %v13975_v37 = vpack.c.bf16 %v10087_v29, %v10086_v25  ;;  %v10073_v46 = vld [vmem:[%s20861_s3 + $0xb78] sm:$0xff]  ;;  %v10108_v50 = vld [vmem:[%s20862_s4 + $0xa80] sm:$0xff]  ;;  %v10102_v25 = vld [vmem:[%s20862_s4 + $0xa50] sm:$0xff] }
0x13b8   : > { %5828 = vmatmul.mubr.f32.gmra.mrb[76].mxu0 %v14751_v51  ;;  %5903 = vmatmul.mubr.f32.gmra.mrb[76].mxu1 %v14752_v52  ;;  %v10109_v51 = vld [vmem:[%s20862_s4 + $0xa88] sm:$0xff]  ;;  %v13949_v52 = vpack.c.bf16 %v10041_v41, %v10040_v20  ;;  %v10119_v33 = vld [vmem:[%s20862_s4 + $0xad8] sm:$0xff]  ;;  %v10124_v41 = vld [vmem:[%s20862_s4 + $0xb00] sm:$0xff] }
0x13b9   : > { %13926 = vmatpush3.bf16.msra.mxu0 %v13925_v39  ;;  %13958 = vmatpush3.bf16.msra.mxu1 %v13957_v40  ;;  %v10071_v39 = vld [vmem:[%s20861_s3 + $0xb68] sm:$0xff]  ;;  %v10056_v40 = vld [vmem:[%s20861_s3 + $0xaf0] sm:$0xff]  ;;  %v14003_v19 = vpack.c.bf16 %v10119_v33, %v10118_v23  ;;  %v10103_v29 = vld [vmem:[%s20862_s4 + $0xa58] sm:$0xff] }
0x13ba   : > { %13928 = vmatprep.subr.bf16.mxu0 %v13927_v4  ;;  %13960 = vmatprep.subr.bf16.mxu1 %v13959_v43  ;;  %v10089_v4 = vld [vmem:[%s20861_s3 + $0xbf8] sm:$0xff]  ;;  %v13945_v43 = vpack.c.bf16 %v10039_v35, %v10038_v32  ;;  %v13977_v38 = vpack.c.bf16 %v10071_v39, %v10070_v48  ;;  %v13947_v9 = vpack.c.bf16 %v10057_v24, %v10056_v40  ;;  %v10122_v48 = vld [vmem:[%s20862_s4 + $0xaf0] sm:$0xff]  ;;  %v10141_v20 = vld [vmem:[%s20862_s4 + $0xb88] sm:$0xff] }
0x13bb   : > { %6045 = vmatprep.mubr.f32.mxu0 %v18937_v34  ;;  %6120 = vmatprep.mubr.f32.mxu1 %v18941_v3  ;;  %v13979_v42 = vpack.c.bf16 %v10089_v4, %v10088_v16  ;;  %v14005_v32 = vpack.c.bf16 %v10103_v29, %v10102_v25  ;;  %v10123_v39 = vld [vmem:[%s20862_s4 + $0xaf8] sm:$0xff]  ;;  %v10106_v16 = vld [vmem:[%s20862_s4 + $0xa70] sm:$0xff] }
0x13bc   : > { %v14011_v24 = vpack.c.bf16 %v10123_v39, %v10122_v48  ;;  %v10107_v4 = vld [vmem:[%s20862_s4 + $0xa78] sm:$0xff]  ;;  %v10150_v11 = vld [vmem:[%s20862_s4 + $0xbd0] sm:$0xff] }
0x13bd   : > { %13930 = vmatpush3.bf16.msra.mxu0 %v13929_v53  ;;  %13962 = vmatpush3.bf16.msra.mxu1 %v13961_v54  ;;  %v13981_v53 = vpack.c.bf16 %v10073_v46, %v10072_v44  ;;  %v13983_v54 = vpack.c.bf16 %v10109_v51, %v10108_v50  ;;  %v10142_v44 = vld [vmem:[%s20862_s4 + $0xb90] sm:$0xff]  ;;  %v10143_v50 = vld [vmem:[%s20862_s4 + $0xb98] sm:$0xff] }
0x13be   : > { %13932 = vmatprep.subr.bf16.mxu0 %v13931_v57  ;;  %13964 = vmatprep.subr.bf16.mxu1 %v13963_v58  ;;  %v10110_v57 = vld [vmem:[%s20862_s4 + $0xa90] sm:$0xff]  ;;  %v10111_v58 = vld [vmem:[%s20862_s4 + $0xa98] sm:$0xff] }
0x13bf   : > { %v13987_v60 = vpack.c.bf16 %v10111_v58, %v10110_v57  ;;  %v10126_v51 = vld [vmem:[%s20862_s4 + $0xb10] sm:$0xff]  ;;  %v10128_v58 = vld [vmem:[%s20862_s4 + $0xb20] sm:$0xff]  ;;  %v10139_v29 = vld [vmem:[%s20862_s4 + $0xb78] sm:$0xff] }
0x13c0   : > { %v10154_v33 = vld [vmem:[%s20862_s4 + $0xbf0] sm:$0xff] }
0x13c1   : > { %13934 = vmatpush3.bf16.msra.mxu0 %v13933_v5  ;;  %13966 = vmatpush3.bf16.msra.mxu1 %v13965_v6  ;;  %v10113_v5 = vld [vmem:[%s20862_s4 + $0xaa8] sm:$0xff]  ;;  %v10138_v25 = vld [vmem:[%s20862_s4 + $0xb70] sm:$0xff] }
0x13c2   : > { %13936 = vmatprep.subr.bf16.mxu0 %v13935_v8  ;;  %13968 = vmatprep.subr.bf16.mxu1 %v13967_v10  ;;  %v14756_v6 = vld [vmem:[%s15167_s25 + $0x28] sm:$0xff]  ;;  %v13991_v8 = vpack.c.bf16 %v10113_v5, %v10112_v26  ;;  %v10130_v26 = vld [vmem:[%s20862_s4 + $0xb30] sm:$0xff]  ;;  %v10131_v5 = vld [vmem:[%s20862_s4 + $0xb38] sm:$0xff] }
0x13c3   : > { %v10097_v10 = vld [vmem:[%s20862_s4 + $0xa28] sm:$0xff] }
0x13c5   : > { %13938 = vmatpush3.bf16.msra.mxu0 %v13937_v1  ;;  %13970 = vmatpush3.bf16.msra.mxu1 %v13969_v2  ;;  %v10098_v1 = vld [vmem:[%s20862_s4 + $0xa30] sm:$0xff]  ;;  %v10099_v2 = vld [vmem:[%s20862_s4 + $0xa38] sm:$0xff] }
0x13c6   : > { %13940 = vmatprep.subr.bf16.mxu0 %v13939_v21  ;;  %13972 = vmatprep.subr.bf16.mxu1 %v13971_v17  ;;  %v10100_v21 = vld [vmem:[%s20862_s4 + $0xa40] sm:$0xff]  ;;  %v10101_v17 = vld [vmem:[%s20862_s4 + $0xa48] sm:$0xff] }
0x13c7   : > { %v14001_v14 = vpack.c.bf16 %v10101_v17, %v10100_v21  ;;  %v10136_v21 = vld [vmem:[%s20862_s4 + $0xb60] sm:$0xff]  ;;  %v10137_v17 = vld [vmem:[%s20862_s4 + $0xb68] sm:$0xff] }
0x13c8   : > { %v14041_v23 = vpack.c.bf16 %v10137_v17, %v10136_v21 }
0x13c9   : > { %13942 = vmatpush3.bf16.msra.mxu0 %v13941_v18  ;;  %13974 = vmatpush3.bf16.msra.mxu1 %v13973_v31  ;;  %v10120_v18 = vld [vmem:[%s20862_s4 + $0xae0] sm:$0xff]  ;;  %v10121_v31 = vld [vmem:[%s20862_s4 + $0xae8] sm:$0xff] }
0x13ca   : > { %13944 = vmatprep.subr.bf16.mxu0 %v13943_v36  ;;  %13976 = vmatprep.subr.bf16.mxu1 %v13975_v37  ;;  %v14007_v35 = vpack.c.bf16 %v10121_v31, %v10120_v18  ;;  %v10104_v36 = vld [vmem:[%s20862_s4 + $0xa60] sm:$0xff]  ;;  %v10105_v37 = vld [vmem:[%s20862_s4 + $0xa68] sm:$0xff]  ;;  %v14045_v18 = vpack.c.bf16 %v10139_v29, %v10138_v25  ;;  %v19239_v31 = vld [vmem:[%s15167_s25 + $0x10] sm:$0xff] }
0x13cb   : > { %v14009_v40 = vpack.c.bf16 %v10105_v37, %v10104_v36  ;;  %v10025_v36 = vld [vmem:[%s20864_s6 + $0x5] ss:$0 sm:$0xff] }
0x13cd   : > { %13946 = vmatpush3.bf16.msra.mxu0 %v13945_v43  ;;  %13978 = vmatpush3.bf16.msra.mxu1 %v13977_v38  ;;  %v14013_v43 = vpack.c.bf16 %v10107_v4, %v10106_v16  ;;  %v10140_v38 = vld [vmem:[%s20862_s4 + $0xb80] sm:$0xff] }
0x13ce   : > { %13948 = vmatprep.subr.bf16.mxu0 %v13947_v9  ;;  %13980 = vmatprep.subr.bf16.mxu1 %v13979_v42  ;;  %v14015_v9 = vpack.c.bf16 %v10141_v20, %v10140_v38  ;;  %v10125_v42 = vld [vmem:[%s20862_s4 + $0xb08] sm:$0xff] }
0x13cf   : > { %v14017_v46 = vpack.c.bf16 %v10125_v42, %v10124_v41 }
0x13d1   : > { %13950 = vmatpush3.bf16.msra.mxu0 %v13949_v52  ;;  %13982 = vmatpush3.bf16.msra.mxu1 %v13981_v53  ;;  %v10127_v52 = vld [vmem:[%s20862_s4 + $0xb18] sm:$0xff]  ;;  %v14019_v53 = vpack.c.bf16 %v10143_v50, %v10142_v44 }
0x13d2   : > { %13984 = vmatprep.subr.bf16.mxu0 %v13983_v54  ;;  %14016 = vmatprep.subr.bf16.mxu1 %v14015_v9  ;;  %v10144_v54 = vld [vmem:[%s20862_s4 + $0xba0] sm:$0xff]  ;;  %v14021_v56 = vpack.c.bf16 %v10127_v52, %v10126_v51 }
0x13d3   : > { %v14023_v57 = vpack.c.bf16 %v10145_v55, %v10144_v54 }
0x13d4   : > { %6046 = vmatmul.mubr.f32.vlgmr.msra.gmra.mrb[78].mxu0 %v19053_v22  ;;  %6121 = vmatmul.mubr.f32.vlgmr.msra.gmra.mrb[78].mxu1 %v18498_v30  ;;  %v10096_v30 = vld [vmem:[%s20862_s4 + $0xa20] sm:$0xff] }
0x13d5   : > { %6050 = vmatprep.mubr.f32.mxu0 %v14756_v6  ;;  %6125 = vmatprep.mubr.f32.mxu1 %v19065_v28  ;;  %v13993_v0 = vpack.c.bf16 %v10097_v10, %v10096_v30  ;;  %v10132_v10 = vld [vmem:[%s20862_s4 + $0xb40] sm:$0xff] }
0x13d6   : > { %13986 = vmatpush3.bf16.msra.mxu0 %v13985_v59  ;;  %14018 = vmatpush3.bf16.msra.mxu1 %v14017_v46  ;;  %v10129_v59 = vld [vmem:[%s20862_s4 + $0xb28] sm:$0xff]  ;;  %v10091_v46 = vld [vmem:[%s20865_s7 + $0x5] ss:$0 sm:$0xff] }
0x13d7   : > { %13988 = vmatprep.subr.bf16.mxu0 %v13987_v60  ;;  %14020 = vmatprep.subr.bf16.mxu1 %v14019_v53  ;;  %v10146_v60 = vld [vmem:[%s20862_s4 + $0xbb0] sm:$0xff]  ;;  %v14025_v62 = vpack.c.bf16 %v10129_v59, %v10128_v58 }
0x13d8   : > { %6051 = vmatmul.mubr.f32.gmra.mrb[80].mxu0 %v14758_v49  ;;  %6126 = vmatmul.mubr.f32.gmra.mrb[80].mxu1 %v19076_v45 }
0x13d9   : > { %6268 = vmatprep.mubr.f32.mxu0 %v18937_v34  ;;  %6343 = vmatprep.mubr.f32.mxu1 %v18941_v3  ;;  %v10117_v34 = vld [vmem:[%s20862_s4 + $0xac8] sm:$0xff]  ;;  %v13997_v3 = vpack.c.bf16 %v10099_v2, %v10098_v1  ;;  %v10134_v1 = vld [vmem:[%s20862_s4 + $0xb50] sm:$0xff]  ;;  %v10135_v2 = vld [vmem:[%s20862_s4 + $0xb58] sm:$0xff] }
0x13da   : > { %13990 = vmatpush3.bf16.msra.mxu0 %v13989_v7  ;;  %v13999_v15 = vpack.c.bf16 %v10117_v34, %v10116_v13  ;;  %14022 = vmatpush3.bf16.msra.mxu1 %v14021_v56  ;;  %v10149_v7 = vld [vmem:[%s20862_s4 + $0xbc8] sm:$0xff]  ;;  %v14037_v13 = vpack.c.bf16 %v10135_v2, %v10134_v1  ;;  %v10152_v34 = vld [vmem:[%s20862_s4 + $0xbe0] sm:$0xff] }
0x13db   : > { %13992 = vmatprep.subr.bf16.mxu0 %v13991_v8  ;;  %14024 = vmatprep.subr.bf16.mxu1 %v14023_v57  ;;  %v14029_v8 = vpack.c.bf16 %v10131_v5, %v10130_v26 }
0x13de   : > { %13994 = vmatpush3.bf16.msra.mxu0 %v13993_v0  ;;  %14026 = vmatpush3.bf16.msra.mxu1 %v14025_v62 }
0x13df   : > { %13996 = vmatprep.subr.bf16.mxu0 %v13995_v12  ;;  %v14035_v12 = vpack.c.bf16 %v10151_v63, %v10150_v11 }
0x13e2   : > { %13998 = vmatpush3.bf16.msra.mxu0 %v13997_v3  ;;  %v10153_v3 = vld [vmem:[%s20862_s4 + $0xbe8] sm:$0xff] }
0x13e3   : > { %14000 = vmatprep.subr.bf16.mxu0 %v13999_v15  ;;  %v14039_v15 = vpack.c.bf16 %v10153_v3, %v10152_v34 }
0x13e6   : > { %14002 = vmatpush3.bf16.msra.mxu0 %v14001_v14  ;;  %v10155_v14 = vld [vmem:[%s20862_s4 + $0xbf8] sm:$0xff] }
0x13e7   : > { %14004 = vmatprep.subr.bf16.mxu0 %v14003_v19  ;;  %v14043_v19 = vpack.c.bf16 %v10155_v14, %v10154_v33 }
0x13ea   : > { %14006 = vmatpush3.bf16.msra.mxu0 %v14005_v32 }
0x13eb   : > { %14008 = vmatprep.subr.bf16.mxu0 %v14007_v35 }
0x13ee   : > { %14010 = vmatpush3.bf16.msra.mxu0 %v14009_v40 }
0x13ef   : > { %14012 = vmatprep.subr.bf16.mxu0 %v14011_v24 }
0x13f2   : > { %14014 = vmatpush3.bf16.msra.mxu0 %v14013_v43 }
0x13f5   : > { %6269 = vmatmul.mubr.f32.vlgmr.msra.gmra.mrb[82].mxu0 %v19053_v22  ;;  %v14027_v22 = vpack.c.bf16 %v10147_v61, %v10146_v60 }
0x13f6   : > { %6273 = vmatprep.mubr.f32.mxu0 %v14756_v6  ;;  %v10148_v6 = vld [vmem:[%s20862_s4 + $0xbc0] sm:$0xff] }
0x13f7   : > { %14028 = vmatprep.subr.bf16.mxu1 %v14027_v22  ;;  %v14031_v30 = vpack.c.bf16 %v10149_v7, %v10148_v6 }
0x13f8   : > { %14030 = vmatpush3.bf16.msra.mxu1 %v14029_v8 }
0x13f9   : > { %6274 = vmatmul.mubr.f32.gmra.mrb[84].mxu0 %v14758_v49  ;;  %v10133_v49 = vld [vmem:[%s20862_s4 + $0xb48] sm:$0xff]  ;;  %14032 = vmatprep.subr.bf16.mxu1 %v14031_v30 }
0x13fa   : > { %v14033_v0 = vpack.c.bf16 %v10133_v49, %v10132_v10  ;;  %v10157_v49 = vld [vmem:[%s20866_s8 + $0x5] ss:$0 sm:$0xff] }
0x13fc   : > { %14034 = vmatpush3.bf16.msra.mxu1 %v14033_v0 }
0x13fd   : > { %14036 = vmatprep.subr.bf16.mxu1 %v14035_v12 }
0x1400   : > { %14038 = vmatpush3.bf16.msra.mxu1 %v14037_v13 }
0x1401   : > { %14040 = vmatprep.subr.bf16.mxu1 %v14039_v15 }
0x1404   : > { %14042 = vmatpush3.bf16.msra.mxu1 %v14041_v23 }
0x1405   : > { %14044 = vmatprep.subr.bf16.mxu1 %v14043_v19 }
0x1408   : > { %14046 = vmatpush3.bf16.msra.mxu1 %v14045_v18 }
0x140b   : > { %6344 = vmatmul.mubr.f32.vlgmr.msra.gmra.mrb[82].mxu1 %v19239_v31 }
0x140c   : > { %6348 = vmatprep.mubr.f32.mxu1 %v19065_v28 }
0x140f   : > { %6349 = vmatmul.mubr.f32.gmra.mrb[84].mxu1 %v19076_v45 }
0x1487   : > { %v11897_v32 = vpop.f32.mrb[74].mxu0  ;;  %v11935_v35 = vpop.f32.mrb[74].mxu1 }
0x1488   : > { %v11898_v37 = vpop.f32.mrb[75].mxu0  ;;  %v11936_v48 = vpop.f32.mrb[75].mxu1 }
0x1489   : > { %v11899_v39 = vadd.f32 %v11898_v37, %v11897_v32  ;;  %v11937_v40 = vadd.f32 %v11936_v48, %v11935_v35 }
0x148b   : > { %v5825_v24 = vadd.f32 %v11899_v39, %v10025_v36  ;;  %v11900_v16 = vpop.f32.mrb[76].mxu0  ;;  %v11938_v4 = vpop.f32.mrb[76].mxu1 }
0x148c   : > { %v11901_v43 = vpop.f32.mrb[77].mxu0  ;;  %v11939_v38 = vpop.f32.mrb[77].mxu1 }
0x148d   : > { %v5900_v20 = vadd.f32 %v11937_v40, %v5825_v24  ;;  %v11902_v9 = vadd.f32 %v11901_v43, %v11900_v16  ;;  %v11940_v28 = vadd.f32 %v11939_v38, %v11938_v4  ;;  %v10165_v16 = vld [vmem:[%s20863_s5 + $0x508] sm:$0xff]  ;;  %v10164_v43 = vld [vmem:[%s20863_s5 + $0x500] sm:$0xff] }
0x148e   : > { %v10169_v4 = vld [vmem:[%s20863_s5 + $0x528] sm:$0xff] }
0x148f   : > { %12647 = vmatprep.mubr.msk.f32.mxu0 %vm1059_vm0, %v5900_v20  ;;  %v5830_v45 = vadd.f32 %v11902_v9, %v10025_v36  ;;  %v14057_v38 = vpack.c.bf16 %v10169_v4, %v10165_v16  ;;  %v10168_v20 = vld [vmem:[%s20863_s5 + $0x520] sm:$0xff]  ;;  %v10167_v9 = vld [vmem:[%s20863_s5 + $0x518] sm:$0xff]  ;;  %v10201_v16 = vld [vmem:[%s20860_s2 + $0xc08] sm:$0xff] }
0x1490   : > { %v10232_v4 = vld [vmem:[%s20860_s2 + $0xd00] sm:$0xff] }
0x1491   : > { %v5905_v41 = vadd.f32 %v11940_v28, %v5830_v45  ;;  %v10171_v28 = vld [vmem:[%s20863_s5 + $0x538] sm:$0xff]  ;;  %v14059_v45 = vpack.c.bf16 %v10168_v20, %v10164_v43  ;;  %v10233_v43 = vld [vmem:[%s20860_s2 + $0xd08] sm:$0xff] }
0x1492   : > { %v10219_v20 = vld [vmem:[%s20860_s2 + $0xc98] sm:$0xff] }
0x14a7   : > { %v11973_v42 = vpop.f32.mrb[78].mxu0  ;;  %v12011_v44 = vpop.f32.mrb[78].mxu1 }
0x14a8   : > { %v11974_v50 = vpop.f32.mrb[79].mxu0  ;;  %v12012_v51 = vpop.f32.mrb[79].mxu1 }
0x14a9   : > { %v11975_v52 = vadd.f32 %v11974_v50, %v11973_v42  ;;  %v12013_v53 = vadd.f32 %v12012_v51, %v12011_v44  ;;  %v10173_v42 = vld [vmem:[%s20863_s5 + $0x548] sm:$0xff]  ;;  %v10176_v50 = vld [vmem:[%s20863_s5 + $0x560] sm:$0xff] }
0x14aa   : > { %v10177_v44 = vld [vmem:[%s20863_s5 + $0x568] sm:$0xff] }
0x14ab   : > { %v6048_v54 = vadd.f32 %v11975_v52, %v10091_v46  ;;  %v11976_v55 = vpop.f32.mrb[80].mxu0  ;;  %v12014_v56 = vpop.f32.mrb[80].mxu1  ;;  %v14061_v51 = vpack.c.bf16 %v10177_v44, %v10173_v42  ;;  %v10202_v42 = vld [vmem:[%s20860_s2 + $0xc10] sm:$0xff]  ;;  %v10203_v44 = vld [vmem:[%s20860_s2 + $0xc18] sm:$0xff] }
0x14ac   : > { %v11977_v57 = vpop.f32.mrb[81].mxu0  ;;  %v12015_v58 = vpop.f32.mrb[81].mxu1 }
0x14ad   : > { %v6123_v59 = vadd.f32 %v12013_v53, %v6048_v54  ;;  %v11978_v60 = vadd.f32 %v11977_v57, %v11976_v55  ;;  %v12016_v61 = vadd.f32 %v12015_v58, %v12014_v56  ;;  %v10181_v53 = vld [vmem:[%s20863_s5 + $0x588] sm:$0xff]  ;;  %v10180_v56 = vld [vmem:[%s20863_s5 + $0x580] sm:$0xff] }
0x14ae   : > { %v10185_v54 = vld [vmem:[%s20863_s5 + $0x5a8] sm:$0xff]  ;;  %v10184_v57 = vld [vmem:[%s20863_s5 + $0x5a0] sm:$0xff] }
0x14af   : > { %v6053_v62 = vadd.f32 %v11978_v60, %v10091_v46  ;;  %v10172_v46 = vld [vmem:[%s20863_s5 + $0x540] sm:$0xff]  ;;  %v14065_v55 = vpack.c.bf16 %v10185_v54, %v10181_v53  ;;  %v14067_v58 = vpack.c.bf16 %v10184_v57, %v10180_v56  ;;  %v10193_v60 = vld [vmem:[%s20863_s5 + $0x5e8] sm:$0xff] }
0x14b0   : > { %v14063_v52 = vpack.c.bf16 %v10176_v50, %v10172_v46  ;;  %v10234_v50 = vld [vmem:[%s20860_s2 + $0xd10] sm:$0xff]  ;;  %v10221_v56 = vld [vmem:[%s20860_s2 + $0xca8] sm:$0xff]  ;;  %v10252_v57 = vld [vmem:[%s20860_s2 + $0xda0] sm:$0xff] }
0x14b1   : > { %v6128_v22 = vadd.f32 %v12016_v61, %v6053_v62  ;;  %v10188_v61 = vld [vmem:[%s20863_s5 + $0x5c0] sm:$0xff] }
0x14b3   : > { %v14047_v26 = vpack.c.bf16 %v6128_v22, %v6123_v59  ;;  %v10189_v59 = vld [vmem:[%s20863_s5 + $0x5c8] sm:$0xff]  ;;  %v10192_v22 = vld [vmem:[%s20863_s5 + $0x5e0] sm:$0xff] }
0x14b4   : > { %v14069_v62 = vpack.c.bf16 %v10193_v60, %v10189_v59  ;;  %v14095_v59 = vpack.c.bf16 %v10203_v44, %v10202_v42  ;;  %v10261_v42 = vld [vmem:[%s20860_s2 + $0xde8] sm:$0xff] }
0x14b5   : > { %14049 = vmatprep.subr.msk.bf16.mxu0 %vm15534_vm1, %v14047_v26 }
0x14b6   : > { %14052 = vmatpush3.bf16.xpose.msk.msra.mxu0 %vm15534_vm1, %v14047_v26  ;;  %v14071_v26 = vpack.c.bf16 %v10192_v22, %v10188_v61  ;;  %v10204_v61 = vld [vmem:[%s20860_s2 + $0xc20] sm:$0xff] }
0x14b7   : > { %14058 = vmatprep.subr.bf16.mxu0 %v14057_v38  ;;  %v10218_v38 = vld [vmem:[%s20860_s2 + $0xc90] sm:$0xff] }
0x14b8   : > { %v14093_v54 = vpack.c.bf16 %v10219_v20, %v10218_v38  ;;  %v10242_v20 = vld [vmem:[%s20860_s2 + $0xd50] sm:$0xff] }
0x14bd   : > { %12648 = vmatmul.mubr.msk.f32.vlgmr.msra.gmra.mrb[86].mxu0 %vm1059_vm0, %v5905_v41  ;;  %v14073_v41 = vpack.c.bf16 %v10171_v28, %v10167_v9  ;;  %v10250_v9 = vld [vmem:[%s20860_s2 + $0xd90] sm:$0xff]  ;;  %v10251_v28 = vld [vmem:[%s20860_s2 + $0xd98] sm:$0xff] }
0x14be   : > { %6649 = vmatprep.mubr.f32.mxu0 %v14801_v27  ;;  %14060 = vmatpush1.bf16.msra.mxu0 %v14059_v45 }
0x14bf   : > { %14062 = vmatprep.subr.bf16.mxu0 %v14061_v51  ;;  %v10235_v51 = vld [vmem:[%s20860_s2 + $0xd18] sm:$0xff] }
0x14c0   : > { %v14127_v60 = vpack.c.bf16 %v10235_v51, %v10234_v50  ;;  %v10212_v50 = vld [vmem:[%s20860_s2 + $0xc60] sm:$0xff]  ;;  %v10213_v51 = vld [vmem:[%s20860_s2 + $0xc68] sm:$0xff] }
0x14c2   : > { %14064 = vmatpush1.bf16.msra.mxu0 %v14063_v52  ;;  %v10220_v52 = vld [vmem:[%s20860_s2 + $0xca0] sm:$0xff] }
0x14c3   : > { %14066 = vmatprep.subr.bf16.mxu0 %v14065_v55  ;;  %v14125_v55 = vpack.c.bf16 %v10251_v28, %v10250_v9  ;;  %v14097_v22 = vpack.c.bf16 %v10221_v56, %v10220_v52  ;;  %v10243_v9 = vld [vmem:[%s20860_s2 + $0xd58] sm:$0xff]  ;;  %v10228_v28 = vld [vmem:[%s20860_s2 + $0xce0] sm:$0xff]  ;;  %v10230_v56 = vld [vmem:[%s20860_s2 + $0xcf0] sm:$0xff] }
0x14c6   : > { %14068 = vmatpush1.bf16.msra.mxu0 %v14067_v58  ;;  %v10253_v58 = vld [vmem:[%s20860_s2 + $0xda8] sm:$0xff] }
0x14c7   : > { %14070 = vmatprep.subr.bf16.mxu0 %v14069_v62  ;;  %v10205_v62 = vld [vmem:[%s20860_s2 + $0xc28] sm:$0xff] }
0x14c8   : > { %v12049_v5 = vpop.f32.mrb[82].mxu0 }
0x14c9   : > { %v12050_v6 = vpop.f32.mrb[83].mxu0 }
0x14ca   : > { %v12051_v7 = vadd.f32 %v12050_v6, %v12049_v5  ;;  %14072 = vmatpush1.bf16.msra.mxu0 %v14071_v26  ;;  %v14129_v26 = vpack.c.bf16 %v10253_v58, %v10252_v57  ;;  %v10231_v57 = vld [vmem:[%s20860_s2 + $0xcf8] sm:$0xff]  ;;  %v10262_v58 = vld [vmem:[%s20860_s2 + $0xdf0] sm:$0xff] }
0x14cc   : > { %v12052_v8 = vpop.f32.mrb[84].mxu0  ;;  %v6271_v11 = vadd.f32 %v12051_v7, %v10157_v49  ;;  %v10166_v7 = vld [vmem:[%s20863_s5 + $0x510] sm:$0xff] }
0x14cd   : > { %v12053_v30 = vpop.f32.mrb[85].mxu0 }
0x14ce   : > { %v12054_v10 = vadd.f32 %v12053_v30, %v12052_v8  ;;  %v10170_v8 = vld [vmem:[%s20863_s5 + $0x530] sm:$0xff] }
0x14d0   : > { %v6276_v1 = vadd.f32 %v12054_v10, %v10157_v49  ;;  %v10175_v10 = vld [vmem:[%s20863_s5 + $0x558] sm:$0xff] }
0x14d1   : > { %v10179_v49 = vld [vmem:[%s20863_s5 + $0x578] sm:$0xff] }
0x14de   : > { %v12087_v63 = vpop.f32.mrb[82].mxu1 }
0x14df   : > { %v12088_v0 = vpop.f32.mrb[83].mxu1 }
0x14e0   : > { %v12089_v12 = vadd.f32 %v12088_v0, %v12087_v63  ;;  %v14075_v0 = vpack.c.bf16 %v10170_v8, %v10166_v7  ;;  %v10222_v7 = vld [vmem:[%s20860_s2 + $0xcb0] sm:$0xff]  ;;  %v10223_v8 = vld [vmem:[%s20860_s2 + $0xcb8] sm:$0xff] }
0x14e2   : > { %v6346_v2 = vadd.f32 %v12089_v12, %v6271_v11  ;;  %v12090_v13 = vpop.f32.mrb[84].mxu1 }
0x14e3   : > { %v12091_v34 = vpop.f32.mrb[85].mxu1 }
0x14e4   : > { %v12092_v3 = vadd.f32 %v12091_v34, %v12090_v13  ;;  %v10178_v13 = vld [vmem:[%s20863_s5 + $0x570] sm:$0xff]  ;;  %v10183_v34 = vld [vmem:[%s20863_s5 + $0x598] sm:$0xff] }
0x14e6   : > { %v6351_v15 = vadd.f32 %v12092_v3, %v6276_v1  ;;  %v14077_v1 = vpack.c.bf16 %v10179_v49, %v10175_v10  ;;  %v10187_v3 = vld [vmem:[%s20863_s5 + $0x5b8] sm:$0xff]  ;;  %v14099_v49 = vpack.c.bf16 %v10205_v62, %v10204_v61  ;;  %v10214_v62 = vld [vmem:[%s20860_s2 + $0xc70] sm:$0xff] }
0x14e7   : > { %v10255_v10 = vld [vmem:[%s20860_s2 + $0xdb8] sm:$0xff] }
0x14e8   : > { %v14053_v21 = vpack.c.bf16 %v6351_v15, %v6346_v2  ;;  %v10174_v2 = vld [vmem:[%s20863_s5 + $0x550] sm:$0xff] }
0x14e9   : > { %v14079_v15 = vpack.c.bf16 %v10178_v13, %v10174_v2  ;;  %v10238_v2 = vld [vmem:[%s20860_s2 + $0xd30] sm:$0xff]  ;;  %v10239_v13 = vld [vmem:[%s20860_s2 + $0xd38] sm:$0xff] }
0x14ea   : > { %14054 = vmatprep.subr.bf16.mxu1 %v14053_v21 }
0x14eb   : > { %14056 = vmatpush3.bf16.msra.mxu1 %v14053_v21  ;;  %v14081_v21 = vpack.c.bf16 %v10187_v3, %v10183_v34  ;;  %v10224_v34 = vld [vmem:[%s20860_s2 + $0xcc0] sm:$0xff]  ;;  %v10225_v3 = vld [vmem:[%s20860_s2 + $0xcc8] sm:$0xff] }
0x14ec   : > { %14074 = vmatprep.subr.bf16.mxu1 %v14073_v41  ;;  %v14123_v41 = vpack.c.bf16 %v10233_v43, %v10232_v4  ;;  %v10211_v4 = vld [vmem:[%s20860_s2 + $0xc58] sm:$0xff] }
0x1590   : > { %v12649_v17 = vpop.f32.mrb[86].mxu0 }
0x1591   : > { %v6442_v23 = vmul.f32 0.125, %v12649_v17  ;;  %v6432_v33 = vpop.f32.mrb[87].mxu0  ;;  %v10182_v17 = vld [vmem:[%s20863_s5 + $0x590] sm:$0xff] }
0x1592   : > { %v6441_v14 = vmul.f32 0.125, %v6432_v33  ;;  %v10191_v33 = vld [vmem:[%s20863_s5 + $0x5d8] sm:$0xff] }
0x1593   : > { %v6446_v19 = vsel %vm1149_vm2, %v6442_v23, -inf }
0x1594   : > { %6447 = vmax.xlane.f32.xlu1 %v6446_v19  ;;  %v6443_v25 = vsel %vm1149_vm2, %v6441_v14, -inf }
0x1595   : > { %6444 = vmax.xlane.f32.xlu0 %v6443_v25 }
0x1621   : > { %v6448_v29 = vpop.xlane.xlu1 %6447 }
0x1622   : > { %v6450_v18 = vsub.f32 %v6442_v23, %v6448_v29  ;;  %v6445_v32 = vpop.xlane.xlu0 %6444  ;;  %v10186_v23 = vld [vmem:[%s20863_s5 + $0x5b0] sm:$0xff] }
0x1623   : > { %v6449_v35 = vsub.f32 %v6441_v14, %v6445_v32  ;;  %v10195_v14 = vld [vmem:[%s20863_s5 + $0x5f8] sm:$0xff]  ;;  %v14083_v19 = vpack.c.bf16 %v10186_v23, %v10182_v17  ;;  %v10190_v29 = vld [vmem:[%s20863_s5 + $0x5d0] sm:$0xff]  ;;  %v14761_v17 = vld [vmem:[%s15031_s29 + $0x8] sm:$0xff] }
0x1624   : > { %v6453_v36 = vmul.f32 1.442695, %v6450_v18  ;;  %v14085_v25 = vpack.c.bf16 %v10195_v14, %v10191_v33  ;;  %v10194_v18 = vld [vmem:[%s20863_s5 + $0x5f0] sm:$0xff]  ;;  %v14762_v23 = vld [vmem:[%s15031_s29 + $0x18] sm:$0xff]  ;;  %v14135_v14 = vpack.c.bf16 %v10239_v13, %v10238_v2  ;;  %v10298_v13 = vld [vmem:[%s20861_s3 + $0xd00] sm:$0xff] }
0x1625   : > { %v6451_v37 = vmul.f32 1.442695, %v6449_v35  ;;  %v14087_v32 = vpack.c.bf16 %v10194_v18, %v10190_v29  ;;  %v10216_v35 = vld [vmem:[%s20860_s2 + $0xc80] sm:$0xff]  ;;  %v14105_v29 = vpack.c.bf16 %v10225_v3, %v10224_v34  ;;  %v10299_v34 = vld [vmem:[%s20861_s3 + $0xd08] sm:$0xff]  ;;  %v10284_v3 = vld [vmem:[%s20861_s3 + $0xc90] sm:$0xff] }
0x1626   : > { %14662 = vpow2.f32 %v6453_v36  ;;  %v10217_v36 = vld [vmem:[%s20860_s2 + $0xc88] sm:$0xff] }
0x1627   : > { %14664 = vpow2.f32 %v6451_v37  ;;  %v14089_v37 = vpack.c.bf16 %v10217_v36, %v10216_v35  ;;  %v10241_v35 = vld [vmem:[%s20860_s2 + $0xd48] sm:$0xff]  ;;  %v10226_v36 = vld [vmem:[%s20860_s2 + $0xcd0] sm:$0xff] }
0x1629   : > { %14090 = vmatprep.subr.bf16.mxu0 %v14089_v37  ;;  %v10227_v37 = vld [vmem:[%s20860_s2 + $0xcd8] sm:$0xff] }
0x162a   : > { %v14109_v43 = vpack.c.bf16 %v10227_v37, %v10226_v36  ;;  %v10287_v36 = vld [vmem:[%s20861_s3 + $0xca8] sm:$0xff]  ;;  %v10318_v37 = vld [vmem:[%s20861_s3 + $0xda0] sm:$0xff] }
0x1630   : > { %v14663_v48 = vpop.eup %14662 }
0x1631   : > { %v14665_v39 = vpop.eup %14664  ;;  %v6458_v40 = vsel %vm1149_vm2, %v14663_v48, 0.0 }
0x1632   : > { %6459 = vadd.xlane.f32.xlu1 %v6458_v40  ;;  %v6455_v24 = vsel %vm1149_vm2, %v14665_v39, 0.0 }
0x1633   : > { %6456 = vadd.xlane.f32.xlu0 %v6455_v24  ;;  %v10200_v24 = vld [vmem:[%s20860_s2 + $0xc00] sm:$0xff] }
0x1634   : > { %v14091_v45 = vpack.c.bf16 %v10201_v16, %v10200_v24  ;;  %v10210_v16 = vld [vmem:[%s20860_s2 + $0xc50] sm:$0xff] }
0x1635   : > { %v14111_v44 = vpack.c.bf16 %v10211_v4, %v10210_v16  ;;  %v10270_v4 = vld [vmem:[%s20861_s3 + $0xc20] sm:$0xff] }
0x16bf   : > { %v6460_v5 = vpop.xlane.xlu1 %6459 }
0x16c0   : > { %14666 = vrcp.f32 %v6460_v5  ;;  %v6457_v6 = vpop.xlane.xlu0 %6456  ;;  %v10236_v5 = vld [vmem:[%s20860_s2 + $0xd20] sm:$0xff] }
0x16c1   : > { %14668 = vrcp.f32 %v6457_v6  ;;  %v10237_v6 = vld [vmem:[%s20860_s2 + $0xd28] sm:$0xff] }
0x16ca   : > { %v14667_v30 = vpop.eup %14666 }
0x16cb   : > { %v14669_v11 = vpop.eup %14668  ;;  %v6464_v12 = vmul.f32 %v14667_v30, %v14663_v48  ;;  %v10248_v48 = vld [vmem:[%s20860_s2 + $0xd80] sm:$0xff]  ;;  %v10254_v30 = vld [vmem:[%s20860_s2 + $0xdb0] sm:$0xff] }
0x16cc   : > { %v6463_v63 = vmul.f32 %v14669_v11, %v14665_v39  ;;  %v10249_v39 = vld [vmem:[%s20860_s2 + $0xd88] sm:$0xff]  ;;  %v14131_v11 = vpack.c.bf16 %v10237_v6, %v10236_v5  ;;  %v10246_v6 = vld [vmem:[%s20860_s2 + $0xd70] sm:$0xff] }
0x16cd   : > { %v14121_v40 = vpack.c.bf16 %v10249_v39, %v10248_v48  ;;  %v10258_v48 = vld [vmem:[%s20860_s2 + $0xdd0] sm:$0xff]  ;;  %v10259_v39 = vld [vmem:[%s20860_s2 + $0xdd8] sm:$0xff] }
0x16ce   : > { %12654 = vmatprep.mubr.msk.f32.mxu1 %vm1149_vm2, %v6463_v63  ;;  %v10206_v63 = vld [vmem:[%s20860_s2 + $0xc30] sm:$0xff]  ;;  %v14141_v38 = vpack.c.bf16 %v10259_v39, %v10258_v48  ;;  %v10319_v48 = vld [vmem:[%s20861_s3 + $0xda8] sm:$0xff]  ;;  %v14763_v39 = vld [vmem:[%s15031_s29] sm:$0xff] }
0x16cf   : > { %12655 = vmatmul.mubr.msk.f32.vlgmr.msra.gmra.mrb[86].mxu1 %vm1149_vm2, %v6464_v12  ;;  %v14101_v12 = vpack.c.bf16 %v10223_v8, %v10222_v7  ;;  %v10247_v7 = vld [vmem:[%s20860_s2 + $0xd78] sm:$0xff]  ;;  %v10282_v8 = vld [vmem:[%s20861_s3 + $0xc80] sm:$0xff] }
0x16d0   : > { %14076 = vmatpush1.bf16.msra.mxu1 %v14075_v0  ;;  %6726 = vmatprep.mubr.f32.mxu1 %v14801_v27  ;;  %v10207_v0 = vld [vmem:[%s20860_s2 + $0xc38] sm:$0xff] }
0x16d1   : > { %14078 = vmatprep.subr.bf16.mxu1 %v14077_v1  ;;  %v14133_v1 = vpack.c.bf16 %v10255_v10, %v10254_v30  ;;  %v14103_v33 = vpack.c.bf16 %v10207_v0, %v10206_v63  ;;  %v10283_v30 = vld [vmem:[%s20861_s3 + $0xc88] sm:$0xff]  ;;  %v10314_v10 = vld [vmem:[%s20861_s3 + $0xd80] sm:$0xff]  ;;  %v14151_v63 = vpack.c.bf16 %v10247_v7, %v10246_v6  ;;  %v19682_v6 = vld [vmem:[%s15167_s25 + $0x18] sm:$0xff] }
0x16d2   : > { %v10266_v0 = vld [vmem:[%s20861_s3 + $0xc00] sm:$0xff] }
0x16d4   : > { %14080 = vmatpush1.bf16.msra.mxu1 %v14079_v15  ;;  %v10256_v15 = vld [vmem:[%s20860_s2 + $0xdc0] sm:$0xff] }
0x16d5   : > { %14082 = vmatprep.subr.bf16.mxu1 %v14081_v21  ;;  %v10257_v21 = vld [vmem:[%s20860_s2 + $0xdc8] sm:$0xff] }
0x16d6   : > { %v14137_v18 = vpack.c.bf16 %v10257_v21, %v10256_v15  ;;  %v10285_v15 = vld [vmem:[%s20861_s3 + $0xc98] sm:$0xff]  ;;  %v10316_v21 = vld [vmem:[%s20861_s3 + $0xd90] sm:$0xff] }
0x16d8   : > { %14084 = vmatpush1.bf16.msra.mxu1 %v14083_v19  ;;  %v10208_v19 = vld [vmem:[%s20860_s2 + $0xc40] sm:$0xff] }
0x16d9   : > { %14086 = vmatprep.subr.bf16.mxu1 %v14085_v25  ;;  %v10209_v25 = vld [vmem:[%s20860_s2 + $0xc48] sm:$0xff] }
0x16dc   : > { %14088 = vmatpush1.bf16.msra.mxu1 %v14087_v32  ;;  %v10240_v32 = vld [vmem:[%s20860_s2 + $0xd40] sm:$0xff] }
0x16dd   : > { %14122 = vmatprep.subr.bf16.mxu1 %v14121_v40  ;;  %v14107_v40 = vpack.c.bf16 %v10209_v25, %v10208_v19  ;;  %v14139_v24 = vpack.c.bf16 %v10241_v35, %v10240_v32  ;;  %v10269_v19 = vld [vmem:[%s20861_s3 + $0xc18] sm:$0xff]  ;;  %v14157_v25 = vpack.c.bf16 %v10285_v15, %v10284_v3  ;;  %v10286_v35 = vld [vmem:[%s20861_s3 + $0xca0] sm:$0xff]  ;;  %v10276_v15 = vld [vmem:[%s20861_s3 + $0xc50] sm:$0xff] }
0x16de   : > { %v10301_v32 = vld [vmem:[%s20861_s3 + $0xd18] sm:$0xff] }
0x17a2   : > { %v12656_v46 = vpop.f32.mrb[86].mxu1 }
0x17a3   : > { %v6537_v53 = vpop.f32.mrb[87].mxu1 }
0x17a4   : > { %10196 = vmatmul.mubr.msk.f32.vlgmr.msra.gmra.mrb[28].mxu0 %vm1059_vm0, %v6537_v53  ;;  %10198 = vmatmul.mubr.msk.f32.vlgmr.msra.gmra.mrb[28].mxu1 %vm1059_vm0, %v6537_v53 }
0x17a5   : > { %14092 = vmatpush3.bf16.msra.mxu0 %v14091_v45  ;;  %14124 = vmatpush3.bf16.msra.mxu1 %v14123_v41  ;;  %v10229_v45 = vld [vmem:[%s20860_s2 + $0xce8] sm:$0xff]  ;;  %v10260_v41 = vld [vmem:[%s20860_s2 + $0xde0] sm:$0xff] }
0x17a6   : > { %6655 = vmatprep.mubr.f32.mxu0 %v14801_v27  ;;  %6732 = vmatprep.mubr.f32.mxu1 %v14801_v27  ;;  %v14113_v52 = vpack.c.bf16 %v10229_v45, %v10228_v28  ;;  %v14145_v53 = vpack.c.bf16 %v10261_v42, %v10260_v41  ;;  %v10303_v28 = vld [vmem:[%s20861_s3 + $0xd28] sm:$0xff]  ;;  %v10288_v45 = vld [vmem:[%s20861_s3 + $0xcb0] sm:$0xff]  ;;  %v10289_v41 = vld [vmem:[%s20861_s3 + $0xcb8] sm:$0xff] }
0x17a7   : > { %14094 = vmatprep.subr.bf16.mxu0 %v14093_v54  ;;  %14126 = vmatprep.subr.bf16.mxu1 %v14125_v55  ;;  %v10244_v54 = vld [vmem:[%s20860_s2 + $0xd60] sm:$0xff]  ;;  %v10245_v55 = vld [vmem:[%s20860_s2 + $0xd68] sm:$0xff]  ;;  %v10320_v42 = vld [vmem:[%s20861_s3 + $0xdb0] sm:$0xff] }
0x17a8   : > { %10197 = vmatmul.mubr.msk.f32.gmra.mrb[30].mxu0 %vm1059_vm0, %v12656_v46  ;;  %10199 = vmatmul.mubr.msk.f32.gmra.mrb[30].mxu1 %vm1059_vm0, %v12656_v46  ;;  %v14143_v46 = vpack.c.bf16 %v10243_v9, %v10242_v20  ;;  %v14147_v61 = vpack.c.bf16 %v10245_v55, %v10244_v54  ;;  %v14193_v20 = vpack.c.bf16 %v10319_v48, %v10318_v37  ;;  %v10302_v9 = vld [vmem:[%s20861_s3 + $0xd20] sm:$0xff]  ;;  %v10272_v55 = vld [vmem:[%s20861_s3 + $0xc30] sm:$0xff]  ;;  %v10279_v37 = vld [vmem:[%s20861_s3 + $0xc68] sm:$0xff] }
0x17a9   : > { %14096 = vmatpush3.bf16.msra.mxu0 %v14095_v59  ;;  %14128 = vmatpush3.bf16.msra.mxu1 %v14127_v60  ;;  %v10263_v59 = vld [vmem:[%s20860_s2 + $0xdf8] sm:$0xff]  ;;  %v14115_v60 = vpack.c.bf16 %v10213_v51, %v10212_v50  ;;  %v14767_v51 = vld [vmem:[%s15031_s29 + $0x20] sm:$0xff]  ;;  %v14195_v54 = vpack.c.bf16 %v10303_v28, %v10302_v9  ;;  %v10280_v28 = vld [vmem:[%s20861_s3 + $0xc70] sm:$0xff] }
0x17aa   : > { %14098 = vmatprep.subr.bf16.mxu0 %v14097_v22  ;;  %14130 = vmatprep.subr.bf16.mxu1 %v14129_v26  ;;  %v10215_v22 = vld [vmem:[%s20860_s2 + $0xc78] sm:$0xff]  ;;  %v14117_v26 = vpack.c.bf16 %v10231_v57, %v10230_v56  ;;  %v14149_v5 = vpack.c.bf16 %v10263_v59, %v10262_v58  ;;  %v14165_v57 = vpack.c.bf16 %v10289_v41, %v10288_v45  ;;  %v10304_v59 = vld [vmem:[%s20861_s3 + $0xd30] sm:$0xff] }
0x17ab   : > { %6884 = vmatprep.mubr.f32.mxu0 %v14761_v17  ;;  %6959 = vmatprep.mubr.f32.mxu1 %v14762_v23  ;;  %v10317_v17 = vld [vmem:[%s20861_s3 + $0xd98] sm:$0xff] }
0x17ac   : > { %v14766_v50 = vld [vmem:[%s15031_s29 + $0x38] sm:$0xff] }
0x17ad   : > { %14100 = vmatpush3.bf16.msra.mxu0 %v14099_v49  ;;  %14132 = vmatpush3.bf16.msra.mxu1 %v14131_v11  ;;  %v10315_v49 = vld [vmem:[%s20861_s3 + $0xd88] sm:$0xff]  ;;  %v14119_v11 = vpack.c.bf16 %v10215_v22, %v10214_v62  ;;  %v10273_v56 = vld [vmem:[%s20861_s3 + $0xc38] sm:$0xff]  ;;  %v10322_v22 = vld [vmem:[%s20861_s3 + $0xdc0] sm:$0xff] }
0x17ae   : > { %14102 = vmatprep.subr.bf16.mxu0 %v14101_v12  ;;  %14134 = vmatprep.subr.bf16.mxu1 %v14133_v1  ;;  %v10267_v12 = vld [vmem:[%s20861_s3 + $0xc08] sm:$0xff]  ;;  %v14153_v1 = vpack.c.bf16 %v10283_v30, %v10282_v8  ;;  %v14185_v2 = vpack.c.bf16 %v10315_v49, %v10314_v10  ;;  %v14167_v7 = vpack.c.bf16 %v10273_v56, %v10272_v55  ;;  %v10274_v30 = vld [vmem:[%s20861_s3 + $0xc40] sm:$0xff]  ;;  %v10281_v41 = vld [vmem:[%s20861_s3 + $0xc78] sm:$0xff] }
0x17af   : > { %v14155_v23 = vpack.c.bf16 %v10267_v12, %v10266_v0  ;;  %v10291_v62 = vld [vmem:[%s20861_s3 + $0xcc8] sm:$0xff]  ;;  %v10292_v12 = vld [vmem:[%s20861_s3 + $0xcd0] sm:$0xff]  ;;  %v10332_v55 = vld [vmem:[%s20862_s4 + $0xc00] sm:$0xff] }
0x17b0   : > { %v10275_v10 = vld [vmem:[%s20861_s3 + $0xc48] sm:$0xff] }
0x17b1   : > { %14104 = vmatpush3.bf16.msra.mxu0 %v14103_v33  ;;  %14136 = vmatpush3.bf16.msra.mxu1 %v14135_v14  ;;  %v14187_v33 = vpack.c.bf16 %v10299_v34, %v10298_v13  ;;  %v10268_v14 = vld [vmem:[%s20861_s3 + $0xc10] sm:$0xff]  ;;  %v10307_v0 = vld [vmem:[%s20861_s3 + $0xd48] sm:$0xff]  ;;  %v10325_v13 = vld [vmem:[%s20861_s3 + $0xdd8] sm:$0xff]  ;;  %v14171_v34 = vpack.c.bf16 %v10275_v10, %v10274_v30 }
0x17b2   : > { %14106 = vmatprep.subr.bf16.mxu0 %v14105_v29  ;;  %14138 = vmatprep.subr.bf16.mxu1 %v14137_v18  ;;  %v14189_v29 = vpack.c.bf16 %v10317_v17, %v10316_v21  ;;  %v10300_v18 = vld [vmem:[%s20861_s3 + $0xd10] sm:$0xff]  ;;  %v10277_v21 = vld [vmem:[%s20861_s3 + $0xc58] sm:$0xff]  ;;  %v10333_v56 = vld [vmem:[%s20862_s4 + $0xc08] sm:$0xff] }
0x17b3   : > { %v14191_v16 = vpack.c.bf16 %v10301_v32, %v10300_v18  ;;  %v10327_v18 = vld [vmem:[%s20861_s3 + $0xde8] sm:$0xff]  ;;  %v14175_v32 = vpack.c.bf16 %v10277_v21, %v10276_v15  ;;  %v19806_v30 = vld [vmem:[%s15167_s25 + $0x38] sm:$0xff]  ;;  %v10356_v15 = vld [vmem:[%s20862_s4 + $0xcc0] sm:$0xff] }
0x17b5   : > { %14108 = vmatpush3.bf16.msra.mxu0 %v14107_v40  ;;  %14140 = vmatpush3.bf16.msra.mxu1 %v14139_v24  ;;  %v14764_v40 = vld [vmem:[%s15031_s29 + $0x10] sm:$0xff]  ;;  %v14159_v24 = vpack.c.bf16 %v10269_v19, %v10268_v14  ;;  %v10309_v14 = vld [vmem:[%s20861_s3 + $0xd58] sm:$0xff]  ;;  %v10294_v19 = vld [vmem:[%s20861_s3 + $0xce0] sm:$0xff] }
0x17b6   : > { %14110 = vmatprep.subr.bf16.mxu0 %v14109_v43  ;;  %14142 = vmatprep.subr.bf16.mxu1 %v14141_v38  ;;  %v10271_v43 = vld [vmem:[%s20861_s3 + $0xc28] sm:$0xff]  ;;  %v14161_v38 = vpack.c.bf16 %v10287_v36, %v10286_v35  ;;  %v10278_v36 = vld [vmem:[%s20861_s3 + $0xc60] sm:$0xff] }
0x17b9   : > { %14112 = vmatpush3.bf16.msra.mxu0 %v14111_v44  ;;  %14144 = vmatpush3.bf16.msra.mxu1 %v14143_v46  ;;  %v10321_v44 = vld [vmem:[%s20861_s3 + $0xdb8] sm:$0xff]  ;;  %v14765_v46 = vld [vmem:[%s15031_s29 + $0x28] sm:$0xff] }
0x17ba   : > { %14114 = vmatprep.subr.bf16.mxu0 %v14113_v52  ;;  %14146 = vmatprep.subr.bf16.mxu1 %v14145_v53  ;;  %v14768_v52 = vld [vmem:[%s15031_s29 + $0x30] sm:$0xff]  ;;  %v14163_v53 = vpack.c.bf16 %v10271_v43, %v10270_v4  ;;  %v14197_v58 = vpack.c.bf16 %v10321_v44, %v10320_v42  ;;  %v10297_v4 = vld [vmem:[%s20861_s3 + $0xcf8] sm:$0xff] }
0x17bb   : > { %v10328_v43 = vld [vmem:[%s20861_s3 + $0xdf0] sm:$0xff] }
0x17bc   : > { %v10312_v44 = vld [vmem:[%s20861_s3 + $0xd70] sm:$0xff] }
0x17bd   : > { %14116 = vmatpush3.bf16.msra.mxu0 %v14115_v60  ;;  %14148 = vmatpush3.bf16.msra.mxu1 %v14147_v61  ;;  %v10305_v60 = vld [vmem:[%s20861_s3 + $0xd38] sm:$0xff]  ;;  %v10290_v61 = vld [vmem:[%s20861_s3 + $0xcc0] sm:$0xff] }
0x17be   : > { %14118 = vmatprep.subr.bf16.mxu0 %v14117_v26  ;;  %14150 = vmatprep.subr.bf16.mxu1 %v14149_v5  ;;  %v10323_v26 = vld [vmem:[%s20861_s3 + $0xdc8] sm:$0xff]  ;;  %v14199_v8 = vpack.c.bf16 %v10305_v60, %v10304_v59  ;;  %v14169_v49 = vpack.c.bf16 %v10291_v62, %v10290_v61  ;;  %v14219_v59 = vpack.c.bf16 %v10333_v56, %v10332_v55  ;;  %v10334_v61 = vld [vmem:[%s20862_s4 + $0xc10] sm:$0xff]  ;;  %v10335_v62 = vld [vmem:[%s20862_s4 + $0xc18] sm:$0xff] }
0x17bf   : > { %v19678_v5 = vld [vmem:[%s15167_s25 + $0x8] sm:$0xff]  ;;  %v14223_v10 = vpack.c.bf16 %v10335_v62, %v10334_v61  ;;  %v10387_v61 = vld [vmem:[%s20862_s4 + $0xdb8] sm:$0xff] }
0x17c0   : > { %v10385_v55 = vld [vmem:[%s20862_s4 + $0xda8] sm:$0xff] }
0x17c1   : > { %14120 = vmatpush3.bf16.msra.mxu0 %v14119_v11  ;;  %14152 = vmatpush3.bf16.msra.mxu1 %v14151_v63  ;;  %v14201_v11 = vpack.c.bf16 %v10323_v26, %v10322_v22  ;;  %v10306_v63 = vld [vmem:[%s20861_s3 + $0xd40] sm:$0xff] }
0x17c2   : > { %14154 = vmatprep.subr.bf16.mxu0 %v14153_v1  ;;  %14186 = vmatprep.subr.bf16.mxu1 %v14185_v2  ;;  %v10293_v1 = vld [vmem:[%s20861_s3 + $0xcd8] sm:$0xff]  ;;  %v10324_v2 = vld [vmem:[%s20861_s3 + $0xdd0] sm:$0xff]  ;;  %v14203_v3 = vpack.c.bf16 %v10307_v0, %v10306_v63  ;;  %v19794_v22 = vld [vmem:[%s15167_s25] sm:$0xff] }
0x17c3   : > { %v14173_v17 = vpack.c.bf16 %v10293_v1, %v10292_v12  ;;  %v10352_v26 = vld [vmem:[%s20862_s4 + $0xca0] sm:$0xff]  ;;  %v19817_v0 = vld [vmem:[%s15167_s25 + $0x30] sm:$0xff]  ;;  %v10355_v1 = vld [vmem:[%s20862_s4 + $0xcb8] sm:$0xff] }
0x17c4   : > { %6885 = vmatmul.mubr.f32.vlgmr.msra.gmra.mrb[88].mxu0 %v14763_v39  ;;  %6960 = vmatmul.mubr.f32.vlgmr.msra.gmra.mrb[88].mxu1 %v14764_v40  ;;  %v10310_v40 = vld [vmem:[%s20861_s3 + $0xd60] sm:$0xff]  ;;  %v10354_v12 = vld [vmem:[%s20862_s4 + $0xcb0] sm:$0xff] }
0x17c5   : > { %14156 = vmatpush3.bf16.msra.mxu0 %v14155_v23  ;;  %14188 = vmatpush3.bf16.msra.mxu1 %v14187_v33  ;;  %v14205_v23 = vpack.c.bf16 %v10325_v13, %v10324_v2  ;;  %v10308_v33 = vld [vmem:[%s20861_s3 + $0xd50] sm:$0xff]  ;;  %v14774_v63 = vld [vmem:[%s15167_s25 + $0x20] sm:$0xff]  ;;  %v14229_v13 = vpack.c.bf16 %v10355_v1, %v10354_v12  ;;  %v10391_v1 = vld [vmem:[%s20862_s4 + $0xdd8] sm:$0xff] }
0x17c6   : > { %14158 = vmatprep.subr.bf16.mxu0 %v14157_v25  ;;  %14190 = vmatprep.subr.bf16.mxu1 %v14189_v29  ;;  %v10295_v25 = vld [vmem:[%s20861_s3 + $0xce8] sm:$0xff]  ;;  %v10326_v29 = vld [vmem:[%s20861_s3 + $0xde0] sm:$0xff]  ;;  %v14207_v35 = vpack.c.bf16 %v10309_v14, %v10308_v33  ;;  %v10358_v33 = vld [vmem:[%s20862_s4 + $0xcd0] sm:$0xff] }
0x17c7   : > { %6889 = vmatprep.mubr.f32.mxu0 %v14765_v46  ;;  %6964 = vmatprep.mubr.f32.mxu1 %v14766_v50  ;;  %v14177_v48 = vpack.c.bf16 %v10295_v25, %v10294_v19  ;;  %v14209_v39 = vpack.c.bf16 %v10327_v18, %v10326_v29  ;;  %v10313_v46 = vld [vmem:[%s20861_s3 + $0xd78] sm:$0xff]  ;;  %v10348_v50 = vld [vmem:[%s20862_s4 + $0xc80] sm:$0xff]  ;;  %v10342_v29 = vld [vmem:[%s20862_s4 + $0xc50] sm:$0xff] }
0x17c8   : > { %6890 = vmatmul.mubr.f32.gmra.mrb[90].mxu0 %v14767_v51  ;;  %6965 = vmatmul.mubr.f32.gmra.mrb[90].mxu1 %v14768_v52  ;;  %v10349_v51 = vld [vmem:[%s20862_s4 + $0xc88] sm:$0xff]  ;;  %v14183_v52 = vpack.c.bf16 %v10281_v41, %v10280_v28  ;;  %v10359_v14 = vld [vmem:[%s20862_s4 + $0xcd8] sm:$0xff]  ;;  %v10364_v41 = vld [vmem:[%s20862_s4 + $0xd00] sm:$0xff] }
0x17c9   : > { %14160 = vmatpush3.bf16.msra.mxu0 %v14159_v24  ;;  %14192 = vmatpush3.bf16.msra.mxu1 %v14191_v16  ;;  %v10311_v24 = vld [vmem:[%s20861_s3 + $0xd68] sm:$0xff]  ;;  %v10296_v16 = vld [vmem:[%s20861_s3 + $0xcf0] sm:$0xff]  ;;  %v14237_v25 = vpack.c.bf16 %v10359_v14, %v10358_v33  ;;  %v10343_v18 = vld [vmem:[%s20862_s4 + $0xc58] sm:$0xff] }
0x17ca   : > { %14162 = vmatprep.subr.bf16.mxu0 %v14161_v38  ;;  %14194 = vmatprep.subr.bf16.mxu1 %v14193_v20  ;;  %v10329_v38 = vld [vmem:[%s20861_s3 + $0xdf8] sm:$0xff]  ;;  %v14179_v20 = vpack.c.bf16 %v10279_v37, %v10278_v36  ;;  %v14211_v9 = vpack.c.bf16 %v10311_v24, %v10310_v40  ;;  %v14181_v45 = vpack.c.bf16 %v10297_v4, %v10296_v16  ;;  %v10362_v40 = vld [vmem:[%s20862_s4 + $0xcf0] sm:$0xff]  ;;  %v10381_v28 = vld [vmem:[%s20862_s4 + $0xd88] sm:$0xff] }
0x17cb   : > { %7107 = vmatprep.mubr.f32.mxu0 %v19678_v5  ;;  %7182 = vmatprep.mubr.f32.mxu1 %v19682_v6  ;;  %v14213_v42 = vpack.c.bf16 %v10329_v38, %v10328_v43  ;;  %v14239_v36 = vpack.c.bf16 %v10343_v18, %v10342_v29  ;;  %v10363_v24 = vld [vmem:[%s20862_s4 + $0xcf8] sm:$0xff]  ;;  %v10346_v43 = vld [vmem:[%s20862_s4 + $0xc70] sm:$0xff] }
0x17cc   : > { %v14245_v4 = vpack.c.bf16 %v10363_v24, %v10362_v40  ;;  %v10347_v38 = vld [vmem:[%s20862_s4 + $0xc78] sm:$0xff]  ;;  %v10390_v12 = vld [vmem:[%s20862_s4 + $0xdd0] sm:$0xff] }
0x17cd   : > { %14164 = vmatpush3.bf16.msra.mxu0 %v14163_v53  ;;  %14196 = vmatpush3.bf16.msra.mxu1 %v14195_v54  ;;  %v14215_v53 = vpack.c.bf16 %v10313_v46, %v10312_v44  ;;  %v14217_v54 = vpack.c.bf16 %v10349_v51, %v10348_v50  ;;  %v10382_v44 = vld [vmem:[%s20862_s4 + $0xd90] sm:$0xff]  ;;  %v10383_v50 = vld [vmem:[%s20862_s4 + $0xd98] sm:$0xff] }
0x17ce   : > { %14166 = vmatprep.subr.bf16.mxu0 %v14165_v57  ;;  %14198 = vmatprep.subr.bf16.mxu1 %v14197_v58  ;;  %v10350_v57 = vld [vmem:[%s20862_s4 + $0xc90] sm:$0xff]  ;;  %v10351_v58 = vld [vmem:[%s20862_s4 + $0xc98] sm:$0xff] }
0x17cf   : > { %v14221_v60 = vpack.c.bf16 %v10351_v58, %v10350_v57  ;;  %v10366_v51 = vld [vmem:[%s20862_s4 + $0xd10] sm:$0xff]  ;;  %v10368_v58 = vld [vmem:[%s20862_s4 + $0xd20] sm:$0xff]  ;;  %v10379_v18 = vld [vmem:[%s20862_s4 + $0xd78] sm:$0xff] }
0x17d0   : > { %v10394_v14 = vld [vmem:[%s20862_s4 + $0xdf0] sm:$0xff] }
0x17d1   : > { %14168 = vmatpush3.bf16.msra.mxu0 %v14167_v7  ;;  %14200 = vmatpush3.bf16.msra.mxu1 %v14199_v8  ;;  %v10353_v7 = vld [vmem:[%s20862_s4 + $0xca8] sm:$0xff]  ;;  %v10378_v29 = vld [vmem:[%s20862_s4 + $0xd70] sm:$0xff] }
0x17d2   : > { %14170 = vmatprep.subr.bf16.mxu0 %v14169_v49  ;;  %14202 = vmatprep.subr.bf16.mxu1 %v14201_v11  ;;  %v14772_v8 = vld [vmem:[%s15167_s25 + $0x28] sm:$0xff]  ;;  %v14225_v49 = vpack.c.bf16 %v10353_v7, %v10352_v26  ;;  %v10370_v26 = vld [vmem:[%s20862_s4 + $0xd30] sm:$0xff]  ;;  %v10371_v7 = vld [vmem:[%s20862_s4 + $0xd38] sm:$0xff] }
0x17d3   : > { %v10337_v11 = vld [vmem:[%s20862_s4 + $0xc28] sm:$0xff] }
0x17d5   : > { %14172 = vmatpush3.bf16.msra.mxu0 %v14171_v34  ;;  %14204 = vmatpush3.bf16.msra.mxu1 %v14203_v3  ;;  %v10338_v34 = vld [vmem:[%s20862_s4 + $0xc30] sm:$0xff]  ;;  %v10339_v3 = vld [vmem:[%s20862_s4 + $0xc38] sm:$0xff] }
0x17d6   : > { %14174 = vmatprep.subr.bf16.mxu0 %v14173_v17  ;;  %14206 = vmatprep.subr.bf16.mxu1 %v14205_v23  ;;  %v10340_v17 = vld [vmem:[%s20862_s4 + $0xc40] sm:$0xff]  ;;  %v10341_v23 = vld [vmem:[%s20862_s4 + $0xc48] sm:$0xff] }
0x17d7   : > { %v14235_v19 = vpack.c.bf16 %v10341_v23, %v10340_v17  ;;  %v10376_v17 = vld [vmem:[%s20862_s4 + $0xd60] sm:$0xff]  ;;  %v10377_v23 = vld [vmem:[%s20862_s4 + $0xd68] sm:$0xff] }
0x17d8   : > { %v14275_v33 = vpack.c.bf16 %v10377_v23, %v10376_v17 }
0x17d9   : > { %14176 = vmatpush3.bf16.msra.mxu0 %v14175_v32  ;;  %14208 = vmatpush3.bf16.msra.mxu1 %v14207_v35  ;;  %v10360_v32 = vld [vmem:[%s20862_s4 + $0xce0] sm:$0xff]  ;;  %v10361_v35 = vld [vmem:[%s20862_s4 + $0xce8] sm:$0xff] }
0x17da   : > { %14178 = vmatprep.subr.bf16.mxu0 %v14177_v48  ;;  %14210 = vmatprep.subr.bf16.mxu1 %v14209_v39  ;;  %v14241_v37 = vpack.c.bf16 %v10361_v35, %v10360_v32  ;;  %v10344_v48 = vld [vmem:[%s20862_s4 + $0xc60] sm:$0xff]  ;;  %v10345_v39 = vld [vmem:[%s20862_s4 + $0xc68] sm:$0xff]  ;;  %v14279_v32 = vpack.c.bf16 %v10379_v18, %v10378_v29  ;;  %v19980_v35 = vld [vmem:[%s15167_s25 + $0x10] sm:$0xff] }
0x17db   : > { %v14243_v16 = vpack.c.bf16 %v10345_v39, %v10344_v48  ;;  %v10265_v48 = vld [vmem:[%s20864_s6 + $0x6] ss:$0 sm:$0xff] }
0x17dd   : > { %14180 = vmatpush3.bf16.msra.mxu0 %v14179_v20  ;;  %14212 = vmatpush3.bf16.msra.mxu1 %v14211_v9  ;;  %v14247_v20 = vpack.c.bf16 %v10347_v38, %v10346_v43  ;;  %v10380_v9 = vld [vmem:[%s20862_s4 + $0xd80] sm:$0xff] }
0x17de   : > { %14182 = vmatprep.subr.bf16.mxu0 %v14181_v45  ;;  %14214 = vmatprep.subr.bf16.mxu1 %v14213_v42  ;;  %v14249_v45 = vpack.c.bf16 %v10381_v28, %v10380_v9  ;;  %v10365_v42 = vld [vmem:[%s20862_s4 + $0xd08] sm:$0xff] }
0x17df   : > { %v14251_v46 = vpack.c.bf16 %v10365_v42, %v10364_v41 }
0x17e1   : > { %14184 = vmatpush3.bf16.msra.mxu0 %v14183_v52  ;;  %14216 = vmatpush3.bf16.msra.mxu1 %v14215_v53  ;;  %v10367_v52 = vld [vmem:[%s20862_s4 + $0xd18] sm:$0xff]  ;;  %v14253_v53 = vpack.c.bf16 %v10383_v50, %v10382_v44 }
0x17e2   : > { %14218 = vmatprep.subr.bf16.mxu0 %v14217_v54  ;;  %14250 = vmatprep.subr.bf16.mxu1 %v14249_v45  ;;  %v10384_v54 = vld [vmem:[%s20862_s4 + $0xda0] sm:$0xff]  ;;  %v14255_v56 = vpack.c.bf16 %v10367_v52, %v10366_v51 }
0x17e3   : > { %v14257_v57 = vpack.c.bf16 %v10385_v55, %v10384_v54 }
0x17e4   : > { %7108 = vmatmul.mubr.f32.vlgmr.msra.gmra.mrb[92].mxu0 %v19794_v22  ;;  %7183 = vmatmul.mubr.f32.vlgmr.msra.gmra.mrb[92].mxu1 %v19239_v31  ;;  %v10336_v31 = vld [vmem:[%s20862_s4 + $0xc20] sm:$0xff] }
0x17e5   : > { %7112 = vmatprep.mubr.f32.mxu0 %v14772_v8  ;;  %7187 = vmatprep.mubr.f32.mxu1 %v19806_v30  ;;  %v14227_v2 = vpack.c.bf16 %v10337_v11, %v10336_v31  ;;  %v10372_v11 = vld [vmem:[%s20862_s4 + $0xd40] sm:$0xff] }
0x17e6   : > { %14220 = vmatpush3.bf16.msra.mxu0 %v14219_v59  ;;  %14252 = vmatpush3.bf16.msra.mxu1 %v14251_v46  ;;  %v10369_v59 = vld [vmem:[%s20862_s4 + $0xd28] sm:$0xff]  ;;  %v10331_v46 = vld [vmem:[%s20865_s7 + $0x6] ss:$0 sm:$0xff] }
0x17e7   : > { %14222 = vmatprep.subr.bf16.mxu0 %v14221_v60  ;;  %14254 = vmatprep.subr.bf16.mxu1 %v14253_v53  ;;  %v10386_v60 = vld [vmem:[%s20862_s4 + $0xdb0] sm:$0xff]  ;;  %v14259_v62 = vpack.c.bf16 %v10369_v59, %v10368_v58 }
0x17e8   : > { %7113 = vmatmul.mubr.f32.gmra.mrb[94].mxu0 %v14774_v63  ;;  %7188 = vmatmul.mubr.f32.gmra.mrb[94].mxu1 %v19817_v0 }
0x17e9   : > { %7330 = vmatprep.mubr.f32.mxu0 %v19678_v5  ;;  %7405 = vmatprep.mubr.f32.mxu1 %v19682_v6  ;;  %v10357_v5 = vld [vmem:[%s20862_s4 + $0xcc8] sm:$0xff]  ;;  %v14231_v6 = vpack.c.bf16 %v10339_v3, %v10338_v34  ;;  %v10374_v34 = vld [vmem:[%s20862_s4 + $0xd50] sm:$0xff]  ;;  %v10375_v3 = vld [vmem:[%s20862_s4 + $0xd58] sm:$0xff] }
0x17ea   : > { %14224 = vmatpush3.bf16.msra.mxu0 %v14223_v10  ;;  %v14233_v21 = vpack.c.bf16 %v10357_v5, %v10356_v15  ;;  %14256 = vmatpush3.bf16.msra.mxu1 %v14255_v56  ;;  %v10389_v10 = vld [vmem:[%s20862_s4 + $0xdc8] sm:$0xff]  ;;  %v14271_v15 = vpack.c.bf16 %v10375_v3, %v10374_v34  ;;  %v10392_v5 = vld [vmem:[%s20862_s4 + $0xde0] sm:$0xff] }
0x17eb   : > { %14226 = vmatprep.subr.bf16.mxu0 %v14225_v49  ;;  %14258 = vmatprep.subr.bf16.mxu1 %v14257_v57  ;;  %v14263_v49 = vpack.c.bf16 %v10371_v7, %v10370_v26 }
0x17ee   : > { %14228 = vmatpush3.bf16.msra.mxu0 %v14227_v2  ;;  %14260 = vmatpush3.bf16.msra.mxu1 %v14259_v62 }
0x17ef   : > { %14230 = vmatprep.subr.bf16.mxu0 %v14229_v13  ;;  %v14269_v13 = vpack.c.bf16 %v10391_v1, %v10390_v12 }
0x17f2   : > { %14232 = vmatpush3.bf16.msra.mxu0 %v14231_v6  ;;  %v10393_v6 = vld [vmem:[%s20862_s4 + $0xde8] sm:$0xff] }
0x17f3   : > { %14234 = vmatprep.subr.bf16.mxu0 %v14233_v21  ;;  %v14273_v21 = vpack.c.bf16 %v10393_v6, %v10392_v5 }
0x17f6   : > { %14236 = vmatpush3.bf16.msra.mxu0 %v14235_v19  ;;  %v10395_v19 = vld [vmem:[%s20862_s4 + $0xdf8] sm:$0xff] }
0x17f7   : > { %14238 = vmatprep.subr.bf16.mxu0 %v14237_v25  ;;  %v14277_v25 = vpack.c.bf16 %v10395_v19, %v10394_v14 }
0x17fa   : > { %14240 = vmatpush3.bf16.msra.mxu0 %v14239_v36 }
0x17fb   : > { %14242 = vmatprep.subr.bf16.mxu0 %v14241_v37 }
0x17fe   : > { %14244 = vmatpush3.bf16.msra.mxu0 %v14243_v16 }
0x17ff   : > { %14246 = vmatprep.subr.bf16.mxu0 %v14245_v4 }
0x1802   : > { %14248 = vmatpush3.bf16.msra.mxu0 %v14247_v20 }
0x1805   : > { %7331 = vmatmul.mubr.f32.vlgmr.msra.gmra.mrb[96].mxu0 %v19794_v22  ;;  %v14261_v22 = vpack.c.bf16 %v10387_v61, %v10386_v60 }
0x1806   : > { %7335 = vmatprep.mubr.f32.mxu0 %v14772_v8  ;;  %v10388_v8 = vld [vmem:[%s20862_s4 + $0xdc0] sm:$0xff] }
0x1807   : > { %14262 = vmatprep.subr.bf16.mxu1 %v14261_v22  ;;  %v14265_v31 = vpack.c.bf16 %v10389_v10, %v10388_v8 }
0x1808   : > { %14264 = vmatpush3.bf16.msra.mxu1 %v14263_v49 }
0x1809   : > { %7336 = vmatmul.mubr.f32.gmra.mrb[98].mxu0 %v14774_v63  ;;  %v10373_v63 = vld [vmem:[%s20862_s4 + $0xd48] sm:$0xff]  ;;  %14266 = vmatprep.subr.bf16.mxu1 %v14265_v31 }
0x180a   : > { %v14267_v2 = vpack.c.bf16 %v10373_v63, %v10372_v11  ;;  %v10397_v63 = vld [vmem:[%s20866_s8 + $0x6] ss:$0 sm:$0xff] }
0x180c   : > { %14268 = vmatpush3.bf16.msra.mxu1 %v14267_v2 }
0x180d   : > { %14270 = vmatprep.subr.bf16.mxu1 %v14269_v13 }
0x1810   : > { %14272 = vmatpush3.bf16.msra.mxu1 %v14271_v15 }
0x1811   : > { %14274 = vmatprep.subr.bf16.mxu1 %v14273_v21 }
0x1814   : > { %14276 = vmatpush3.bf16.msra.mxu1 %v14275_v33 }
0x1815   : > { %14278 = vmatprep.subr.bf16.mxu1 %v14277_v25 }
0x1818   : > { %14280 = vmatpush3.bf16.msra.mxu1 %v14279_v32 }
0x181b   : > { %7406 = vmatmul.mubr.f32.vlgmr.msra.gmra.mrb[96].mxu1 %v19980_v35 }
0x181c   : > { %7410 = vmatprep.mubr.f32.mxu1 %v19806_v30 }
0x181f   : > { %7411 = vmatmul.mubr.f32.gmra.mrb[98].mxu1 %v19817_v0 }
0x1897   : > { %v12133_v36 = vpop.f32.mrb[88].mxu0  ;;  %v12171_v37 = vpop.f32.mrb[88].mxu1 }
0x1898   : > { %v12134_v39 = vpop.f32.mrb[89].mxu0  ;;  %v12172_v40 = vpop.f32.mrb[89].mxu1 }
0x1899   : > { %v12135_v24 = vadd.f32 %v12134_v39, %v12133_v36  ;;  %v12173_v16 = vadd.f32 %v12172_v40, %v12171_v37 }
0x189b   : > { %v6887_v4 = vadd.f32 %v12135_v24, %v10265_v48  ;;  %v12136_v43 = vpop.f32.mrb[90].mxu0  ;;  %v12174_v38 = vpop.f32.mrb[90].mxu1 }
0x189c   : > { %v12137_v20 = vpop.f32.mrb[91].mxu0  ;;  %v12175_v9 = vpop.f32.mrb[91].mxu1 }
0x189d   : > { %v6962_v28 = vadd.f32 %v12173_v16, %v6887_v4  ;;  %v12138_v45 = vadd.f32 %v12137_v20, %v12136_v43  ;;  %v12176_v30 = vadd.f32 %v12175_v9, %v12174_v38  ;;  %v10405_v43 = vld [vmem:[%s20863_s5 + $0x608] sm:$0xff]  ;;  %v10404_v20 = vld [vmem:[%s20863_s5 + $0x600] sm:$0xff] }
0x189e   : > { %v10409_v38 = vld [vmem:[%s20863_s5 + $0x628] sm:$0xff] }
0x189f   : > { %12661 = vmatprep.mubr.msk.f32.mxu0 %vm1059_vm0, %v6962_v28  ;;  %v6892_v0 = vadd.f32 %v12138_v45, %v10265_v48  ;;  %v14291_v9 = vpack.c.bf16 %v10409_v38, %v10405_v43  ;;  %v10408_v28 = vld [vmem:[%s20863_s5 + $0x620] sm:$0xff]  ;;  %v10407_v45 = vld [vmem:[%s20863_s5 + $0x618] sm:$0xff]  ;;  %v10441_v43 = vld [vmem:[%s20860_s2 + $0xe08] sm:$0xff] }
0x18a0   : > { %v10472_v38 = vld [vmem:[%s20860_s2 + $0xf00] sm:$0xff] }
0x18a1   : > { %v6967_v41 = vadd.f32 %v12176_v30, %v6892_v0  ;;  %v10411_v30 = vld [vmem:[%s20863_s5 + $0x638] sm:$0xff]  ;;  %v14293_v0 = vpack.c.bf16 %v10408_v28, %v10404_v20  ;;  %v10473_v20 = vld [vmem:[%s20860_s2 + $0xf08] sm:$0xff] }
0x18a2   : > { %v10459_v28 = vld [vmem:[%s20860_s2 + $0xe98] sm:$0xff] }
0x18b7   : > { %v12209_v42 = vpop.f32.mrb[92].mxu0  ;;  %v12247_v44 = vpop.f32.mrb[92].mxu1 }
0x18b8   : > { %v12210_v50 = vpop.f32.mrb[93].mxu0  ;;  %v12248_v51 = vpop.f32.mrb[93].mxu1 }
0x18b9   : > { %v12211_v52 = vadd.f32 %v12210_v50, %v12209_v42  ;;  %v12249_v53 = vadd.f32 %v12248_v51, %v12247_v44  ;;  %v10413_v42 = vld [vmem:[%s20863_s5 + $0x648] sm:$0xff]  ;;  %v10416_v50 = vld [vmem:[%s20863_s5 + $0x660] sm:$0xff] }
0x18ba   : > { %v10417_v44 = vld [vmem:[%s20863_s5 + $0x668] sm:$0xff] }
0x18bb   : > { %v7110_v54 = vadd.f32 %v12211_v52, %v10331_v46  ;;  %v12212_v55 = vpop.f32.mrb[94].mxu0  ;;  %v12250_v56 = vpop.f32.mrb[94].mxu1  ;;  %v14295_v51 = vpack.c.bf16 %v10417_v44, %v10413_v42  ;;  %v10442_v42 = vld [vmem:[%s20860_s2 + $0xe10] sm:$0xff]  ;;  %v10443_v44 = vld [vmem:[%s20860_s2 + $0xe18] sm:$0xff] }
0x18bc   : > { %v12213_v57 = vpop.f32.mrb[95].mxu0  ;;  %v12251_v58 = vpop.f32.mrb[95].mxu1 }
0x18bd   : > { %v7185_v59 = vadd.f32 %v12249_v53, %v7110_v54  ;;  %v12214_v60 = vadd.f32 %v12213_v57, %v12212_v55  ;;  %v12252_v61 = vadd.f32 %v12251_v58, %v12250_v56  ;;  %v10421_v53 = vld [vmem:[%s20863_s5 + $0x688] sm:$0xff]  ;;  %v10420_v56 = vld [vmem:[%s20863_s5 + $0x680] sm:$0xff] }
0x18be   : > { %v10425_v54 = vld [vmem:[%s20863_s5 + $0x6a8] sm:$0xff]  ;;  %v10424_v57 = vld [vmem:[%s20863_s5 + $0x6a0] sm:$0xff] }
0x18bf   : > { %v7115_v62 = vadd.f32 %v12214_v60, %v10331_v46  ;;  %v10412_v46 = vld [vmem:[%s20863_s5 + $0x640] sm:$0xff]  ;;  %v14299_v55 = vpack.c.bf16 %v10425_v54, %v10421_v53  ;;  %v14301_v58 = vpack.c.bf16 %v10424_v57, %v10420_v56  ;;  %v10433_v60 = vld [vmem:[%s20863_s5 + $0x6e8] sm:$0xff] }
0x18c0   : > { %v14297_v52 = vpack.c.bf16 %v10416_v50, %v10412_v46  ;;  %v10474_v50 = vld [vmem:[%s20860_s2 + $0xf10] sm:$0xff]  ;;  %v10461_v56 = vld [vmem:[%s20860_s2 + $0xea8] sm:$0xff]  ;;  %v10492_v57 = vld [vmem:[%s20860_s2 + $0xfa0] sm:$0xff] }
0x18c1   : > { %v7190_v22 = vadd.f32 %v12252_v61, %v7115_v62  ;;  %v10428_v61 = vld [vmem:[%s20863_s5 + $0x6c0] sm:$0xff] }
0x18c3   : > { %v14281_v26 = vpack.c.bf16 %v7190_v22, %v7185_v59  ;;  %v10429_v59 = vld [vmem:[%s20863_s5 + $0x6c8] sm:$0xff]  ;;  %v10432_v22 = vld [vmem:[%s20863_s5 + $0x6e0] sm:$0xff] }
0x18c4   : > { %v14303_v62 = vpack.c.bf16 %v10433_v60, %v10429_v59  ;;  %v14329_v59 = vpack.c.bf16 %v10443_v44, %v10442_v42  ;;  %v10501_v42 = vld [vmem:[%s20860_s2 + $0xfe8] sm:$0xff] }
0x18c5   : > { %14283 = vmatprep.subr.msk.bf16.mxu0 %vm15534_vm1, %v14281_v26 }
0x18c6   : > { %14286 = vmatpush3.bf16.xpose.msk.msra.mxu0 %vm15534_vm1, %v14281_v26  ;;  %v14305_v26 = vpack.c.bf16 %v10432_v22, %v10428_v61  ;;  %v10444_v61 = vld [vmem:[%s20860_s2 + $0xe20] sm:$0xff] }
0x18c7   : > { %14292 = vmatprep.subr.bf16.mxu0 %v14291_v9  ;;  %v10458_v9 = vld [vmem:[%s20860_s2 + $0xe90] sm:$0xff] }
0x18c8   : > { %v14327_v54 = vpack.c.bf16 %v10459_v28, %v10458_v9  ;;  %v10482_v28 = vld [vmem:[%s20860_s2 + $0xf50] sm:$0xff] }
0x18cd   : > { %12662 = vmatmul.mubr.msk.f32.vlgmr.msra.gmra.mrb[100].mxu0 %vm1059_vm0, %v6967_v41  ;;  %v14307_v41 = vpack.c.bf16 %v10411_v30, %v10407_v45  ;;  %v10490_v45 = vld [vmem:[%s20860_s2 + $0xf90] sm:$0xff]  ;;  %v10491_v30 = vld [vmem:[%s20860_s2 + $0xf98] sm:$0xff] }
0x18ce   : > { %7711 = vmatprep.mubr.f32.mxu0 %v14801_v27  ;;  %14294 = vmatpush1.bf16.msra.mxu0 %v14293_v0 }
0x18cf   : > { %14296 = vmatprep.subr.bf16.mxu0 %v14295_v51  ;;  %v10475_v51 = vld [vmem:[%s20860_s2 + $0xf18] sm:$0xff] }
0x18d0   : > { %v14361_v60 = vpack.c.bf16 %v10475_v51, %v10474_v50  ;;  %v10452_v50 = vld [vmem:[%s20860_s2 + $0xe60] sm:$0xff]  ;;  %v10453_v51 = vld [vmem:[%s20860_s2 + $0xe68] sm:$0xff] }
0x18d2   : > { %14298 = vmatpush1.bf16.msra.mxu0 %v14297_v52  ;;  %v10460_v52 = vld [vmem:[%s20860_s2 + $0xea0] sm:$0xff] }
0x18d3   : > { %14300 = vmatprep.subr.bf16.mxu0 %v14299_v55  ;;  %v14359_v55 = vpack.c.bf16 %v10491_v30, %v10490_v45  ;;  %v14331_v22 = vpack.c.bf16 %v10461_v56, %v10460_v52  ;;  %v10483_v45 = vld [vmem:[%s20860_s2 + $0xf58] sm:$0xff]  ;;  %v10468_v30 = vld [vmem:[%s20860_s2 + $0xee0] sm:$0xff]  ;;  %v10470_v56 = vld [vmem:[%s20860_s2 + $0xef0] sm:$0xff] }
0x18d6   : > { %14302 = vmatpush1.bf16.msra.mxu0 %v14301_v58  ;;  %v10493_v58 = vld [vmem:[%s20860_s2 + $0xfa8] sm:$0xff] }
0x18d7   : > { %14304 = vmatprep.subr.bf16.mxu0 %v14303_v62  ;;  %v10445_v62 = vld [vmem:[%s20860_s2 + $0xe28] sm:$0xff] }
0x18d8   : > { %v12285_v7 = vpop.f32.mrb[96].mxu0 }
0x18d9   : > { %v12286_v8 = vpop.f32.mrb[97].mxu0 }
0x18da   : > { %v12287_v10 = vadd.f32 %v12286_v8, %v12285_v7  ;;  %14306 = vmatpush1.bf16.msra.mxu0 %v14305_v26  ;;  %v14363_v26 = vpack.c.bf16 %v10493_v58, %v10492_v57  ;;  %v10471_v57 = vld [vmem:[%s20860_s2 + $0xef8] sm:$0xff]  ;;  %v10502_v58 = vld [vmem:[%s20860_s2 + $0xff0] sm:$0xff] }
0x18dc   : > { %v12288_v49 = vpop.f32.mrb[98].mxu0  ;;  %v7333_v12 = vadd.f32 %v12287_v10, %v10397_v63  ;;  %v10406_v10 = vld [vmem:[%s20863_s5 + $0x610] sm:$0xff] }
0x18dd   : > { %v12289_v31 = vpop.f32.mrb[99].mxu0 }
0x18de   : > { %v12290_v11 = vadd.f32 %v12289_v31, %v12288_v49  ;;  %v10410_v49 = vld [vmem:[%s20863_s5 + $0x630] sm:$0xff] }
0x18e0   : > { %v7338_v34 = vadd.f32 %v12290_v11, %v10397_v63  ;;  %v10415_v11 = vld [vmem:[%s20863_s5 + $0x658] sm:$0xff] }
0x18e1   : > { %v10419_v63 = vld [vmem:[%s20863_s5 + $0x678] sm:$0xff] }
0x18ee   : > { %v12323_v1 = vpop.f32.mrb[96].mxu1 }
0x18ef   : > { %v12324_v2 = vpop.f32.mrb[97].mxu1 }
0x18f0   : > { %v12325_v13 = vadd.f32 %v12324_v2, %v12323_v1  ;;  %v14309_v2 = vpack.c.bf16 %v10410_v49, %v10406_v10  ;;  %v10462_v10 = vld [vmem:[%s20860_s2 + $0xeb0] sm:$0xff]  ;;  %v10463_v49 = vld [vmem:[%s20860_s2 + $0xeb8] sm:$0xff] }
0x18f2   : > { %v7408_v3 = vadd.f32 %v12325_v13, %v7333_v12  ;;  %v12326_v15 = vpop.f32.mrb[98].mxu1 }
0x18f3   : > { %v12327_v5 = vpop.f32.mrb[99].mxu1 }
0x18f4   : > { %v12328_v6 = vadd.f32 %v12327_v5, %v12326_v15  ;;  %v10418_v15 = vld [vmem:[%s20863_s5 + $0x670] sm:$0xff]  ;;  %v10423_v5 = vld [vmem:[%s20863_s5 + $0x698] sm:$0xff] }
0x18f6   : > { %v7413_v21 = vadd.f32 %v12328_v6, %v7338_v34  ;;  %v14311_v34 = vpack.c.bf16 %v10419_v63, %v10415_v11  ;;  %v10427_v6 = vld [vmem:[%s20863_s5 + $0x6b8] sm:$0xff]  ;;  %v14333_v63 = vpack.c.bf16 %v10445_v62, %v10444_v61  ;;  %v10454_v62 = vld [vmem:[%s20860_s2 + $0xe70] sm:$0xff] }
0x18f7   : > { %v10495_v11 = vld [vmem:[%s20860_s2 + $0xfb8] sm:$0xff] }
0x18f8   : > { %v14287_v17 = vpack.c.bf16 %v7413_v21, %v7408_v3  ;;  %v10414_v3 = vld [vmem:[%s20863_s5 + $0x650] sm:$0xff] }
0x18f9   : > { %v14313_v21 = vpack.c.bf16 %v10418_v15, %v10414_v3  ;;  %v10478_v3 = vld [vmem:[%s20860_s2 + $0xf30] sm:$0xff]  ;;  %v10479_v15 = vld [vmem:[%s20860_s2 + $0xf38] sm:$0xff] }
0x18fa   : > { %14288 = vmatprep.subr.bf16.mxu1 %v14287_v17 }
0x18fb   : > { %14290 = vmatpush3.bf16.msra.mxu1 %v14287_v17  ;;  %v14315_v17 = vpack.c.bf16 %v10427_v6, %v10423_v5  ;;  %v10464_v5 = vld [vmem:[%s20860_s2 + $0xec0] sm:$0xff]  ;;  %v10465_v6 = vld [vmem:[%s20860_s2 + $0xec8] sm:$0xff] }
0x18fc   : > { %14308 = vmatprep.subr.bf16.mxu1 %v14307_v41  ;;  %v14357_v41 = vpack.c.bf16 %v10473_v20, %v10472_v38  ;;  %v10451_v38 = vld [vmem:[%s20860_s2 + $0xe58] sm:$0xff] }
0x19a0   : > { %v12663_v23 = vpop.f32.mrb[100].mxu0 }
0x19a1   : > { %v7504_v33 = vmul.f32 0.125, %v12663_v23  ;;  %v7494_v14 = vpop.f32.mrb[101].mxu0  ;;  %v10422_v23 = vld [vmem:[%s20863_s5 + $0x690] sm:$0xff] }
0x19a2   : > { %v7503_v19 = vmul.f32 0.125, %v7494_v14  ;;  %v10431_v14 = vld [vmem:[%s20863_s5 + $0x6d8] sm:$0xff] }
0x19a3   : > { %v7508_v25 = vsel %vm1149_vm2, %v7504_v33, -inf }
0x19a4   : > { %7509 = vmax.xlane.f32.xlu1 %v7508_v25  ;;  %v7505_v29 = vsel %vm1149_vm2, %v7503_v19, -inf }
0x19a5   : > { %7506 = vmax.xlane.f32.xlu0 %v7505_v29 }
0x1a31   : > { %v7510_v18 = vpop.xlane.xlu1 %7509 }
0x1a32   : > { %v7512_v32 = vsub.f32 %v7504_v33, %v7510_v18  ;;  %v7507_v36 = vpop.xlane.xlu0 %7506  ;;  %v10426_v33 = vld [vmem:[%s20863_s5 + $0x6b0] sm:$0xff] }
0x1a33   : > { %v7511_v37 = vsub.f32 %v7503_v19, %v7507_v36  ;;  %v10435_v19 = vld [vmem:[%s20863_s5 + $0x6f8] sm:$0xff]  ;;  %v14317_v25 = vpack.c.bf16 %v10426_v33, %v10422_v23  ;;  %v10430_v18 = vld [vmem:[%s20863_s5 + $0x6d0] sm:$0xff]  ;;  %v14777_v23 = vld [vmem:[%s15031_s29 + $0x8] sm:$0xff] }
0x1a34   : > { %v7515_v48 = vmul.f32 1.442695, %v7512_v32  ;;  %v14319_v29 = vpack.c.bf16 %v10435_v19, %v10431_v14  ;;  %v10434_v32 = vld [vmem:[%s20863_s5 + $0x6f0] sm:$0xff]  ;;  %v14778_v33 = vld [vmem:[%s15031_s29 + $0x18] sm:$0xff]  ;;  %v14369_v19 = vpack.c.bf16 %v10479_v15, %v10478_v3  ;;  %v10538_v15 = vld [vmem:[%s20861_s3 + $0xf00] sm:$0xff] }
0x1a35   : > { %v7513_v39 = vmul.f32 1.442695, %v7511_v37  ;;  %v14321_v36 = vpack.c.bf16 %v10434_v32, %v10430_v18  ;;  %v10456_v37 = vld [vmem:[%s20860_s2 + $0xe80] sm:$0xff]  ;;  %v14339_v18 = vpack.c.bf16 %v10465_v6, %v10464_v5  ;;  %v10539_v5 = vld [vmem:[%s20861_s3 + $0xf08] sm:$0xff]  ;;  %v10524_v6 = vld [vmem:[%s20861_s3 + $0xe90] sm:$0xff] }
0x1a36   : > { %14670 = vpow2.f32 %v7515_v48  ;;  %v10457_v48 = vld [vmem:[%s20860_s2 + $0xe88] sm:$0xff] }
0x1a37   : > { %14672 = vpow2.f32 %v7513_v39  ;;  %v14323_v39 = vpack.c.bf16 %v10457_v48, %v10456_v37  ;;  %v10481_v37 = vld [vmem:[%s20860_s2 + $0xf48] sm:$0xff]  ;;  %v10466_v48 = vld [vmem:[%s20860_s2 + $0xed0] sm:$0xff] }
0x1a39   : > { %14324 = vmatprep.subr.bf16.mxu0 %v14323_v39  ;;  %v10467_v39 = vld [vmem:[%s20860_s2 + $0xed8] sm:$0xff] }
0x1a3a   : > { %v14343_v20 = vpack.c.bf16 %v10467_v39, %v10466_v48  ;;  %v10527_v48 = vld [vmem:[%s20861_s3 + $0xea8] sm:$0xff]  ;;  %v10558_v39 = vld [vmem:[%s20861_s3 + $0xfa0] sm:$0xff] }
0x1a40   : > { %v14671_v40 = vpop.eup %14670 }
0x1a41   : > { %v14673_v24 = vpop.eup %14672  ;;  %v7520_v16 = vsel %vm1149_vm2, %v14671_v40, 0.0 }
0x1a42   : > { %7521 = vadd.xlane.f32.xlu1 %v7520_v16  ;;  %v7517_v4 = vsel %vm1149_vm2, %v14673_v24, 0.0 }
0x1a43   : > { %7518 = vadd.xlane.f32.xlu0 %v7517_v4  ;;  %v10440_v4 = vld [vmem:[%s20860_s2 + $0xe00] sm:$0xff] }
0x1a44   : > { %v14325_v0 = vpack.c.bf16 %v10441_v43, %v10440_v4  ;;  %v10450_v43 = vld [vmem:[%s20860_s2 + $0xe50] sm:$0xff] }
0x1a45   : > { %v14345_v44 = vpack.c.bf16 %v10451_v38, %v10450_v43  ;;  %v10510_v38 = vld [vmem:[%s20861_s3 + $0xe20] sm:$0xff] }
0x1acf   : > { %v7522_v7 = vpop.xlane.xlu1 %7521 }
0x1ad0   : > { %14674 = vrcp.f32 %v7522_v7  ;;  %v7519_v8 = vpop.xlane.xlu0 %7518  ;;  %v10476_v7 = vld [vmem:[%s20860_s2 + $0xf20] sm:$0xff] }
0x1ad1   : > { %14676 = vrcp.f32 %v7519_v8  ;;  %v10477_v8 = vld [vmem:[%s20860_s2 + $0xf28] sm:$0xff] }
0x1ada   : > { %v14675_v31 = vpop.eup %14674 }
0x1adb   : > { %v14677_v12 = vpop.eup %14676  ;;  %v7526_v13 = vmul.f32 %v14675_v31, %v14671_v40  ;;  %v10488_v40 = vld [vmem:[%s20860_s2 + $0xf80] sm:$0xff]  ;;  %v10494_v31 = vld [vmem:[%s20860_s2 + $0xfb0] sm:$0xff] }
0x1adc   : > { %v7525_v1 = vmul.f32 %v14677_v12, %v14673_v24  ;;  %v10489_v24 = vld [vmem:[%s20860_s2 + $0xf88] sm:$0xff]  ;;  %v14365_v12 = vpack.c.bf16 %v10477_v8, %v10476_v7  ;;  %v10486_v8 = vld [vmem:[%s20860_s2 + $0xf70] sm:$0xff] }
0x1add   : > { %v14355_v16 = vpack.c.bf16 %v10489_v24, %v10488_v40  ;;  %v10498_v40 = vld [vmem:[%s20860_s2 + $0xfd0] sm:$0xff]  ;;  %v10499_v24 = vld [vmem:[%s20860_s2 + $0xfd8] sm:$0xff] }
0x1ade   : > { %12668 = vmatprep.mubr.msk.f32.mxu1 %vm1149_vm2, %v7525_v1  ;;  %v10446_v1 = vld [vmem:[%s20860_s2 + $0xe30] sm:$0xff]  ;;  %v14375_v9 = vpack.c.bf16 %v10499_v24, %v10498_v40  ;;  %v10559_v40 = vld [vmem:[%s20861_s3 + $0xfa8] sm:$0xff]  ;;  %v14779_v24 = vld [vmem:[%s15031_s29] sm:$0xff] }
0x1adf   : > { %12669 = vmatmul.mubr.msk.f32.vlgmr.msra.gmra.mrb[100].mxu1 %vm1149_vm2, %v7526_v13  ;;  %v14335_v13 = vpack.c.bf16 %v10463_v49, %v10462_v10  ;;  %v10487_v10 = vld [vmem:[%s20860_s2 + $0xf78] sm:$0xff]  ;;  %v10522_v49 = vld [vmem:[%s20861_s3 + $0xe80] sm:$0xff] }
0x1ae0   : > { %14310 = vmatpush1.bf16.msra.mxu1 %v14309_v2  ;;  %7788 = vmatprep.mubr.f32.mxu1 %v14801_v27  ;;  %v10447_v2 = vld [vmem:[%s20860_s2 + $0xe38] sm:$0xff] }
0x1ae1   : > { %14312 = vmatprep.subr.bf16.mxu1 %v14311_v34  ;;  %v14367_v34 = vpack.c.bf16 %v10495_v11, %v10494_v31  ;;  %v14337_v14 = vpack.c.bf16 %v10447_v2, %v10446_v1  ;;  %v10523_v31 = vld [vmem:[%s20861_s3 + $0xe88] sm:$0xff]  ;;  %v10554_v11 = vld [vmem:[%s20861_s3 + $0xf80] sm:$0xff]  ;;  %v14385_v1 = vpack.c.bf16 %v10487_v10, %v10486_v8  ;;  %v20423_v8 = vld [vmem:[%s15167_s25 + $0x18] sm:$0xff] }
0x1ae2   : > { %v10506_v2 = vld [vmem:[%s20861_s3 + $0xe00] sm:$0xff] }
0x1ae4   : > { %14314 = vmatpush1.bf16.msra.mxu1 %v14313_v21  ;;  %v10496_v21 = vld [vmem:[%s20860_s2 + $0xfc0] sm:$0xff] }
0x1ae5   : > { %14316 = vmatprep.subr.bf16.mxu1 %v14315_v17  ;;  %v10497_v17 = vld [vmem:[%s20860_s2 + $0xfc8] sm:$0xff] }
0x1ae6   : > { %v14371_v32 = vpack.c.bf16 %v10497_v17, %v10496_v21  ;;  %v10525_v21 = vld [vmem:[%s20861_s3 + $0xe98] sm:$0xff]  ;;  %v10556_v17 = vld [vmem:[%s20861_s3 + $0xf90] sm:$0xff] }
0x1ae8   : > { %14318 = vmatpush1.bf16.msra.mxu1 %v14317_v25  ;;  %v10448_v25 = vld [vmem:[%s20860_s2 + $0xe40] sm:$0xff] }
0x1ae9   : > { %14320 = vmatprep.subr.bf16.mxu1 %v14319_v29  ;;  %v10449_v29 = vld [vmem:[%s20860_s2 + $0xe48] sm:$0xff] }
0x1aec   : > { %14322 = vmatpush1.bf16.msra.mxu1 %v14321_v36  ;;  %v10480_v36 = vld [vmem:[%s20860_s2 + $0xf40] sm:$0xff] }
0x1aed   : > { %14356 = vmatprep.subr.bf16.mxu1 %v14355_v16  ;;  %v14341_v16 = vpack.c.bf16 %v10449_v29, %v10448_v25  ;;  %v14373_v4 = vpack.c.bf16 %v10481_v37, %v10480_v36  ;;  %v10509_v25 = vld [vmem:[%s20861_s3 + $0xe18] sm:$0xff]  ;;  %v14391_v29 = vpack.c.bf16 %v10525_v21, %v10524_v6  ;;  %v10526_v37 = vld [vmem:[%s20861_s3 + $0xea0] sm:$0xff]  ;;  %v10516_v21 = vld [vmem:[%s20861_s3 + $0xe50] sm:$0xff] }
0x1aee   : > { %v10541_v36 = vld [vmem:[%s20861_s3 + $0xf18] sm:$0xff] }
0x1bb2   : > { %v12670_v46 = vpop.f32.mrb[100].mxu1 }
0x1bb3   : > { %v7599_v53 = vpop.f32.mrb[101].mxu1 }
0x1bb4   : > { %10436 = vmatmul.mubr.msk.f32.vlgmr.msra.gmra.mrb[28].mxu0 %vm1059_vm0, %v7599_v53  ;;  %10438 = vmatmul.mubr.msk.f32.vlgmr.msra.gmra.mrb[28].mxu1 %vm1059_vm0, %v7599_v53 }
0x1bb5   : > { %14326 = vmatpush3.bf16.msra.mxu0 %v14325_v0  ;;  %14358 = vmatpush3.bf16.msra.mxu1 %v14357_v41  ;;  %v10469_v0 = vld [vmem:[%s20860_s2 + $0xee8] sm:$0xff]  ;;  %v10500_v41 = vld [vmem:[%s20860_s2 + $0xfe0] sm:$0xff] }
0x1bb6   : > { %7717 = vmatprep.mubr.f32.mxu0 %v14801_v27  ;;  %7794 = vmatprep.mubr.f32.mxu1 %v14801_v27  ;;  %v14347_v52 = vpack.c.bf16 %v10469_v0, %v10468_v30  ;;  %v14379_v53 = vpack.c.bf16 %v10501_v42, %v10500_v41  ;;  %v10543_v30 = vld [vmem:[%s20861_s3 + $0xf28] sm:$0xff]  ;;  %v10528_v0 = vld [vmem:[%s20861_s3 + $0xeb0] sm:$0xff]  ;;  %v10529_v41 = vld [vmem:[%s20861_s3 + $0xeb8] sm:$0xff] }
0x1bb7   : > { %14328 = vmatprep.subr.bf16.mxu0 %v14327_v54  ;;  %14360 = vmatprep.subr.bf16.mxu1 %v14359_v55  ;;  %v10484_v54 = vld [vmem:[%s20860_s2 + $0xf60] sm:$0xff]  ;;  %v10485_v55 = vld [vmem:[%s20860_s2 + $0xf68] sm:$0xff]  ;;  %v10560_v42 = vld [vmem:[%s20861_s3 + $0xfb0] sm:$0xff] }
0x1bb8   : > { %10437 = vmatmul.mubr.msk.f32.gmra.mrb[30].mxu0 %vm1059_vm0, %v12670_v46  ;;  %10439 = vmatmul.mubr.msk.f32.gmra.mrb[30].mxu1 %vm1059_vm0, %v12670_v46  ;;  %v14377_v46 = vpack.c.bf16 %v10483_v45, %v10482_v28  ;;  %v14381_v61 = vpack.c.bf16 %v10485_v55, %v10484_v54  ;;  %v14427_v28 = vpack.c.bf16 %v10559_v40, %v10558_v39  ;;  %v10542_v45 = vld [vmem:[%s20861_s3 + $0xf20] sm:$0xff]  ;;  %v10512_v55 = vld [vmem:[%s20861_s3 + $0xe30] sm:$0xff]  ;;  %v10519_v39 = vld [vmem:[%s20861_s3 + $0xe68] sm:$0xff] }
0x1bb9   : > { %14330 = vmatpush3.bf16.msra.mxu0 %v14329_v59  ;;  %14362 = vmatpush3.bf16.msra.mxu1 %v14361_v60  ;;  %v10503_v59 = vld [vmem:[%s20860_s2 + $0xff8] sm:$0xff]  ;;  %v14349_v60 = vpack.c.bf16 %v10453_v51, %v10452_v50  ;;  %v14783_v51 = vld [vmem:[%s15031_s29 + $0x20] sm:$0xff]  ;;  %v14429_v54 = vpack.c.bf16 %v10543_v30, %v10542_v45  ;;  %v10520_v30 = vld [vmem:[%s20861_s3 + $0xe70] sm:$0xff] }
0x1bba   : > { %14332 = vmatprep.subr.bf16.mxu0 %v14331_v22  ;;  %14364 = vmatprep.subr.bf16.mxu1 %v14363_v26  ;;  %v10455_v22 = vld [vmem:[%s20860_s2 + $0xe78] sm:$0xff]  ;;  %v14351_v26 = vpack.c.bf16 %v10471_v57, %v10470_v56  ;;  %v14383_v7 = vpack.c.bf16 %v10503_v59, %v10502_v58  ;;  %v14399_v57 = vpack.c.bf16 %v10529_v41, %v10528_v0  ;;  %v10544_v59 = vld [vmem:[%s20861_s3 + $0xf30] sm:$0xff] }
0x1bbb   : > { %7946 = vmatprep.mubr.f32.mxu0 %v14777_v23  ;;  %8021 = vmatprep.mubr.f32.mxu1 %v14778_v33  ;;  %v10557_v23 = vld [vmem:[%s20861_s3 + $0xf98] sm:$0xff] }
0x1bbc   : > { %v14782_v50 = vld [vmem:[%s15031_s29 + $0x38] sm:$0xff] }
0x1bbd   : > { %14334 = vmatpush3.bf16.msra.mxu0 %v14333_v63  ;;  %14366 = vmatpush3.bf16.msra.mxu1 %v14365_v12  ;;  %v10555_v63 = vld [vmem:[%s20861_s3 + $0xf88] sm:$0xff]  ;;  %v14353_v12 = vpack.c.bf16 %v10455_v22, %v10454_v62  ;;  %v10513_v56 = vld [vmem:[%s20861_s3 + $0xe38] sm:$0xff]  ;;  %v10562_v22 = vld [vmem:[%s20861_s3 + $0xfc0] sm:$0xff] }
0x1bbe   : > { %14336 = vmatprep.subr.bf16.mxu0 %v14335_v13  ;;  %14368 = vmatprep.subr.bf16.mxu1 %v14367_v34  ;;  %v10507_v13 = vld [vmem:[%s20861_s3 + $0xe08] sm:$0xff]  ;;  %v14387_v34 = vpack.c.bf16 %v10523_v31, %v10522_v49  ;;  %v14419_v3 = vpack.c.bf16 %v10555_v63, %v10554_v11  ;;  %v14401_v10 = vpack.c.bf16 %v10513_v56, %v10512_v55  ;;  %v10514_v31 = vld [vmem:[%s20861_s3 + $0xe40] sm:$0xff]  ;;  %v10521_v41 = vld [vmem:[%s20861_s3 + $0xe78] sm:$0xff] }
0x1bbf   : > { %v14389_v33 = vpack.c.bf16 %v10507_v13, %v10506_v2  ;;  %v10531_v62 = vld [vmem:[%s20861_s3 + $0xec8] sm:$0xff]  ;;  %v10532_v13 = vld [vmem:[%s20861_s3 + $0xed0] sm:$0xff]  ;;  %v10572_v55 = vld [vmem:[%s20862_s4 + $0xe00] sm:$0xff] }
0x1bc0   : > { %v10515_v11 = vld [vmem:[%s20861_s3 + $0xe48] sm:$0xff] }
0x1bc1   : > { %14338 = vmatpush3.bf16.msra.mxu0 %v14337_v14  ;;  %14370 = vmatpush3.bf16.msra.mxu1 %v14369_v19  ;;  %v14421_v14 = vpack.c.bf16 %v10539_v5, %v10538_v15  ;;  %v10508_v19 = vld [vmem:[%s20861_s3 + $0xe10] sm:$0xff]  ;;  %v10547_v2 = vld [vmem:[%s20861_s3 + $0xf48] sm:$0xff]  ;;  %v10565_v15 = vld [vmem:[%s20861_s3 + $0xfd8] sm:$0xff]  ;;  %v14405_v5 = vpack.c.bf16 %v10515_v11, %v10514_v31 }
0x1bc2   : > { %14340 = vmatprep.subr.bf16.mxu0 %v14339_v18  ;;  %14372 = vmatprep.subr.bf16.mxu1 %v14371_v32  ;;  %v14423_v18 = vpack.c.bf16 %v10557_v23, %v10556_v17  ;;  %v10540_v32 = vld [vmem:[%s20861_s3 + $0xf10] sm:$0xff]  ;;  %v10517_v17 = vld [vmem:[%s20861_s3 + $0xe58] sm:$0xff]  ;;  %v10573_v56 = vld [vmem:[%s20862_s4 + $0xe08] sm:$0xff] }
0x1bc3   : > { %v14425_v43 = vpack.c.bf16 %v10541_v36, %v10540_v32  ;;  %v10567_v32 = vld [vmem:[%s20861_s3 + $0xfe8] sm:$0xff]  ;;  %v14409_v36 = vpack.c.bf16 %v10517_v17, %v10516_v21  ;;  %v20547_v31 = vld [vmem:[%s15167_s25 + $0x38] sm:$0xff]  ;;  %v10596_v21 = vld [vmem:[%s20862_s4 + $0xec0] sm:$0xff] }
0x1bc5   : > { %14342 = vmatpush3.bf16.msra.mxu0 %v14341_v16  ;;  %14374 = vmatpush3.bf16.msra.mxu1 %v14373_v4  ;;  %v14780_v16 = vld [vmem:[%s15031_s29 + $0x10] sm:$0xff]  ;;  %v14393_v4 = vpack.c.bf16 %v10509_v25, %v10508_v19  ;;  %v10549_v19 = vld [vmem:[%s20861_s3 + $0xf58] sm:$0xff]  ;;  %v10534_v25 = vld [vmem:[%s20861_s3 + $0xee0] sm:$0xff] }
0x1bc6   : > { %14344 = vmatprep.subr.bf16.mxu0 %v14343_v20  ;;  %14376 = vmatprep.subr.bf16.mxu1 %v14375_v9  ;;  %v10511_v20 = vld [vmem:[%s20861_s3 + $0xe28] sm:$0xff]  ;;  %v14395_v9 = vpack.c.bf16 %v10527_v48, %v10526_v37  ;;  %v10518_v48 = vld [vmem:[%s20861_s3 + $0xe60] sm:$0xff] }
0x1bc9   : > { %14346 = vmatpush3.bf16.msra.mxu0 %v14345_v44  ;;  %14378 = vmatpush3.bf16.msra.mxu1 %v14377_v46  ;;  %v10561_v44 = vld [vmem:[%s20861_s3 + $0xfb8] sm:$0xff]  ;;  %v14781_v46 = vld [vmem:[%s15031_s29 + $0x28] sm:$0xff] }
0x1bca   : > { %14348 = vmatprep.subr.bf16.mxu0 %v14347_v52  ;;  %14380 = vmatprep.subr.bf16.mxu1 %v14379_v53  ;;  %v14784_v52 = vld [vmem:[%s15031_s29 + $0x30] sm:$0xff]  ;;  %v14397_v53 = vpack.c.bf16 %v10511_v20, %v10510_v38  ;;  %v14431_v58 = vpack.c.bf16 %v10561_v44, %v10560_v42  ;;  %v10537_v38 = vld [vmem:[%s20861_s3 + $0xef8] sm:$0xff] }
0x1bcb   : > { %v10568_v20 = vld [vmem:[%s20861_s3 + $0xff0] sm:$0xff] }
0x1bcc   : > { %v10552_v44 = vld [vmem:[%s20861_s3 + $0xf70] sm:$0xff] }
0x1bcd   : > { %14350 = vmatpush3.bf16.msra.mxu0 %v14349_v60  ;;  %14382 = vmatpush3.bf16.msra.mxu1 %v14381_v61  ;;  %v10545_v60 = vld [vmem:[%s20861_s3 + $0xf38] sm:$0xff]  ;;  %v10530_v61 = vld [vmem:[%s20861_s3 + $0xec0] sm:$0xff] }
0x1bce   : > { %14352 = vmatprep.subr.bf16.mxu0 %v14351_v26  ;;  %14384 = vmatprep.subr.bf16.mxu1 %v14383_v7  ;;  %v10563_v26 = vld [vmem:[%s20861_s3 + $0xfc8] sm:$0xff]  ;;  %v14433_v49 = vpack.c.bf16 %v10545_v60, %v10544_v59  ;;  %v14403_v63 = vpack.c.bf16 %v10531_v62, %v10530_v61  ;;  %v14453_v59 = vpack.c.bf16 %v10573_v56, %v10572_v55  ;;  %v10574_v61 = vld [vmem:[%s20862_s4 + $0xe10] sm:$0xff]  ;;  %v10575_v62 = vld [vmem:[%s20862_s4 + $0xe18] sm:$0xff] }
0x1bcf   : > { %v20419_v7 = vld [vmem:[%s15167_s25 + $0x8] sm:$0xff]  ;;  %v14457_v11 = vpack.c.bf16 %v10575_v62, %v10574_v61  ;;  %v10627_v61 = vld [vmem:[%s20862_s4 + $0xfb8] sm:$0xff] }
0x1bd0   : > { %v10625_v55 = vld [vmem:[%s20862_s4 + $0xfa8] sm:$0xff] }
0x1bd1   : > { %14354 = vmatpush3.bf16.msra.mxu0 %v14353_v12  ;;  %14386 = vmatpush3.bf16.msra.mxu1 %v14385_v1  ;;  %v14435_v12 = vpack.c.bf16 %v10563_v26, %v10562_v22  ;;  %v10546_v1 = vld [vmem:[%s20861_s3 + $0xf40] sm:$0xff] }
0x1bd2   : > { %14388 = vmatprep.subr.bf16.mxu0 %v14387_v34  ;;  %14420 = vmatprep.subr.bf16.mxu1 %v14419_v3  ;;  %v10533_v34 = vld [vmem:[%s20861_s3 + $0xed8] sm:$0xff]  ;;  %v10564_v3 = vld [vmem:[%s20861_s3 + $0xfd0] sm:$0xff]  ;;  %v14437_v6 = vpack.c.bf16 %v10547_v2, %v10546_v1  ;;  %v20535_v22 = vld [vmem:[%s15167_s25] sm:$0xff] }
0x1bd3   : > { %v14407_v23 = vpack.c.bf16 %v10533_v34, %v10532_v13  ;;  %v10592_v26 = vld [vmem:[%s20862_s4 + $0xea0] sm:$0xff]  ;;  %v20558_v2 = vld [vmem:[%s15167_s25 + $0x30] sm:$0xff]  ;;  %v10595_v34 = vld [vmem:[%s20862_s4 + $0xeb8] sm:$0xff] }
0x1bd4   : > { %7947 = vmatmul.mubr.f32.vlgmr.msra.gmra.mrb[102].mxu0 %v14779_v24  ;;  %8022 = vmatmul.mubr.f32.vlgmr.msra.gmra.mrb[102].mxu1 %v14780_v16  ;;  %v10550_v16 = vld [vmem:[%s20861_s3 + $0xf60] sm:$0xff]  ;;  %v10594_v13 = vld [vmem:[%s20862_s4 + $0xeb0] sm:$0xff] }
0x1bd5   : > { %14390 = vmatpush3.bf16.msra.mxu0 %v14389_v33  ;;  %14422 = vmatpush3.bf16.msra.mxu1 %v14421_v14  ;;  %v14439_v33 = vpack.c.bf16 %v10565_v15, %v10564_v3  ;;  %v10548_v14 = vld [vmem:[%s20861_s3 + $0xf50] sm:$0xff]  ;;  %v14790_v1 = vld [vmem:[%s15167_s25 + $0x20] sm:$0xff]  ;;  %v14463_v15 = vpack.c.bf16 %v10595_v34, %v10594_v13  ;;  %v10631_v34 = vld [vmem:[%s20862_s4 + $0xfd8] sm:$0xff] }
0x1bd6   : > { %14392 = vmatprep.subr.bf16.mxu0 %v14391_v29  ;;  %14424 = vmatprep.subr.bf16.mxu1 %v14423_v18  ;;  %v10535_v29 = vld [vmem:[%s20861_s3 + $0xee8] sm:$0xff]  ;;  %v10566_v18 = vld [vmem:[%s20861_s3 + $0xfe0] sm:$0xff]  ;;  %v14441_v37 = vpack.c.bf16 %v10549_v19, %v10548_v14  ;;  %v10598_v14 = vld [vmem:[%s20862_s4 + $0xed0] sm:$0xff] }
0x1bd7   : > { %7951 = vmatprep.mubr.f32.mxu0 %v14781_v46  ;;  %8026 = vmatprep.mubr.f32.mxu1 %v14782_v50  ;;  %v14411_v40 = vpack.c.bf16 %v10535_v29, %v10534_v25  ;;  %v14443_v24 = vpack.c.bf16 %v10567_v32, %v10566_v18  ;;  %v10553_v46 = vld [vmem:[%s20861_s3 + $0xf78] sm:$0xff]  ;;  %v10588_v50 = vld [vmem:[%s20862_s4 + $0xe80] sm:$0xff]  ;;  %v10582_v18 = vld [vmem:[%s20862_s4 + $0xe50] sm:$0xff] }
0x1bd8   : > { %7952 = vmatmul.mubr.f32.gmra.mrb[104].mxu0 %v14783_v51  ;;  %8027 = vmatmul.mubr.f32.gmra.mrb[104].mxu1 %v14784_v52  ;;  %v10589_v51 = vld [vmem:[%s20862_s4 + $0xe88] sm:$0xff]  ;;  %v14417_v52 = vpack.c.bf16 %v10521_v41, %v10520_v30  ;;  %v10599_v19 = vld [vmem:[%s20862_s4 + $0xed8] sm:$0xff]  ;;  %v10604_v41 = vld [vmem:[%s20862_s4 + $0xf00] sm:$0xff] }
0x1bd9   : > { %14394 = vmatpush3.bf16.msra.mxu0 %v14393_v4  ;;  %14426 = vmatpush3.bf16.msra.mxu1 %v14425_v43  ;;  %v10551_v4 = vld [vmem:[%s20861_s3 + $0xf68] sm:$0xff]  ;;  %v10536_v43 = vld [vmem:[%s20861_s3 + $0xef0] sm:$0xff]  ;;  %v14471_v29 = vpack.c.bf16 %v10599_v19, %v10598_v14  ;;  %v10583_v32 = vld [vmem:[%s20862_s4 + $0xe58] sm:$0xff] }
0x1bda   : > { %14396 = vmatprep.subr.bf16.mxu0 %v14395_v9  ;;  %14428 = vmatprep.subr.bf16.mxu1 %v14427_v28  ;;  %v10569_v9 = vld [vmem:[%s20861_s3 + $0xff8] sm:$0xff]  ;;  %v14413_v28 = vpack.c.bf16 %v10519_v39, %v10518_v48  ;;  %v14445_v45 = vpack.c.bf16 %v10551_v4, %v10550_v16  ;;  %v14415_v0 = vpack.c.bf16 %v10537_v38, %v10536_v43  ;;  %v10602_v16 = vld [vmem:[%s20862_s4 + $0xef0] sm:$0xff]  ;;  %v10621_v30 = vld [vmem:[%s20862_s4 + $0xf88] sm:$0xff] }
0x1bdb   : > { %8169 = vmatprep.mubr.f32.mxu0 %v20419_v7  ;;  %8244 = vmatprep.mubr.f32.mxu1 %v20423_v8  ;;  %v14447_v42 = vpack.c.bf16 %v10569_v9, %v10568_v20  ;;  %v14473_v48 = vpack.c.bf16 %v10583_v32, %v10582_v18  ;;  %v10603_v4 = vld [vmem:[%s20862_s4 + $0xef8] sm:$0xff]  ;;  %v10586_v20 = vld [vmem:[%s20862_s4 + $0xe70] sm:$0xff] }
0x1bdc   : > { %v14479_v38 = vpack.c.bf16 %v10603_v4, %v10602_v16  ;;  %v10587_v9 = vld [vmem:[%s20862_s4 + $0xe78] sm:$0xff]  ;;  %v10630_v13 = vld [vmem:[%s20862_s4 + $0xfd0] sm:$0xff] }
0x1bdd   : > { %14398 = vmatpush3.bf16.msra.mxu0 %v14397_v53  ;;  %14430 = vmatpush3.bf16.msra.mxu1 %v14429_v54  ;;  %v14449_v53 = vpack.c.bf16 %v10553_v46, %v10552_v44  ;;  %v14451_v54 = vpack.c.bf16 %v10589_v51, %v10588_v50  ;;  %v10622_v44 = vld [vmem:[%s20862_s4 + $0xf90] sm:$0xff]  ;;  %v10623_v50 = vld [vmem:[%s20862_s4 + $0xf98] sm:$0xff] }
0x1bde   : > { %14400 = vmatprep.subr.bf16.mxu0 %v14399_v57  ;;  %14432 = vmatprep.subr.bf16.mxu1 %v14431_v58  ;;  %v10590_v57 = vld [vmem:[%s20862_s4 + $0xe90] sm:$0xff]  ;;  %v10591_v58 = vld [vmem:[%s20862_s4 + $0xe98] sm:$0xff] }
0x1bdf   : > { %v14455_v60 = vpack.c.bf16 %v10591_v58, %v10590_v57  ;;  %v10606_v51 = vld [vmem:[%s20862_s4 + $0xf10] sm:$0xff]  ;;  %v10608_v58 = vld [vmem:[%s20862_s4 + $0xf20] sm:$0xff]  ;;  %v10619_v32 = vld [vmem:[%s20862_s4 + $0xf78] sm:$0xff] }
0x1be0   : > { %v10634_v19 = vld [vmem:[%s20862_s4 + $0xff0] sm:$0xff] }
0x1be1   : > { %14402 = vmatpush3.bf16.msra.mxu0 %v14401_v10  ;;  %14434 = vmatpush3.bf16.msra.mxu1 %v14433_v49  ;;  %v10593_v10 = vld [vmem:[%s20862_s4 + $0xea8] sm:$0xff]  ;;  %v10618_v18 = vld [vmem:[%s20862_s4 + $0xf70] sm:$0xff] }
0x1be2   : > { %14404 = vmatprep.subr.bf16.mxu0 %v14403_v63  ;;  %14436 = vmatprep.subr.bf16.mxu1 %v14435_v12  ;;  %v14788_v49 = vld [vmem:[%s15167_s25 + $0x28] sm:$0xff]  ;;  %v14459_v63 = vpack.c.bf16 %v10593_v10, %v10592_v26  ;;  %v10610_v26 = vld [vmem:[%s20862_s4 + $0xf30] sm:$0xff]  ;;  %v10611_v10 = vld [vmem:[%s20862_s4 + $0xf38] sm:$0xff] }
0x1be3   : > { %v10577_v12 = vld [vmem:[%s20862_s4 + $0xe28] sm:$0xff] }
0x1be5   : > { %14406 = vmatpush3.bf16.msra.mxu0 %v14405_v5  ;;  %14438 = vmatpush3.bf16.msra.mxu1 %v14437_v6  ;;  %v10578_v5 = vld [vmem:[%s20862_s4 + $0xe30] sm:$0xff]  ;;  %v10579_v6 = vld [vmem:[%s20862_s4 + $0xe38] sm:$0xff] }
0x1be6   : > { %14408 = vmatprep.subr.bf16.mxu0 %v14407_v23  ;;  %14440 = vmatprep.subr.bf16.mxu1 %v14439_v33  ;;  %v10580_v23 = vld [vmem:[%s20862_s4 + $0xe40] sm:$0xff]  ;;  %v10581_v33 = vld [vmem:[%s20862_s4 + $0xe48] sm:$0xff] }
0x1be7   : > { %v14469_v25 = vpack.c.bf16 %v10581_v33, %v10580_v23  ;;  %v10616_v23 = vld [vmem:[%s20862_s4 + $0xf60] sm:$0xff]  ;;  %v10617_v33 = vld [vmem:[%s20862_s4 + $0xf68] sm:$0xff] }
0x1be8   : > { %v14509_v14 = vpack.c.bf16 %v10617_v33, %v10616_v23 }
0x1be9   : > { %14410 = vmatpush3.bf16.msra.mxu0 %v14409_v36  ;;  %14442 = vmatpush3.bf16.msra.mxu1 %v14441_v37  ;;  %v10600_v36 = vld [vmem:[%s20862_s4 + $0xee0] sm:$0xff]  ;;  %v10601_v37 = vld [vmem:[%s20862_s4 + $0xee8] sm:$0xff] }
0x1bea   : > { %14412 = vmatprep.subr.bf16.mxu0 %v14411_v40  ;;  %14444 = vmatprep.subr.bf16.mxu1 %v14443_v24  ;;  %v14475_v39 = vpack.c.bf16 %v10601_v37, %v10600_v36  ;;  %v10584_v40 = vld [vmem:[%s20862_s4 + $0xe60] sm:$0xff]  ;;  %v10585_v24 = vld [vmem:[%s20862_s4 + $0xe68] sm:$0xff]  ;;  %v14513_v36 = vpack.c.bf16 %v10619_v32, %v10618_v18  ;;  %v14792_v37 = vld [vmem:[%s15167_s25 + $0x10] sm:$0xff]  ;;  %s379_s25 = scalar_lea.vmem %s20868_s10, %s15007_s15 }
0x1beb   : > { %v14477_v43 = vpack.c.bf16 %v10585_v24, %v10584_v40  ;;  %v10505_v40 = vld [vmem:[%s20864_s6 + $0x7] ss:$0 sm:$0xff] }
0x1bed   : > { %14414 = vmatpush3.bf16.msra.mxu0 %v14413_v28  ;;  %14446 = vmatpush3.bf16.msra.mxu1 %v14445_v45  ;;  %v14481_v28 = vpack.c.bf16 %v10587_v9, %v10586_v20  ;;  %v10620_v45 = vld [vmem:[%s20862_s4 + $0xf80] sm:$0xff] }
0x1bee   : > { %14416 = vmatprep.subr.bf16.mxu0 %v14415_v0  ;;  %14448 = vmatprep.subr.bf16.mxu1 %v14447_v42  ;;  %v14483_v0 = vpack.c.bf16 %v10621_v30, %v10620_v45  ;;  %v10605_v42 = vld [vmem:[%s20862_s4 + $0xf08] sm:$0xff] }
0x1bef   : > { %v14485_v46 = vpack.c.bf16 %v10605_v42, %v10604_v41 }
0x1bf1   : > { %14418 = vmatpush3.bf16.msra.mxu0 %v14417_v52  ;;  %14450 = vmatpush3.bf16.msra.mxu1 %v14449_v53  ;;  %v10607_v52 = vld [vmem:[%s20862_s4 + $0xf18] sm:$0xff]  ;;  %v14487_v53 = vpack.c.bf16 %v10623_v50, %v10622_v44 }
0x1bf2   : > { %14452 = vmatprep.subr.bf16.mxu0 %v14451_v54  ;;  %14484 = vmatprep.subr.bf16.mxu1 %v14483_v0  ;;  %v10624_v54 = vld [vmem:[%s20862_s4 + $0xfa0] sm:$0xff]  ;;  %v14489_v56 = vpack.c.bf16 %v10607_v52, %v10606_v51 }
0x1bf3   : > { %v14491_v57 = vpack.c.bf16 %v10625_v55, %v10624_v54 }
0x1bf4   : > { %8170 = vmatmul.mubr.f32.vlgmr.msra.gmra.mrb[106].mxu0 %v20535_v22  ;;  %8245 = vmatmul.mubr.f32.vlgmr.msra.gmra.mrb[106].mxu1 %v19980_v35  ;;  %v10576_v35 = vld [vmem:[%s20862_s4 + $0xe20] sm:$0xff] }
0x1bf5   : > { %8174 = vmatprep.mubr.f32.mxu0 %v14788_v49  ;;  %8249 = vmatprep.mubr.f32.mxu1 %v20547_v31  ;;  %v14461_v3 = vpack.c.bf16 %v10577_v12, %v10576_v35  ;;  %v10612_v12 = vld [vmem:[%s20862_s4 + $0xf40] sm:$0xff] }
0x1bf6   : > { %14454 = vmatpush3.bf16.msra.mxu0 %v14453_v59  ;;  %14486 = vmatpush3.bf16.msra.mxu1 %v14485_v46  ;;  %v10609_v59 = vld [vmem:[%s20862_s4 + $0xf28] sm:$0xff]  ;;  %v10571_v46 = vld [vmem:[%s20865_s7 + $0x7] ss:$0 sm:$0xff] }
0x1bf7   : > { %14456 = vmatprep.subr.bf16.mxu0 %v14455_v60  ;;  %14488 = vmatprep.subr.bf16.mxu1 %v14487_v53  ;;  %v10626_v60 = vld [vmem:[%s20862_s4 + $0xfb0] sm:$0xff]  ;;  %v14493_v62 = vpack.c.bf16 %v10609_v59, %v10608_v58 }
0x1bf8   : > { %8175 = vmatmul.mubr.f32.gmra.mrb[108].mxu0 %v14790_v1  ;;  %8250 = vmatmul.mubr.f32.gmra.mrb[108].mxu1 %v20558_v2 }
0x1bf9   : > { %8392 = vmatprep.mubr.f32.mxu0 %v20419_v7  ;;  %8467 = vmatprep.mubr.f32.mxu1 %v20423_v8  ;;  %v10597_v7 = vld [vmem:[%s20862_s4 + $0xec8] sm:$0xff]  ;;  %v14465_v8 = vpack.c.bf16 %v10579_v6, %v10578_v5  ;;  %v10614_v5 = vld [vmem:[%s20862_s4 + $0xf50] sm:$0xff]  ;;  %v10615_v6 = vld [vmem:[%s20862_s4 + $0xf58] sm:$0xff] }
0x1bfa   : > { %14458 = vmatpush3.bf16.msra.mxu0 %v14457_v11  ;;  %v14467_v17 = vpack.c.bf16 %v10597_v7, %v10596_v21  ;;  %14490 = vmatpush3.bf16.msra.mxu1 %v14489_v56  ;;  %v10629_v11 = vld [vmem:[%s20862_s4 + $0xfc8] sm:$0xff]  ;;  %v14505_v21 = vpack.c.bf16 %v10615_v6, %v10614_v5  ;;  %v10632_v7 = vld [vmem:[%s20862_s4 + $0xfe0] sm:$0xff] }
0x1bfb   : > { %14460 = vmatprep.subr.bf16.mxu0 %v14459_v63  ;;  %14492 = vmatprep.subr.bf16.mxu1 %v14491_v57  ;;  %v14497_v63 = vpack.c.bf16 %v10611_v10, %v10610_v26 }
0x1bfe   : > { %14462 = vmatpush3.bf16.msra.mxu0 %v14461_v3  ;;  %14494 = vmatpush3.bf16.msra.mxu1 %v14493_v62 }
0x1bff   : > { %14464 = vmatprep.subr.bf16.mxu0 %v14463_v15  ;;  %v14503_v15 = vpack.c.bf16 %v10631_v34, %v10630_v13 }
0x1c02   : > { %14466 = vmatpush3.bf16.msra.mxu0 %v14465_v8  ;;  %v10633_v8 = vld [vmem:[%s20862_s4 + $0xfe8] sm:$0xff] }
0x1c03   : > { %14468 = vmatprep.subr.bf16.mxu0 %v14467_v17  ;;  %v14507_v17 = vpack.c.bf16 %v10633_v8, %v10632_v7 }
0x1c06   : > { %14470 = vmatpush3.bf16.msra.mxu0 %v14469_v25  ;;  %v10635_v25 = vld [vmem:[%s20862_s4 + $0xff8] sm:$0xff] }
0x1c07   : > { %14472 = vmatprep.subr.bf16.mxu0 %v14471_v29  ;;  %v14511_v29 = vpack.c.bf16 %v10635_v25, %v10634_v19 }
0x1c0a   : > { %14474 = vmatpush3.bf16.msra.mxu0 %v14473_v48 }
0x1c0b   : > { %14476 = vmatprep.subr.bf16.mxu0 %v14475_v39 }
0x1c0e   : > { %14478 = vmatpush3.bf16.msra.mxu0 %v14477_v43 }
0x1c0f   : > { %14480 = vmatprep.subr.bf16.mxu0 %v14479_v38 }
0x1c12   : > { %14482 = vmatpush3.bf16.msra.mxu0 %v14481_v28 }
0x1c15   : > { %8393 = vmatmul.mubr.f32.vlgmr.msra.gmra.mrb[110].mxu0 %v20535_v22  ;;  %v14495_v22 = vpack.c.bf16 %v10627_v61, %v10626_v60 }
0x1c16   : > { %8397 = vmatprep.mubr.f32.mxu0 %v14788_v49  ;;  %v10628_v49 = vld [vmem:[%s20862_s4 + $0xfc0] sm:$0xff] }
0x1c17   : > { %14496 = vmatprep.subr.bf16.mxu1 %v14495_v22  ;;  %v14499_v35 = vpack.c.bf16 %v10629_v11, %v10628_v49 }
0x1c18   : > { %14498 = vmatpush3.bf16.msra.mxu1 %v14497_v63 }
0x1c19   : > { %8398 = vmatmul.mubr.f32.gmra.mrb[112].mxu0 %v14790_v1  ;;  %v10613_v1 = vld [vmem:[%s20862_s4 + $0xf48] sm:$0xff]  ;;  %14500 = vmatprep.subr.bf16.mxu1 %v14499_v35 }
0x1c1a   : > { %v14501_v3 = vpack.c.bf16 %v10613_v1, %v10612_v12  ;;  %v10637_v1 = vld [vmem:[%s20866_s8 + $0x7] ss:$0 sm:$0xff] }
0x1c1c   : > { %14502 = vmatpush3.bf16.msra.mxu1 %v14501_v3 }
0x1c1d   : > { %14504 = vmatprep.subr.bf16.mxu1 %v14503_v15 }
0x1c20   : > { %14506 = vmatpush3.bf16.msra.mxu1 %v14505_v21 }
0x1c21   : > { %14508 = vmatprep.subr.bf16.mxu1 %v14507_v17 }
0x1c24   : > { %14510 = vmatpush3.bf16.msra.mxu1 %v14509_v14 }
0x1c25   : > { %14512 = vmatprep.subr.bf16.mxu1 %v14511_v29 }
0x1c28   : > { %14514 = vmatpush3.bf16.msra.mxu1 %v14513_v36 }
0x1c2b   : > { %8468 = vmatmul.mubr.f32.vlgmr.msra.gmra.mrb[110].mxu1 %v14792_v37 }
0x1c2c   : > { %8472 = vmatprep.mubr.f32.mxu1 %v20547_v31 }
0x1c2f   : > { %8473 = vmatmul.mubr.f32.gmra.mrb[112].mxu1 %v20558_v2 }
0x1ca7   : > { %v12369_v48 = vpop.f32.mrb[102].mxu0  ;;  %v12407_v39 = vpop.f32.mrb[102].mxu1 }
0x1ca8   : > { %v12370_v24 = vpop.f32.mrb[103].mxu0  ;;  %v12408_v16 = vpop.f32.mrb[103].mxu1 }
0x1ca9   : > { %v12371_v4 = vadd.f32 %v12370_v24, %v12369_v48  ;;  %v12409_v43 = vadd.f32 %v12408_v16, %v12407_v39 }
0x1cab   : > { %v7949_v38 = vadd.f32 %v12371_v4, %v10505_v40  ;;  %v12372_v20 = vpop.f32.mrb[104].mxu0  ;;  %v12410_v9 = vpop.f32.mrb[104].mxu1 }
0x1cac   : > { %v12373_v28 = vpop.f32.mrb[105].mxu0  ;;  %v12411_v45 = vpop.f32.mrb[105].mxu1 }
0x1cad   : > { %v8024_v30 = vadd.f32 %v12409_v43, %v7949_v38  ;;  %v12374_v0 = vadd.f32 %v12373_v28, %v12372_v20  ;;  %v12412_v31 = vadd.f32 %v12411_v45, %v12410_v9  ;;  %v10645_v43 = vld [vmem:[%s20863_s5 + $0x708] sm:$0xff]  ;;  %v10647_v20 = vld [vmem:[%s20863_s5 + $0x718] sm:$0xff]  ;;  %v10644_v45 = vld [vmem:[%s20863_s5 + $0x700] sm:$0xff] }
0x1cae   : > { %v10649_v38 = vld [vmem:[%s20863_s5 + $0x728] sm:$0xff]  ;;  %v10651_v28 = vld [vmem:[%s20863_s5 + $0x738] sm:$0xff] }
0x1caf   : > { %12675 = vmatprep.mubr.msk.f32.mxu0 %vm1059_vm0, %v8024_v30  ;;  %v7954_v2 = vadd.f32 %v12374_v0, %v10505_v40  ;;  %v14525_v9 = vpack.c.bf16 %v10649_v38, %v10645_v43  ;;  %v10648_v30 = vld [vmem:[%s20863_s5 + $0x720] sm:$0xff]  ;;  %v14541_v0 = vpack.c.bf16 %v10651_v28, %v10647_v20 }
0x1cb1   : > { %v8029_v41 = vadd.f32 %v12412_v31, %v7954_v2  ;;  %v14527_v31 = vpack.c.bf16 %v10648_v30, %v10644_v45  ;;  %v10653_v2 = vld [vmem:[%s20863_s5 + $0x748] sm:$0xff] }
0x1cc7   : > { %v12445_v42 = vpop.f32.mrb[106].mxu0  ;;  %v12483_v44 = vpop.f32.mrb[106].mxu1 }
0x1cc8   : > { %v12446_v50 = vpop.f32.mrb[107].mxu0  ;;  %v12484_v51 = vpop.f32.mrb[107].mxu1 }
0x1cc9   : > { %v12447_v52 = vadd.f32 %v12446_v50, %v12445_v42  ;;  %v12485_v53 = vadd.f32 %v12484_v51, %v12483_v44  ;;  %v10652_v44 = vld [vmem:[%s20863_s5 + $0x740] sm:$0xff]  ;;  %v10661_v51 = vld [vmem:[%s20863_s5 + $0x788] sm:$0xff] }
0x1ccb   : > { %v8172_v54 = vadd.f32 %v12447_v52, %v10571_v46  ;;  %v12448_v55 = vpop.f32.mrb[108].mxu0  ;;  %v12486_v56 = vpop.f32.mrb[108].mxu1  ;;  %v10665_v52 = vld [vmem:[%s20863_s5 + $0x7a8] sm:$0xff] }
0x1ccc   : > { %v12449_v57 = vpop.f32.mrb[109].mxu0  ;;  %v12487_v58 = vpop.f32.mrb[109].mxu1 }
0x1ccd   : > { %v8247_v59 = vadd.f32 %v12485_v53, %v8172_v54  ;;  %v12450_v60 = vadd.f32 %v12449_v57, %v12448_v55  ;;  %v12488_v61 = vadd.f32 %v12487_v58, %v12486_v56  ;;  %v14533_v53 = vpack.c.bf16 %v10665_v52, %v10661_v51  ;;  %v10660_v54 = vld [vmem:[%s20863_s5 + $0x780] sm:$0xff]  ;;  %v10669_v57 = vld [vmem:[%s20863_s5 + $0x7c8] sm:$0xff] }
0x1cce   : > { %v10664_v55 = vld [vmem:[%s20863_s5 + $0x7a0] sm:$0xff]  ;;  %v10673_v58 = vld [vmem:[%s20863_s5 + $0x7e8] sm:$0xff] }
0x1ccf   : > { %v8177_v62 = vadd.f32 %v12450_v60, %v10571_v46  ;;  %v10656_v46 = vld [vmem:[%s20863_s5 + $0x760] sm:$0xff]  ;;  %v14535_v56 = vpack.c.bf16 %v10664_v55, %v10660_v54 }
0x1cd0   : > { %v14531_v50 = vpack.c.bf16 %v10656_v46, %v10652_v44  ;;  %v10668_v60 = vld [vmem:[%s20863_s5 + $0x7c0] sm:$0xff] }
0x1cd1   : > { %v8252_v22 = vadd.f32 %v12488_v61, %v8177_v62  ;;  %v10672_v61 = vld [vmem:[%s20863_s5 + $0x7e0] sm:$0xff] }
0x1cd2   : > { %v14539_v62 = vpack.c.bf16 %v10672_v61, %v10668_v60 }
0x1cd3   : > { %v14515_v26 = vpack.c.bf16 %v8252_v22, %v8247_v59  ;;  %v14537_v59 = vpack.c.bf16 %v10673_v58, %v10669_v57 }
0x1cd5   : > { %14517 = vmatprep.subr.msk.bf16.mxu0 %vm15534_vm1, %v14515_v26 }
0x1cd6   : > { %14520 = vmatpush3.bf16.xpose.msk.msra.mxu0 %vm15534_vm1, %v14515_v26 }
0x1cd7   : > { %14526 = vmatprep.subr.bf16.mxu0 %v14525_v9 }
0x1cdd   : > { %12676 = vmatmul.mubr.msk.f32.vlgmr.msra.gmra.mrb[114].mxu0 %vm1059_vm0, %v8029_v41  ;;  %v10657_v41 = vld [vmem:[%s20863_s5 + $0x768] sm:$0xff] }
0x1cde   : > { %8773 = vmatprep.mubr.f32.mxu0 %v14801_v27  ;;  %14528 = vmatpush1.bf16.msra.mxu0 %v14527_v31  ;;  %v14529_v42 = vpack.c.bf16 %v10657_v41, %v10653_v2 }
0x1ce0   : > { %14530 = vmatprep.subr.bf16.mxu0 %v14529_v42 }
0x1ce2   : > { %14532 = vmatpush1.bf16.msra.mxu0 %v14531_v50 }
0x1ce3   : > { %14534 = vmatprep.subr.bf16.mxu0 %v14533_v53 }
0x1ce6   : > { %14536 = vmatpush1.bf16.msra.mxu0 %v14535_v56 }
0x1ce7   : > { %14538 = vmatprep.subr.bf16.mxu0 %v14537_v59 }
0x1ce8   : > { %v12521_v10 = vpop.f32.mrb[110].mxu0 }
0x1ce9   : > { %v12522_v49 = vpop.f32.mrb[111].mxu0 }
0x1cea   : > { %v12523_v11 = vadd.f32 %v12522_v49, %v12521_v10  ;;  %14540 = vmatpush1.bf16.msra.mxu0 %v14539_v62  ;;  %v10646_v10 = vld [vmem:[%s20863_s5 + $0x710] sm:$0xff] }
0x1ceb   : > { %v10650_v49 = vld [vmem:[%s20863_s5 + $0x730] sm:$0xff] }
0x1cec   : > { %v12524_v63 = vpop.f32.mrb[112].mxu0  ;;  %v8395_v13 = vadd.f32 %v12523_v11, %v10637_v1 }
0x1ced   : > { %v12525_v35 = vpop.f32.mrb[113].mxu0 }
0x1cee   : > { %v12526_v12 = vadd.f32 %v12525_v35, %v12524_v63  ;;  %v10655_v63 = vld [vmem:[%s20863_s5 + $0x758] sm:$0xff] }
0x1cef   : > { %v10659_v35 = vld [vmem:[%s20863_s5 + $0x778] sm:$0xff] }
0x1cf0   : > { %v8400_v47 = vadd.f32 %v12526_v12, %v10637_v1 }
0x1cfe   : > { %v12559_v34 = vpop.f32.mrb[110].mxu1 }
0x1cff   : > { %v12560_v3 = vpop.f32.mrb[111].mxu1 }
0x1d00   : > { %v12561_v15 = vadd.f32 %v12560_v3, %v12559_v34  ;;  %v14545_v3 = vpack.c.bf16 %v10659_v35, %v10655_v63 }
0x1d02   : > { %v8470_v5 = vadd.f32 %v12561_v15, %v8395_v13  ;;  %v12562_v6 = vpop.f32.mrb[112].mxu1  ;;  %v14543_v13 = vpack.c.bf16 %v10650_v49, %v10646_v10  ;;  %v10654_v15 = vld [vmem:[%s20863_s5 + $0x750] sm:$0xff] }
0x1d03   : > { %v12563_v21 = vpop.f32.mrb[113].mxu1 }
0x1d04   : > { %v12564_v7 = vadd.f32 %v12563_v21, %v12562_v6  ;;  %v10667_v6 = vld [vmem:[%s20863_s5 + $0x7b8] sm:$0xff] }
0x1d06   : > { %v8475_v8 = vadd.f32 %v12564_v7, %v8400_v47  ;;  %v10658_v47 = vld [vmem:[%s20863_s5 + $0x770] sm:$0xff] }
0x1d07   : > { %v14547_v21 = vpack.c.bf16 %v10658_v47, %v10654_v15 }
0x1d08   : > { %v14521_v17 = vpack.c.bf16 %v8475_v8, %v8470_v5  ;;  %v10663_v5 = vld [vmem:[%s20863_s5 + $0x798] sm:$0xff]  ;;  %v10662_v8 = vld [vmem:[%s20863_s5 + $0x790] sm:$0xff] }
0x1d09   : > { %v14549_v7 = vpack.c.bf16 %v10667_v6, %v10663_v5 }
0x1d0a   : > { %14522 = vmatprep.subr.bf16.mxu1 %v14521_v17 }
0x1d0b   : > { %14524 = vmatpush3.bf16.msra.mxu1 %v14521_v17  ;;  %v10666_v17 = vld [vmem:[%s20863_s5 + $0x7b0] sm:$0xff] }
0x1d0c   : > { %14542 = vmatprep.subr.bf16.mxu1 %v14541_v0 }
0x1db0   : > { %v12677_v23 = vpop.f32.mrb[114].mxu0 }
0x1db1   : > { %v8566_v33 = vmul.f32 0.125, %v12677_v23  ;;  %v8556_v14 = vpop.f32.mrb[115].mxu0  ;;  %v10671_v23 = vld [vmem:[%s20863_s5 + $0x7d8] sm:$0xff] }
0x1db2   : > { %v8565_v19 = vmul.f32 0.125, %v8556_v14  ;;  %v14551_v14 = vpack.c.bf16 %v10666_v17, %v10662_v8 }
0x1db3   : > { %v8570_v25 = vsel %vm1149_vm2, %v8566_v33, -inf }
0x1db4   : > { %8571 = vmax.xlane.f32.xlu1 %v8570_v25  ;;  %v8567_v29 = vsel %vm1149_vm2, %v8565_v19, -inf  ;;  %v10670_v25 = vld [vmem:[%s20863_s5 + $0x7d0] sm:$0xff] }
0x1db5   : > { %8568 = vmax.xlane.f32.xlu0 %v8567_v29  ;;  %v10674_v29 = vld [vmem:[%s20863_s5 + $0x7f0] sm:$0xff] }
0x1e41   : > { %v8572_v18 = vpop.xlane.xlu1 %8571 }
0x1e42   : > { %v8574_v32 = vsub.f32 %v8566_v33, %v8572_v18  ;;  %v8569_v36 = vpop.xlane.xlu0 %8568  ;;  %v10675_v33 = vld [vmem:[%s20863_s5 + $0x7f8] sm:$0xff]  ;;  %v14555_v18 = vpack.c.bf16 %v10674_v29, %v10670_v25 }
0x1e43   : > { %v8573_v37 = vsub.f32 %v8565_v19, %v8569_v36  ;;  %v14553_v19 = vpack.c.bf16 %v10675_v33, %v10671_v23 }
0x1e44   : > { %v8577_v48 = vmul.f32 1.442695, %v8574_v32 }
0x1e45   : > { %v8575_v39 = vmul.f32 1.442695, %v8573_v37  ;;  %v8873_v37 = vlaneseq }
0x1e46   : > { %14678 = vpow2.f32 %v8577_v48 }
0x1e47   : > { %14680 = vpow2.f32 %v8575_v39  ;;  %v8874_v48 = vshrl.u32 %v8873_v37, 7 }
0x1e49   : > { %v8875_v39 = vsub.s32 0, %v8874_v48 }
0x1e50   : > { %v14679_v40 = vpop.eup %14678 }
0x1e51   : > { %v14681_v24 = vpop.eup %14680  ;;  %v8582_v16 = vsel %vm1149_vm2, %v14679_v40, 0.0 }
0x1e52   : > { %8583 = vadd.xlane.f32.xlu1 %v8582_v16  ;;  %v8579_v4 = vsel %vm1149_vm2, %v14681_v24, 0.0  ;;  %v8879_v16 = vsub.s32 1, %v8874_v48 }
0x1e53   : > { %8580 = vadd.xlane.f32.xlu0 %v8579_v4  ;;  %v8887_v4 = vsub.s32 3, %v8874_v48 }
0x1edf   : > { %v8584_v22 = vpop.xlane.xlu1 %8583 }
0x1ee0   : > { %14682 = vrcp.f32 %v8584_v22  ;;  %v8581_v26 = vpop.xlane.xlu0 %8580 }
0x1ee1   : > { %14684 = vrcp.f32 %v8581_v26 }
0x1eea   : > { %v14683_v11 = vpop.eup %14682 }
0x1eeb   : > { %v14685_v12 = vpop.eup %14684  ;;  %v8588_v34 = vmul.f32 %v14683_v11, %v14679_v40  ;;  %v8883_v40 = vsub.s32 2, %v8874_v48 }
0x1eec   : > { %v8587_v1 = vmul.f32 %v14685_v12, %v14681_v24  ;;  %v8871_v24 = vld [vmem:[%s20867_s9] sm:$0xf] }
0x1eed   : > { %v8876_v43 = vrot.slane %v8871_v24, %v8875_v39  ;;  %v8884_v38 = vrot.slane %v8871_v24, %v8883_v40  ;;  %v8880_v20 = vrot.slane %v8871_v24, %v8879_v16  ;;  %v8888_v9 = vrot.slane %v8871_v24, %v8887_v4 }
0x1eee   : > { %12682 = vmatprep.mubr.msk.f32.mxu1 %vm1149_vm2, %v8587_v1 }
0x1eef   : > { %12683 = vmatmul.mubr.msk.f32.vlgmr.msra.gmra.mrb[114].mxu1 %vm1149_vm2, %v8588_v34 }
0x1ef0   : > { %14544 = vmatpush1.bf16.msra.mxu1 %v14543_v13  ;;  %8850 = vmatprep.mubr.f32.mxu1 %v14801_v27 }
0x1ef1   : > { %14546 = vmatprep.subr.bf16.mxu1 %v14545_v3 }
0x1ef4   : > { %14548 = vmatpush1.bf16.msra.mxu1 %v14547_v21 }
0x1ef5   : > { %14550 = vmatprep.subr.bf16.mxu1 %v14549_v7 }
0x1ef8   : > { %14552 = vmatpush1.bf16.msra.mxu1 %v14551_v14 }
0x1ef9   : > { %14554 = vmatprep.subr.bf16.mxu1 %v14553_v19 }
0x1efc   : > { %14556 = vmatpush1.bf16.msra.mxu1 %v14555_v18 }
0x1fc2   : > { %v12684_v32 = vpop.f32.mrb[114].mxu1 }
0x1fc3   : > { %v8661_v36 = vpop.f32.mrb[115].mxu1 }
0x1fc4   : > { %10676 = vmatmul.mubr.msk.f32.vlgmr.msra.gmra.mrb[28].mxu0 %vm1059_vm0, %v8661_v36  ;;  %10678 = vmatmul.mubr.msk.f32.vlgmr.msra.gmra.mrb[28].mxu1 %vm1059_vm0, %v8661_v36 }
0x1fc5   : > { %8779 = vmatprep.mubr.f32.mxu0 %v14801_v27  ;;  %8856 = vmatprep.mubr.f32.mxu1 %v14801_v27 }
0x1fc8   : > { %10677 = vmatmul.mubr.msk.f32.gmra.mrb[30].mxu0 %vm1059_vm0, %v12684_v32  ;;  %10679 = vmatmul.mubr.msk.f32.gmra.mrb[30].mxu1 %vm1059_vm0, %v12684_v32 }
0x2097   : > { %v8775_v27 = vpop.f32.mrb[28].mxu0  ;;  %v8852_v28 = vpop.f32.mrb[28].mxu1 }
0x2098   : > { %v8893_v45 = vadd.f32 %v8876_v43, %v8775_v27  ;;  %v8895_v30 = vadd.f32 %v8884_v38, %v8852_v28  ;;  %v8777_v0 = vpop.f32.mrb[29].mxu0  ;;  %v8854_v31 = vpop.f32.mrb[29].mxu1 }
0x2099   : > { %v8894_v2 = vadd.f32 %v8880_v20, %v8777_v0  ;;  %v8896_v41 = vadd.f32 %v8888_v9, %v8854_v31 }
0x209a   : > { %8901 = vst [vmem:[%s379_s25] sm:$0xff] %v8893_v45  ;;  %8903 = vst [vmem:[%s379_s25 + $0x10] sm:$0xff] %v8895_v30 }
0x209b   : > { %8902 = vst [vmem:[%s379_s25 + $0x8] sm:$0xff] %v8894_v2  ;;  %8904 = vst [vmem:[%s379_s25 + $0x18] sm:$0xff] %v8896_v41  ;;  %v8781_v42 = vpop.f32.mrb[30].mxu0  ;;  %v8858_v44 = vpop.f32.mrb[30].mxu1 }
0x209c   : > { %v8897_v46 = vadd.f32 %v8876_v43, %v8781_v42  ;;  %v8899_v50 = vadd.f32 %v8884_v38, %v8858_v44  ;;  %v8783_v51 = vpop.f32.mrb[31].mxu0  ;;  %v8860_v52 = vpop.f32.mrb[31].mxu1 }
0x209d   : > { %v8898_v53 = vadd.f32 %v8880_v20, %v8783_v51  ;;  %v8900_v54 = vadd.f32 %v8888_v9, %v8860_v52 }
0x209e   : > { %8905 = vst [vmem:[%s379_s25 + $0x20] sm:$0xff] %v8897_v46  ;;  %8907 = vst [vmem:[%s379_s25 + $0x30] sm:$0xff] %v8899_v50 }
0x209f   : > { %8906 = vst [vmem:[%s379_s25 + $0x28] sm:$0xff] %v8898_v53  ;;  %8908 = vst [vmem:[%s379_s25 + $0x38] sm:$0xff] %v8900_v54 }
0x20a0 PF: > { %s20_s13 = sadd.s32 1, %s14799_s13  }
0x20a1   : > { %p17_p4 = scmp.ge.s32.totalorder %s20_s13, 4  }
0x20a3   :  { %19 = sbr.rel (!%p17_p4) target bundleno = 1 (0x1), region = 142 }

</bundles_post_ra>
